<compile_context>
chip_gen: v6e
topology: v6e:2x2x1
jax: 0.10.0
libtpu: 0.0.40
codegen_flags: <defaults>
</compile_context>

<pallas_src>
import functools
import math

import jax
import jax.numpy as jnp
from jax.experimental import pallas as pl
from jax.experimental.pallas import tpu as pltpu


_MIN_PALLAS_TOUT = 8   # layers with fewer output columns fall back to plain einsum


# -----------------------------------------------------------------------------
# Pallas kernel: strided (grouped) conv as ONE im2col matmul + bias + LeakyReLU
# -----------------------------------------------------------------------------
def _conv_im2col_kernel(x_ref, w_ref, b_ref, o_ref, *, K, S, T_out, slope):
    # x_ref: (1, S, Cin, L)      bf16  polyphase-split, zero padding already folded in
    # w_ref: (co_tile, K*Cin)    bf16  block-diagonal over groups, (k, ci) minor order
    # b_ref: (co_tile, 1)        f32
    # o_ref: (1, co_tile, T_out) f32
    phases = [x_ref[0, q].astype(jnp.float32) for q in range(S)]     # each (Cin, L)
    cols = []
    for k in range(K):                     # static unroll: build (K*Cin, T_out) im2col
        q, j0 = k % S, k // S
        cols.append(phases[q][:, j0:j0 + T_out])                      # x_pad[:, t*S + k]
    xcol = cols[0] if K == 1 else jnp.concatenate(cols, axis=0)       # (K*Cin, T_out)
    acc = jnp.dot(w_ref[...], xcol.astype(jnp.bfloat16),
                  preferred_element_type=jnp.float32)                 # (co_tile, T_out)
    acc = acc + b_ref[...]
    acc = jnp.where(acc >= 0.0, acc, acc * slope)   # LeakyReLU (slope=1.0 -> identity)
    o_ref[0] = acc.astype(o_ref.dtype)


def _conv_pallas(xphase, wflat, bias, *, K, S, T_out, slope):
    B, S_, Cin, L = xphase.shape
    Cout, KC = wflat.shape
    co_tile = Cout if Cout <= 128 else 128
    assert Cout % co_tile == 0
    n_co = Cout // co_tile
    kernel = functools.partial(_conv_im2col_kernel, K=K, S=S, T_out=T_out, slope=slope)
    return pl.pallas_call(
        kernel,
        out_shape=jax.ShapeDtypeStruct((B, Cout, T_out), jnp.float32),
        grid_spec=pltpu.PrefetchScalarGridSpec(
            num_scalar_prefetch=0,
            grid=(n_co, B),          # batch innermost: weight/bias blocks stay resident
            in_specs=[
                pl.BlockSpec((1, S, Cin, L), lambda c, b: (b, 0, 0, 0)),
                pl.BlockSpec((co_tile, KC), lambda c, b: (c, 0)),
                pl.BlockSpec((co_tile, 1), lambda c, b: (c, 0)),
            ],
            out_specs=pl.BlockSpec((1, co_tile, T_out), lambda c, b: (b, c, 0)),
        ),
        compiler_params=pltpu.CompilerParams(
            dimension_semantics=("parallel", "parallel")),
    )(xphase, wflat, bias)


def _conv_fallback(xphase, wflat, bias, *, K, S, T_out, slope):
    # Same math as the kernel, for micro layers where pallas_call is pure overhead.
    cols = [xphase[:, k % S, :, (k // S):(k // S) + T_out] for k in range(K)]
    xcol = cols[0] if K == 1 else jnp.concatenate(cols, axis=1)        # (B, K*Cin, T_out)
    acc = jnp.einsum('of,bft->bot', wflat, xcol,
                     preferred_element_type=jnp.float32)
    acc = acc + bias[None]
    return jnp.where(acc >= 0.0, acc, acc * slope)


def conv1d(x, layer):
    """Generic strided/grouped conv.  x: (B, Cin, T) -> (B, Cout, T_out) f32."""
    wflat, bias = layer["wflat"], layer["b"]
    K, S, P, slope = layer["K"], layer["stride"], layer["padding"], layer["slope"]
    B, Cin, T = x.shape
    assert wflat.shape[1] == K * Cin

    T_pad = T + 2 * P
    T_out = (T_pad - K) // S + 1
    assert T_out >= 1
    L = T_out + (K - 1) // S                 # phase length needed by the kernel
    total = S * L

    # Fold zero padding + stride into one polyphase layout: (B, S, Cin, L) with
    #   xphase[b, q, ci, j] == x_padded[b, ci, j*S + q]
    # so tap k (offset t*S + k) is a stride-1 slice of phase k%S starting at k//S.
    x = x.astype(jnp.bfloat16)
    pad_back = max(0, total - (T + P))
    xp = jnp.pad(x, ((0, 0), (0, 0), (P, pad_back)))[:, :, :total]
    xphase = xp.reshape(B, Cin, L, S).transpose(0, 3, 1, 2)

    if T_out >= _MIN_PALLAS_TOUT:
        return _conv_pallas(xphase, wflat, bias, K=K, S=S, T_out=T_out, slope=slope)
    return _conv_fallback(xphase, wflat, bias, K=K, S=S, T_out=T_out, slope=slope)


# -----------------------------------------------------------------------------
# Parameter construction (deterministic, mirrors the PyTorch __init__ logic)
# -----------------------------------------------------------------------------
def _block_diag_flat(w, groups):
    """Torch (Cout, Cin_g, K) -> (Cout, K*Cin) block-diagonal, (k, ci) minor order."""
    cout, cin_g, k = w.shape
    cout_g = cout // groups
    cin = cin_g * groups
    wkc = jnp.transpose(w, (0, 2, 1))                       # (Cout, K, Cin_g)
    if groups == 1:
        wfull = wkc
    else:
        wfull = jnp.zeros((cout, k, cin), w.dtype)
        for g in range(groups):
            wfull = wfull.at[g * cout_g:(g + 1) * cout_g, :,
                             g * cin_g:(g + 1) * cin_g].set(
                wkc[g * cout_g:(g + 1) * cout_g])
    return wfull.reshape(cout, k * cin)


def _make_layer(key, cout, cin, k, *, stride, padding, groups, slope):
    kw, kb = jax.random.split(key)
    cin_g = cin // groups
    s = 1.0 / math.sqrt(max(cin_g * k, 1))
    w = jax.random.uniform(kw, (cout, cin_g, k), jnp.float32, -s, s)
    b = jax.random.uniform(kb, (cout,), jnp.float32, -s, s)
    return dict(wflat=_block_diag_flat(w, groups).astype(jnp.bfloat16),
                b=b.reshape(cout, 1),
                K=k, stride=stride, padding=padding, slope=slope)


def build_scale_discriminator(key, *, in_channels=1, out_channels=1,
                              kernel_sizes=(15, 41, 5, 3), channels=16,
                              max_downsample_channels=64, max_groups=4,
                              downsample_scales=(2, 2, 4, 4, 1),
                              negative_slope=0.1):
    keys = jax.random.split(key, len(downsample_scales) + 3)
    layers = [_make_layer(keys[0], channels, in_channels, kernel_sizes[0],
                          stride=1, padding=(kernel_sizes[0] - 1) // 2, groups=1,
                          slope=negative_slope)]
    in_chs, out_chs, groups = channels, channels, 4
    for i, ds in enumerate(downsample_scales):
        layers.append(_make_layer(keys[1 + i], out_chs, in_chs, kernel_sizes[1],
                                  stride=ds, padding=(kernel_sizes[1] - 1) // 2,
                                  groups=groups, slope=negative_slope))
        in_chs = out_chs
        out_chs = min(in_chs * 2, max_downsample_channels)
        groups = min(groups * 4, max_groups)
    out_chs = min(in_chs * 2, max_downsample_channels)
    layers.append(_make_layer(keys[-2], out_chs, in_chs, kernel_sizes[2],
                              stride=1, padding=(kernel_sizes[2] - 1) // 2, groups=1,
                              slope=negative_slope))
    layers.append(_make_layer(keys[-1], out_channels, out_chs, kernel_sizes[3],
                              stride=1, padding=(kernel_sizes[3] - 1) // 2, groups=1,
                              slope=1.0))                  # last layer: no activation
    return layers


def scale_discriminator_forward(layers, x):
    for L in layers:
        x = conv1d(x, L)
    return x                       # (B, out_channels, T_last), not flattened (as in torch)


def build_period_discriminator(key, period, *, in_channels=1, out_channels=1,
                               kernel_sizes=(5, 3), channels=8,
                               downsample_scales=(3, 3, 3, 3, 1),
                               max_downsample_channels=64, negative_slope=0.1):
    keys = jax.random.split(key, len(downsample_scales) + 1)
    layers = []
    in_chs, out_chs = in_channels, channels
    for i, ds in enumerate(downsample_scales):
        layers.append(_make_layer(keys[i], out_chs, in_chs, kernel_sizes[0],
                                  stride=ds, padding=(kernel_sizes[0] - 1) // 2,
                                  groups=1, slope=negative_slope))
        in_chs = out_chs
        out_chs = min(out_chs * 4, max_downsample_channels)
    # output_conv: kernel height kernel_sizes[1]-1 (even), padding (k1-1)//2, no activation
    layers.append(_make_layer(keys[-1], out_channels, out_chs, kernel_sizes[1] - 1,
                              stride=1, padding=(kernel_sizes[1] - 1) // 2,
                              groups=1, slope=1.0))
    return dict(period=period, layers=layers)


def period_discriminator_forward(params, x):
    B, C, T = x.shape
    period = params["period"]
    if T % period != 0:
        n_pad = period - (T % period)
        x = jnp.pad(x, ((0, 0), (0, 0), (0, n_pad)), mode="reflect")
        T += n_pad
    H = T // period
    # Fold the period axis into batch ONCE; the (k,1)/(s,1) Conv2d never mixes it.
    x = x.reshape(B, C, H, period).transpose(0, 3, 1, 2).reshape(B * period, C, H)
    for L in params["layers"]:
        x = conv1d(x, L)
    BP, Cl, Hl = x.shape
    x = x.reshape(B, period, Cl, Hl).transpose(0, 2, 3, 1)     # (B, Cl, Hl, P)
    return x.reshape(B, -1)                                    # torch.flatten(x, 1, -1)


def build_avg_pool(kernel_size=4, stride=2, padding=2):
    # AvgPool1d (count_include_pad=True) on the 1-channel input == 1x1-group conv.
    return dict(wflat=jnp.full((1, kernel_size), 1.0 / kernel_size, jnp.bfloat16),
                b=jnp.zeros((1, 1), jnp.float32),
                K=kernel_size, stride=stride, padding=padding, slope=1.0)


def build_model(key, *, scales=3, periods=(2, 3, 5, 7, 11)):
    keys = jax.random.split(key, scales + len(periods))
    msd = [build_scale_discriminator(keys[i]) for i in range(scales)]
    mpd = [build_period_discriminator(keys[scales + i], p) for i, p in enumerate(periods)]
    return dict(msd=msd, mpd=mpd, pool=build_avg_pool())


def model_forward(params, x):
    """x: (B, 1, T).  Returns list: multi-scale outputs + multi-period outputs."""
    outs = []
    xi = x
    for i, disc in enumerate(params["msd"]):
        outs.append(scale_discriminator_forward(disc, xi))
        if i < len(params["msd"]) - 1:
            xi = conv1d(xi, params["pool"])
    for disc in params["mpd"]:
        outs.append(period_discriminator_forward(disc, x))
    return outs


if __name__ == "__main__":
    key = jax.random.PRNGKey(0)
    kx, kp = jax.random.split(key)
    B, T = 2, 128
    x = jax.random.normal(kx, (B, 1, T), jnp.float32)

    params = build_model(kp)
    fwd = jax.jit(lambda xx: model_forward(params, xx))   # params as closure constants
    outs = jax.block_until_ready(fwd(x))

    assert len(outs) == 3 + 5                      # 3 scale + 5 period discriminators
    assert all(o.ndim in (2, 3) for o in outs)
    assert all(bool(jnp.all(jnp.isfinite(o))) for o in outs)
    print("KERNEL_OK")
</pallas_src>

<mosaic_0001>
module attributes {stable_mosaic.version = 11 : i64} {
  func.func @_conv_im2col_kernel(%arg0: i32, %arg1: i32, %arg2: memref<1x1x1x142xbf16, #tpu.memory_space<vmem>>, %arg3: memref<16x15xbf16, #tpu.memory_space<vmem>>, %arg4: memref<16x1xf32, #tpu.memory_space<vmem>>, %arg5: memref<1x16x128xf32, #tpu.memory_space<vmem>>) attributes {dimension_semantics = [#tpu.dimension_semantics<parallel>, #tpu.dimension_semantics<parallel>], iteration_bounds = array<i64: 1, 2>, scalar_prefetch = 0 : i64, scratch_operands = 0 : i64, tpu.core_type = #tpu.core_type<tc>, window_params = [{transform_indices = @transform_0, window_bounds = array<i64: 1, 1, 1, 142>}, {transform_indices = @transform_1, window_bounds = array<i64: 16, 15>}, {transform_indices = @transform_2, window_bounds = array<i64: 16, 1>}, {transform_indices = @transform_3, window_bounds = array<i64: 1, 16, 128>}]} {
    %c0 = arith.constant 0 : index
    %c0_0 = arith.constant 0 : index
    %c0_1 = arith.constant 0 : index
    %c0_2 = arith.constant 0 : index
    %0 = vector.load %arg2[%c0, %c0_0, %c0_1, %c0_2] : memref<1x1x1x142xbf16, #tpu.memory_space<vmem>>, vector<1x1x1x142xbf16>
    %1 = vector.shape_cast %0 : vector<1x1x1x142xbf16> to vector<1x142xbf16>
    %2 = arith.extf %1 : vector<1x142xbf16> to vector<1x142xf32>
    %3 = vector.extract_strided_slice %2 {offsets = [0, 0], sizes = [1, 128], strides = [1, 1]} : vector<1x142xf32> to vector<1x128xf32>
    %4 = vector.extract_strided_slice %2 {offsets = [0, 1], sizes = [1, 128], strides = [1, 1]} : vector<1x142xf32> to vector<1x128xf32>
    %5 = vector.extract_strided_slice %2 {offsets = [0, 2], sizes = [1, 128], strides = [1, 1]} : vector<1x142xf32> to vector<1x128xf32>
    %6 = vector.extract_strided_slice %2 {offsets = [0, 3], sizes = [1, 128], strides = [1, 1]} : vector<1x142xf32> to vector<1x128xf32>
    %7 = vector.extract_strided_slice %2 {offsets = [0, 4], sizes = [1, 128], strides = [1, 1]} : vector<1x142xf32> to vector<1x128xf32>
    %8 = vector.extract_strided_slice %2 {offsets = [0, 5], sizes = [1, 128], strides = [1, 1]} : vector<1x142xf32> to vector<1x128xf32>
    %9 = vector.extract_strided_slice %2 {offsets = [0, 6], sizes = [1, 128], strides = [1, 1]} : vector<1x142xf32> to vector<1x128xf32>
    %10 = vector.extract_strided_slice %2 {offsets = [0, 7], sizes = [1, 128], strides = [1, 1]} : vector<1x142xf32> to vector<1x128xf32>
    %11 = vector.extract_strided_slice %2 {offsets = [0, 8], sizes = [1, 128], strides = [1, 1]} : vector<1x142xf32> to vector<1x128xf32>
    %12 = vector.extract_strided_slice %2 {offsets = [0, 9], sizes = [1, 128], strides = [1, 1]} : vector<1x142xf32> to vector<1x128xf32>
    %13 = vector.extract_strided_slice %2 {offsets = [0, 10], sizes = [1, 128], strides = [1, 1]} : vector<1x142xf32> to vector<1x128xf32>
    %14 = vector.extract_strided_slice %2 {offsets = [0, 11], sizes = [1, 128], strides = [1, 1]} : vector<1x142xf32> to vector<1x128xf32>
    %15 = vector.extract_strided_slice %2 {offsets = [0, 12], sizes = [1, 128], strides = [1, 1]} : vector<1x142xf32> to vector<1x128xf32>
    %16 = vector.extract_strided_slice %2 {offsets = [0, 13], sizes = [1, 128], strides = [1, 1]} : vector<1x142xf32> to vector<1x128xf32>
    %17 = vector.extract_strided_slice %2 {offsets = [0, 14], sizes = [1, 128], strides = [1, 1]} : vector<1x142xf32> to vector<1x128xf32>
    %18 = tpu.concatenate %3, %4, %5, %6, %7, %8, %9, %10, %11, %12, %13, %14, %15, %16, %17 in 0 : vector<1x128xf32>, vector<1x128xf32>, vector<1x128xf32>, vector<1x128xf32>, vector<1x128xf32>, vector<1x128xf32>, vector<1x128xf32>, vector<1x128xf32>, vector<1x128xf32>, vector<1x128xf32>, vector<1x128xf32>, vector<1x128xf32>, vector<1x128xf32>, vector<1x128xf32>, vector<1x128xf32> -> vector<15x128xf32>
    %c0_3 = arith.constant 0 : index
    %c0_4 = arith.constant 0 : index
    %19 = vector.load %arg3[%c0_3, %c0_4] : memref<16x15xbf16, #tpu.memory_space<vmem>>, vector<16x15xbf16>
    %20 = arith.truncf %18 : vector<15x128xf32> to vector<15x128xbf16>
    %cst = arith.constant dense<0.000000e+00> : vector<16x128xf32>
    %21 = tpu.matmul %19, %20, %cst {dimension_numbers = #tpu.dot_dimension_numbers<[1], [0], [0], [1], [0, 0, 1, 1], [], []>} : vector<16x15xbf16>, vector<15x128xbf16>, vector<16x128xf32> -> vector<16x128xf32>
    %c0_5 = arith.constant 0 : index
    %c0_6 = arith.constant 0 : index
    %22 = vector.load %arg4[%c0_5, %c0_6] : memref<16x1xf32, #tpu.memory_space<vmem>>, vector<16x1xf32>
    %23 = vector.broadcast %22 : vector<16x1xf32> to vector<16x128xf32>
    %24 = arith.addf %21, %23 : vector<16x128xf32>
    %cst_7 = arith.constant 0.000000e+00 : f32
    %25 = vector.broadcast %cst_7 : f32 to vector<16x128xf32>
    %26 = arith.cmpf oge, %24, %25 : vector<16x128xf32>
    %cst_8 = arith.constant 1.000000e-01 : f32
    %27 = vector.broadcast %cst_8 : f32 to vector<16x128xf32>
    %28 = arith.mulf %24, %27 : vector<16x128xf32>
    %29 = arith.select %26, %24, %28 : vector<16x128xi1>, vector<16x128xf32>
    %c0_9 = arith.constant 0 : index
    %c0_10 = arith.constant 0 : index
    %c0_11 = arith.constant 0 : index
    %30 = vector.load %arg5[%c0_9, %c0_10, %c0_11] : memref<1x16x128xf32, #tpu.memory_space<vmem>>, vector<1x16x128xf32>
    %31 = vector.shape_cast %30 : vector<1x16x128xf32> to vector<16x128xf32>
    %32 = vector.shape_cast %29 : vector<16x128xf32> to vector<1x16x128xf32>
    tpu.vector_store %arg5[%c0_9, %c0_10, %c0_11], %32 {strides = array<i32>} : memref<1x16x128xf32, #tpu.memory_space<vmem>>, vector<1x16x128xf32>,
    return
  }
  func.func @transform_0(%arg0: i32, %arg1: i32) -> (i32, i32, i32, i32) {
    %c0_i32 = arith.constant 0 : i32
    %c0_i32_0 = arith.constant 0 : i32
    %c0_i32_1 = arith.constant 0 : i32
    %c0_i32_2 = arith.constant 0 : i32
    return %arg1, %c0_i32, %c0_i32_0, %c0_i32_1 : i32, i32, i32, i32
  }
  func.func @transform_1(%arg0: i32, %arg1: i32) -> (i32, i32) {
    %c0_i32 = arith.constant 0 : i32
    %c0_i32_0 = arith.constant 0 : i32
    return %arg0, %c0_i32 : i32, i32
  }
  func.func @transform_2(%arg0: i32, %arg1: i32) -> (i32, i32) {
    %c0_i32 = arith.constant 0 : i32
    %c0_i32_0 = arith.constant 0 : i32
    return %arg0, %c0_i32 : i32, i32
  }
  func.func @transform_3(%arg0: i32, %arg1: i32) -> (i32, i32, i32) {
    %c0_i32 = arith.constant 0 : i32
    %c0_i32_0 = arith.constant 0 : i32
    return %arg1, %arg0, %c0_i32 : i32, i32, i32
  }
}

module attributes {stable_mosaic.version = 11 : i64} {
  func.func @_conv_im2col_kernel(%arg0: i32, %arg1: i32, %arg2: memref<1x2x16x84xbf16, #tpu.memory_space<vmem>>, %arg3: memref<16x656xbf16, #tpu.memory_space<vmem>>, %arg4: memref<16x1xf32, #tpu.memory_space<vmem>>, %arg5: memref<1x16x64xf32, #tpu.memory_space<vmem>>) attributes {dimension_semantics = [#tpu.dimension_semantics<parallel>, #tpu.dimension_semantics<parallel>], iteration_bounds = array<i64: 1, 2>, scalar_prefetch = 0 : i64, scratch_operands = 0 : i64, tpu.core_type = #tpu.core_type<tc>, window_params = [{transform_indices = @transform_0, window_bounds = array<i64: 1, 2, 16, 84>}, {transform_indices = @transform_1, window_bounds = array<i64: 16, 656>}, {transform_indices = @transform_2, window_bounds = array<i64: 16, 1>}, {transform_indices = @transform_3, window_bounds = array<i64: 1, 16, 64>}]} {
    %c0 = arith.constant 0 : index
    %c0_0 = arith.constant 0 : index
    %c0_1 = arith.constant 0 : index
    %c0_2 = arith.constant 0 : index
    %0 = vector.load %arg2[%c0, %c0_0, %c0_1, %c0_2] : memref<1x2x16x84xbf16, #tpu.memory_space<vmem>>, vector<1x1x16x84xbf16>
    %1 = vector.shape_cast %0 : vector<1x1x16x84xbf16> to vector<16x84xbf16>
    %2 = arith.extf %1 : vector<16x84xbf16> to vector<16x84xf32>
    %c0_3 = arith.constant 0 : index
    %c1 = arith.constant 1 : index
    %c0_4 = arith.constant 0 : index
    %c0_5 = arith.constant 0 : index
    %3 = vector.load %arg2[%c0_3, %c1, %c0_4, %c0_5] : memref<1x2x16x84xbf16, #tpu.memory_space<vmem>>, vector<1x1x16x84xbf16>
    %4 = vector.shape_cast %3 : vector<1x1x16x84xbf16> to vector<16x84xbf16>
    %5 = arith.extf %4 : vector<16x84xbf16> to vector<16x84xf32>
    %6 = vector.extract_strided_slice %2 {offsets = [0, 0], sizes = [16, 64], strides = [1, 1]} : vector<16x84xf32> to vector<16x64xf32>
    %7 = vector.extract_strided_slice %5 {offsets = [0, 0], sizes = [16, 64], strides = [1, 1]} : vector<16x84xf32> to vector<16x64xf32>
    %8 = vector.extract_strided_slice %2 {offsets = [0, 1], sizes = [16, 64], strides = [1, 1]} : vector<16x84xf32> to vector<16x64xf32>
    %9 = vector.extract_strided_slice %5 {offsets = [0, 1], sizes = [16, 64], strides = [1, 1]} : vector<16x84xf32> to vector<16x64xf32>
    %10 = vector.extract_strided_slice %2 {offsets = [0, 2], sizes = [16, 64], strides = [1, 1]} : vector<16x84xf32> to vector<16x64xf32>
    %11 = vector.extract_strided_slice %5 {offsets = [0, 2], sizes = [16, 64], strides = [1, 1]} : vector<16x84xf32> to vector<16x64xf32>
    %12 = vector.extract_strided_slice %2 {offsets = [0, 3], sizes = [16, 64], strides = [1, 1]} : vector<16x84xf32> to vector<16x64xf32>
    %13 = vector.extract_strided_slice %5 {offsets = [0, 3], sizes = [16, 64], strides = [1, 1]} : vector<16x84xf32> to vector<16x64xf32>
    %14 = vector.extract_strided_slice %2 {offsets = [0, 4], sizes = [16, 64], strides = [1, 1]} : vector<16x84xf32> to vector<16x64xf32>
    %15 = vector.extract_strided_slice %5 {offsets = [0, 4], sizes = [16, 64], strides = [1, 1]} : vector<16x84xf32> to vector<16x64xf32>
    %16 = vector.extract_strided_slice %2 {offsets = [0, 5], sizes = [16, 64], strides = [1, 1]} : vector<16x84xf32> to vector<16x64xf32>
    %17 = vector.extract_strided_slice %5 {offsets = [0, 5], sizes = [16, 64], strides = [1, 1]} : vector<16x84xf32> to vector<16x64xf32>
    %18 = vector.extract_strided_slice %2 {offsets = [0, 6], sizes = [16, 64], strides = [1, 1]} : vector<16x84xf32> to vector<16x64xf32>
    %19 = vector.extract_strided_slice %5 {offsets = [0, 6], sizes = [16, 64], strides = [1, 1]} : vector<16x84xf32> to vector<16x64xf32>
    %20 = vector.extract_strided_slice %2 {offsets = [0, 7], sizes = [16, 64], strides = [1, 1]} : vector<16x84xf32> to vector<16x64xf32>
    %21 = vector.extract_strided_slice %5 {offsets = [0, 7], sizes = [16, 64], strides = [1, 1]} : vector<16x84xf32> to vector<16x64xf32>
    %22 = vector.extract_strided_slice %2 {offsets = [0, 8], sizes = [16, 64], strides = [1, 1]} : vector<16x84xf32> to vector<16x64xf32>
    %23 = vector.extract_strided_slice %5 {offsets = [0, 8], sizes = [16, 64], strides = [1, 1]} : vector<16x84xf32> to vector<16x64xf32>
    %24 = vector.extract_strided_slice %2 {offsets = [0, 9], sizes = [16, 64], strides = [1, 1]} : vector<16x84xf32> to vector<16x64xf32>
    %25 = vector.extract_strided_slice %5 {offsets = [0, 9], sizes = [16, 64], strides = [1, 1]} : vector<16x84xf32> to vector<16x64xf32>
    %26 = vector.extract_strided_slice %2 {offsets = [0, 10], sizes = [16, 64], strides = [1, 1]} : vector<16x84xf32> to vector<16x64xf32>
    %27 = vector.extract_strided_slice %5 {offsets = [0, 10], sizes = [16, 64], strides = [1, 1]} : vector<16x84xf32> to vector<16x64xf32>
    %28 = vector.extract_strided_slice %2 {offsets = [0, 11], sizes = [16, 64], strides = [1, 1]} : vector<16x84xf32> to vector<16x64xf32>
    %29 = vector.extract_strided_slice %5 {offsets = [0, 11], sizes = [16, 64], strides = [1, 1]} : vector<16x84xf32> to vector<16x64xf32>
    %30 = vector.extract_strided_slice %2 {offsets = [0, 12], sizes = [16, 64], strides = [1, 1]} : vector<16x84xf32> to vector<16x64xf32>
    %31 = vector.extract_strided_slice %5 {offsets = [0, 12], sizes = [16, 64], strides = [1, 1]} : vector<16x84xf32> to vector<16x64xf32>
    %32 = vector.extract_strided_slice %2 {offsets = [0, 13], sizes = [16, 64], strides = [1, 1]} : vector<16x84xf32> to vector<16x64xf32>
    %33 = vector.extract_strided_slice %5 {offsets = [0, 13], sizes = [16, 64], strides = [1, 1]} : vector<16x84xf32> to vector<16x64xf32>
    %34 = vector.extract_strided_slice %2 {offsets = [0, 14], sizes = [16, 64], strides = [1, 1]} : vector<16x84xf32> to vector<16x64xf32>
    %35 = vector.extract_strided_slice %5 {offsets = [0, 14], sizes = [16, 64], strides = [1, 1]} : vector<16x84xf32> to vector<16x64xf32>
    %36 = vector.extract_strided_slice %2 {offsets = [0, 15], sizes = [16, 64], strides = [1, 1]} : vector<16x84xf32> to vector<16x64xf32>
    %37 = vector.extract_strided_slice %5 {offsets = [0, 15], sizes = [16, 64], strides = [1, 1]} : vector<16x84xf32> to vector<16x64xf32>
    %38 = vector.extract_strided_slice %2 {offsets = [0, 16], sizes = [16, 64], strides = [1, 1]} : vector<16x84xf32> to vector<16x64xf32>
    %39 = vector.extract_strided_slice %5 {offsets = [0, 16], sizes = [16, 64], strides = [1, 1]} : vector<16x84xf32> to vector<16x64xf32>
    %40 = vector.extract_strided_slice %2 {offsets = [0, 17], sizes = [16, 64], strides = [1, 1]} : vector<16x84xf32> to vector<16x64xf32>
    %41 = vector.extract_strided_slice %5 {offsets = [0, 17], sizes = [16, 64], strides = [1, 1]} : vector<16x84xf32> to vector<16x64xf32>
    %42 = vector.extract_strided_slice %2 {offsets = [0, 18], sizes = [16, 64], strides = [1, 1]} : vector<16x84xf32> to vector<16x64xf32>
    %43 = vector.extract_strided_slice %5 {offsets = [0, 18], sizes = [16, 64], strides = [1, 1]} : vector<16x84xf32> to vector<16x64xf32>
    %44 = vector.extract_strided_slice %2 {offsets = [0, 19], sizes = [16, 64], strides = [1, 1]} : vector<16x84xf32> to vector<16x64xf32>
    %45 = vector.extract_strided_slice %5 {offsets = [0, 19], sizes = [16, 64], strides = [1, 1]} : vector<16x84xf32> to vector<16x64xf32>
    %46 = vector.extract_strided_slice %2 {offsets = [0, 20], sizes = [16, 64], strides = [1, 1]} : vector<16x84xf32> to vector<16x64xf32>
    %47 = tpu.concatenate %6, %7, %8, %9, %10, %11, %12, %13, %14, %15, %16, %17, %18, %19, %20, %21 in 0 : vector<16x64xf32>, vector<16x64xf32>, vector<16x64xf32>, vector<16x64xf32>, vector<16x64xf32>, vector<16x64xf32>, vector<16x64xf32>, vector<16x64xf32>, vector<16x64xf32>, vector<16x64xf32>, vector<16x64xf32>, vector<16x64xf32>, vector<16x64xf32>, vector<16x64xf32>, vector<16x64xf32>, vector<16x64xf32> -> vector<256x64xf32>
    %48 = tpu.concatenate %22, %23, %24, %25, %26, %27, %28, %29, %30, %31, %32, %33, %34, %35, %36, %37 in 0 : vector<16x64xf32>, vector<16x64xf32>, vector<16x64xf32>, vector<16x64xf32>, vector<16x64xf32>, vector<16x64xf32>, vector<16x64xf32>, vector<16x64xf32>, vector<16x64xf32>, vector<16x64xf32>, vector<16x64xf32>, vector<16x64xf32>, vector<16x64xf32>, vector<16x64xf32>, vector<16x64xf32>, vector<16x64xf32> -> vector<256x64xf32>
    %49 = tpu.concatenate %38, %39, %40, %41, %42, %43, %44, %45, %46 in 0 : vector<16x64xf32>, vector<16x64xf32>, vector<16x64xf32>, vector<16x64xf32>, vector<16x64xf32>, vector<16x64xf32>, vector<16x64xf32>, vector<16x64xf32>, vector<16x64xf32> -> vector<144x64xf32>
    %50 = tpu.concatenate %47, %48, %49 in 0 : vector<256x64xf32>, vector<256x64xf32>, vector<144x64xf32> -> vector<656x64xf32>
    %c0_6 = arith.constant 0 : index
    %c0_7 = arith.constant 0 : index
    %51 = vector.load %arg3[%c0_6, %c0_7] : memref<16x656xbf16, #tpu.memory_space<vmem>>, vector<16x656xbf16>
    %52 = arith.truncf %50 : vector<656x64xf32> to vector<656x64xbf16>
    %cst = arith.constant dense<0.000000e+00> : vector<16x64xf32>
    %53 = tpu.matmul %51, %52, %cst {dimension_numbers = #tpu.dot_dimension_numbers<[1], [0], [0], [1], [0, 0, 1, 1], [], []>} : vector<16x656xbf16>, vector<656x64xbf16>, vector<16x64xf32> -> vector<16x64xf32>
    %c0_8 = arith.constant 0 : index
    %c0_9 = arith.constant 0 : index
    %54 = vector.load %arg4[%c0_8, %c0_9] : memref<16x1xf32, #tpu.memory_space<vmem>>, vector<16x1xf32>
    %55 = vector.broadcast %54 : vector<16x1xf32> to vector<16x64xf32>
    %56 = arith.addf %53, %55 : vector<16x64xf32>
    %cst_10 = arith.constant 0.000000e+00 : f32
    %57 = vector.broadcast %cst_10 : f32 to vector<16x64xf32>
    %58 = arith.cmpf oge, %56, %57 : vector<16x64xf32>
    %cst_11 = arith.constant 1.000000e-01 : f32
    %59 = vector.broadcast %cst_11 : f32 to vector<16x64xf32>
    %60 = arith.mulf %56, %59 : vector<16x64xf32>
    %61 = arith.select %58, %56, %60 : vector<16x64xi1>, vector<16x64xf32>
    %c0_12 = arith.constant 0 : index
    %c0_13 = arith.constant 0 : index
    %c0_14 = arith.constant 0 : index
    %62 = vector.load %arg5[%c0_12, %c0_13, %c0_14] : memref<1x16x64xf32, #tpu.memory_space<vmem>>, vector<1x16x64xf32>
    %63 = vector.shape_cast %62 : vector<1x16x64xf32> to vector<16x64xf32>
    %64 = vector.shape_cast %61 : vector<16x64xf32> to vector<1x16x64xf32>
    tpu.vector_store %arg5[%c0_12, %c0_13, %c0_14], %64 {strides = array<i32>} : memref<1x16x64xf32, #tpu.memory_space<vmem>>, vector<1x16x64xf32>,
    return
  }
  func.func @transform_0(%arg0: i32, %arg1: i32) -> (i32, i32, i32, i32) {
    %c0_i32 = arith.constant 0 : i32
    %c0_i32_0 = arith.constant 0 : i32
    %c0_i32_1 = arith.constant 0 : i32
    %c0_i32_2 = arith.constant 0 : i32
    return %arg1, %c0_i32, %c0_i32_0, %c0_i32_1 : i32, i32, i32, i32
  }
  func.func @transform_1(%arg0: i32, %arg1: i32) -> (i32, i32) {
    %c0_i32 = arith.constant 0 : i32
    %c0_i32_0 = arith.constant 0 : i32
    return %arg0, %c0_i32 : i32, i32
  }
  func.func @transform_2(%arg0: i32, %arg1: i32) -> (i32, i32) {
    %c0_i32 = arith.constant 0 : i32
    %c0_i32_0 = arith.constant 0 : i32
    return %arg0, %c0_i32 : i32, i32
  }
  func.func @transform_3(%arg0: i32, %arg1: i32) -> (i32, i32, i32) {
    %c0_i32 = arith.constant 0 : i32
    %c0_i32_0 = arith.constant 0 : i32
    return %arg1, %arg0, %c0_i32 : i32, i32, i32
  }
}

module attributes {stable_mosaic.version = 11 : i64} {
  func.func @_conv_im2col_kernel(%arg0: i32, %arg1: i32, %arg2: memref<1x2x16x52xbf16, #tpu.memory_space<vmem>>, %arg3: memref<32x656xbf16, #tpu.memory_space<vmem>>, %arg4: memref<32x1xf32, #tpu.memory_space<vmem>>, %arg5: memref<1x32x32xf32, #tpu.memory_space<vmem>>) attributes {dimension_semantics = [#tpu.dimension_semantics<parallel>, #tpu.dimension_semantics<parallel>], iteration_bounds = array<i64: 1, 2>, scalar_prefetch = 0 : i64, scratch_operands = 0 : i64, tpu.core_type = #tpu.core_type<tc>, window_params = [{transform_indices = @transform_0, window_bounds = array<i64: 1, 2, 16, 52>}, {transform_indices = @transform_1, window_bounds = array<i64: 32, 656>}, {transform_indices = @transform_2, window_bounds = array<i64: 32, 1>}, {transform_indices = @transform_3, window_bounds = array<i64: 1, 32, 32>}]} {
    %c0 = arith.constant 0 : index
    %c0_0 = arith.constant 0 : index
    %c0_1 = arith.constant 0 : index
    %c0_2 = arith.constant 0 : index
    %0 = vector.load %arg2[%c0, %c0_0, %c0_1, %c0_2] : memref<1x2x16x52xbf16, #tpu.memory_space<vmem>>, vector<1x1x16x52xbf16>
    %1 = vector.shape_cast %0 : vector<1x1x16x52xbf16> to vector<16x52xbf16>
    %2 = arith.extf %1 : vector<16x52xbf16> to vector<16x52xf32>
    %c0_3 = arith.constant 0 : index
    %c1 = arith.constant 1 : index
    %c0_4 = arith.constant 0 : index
    %c0_5 = arith.constant 0 : index
    %3 = vector.load %arg2[%c0_3, %c1, %c0_4, %c0_5] : memref<1x2x16x52xbf16, #tpu.memory_space<vmem>>, vector<1x1x16x52xbf16>
    %4 = vector.shape_cast %3 : vector<1x1x16x52xbf16> to vector<16x52xbf16>
    %5 = arith.extf %4 : vector<16x52xbf16> to vector<16x52xf32>
    %6 = vector.extract_strided_slice %2 {offsets = [0, 0], sizes = [16, 32], strides = [1, 1]} : vector<16x52xf32> to vector<16x32xf32>
    %7 = vector.extract_strided_slice %5 {offsets = [0, 0], sizes = [16, 32], strides = [1, 1]} : vector<16x52xf32> to vector<16x32xf32>
    %8 = vector.extract_strided_slice %2 {offsets = [0, 1], sizes = [16, 32], strides = [1, 1]} : vector<16x52xf32> to vector<16x32xf32>
    %9 = vector.extract_strided_slice %5 {offsets = [0, 1], sizes = [16, 32], strides = [1, 1]} : vector<16x52xf32> to vector<16x32xf32>
    %10 = vector.extract_strided_slice %2 {offsets = [0, 2], sizes = [16, 32], strides = [1, 1]} : vector<16x52xf32> to vector<16x32xf32>
    %11 = vector.extract_strided_slice %5 {offsets = [0, 2], sizes = [16, 32], strides = [1, 1]} : vector<16x52xf32> to vector<16x32xf32>
    %12 = vector.extract_strided_slice %2 {offsets = [0, 3], sizes = [16, 32], strides = [1, 1]} : vector<16x52xf32> to vector<16x32xf32>
    %13 = vector.extract_strided_slice %5 {offsets = [0, 3], sizes = [16, 32], strides = [1, 1]} : vector<16x52xf32> to vector<16x32xf32>
    %14 = vector.extract_strided_slice %2 {offsets = [0, 4], sizes = [16, 32], strides = [1, 1]} : vector<16x52xf32> to vector<16x32xf32>
    %15 = vector.extract_strided_slice %5 {offsets = [0, 4], sizes = [16, 32], strides = [1, 1]} : vector<16x52xf32> to vector<16x32xf32>
    %16 = vector.extract_strided_slice %2 {offsets = [0, 5], sizes = [16, 32], strides = [1, 1]} : vector<16x52xf32> to vector<16x32xf32>
    %17 = vector.extract_strided_slice %5 {offsets = [0, 5], sizes = [16, 32], strides = [1, 1]} : vector<16x52xf32> to vector<16x32xf32>
    %18 = vector.extract_strided_slice %2 {offsets = [0, 6], sizes = [16, 32], strides = [1, 1]} : vector<16x52xf32> to vector<16x32xf32>
    %19 = vector.extract_strided_slice %5 {offsets = [0, 6], sizes = [16, 32], strides = [1, 1]} : vector<16x52xf32> to vector<16x32xf32>
    %20 = vector.extract_strided_slice %2 {offsets = [0, 7], sizes = [16, 32], strides = [1, 1]} : vector<16x52xf32> to vector<16x32xf32>
    %21 = vector.extract_strided_slice %5 {offsets = [0, 7], sizes = [16, 32], strides = [1, 1]} : vector<16x52xf32> to vector<16x32xf32>
    %22 = vector.extract_strided_slice %2 {offsets = [0, 8], sizes = [16, 32], strides = [1, 1]} : vector<16x52xf32> to vector<16x32xf32>
    %23 = vector.extract_strided_slice %5 {offsets = [0, 8], sizes = [16, 32], strides = [1, 1]} : vector<16x52xf32> to vector<16x32xf32>
    %24 = vector.extract_strided_slice %2 {offsets = [0, 9], sizes = [16, 32], strides = [1, 1]} : vector<16x52xf32> to vector<16x32xf32>
    %25 = vector.extract_strided_slice %5 {offsets = [0, 9], sizes = [16, 32], strides = [1, 1]} : vector<16x52xf32> to vector<16x32xf32>
    %26 = vector.extract_strided_slice %2 {offsets = [0, 10], sizes = [16, 32], strides = [1, 1]} : vector<16x52xf32> to vector<16x32xf32>
    %27 = vector.extract_strided_slice %5 {offsets = [0, 10], sizes = [16, 32], strides = [1, 1]} : vector<16x52xf32> to vector<16x32xf32>
    %28 = vector.extract_strided_slice %2 {offsets = [0, 11], sizes = [16, 32], strides = [1, 1]} : vector<16x52xf32> to vector<16x32xf32>
    %29 = vector.extract_strided_slice %5 {offsets = [0, 11], sizes = [16, 32], strides = [1, 1]} : vector<16x52xf32> to vector<16x32xf32>
    %30 = vector.extract_strided_slice %2 {offsets = [0, 12], sizes = [16, 32], strides = [1, 1]} : vector<16x52xf32> to vector<16x32xf32>
    %31 = vector.extract_strided_slice %5 {offsets = [0, 12], sizes = [16, 32], strides = [1, 1]} : vector<16x52xf32> to vector<16x32xf32>
    %32 = vector.extract_strided_slice %2 {offsets = [0, 13], sizes = [16, 32], strides = [1, 1]} : vector<16x52xf32> to vector<16x32xf32>
    %33 = vector.extract_strided_slice %5 {offsets = [0, 13], sizes = [16, 32], strides = [1, 1]} : vector<16x52xf32> to vector<16x32xf32>
    %34 = vector.extract_strided_slice %2 {offsets = [0, 14], sizes = [16, 32], strides = [1, 1]} : vector<16x52xf32> to vector<16x32xf32>
    %35 = vector.extract_strided_slice %5 {offsets = [0, 14], sizes = [16, 32], strides = [1, 1]} : vector<16x52xf32> to vector<16x32xf32>
    %36 = vector.extract_strided_slice %2 {offsets = [0, 15], sizes = [16, 32], strides = [1, 1]} : vector<16x52xf32> to vector<16x32xf32>
    %37 = vector.extract_strided_slice %5 {offsets = [0, 15], sizes = [16, 32], strides = [1, 1]} : vector<16x52xf32> to vector<16x32xf32>
    %38 = vector.extract_strided_slice %2 {offsets = [0, 16], sizes = [16, 32], strides = [1, 1]} : vector<16x52xf32> to vector<16x32xf32>
    %39 = vector.extract_strided_slice %5 {offsets = [0, 16], sizes = [16, 32], strides = [1, 1]} : vector<16x52xf32> to vector<16x32xf32>
    %40 = vector.extract_strided_slice %2 {offsets = [0, 17], sizes = [16, 32], strides = [1, 1]} : vector<16x52xf32> to vector<16x32xf32>
    %41 = vector.extract_strided_slice %5 {offsets = [0, 17], sizes = [16, 32], strides = [1, 1]} : vector<16x52xf32> to vector<16x32xf32>
    %42 = vector.extract_strided_slice %2 {offsets = [0, 18], sizes = [16, 32], strides = [1, 1]} : vector<16x52xf32> to vector<16x32xf32>
    %43 = vector.extract_strided_slice %5 {offsets = [0, 18], sizes = [16, 32], strides = [1, 1]} : vector<16x52xf32> to vector<16x32xf32>
    %44 = vector.extract_strided_slice %2 {offsets = [0, 19], sizes = [16, 32], strides = [1, 1]} : vector<16x52xf32> to vector<16x32xf32>
    %45 = vector.extract_strided_slice %5 {offsets = [0, 19], sizes = [16, 32], strides = [1, 1]} : vector<16x52xf32> to vector<16x32xf32>
    %46 = vector.extract_strided_slice %2 {offsets = [0, 20], sizes = [16, 32], strides = [1, 1]} : vector<16x52xf32> to vector<16x32xf32>
    %47 = tpu.concatenate %6, %7, %8, %9, %10, %11, %12, %13, %14, %15, %16, %17, %18, %19, %20, %21 in 0 : vector<16x32xf32>, vector<16x32xf32>, vector<16x32xf32>, vector<16x32xf32>, vector<16x32xf32>, vector<16x32xf32>, vector<16x32xf32>, vector<16x32xf32>, vector<16x32xf32>, vector<16x32xf32>, vector<16x32xf32>, vector<16x32xf32>, vector<16x32xf32>, vector<16x32xf32>, vector<16x32xf32>, vector<16x32xf32> -> vector<256x32xf32>
    %48 = tpu.concatenate %22, %23, %24, %25, %26, %27, %28, %29, %30, %31, %32, %33, %34, %35, %36, %37 in 0 : vector<16x32xf32>, vector<16x32xf32>, vector<16x32xf32>, vector<16x32xf32>, vector<16x32xf32>, vector<16x32xf32>, vector<16x32xf32>, vector<16x32xf32>, vector<16x32xf32>, vector<16x32xf32>, vector<16x32xf32>, vector<16x32xf32>, vector<16x32xf32>, vector<16x32xf32>, vector<16x32xf32>, vector<16x32xf32> -> vector<256x32xf32>
    %49 = tpu.concatenate %38, %39, %40, %41, %42, %43, %44, %45, %46 in 0 : vector<16x32xf32>, vector<16x32xf32>, vector<16x32xf32>, vector<16x32xf32>, vector<16x32xf32>, vector<16x32xf32>, vector<16x32xf32>, vector<16x32xf32>, vector<16x32xf32> -> vector<144x32xf32>
    %50 = tpu.concatenate %47, %48, %49 in 0 : vector<256x32xf32>, vector<256x32xf32>, vector<144x32xf32> -> vector<656x32xf32>
    %c0_6 = arith.constant 0 : index
    %c0_7 = arith.constant 0 : index
    %51 = vector.load %arg3[%c0_6, %c0_7] : memref<32x656xbf16, #tpu.memory_space<vmem>>, vector<32x656xbf16>
    %52 = arith.truncf %50 : vector<656x32xf32> to vector<656x32xbf16>
    %cst = arith.constant dense<0.000000e+00> : vector<32x32xf32>
    %53 = tpu.matmul %51, %52, %cst {dimension_numbers = #tpu.dot_dimension_numbers<[1], [0], [0], [1], [0, 0, 1, 1], [], []>} : vector<32x656xbf16>, vector<656x32xbf16>, vector<32x32xf32> -> vector<32x32xf32>
    %c0_8 = arith.constant 0 : index
    %c0_9 = arith.constant 0 : index
    %54 = vector.load %arg4[%c0_8, %c0_9] : memref<32x1xf32, #tpu.memory_space<vmem>>, vector<32x1xf32>
    %55 = vector.broadcast %54 : vector<32x1xf32> to vector<32x32xf32>
    %56 = arith.addf %53, %55 : vector<32x32xf32>
    %cst_10 = arith.constant 0.000000e+00 : f32
    %57 = vector.broadcast %cst_10 : f32 to vector<32x32xf32>
    %58 = arith.cmpf oge, %56, %57 : vector<32x32xf32>
    %cst_11 = arith.constant 1.000000e-01 : f32
    %59 = vector.broadcast %cst_11 : f32 to vector<32x32xf32>
    %60 = arith.mulf %56, %59 : vector<32x32xf32>
    %61 = arith.select %58, %56, %60 : vector<32x32xi1>, vector<32x32xf32>
    %c0_12 = arith.constant 0 : index
    %c0_13 = arith.constant 0 : index
    %c0_14 = arith.constant 0 : index
    %62 = vector.load %arg5[%c0_12, %c0_13, %c0_14] : memref<1x32x32xf32, #tpu.memory_space<vmem>>, vector<1x32x32xf32>
    %63 = vector.shape_cast %62 : vector<1x32x32xf32> to vector<32x32xf32>
    %64 = vector.shape_cast %61 : vector<32x32xf32> to vector<1x32x32xf32>
    tpu.vector_store %arg5[%c0_12, %c0_13, %c0_14], %64 {strides = array<i32>} : memref<1x32x32xf32, #tpu.memory_space<vmem>>, vector<1x32x32xf32>,
    return
  }
  func.func @transform_0(%arg0: i32, %arg1: i32) -> (i32, i32, i32, i32) {
    %c0_i32 = arith.constant 0 : i32
    %c0_i32_0 = arith.constant 0 : i32
    %c0_i32_1 = arith.constant 0 : i32
    %c0_i32_2 = arith.constant 0 : i32
    return %arg1, %c0_i32, %c0_i32_0, %c0_i32_1 : i32, i32, i32, i32
  }
  func.func @transform_1(%arg0: i32, %arg1: i32) -> (i32, i32) {
    %c0_i32 = arith.constant 0 : i32
    %c0_i32_0 = arith.constant 0 : i32
    return %arg0, %c0_i32 : i32, i32
  }
  func.func @transform_2(%arg0: i32, %arg1: i32) -> (i32, i32) {
    %c0_i32 = arith.constant 0 : i32
    %c0_i32_0 = arith.constant 0 : i32
    return %arg0, %c0_i32 : i32, i32
  }
  func.func @transform_3(%arg0: i32, %arg1: i32) -> (i32, i32, i32) {
    %c0_i32 = arith.constant 0 : i32
    %c0_i32_0 = arith.constant 0 : i32
    return %arg1, %arg0, %c0_i32 : i32, i32, i32
  }
}

module attributes {stable_mosaic.version = 11 : i64} {
  func.func @_conv_im2col_kernel(%arg0: i32, %arg1: i32, %arg2: memref<1x4x32x18xbf16, #tpu.memory_space<vmem>>, %arg3: memref<64x1312xbf16, #tpu.memory_space<vmem>>, %arg4: memref<64x1xf32, #tpu.memory_space<vmem>>, %arg5: memref<1x64x8xf32, #tpu.memory_space<vmem>>) attributes {dimension_semantics = [#tpu.dimension_semantics<parallel>, #tpu.dimension_semantics<parallel>], iteration_bounds = array<i64: 1, 2>, scalar_prefetch = 0 : i64, scratch_operands = 0 : i64, tpu.core_type = #tpu.core_type<tc>, window_params = [{transform_indices = @transform_0, window_bounds = array<i64: 1, 4, 32, 18>}, {transform_indices = @transform_1, window_bounds = array<i64: 64, 1312>}, {transform_indices = @transform_2, window_bounds = array<i64: 64, 1>}, {transform_indices = @transform_3, window_bounds = array<i64: 1, 64, 8>}]} {
    %c0 = arith.constant 0 : index
    %c0_0 = arith.constant 0 : index
    %c0_1 = arith.constant 0 : index
    %c0_2 = arith.constant 0 : index
    %0 = vector.load %arg2[%c0, %c0_0, %c0_1, %c0_2] : memref<1x4x32x18xbf16, #tpu.memory_space<vmem>>, vector<1x1x32x18xbf16>
    %1 = vector.shape_cast %0 : vector<1x1x32x18xbf16> to vector<32x18xbf16>
    %2 = arith.extf %1 : vector<32x18xbf16> to vector<32x18xf32>
    %c0_3 = arith.constant 0 : index
    %c1 = arith.constant 1 : index
    %c0_4 = arith.constant 0 : index
    %c0_5 = arith.constant 0 : index
    %3 = vector.load %arg2[%c0_3, %c1, %c0_4, %c0_5] : memref<1x4x32x18xbf16, #tpu.memory_space<vmem>>, vector<1x1x32x18xbf16>
    %4 = vector.shape_cast %3 : vector<1x1x32x18xbf16> to vector<32x18xbf16>
    %5 = arith.extf %4 : vector<32x18xbf16> to vector<32x18xf32>
    %c0_6 = arith.constant 0 : index
    %c2 = arith.constant 2 : index
    %c0_7 = arith.constant 0 : index
    %c0_8 = arith.constant 0 : index
    %6 = vector.load %arg2[%c0_6, %c2, %c0_7, %c0_8] : memref<1x4x32x18xbf16, #tpu.memory_space<vmem>>, vector<1x1x32x18xbf16>
    %7 = vector.shape_cast %6 : vector<1x1x32x18xbf16> to vector<32x18xbf16>
    %8 = arith.extf %7 : vector<32x18xbf16> to vector<32x18xf32>
    %c0_9 = arith.constant 0 : index
    %c3 = arith.constant 3 : index
    %c0_10 = arith.constant 0 : index
    %c0_11 = arith.constant 0 : index
    %9 = vector.load %arg2[%c0_9, %c3, %c0_10, %c0_11] : memref<1x4x32x18xbf16, #tpu.memory_space<vmem>>, vector<1x1x32x18xbf16>
    %10 = vector.shape_cast %9 : vector<1x1x32x18xbf16> to vector<32x18xbf16>
    %11 = arith.extf %10 : vector<32x18xbf16> to vector<32x18xf32>
    %12 = vector.extract_strided_slice %2 {offsets = [0, 0], sizes = [32, 8], strides = [1, 1]} : vector<32x18xf32> to vector<32x8xf32>
    %13 = vector.extract_strided_slice %5 {offsets = [0, 0], sizes = [32, 8], strides = [1, 1]} : vector<32x18xf32> to vector<32x8xf32>
    %14 = vector.extract_strided_slice %8 {offsets = [0, 0], sizes = [32, 8], strides = [1, 1]} : vector<32x18xf32> to vector<32x8xf32>
    %15 = vector.extract_strided_slice %11 {offsets = [0, 0], sizes = [32, 8], strides = [1, 1]} : vector<32x18xf32> to vector<32x8xf32>
    %16 = vector.extract_strided_slice %2 {offsets = [0, 1], sizes = [32, 8], strides = [1, 1]} : vector<32x18xf32> to vector<32x8xf32>
    %17 = vector.extract_strided_slice %5 {offsets = [0, 1], sizes = [32, 8], strides = [1, 1]} : vector<32x18xf32> to vector<32x8xf32>
    %18 = vector.extract_strided_slice %8 {offsets = [0, 1], sizes = [32, 8], strides = [1, 1]} : vector<32x18xf32> to vector<32x8xf32>
    %19 = vector.extract_strided_slice %11 {offsets = [0, 1], sizes = [32, 8], strides = [1, 1]} : vector<32x18xf32> to vector<32x8xf32>
    %20 = vector.extract_strided_slice %2 {offsets = [0, 2], sizes = [32, 8], strides = [1, 1]} : vector<32x18xf32> to vector<32x8xf32>
    %21 = vector.extract_strided_slice %5 {offsets = [0, 2], sizes = [32, 8], strides = [1, 1]} : vector<32x18xf32> to vector<32x8xf32>
    %22 = vector.extract_strided_slice %8 {offsets = [0, 2], sizes = [32, 8], strides = [1, 1]} : vector<32x18xf32> to vector<32x8xf32>
    %23 = vector.extract_strided_slice %11 {offsets = [0, 2], sizes = [32, 8], strides = [1, 1]} : vector<32x18xf32> to vector<32x8xf32>
    %24 = vector.extract_strided_slice %2 {offsets = [0, 3], sizes = [32, 8], strides = [1, 1]} : vector<32x18xf32> to vector<32x8xf32>
    %25 = vector.extract_strided_slice %5 {offsets = [0, 3], sizes = [32, 8], strides = [1, 1]} : vector<32x18xf32> to vector<32x8xf32>
    %26 = vector.extract_strided_slice %8 {offsets = [0, 3], sizes = [32, 8], strides = [1, 1]} : vector<32x18xf32> to vector<32x8xf32>
    %27 = vector.extract_strided_slice %11 {offsets = [0, 3], sizes = [32, 8], strides = [1, 1]} : vector<32x18xf32> to vector<32x8xf32>
    %28 = vector.extract_strided_slice %2 {offsets = [0, 4], sizes = [32, 8], strides = [1, 1]} : vector<32x18xf32> to vector<32x8xf32>
    %29 = vector.extract_strided_slice %5 {offsets = [0, 4], sizes = [32, 8], strides = [1, 1]} : vector<32x18xf32> to vector<32x8xf32>
    %30 = vector.extract_strided_slice %8 {offsets = [0, 4], sizes = [32, 8], strides = [1, 1]} : vector<32x18xf32> to vector<32x8xf32>
    %31 = vector.extract_strided_slice %11 {offsets = [0, 4], sizes = [32, 8], strides = [1, 1]} : vector<32x18xf32> to vector<32x8xf32>
    %32 = vector.extract_strided_slice %2 {offsets = [0, 5], sizes = [32, 8], strides = [1, 1]} : vector<32x18xf32> to vector<32x8xf32>
    %33 = vector.extract_strided_slice %5 {offsets = [0, 5], sizes = [32, 8], strides = [1, 1]} : vector<32x18xf32> to vector<32x8xf32>
    %34 = vector.extract_strided_slice %8 {offsets = [0, 5], sizes = [32, 8], strides = [1, 1]} : vector<32x18xf32> to vector<32x8xf32>
    %35 = vector.extract_strided_slice %11 {offsets = [0, 5], sizes = [32, 8], strides = [1, 1]} : vector<32x18xf32> to vector<32x8xf32>
    %36 = vector.extract_strided_slice %2 {offsets = [0, 6], sizes = [32, 8], strides = [1, 1]} : vector<32x18xf32> to vector<32x8xf32>
    %37 = vector.extract_strided_slice %5 {offsets = [0, 6], sizes = [32, 8], strides = [1, 1]} : vector<32x18xf32> to vector<32x8xf32>
    %38 = vector.extract_strided_slice %8 {offsets = [0, 6], sizes = [32, 8], strides = [1, 1]} : vector<32x18xf32> to vector<32x8xf32>
    %39 = vector.extract_strided_slice %11 {offsets = [0, 6], sizes = [32, 8], strides = [1, 1]} : vector<32x18xf32> to vector<32x8xf32>
    %40 = vector.extract_strided_slice %2 {offsets = [0, 7], sizes = [32, 8], strides = [1, 1]} : vector<32x18xf32> to vector<32x8xf32>
    %41 = vector.extract_strided_slice %5 {offsets = [0, 7], sizes = [32, 8], strides = [1, 1]} : vector<32x18xf32> to vector<32x8xf32>
    %42 = vector.extract_strided_slice %8 {offsets = [0, 7], sizes = [32, 8], strides = [1, 1]} : vector<32x18xf32> to vector<32x8xf32>
    %43 = vector.extract_strided_slice %11 {offsets = [0, 7], sizes = [32, 8], strides = [1, 1]} : vector<32x18xf32> to vector<32x8xf32>
    %44 = vector.extract_strided_slice %2 {offsets = [0, 8], sizes = [32, 8], strides = [1, 1]} : vector<32x18xf32> to vector<32x8xf32>
    %45 = vector.extract_strided_slice %5 {offsets = [0, 8], sizes = [32, 8], strides = [1, 1]} : vector<32x18xf32> to vector<32x8xf32>
    %46 = vector.extract_strided_slice %8 {offsets = [0, 8], sizes = [32, 8], strides = [1, 1]} : vector<32x18xf32> to vector<32x8xf32>
    %47 = vector.extract_strided_slice %11 {offsets = [0, 8], sizes = [32, 8], strides = [1, 1]} : vector<32x18xf32> to vector<32x8xf32>
    %48 = vector.extract_strided_slice %2 {offsets = [0, 9], sizes = [32, 8], strides = [1, 1]} : vector<32x18xf32> to vector<32x8xf32>
    %49 = vector.extract_strided_slice %5 {offsets = [0, 9], sizes = [32, 8], strides = [1, 1]} : vector<32x18xf32> to vector<32x8xf32>
    %50 = vector.extract_strided_slice %8 {offsets = [0, 9], sizes = [32, 8], strides = [1, 1]} : vector<32x18xf32> to vector<32x8xf32>
    %51 = vector.extract_strided_slice %11 {offsets = [0, 9], sizes = [32, 8], strides = [1, 1]} : vector<32x18xf32> to vector<32x8xf32>
    %52 = vector.extract_strided_slice %2 {offsets = [0, 10], sizes = [32, 8], strides = [1, 1]} : vector<32x18xf32> to vector<32x8xf32>
    %53 = tpu.concatenate %12, %13, %14, %15, %16, %17, %18, %19, %20, %21, %22, %23, %24, %25, %26, %27 in 0 : vector<32x8xf32>, vector<32x8xf32>, vector<32x8xf32>, vector<32x8xf32>, vector<32x8xf32>, vector<32x8xf32>, vector<32x8xf32>, vector<32x8xf32>, vector<32x8xf32>, vector<32x8xf32>, vector<32x8xf32>, vector<32x8xf32>, vector<32x8xf32>, vector<32x8xf32>, vector<32x8xf32>, vector<32x8xf32> -> vector<512x8xf32>
    %54 = tpu.concatenate %28, %29, %30, %31, %32, %33, %34, %35, %36, %37, %38, %39, %40, %41, %42, %43 in 0 : vector<32x8xf32>, vector<32x8xf32>, vector<32x8xf32>, vector<32x8xf32>, vector<32x8xf32>, vector<32x8xf32>, vector<32x8xf32>, vector<32x8xf32>, vector<32x8xf32>, vector<32x8xf32>, vector<32x8xf32>, vector<32x8xf32>, vector<32x8xf32>, vector<32x8xf32>, vector<32x8xf32>, vector<32x8xf32> -> vector<512x8xf32>
    %55 = tpu.concatenate %44, %45, %46, %47, %48, %49, %50, %51, %52 in 0 : vector<32x8xf32>, vector<32x8xf32>, vector<32x8xf32>, vector<32x8xf32>, vector<32x8xf32>, vector<32x8xf32>, vector<32x8xf32>, vector<32x8xf32>, vector<32x8xf32> -> vector<288x8xf32>
    %56 = tpu.concatenate %53, %54, %55 in 0 : vector<512x8xf32>, vector<512x8xf32>, vector<288x8xf32> -> vector<1312x8xf32>
    %c0_12 = arith.constant 0 : index
    %c0_13 = arith.constant 0 : index
    %57 = vector.load %arg3[%c0_12, %c0_13] : memref<64x1312xbf16, #tpu.memory_space<vmem>>, vector<64x1312xbf16>
    %58 = arith.truncf %56 : vector<1312x8xf32> to vector<1312x8xbf16>
    %cst = arith.constant dense<0.000000e+00> : vector<64x8xf32>
    %59 = tpu.matmul %57, %58, %cst {dimension_numbers = #tpu.dot_dimension_numbers<[1], [0], [0], [1], [0, 0, 1, 1], [], []>} : vector<64x1312xbf16>, vector<1312x8xbf16>, vector<64x8xf32> -> vector<64x8xf32>
    %c0_14 = arith.constant 0 : index
    %c0_15 = arith.constant 0 : index
    %60 = vector.load %arg4[%c0_14, %c0_15] : memref<64x1xf32, #tpu.memory_space<vmem>>, vector<64x1xf32>
    %61 = vector.broadcast %60 : vector<64x1xf32> to vector<64x8xf32>
    %62 = arith.addf %59, %61 : vector<64x8xf32>
    %cst_16 = arith.constant 0.000000e+00 : f32
    %63 = vector.broadcast %cst_16 : f32 to vector<64x8xf32>
    %64 = arith.cmpf oge, %62, %63 : vector<64x8xf32>
    %cst_17 = arith.constant 1.000000e-01 : f32
    %65 = vector.broadcast %cst_17 : f32 to vector<64x8xf32>
    %66 = arith.mulf %62, %65 : vector<64x8xf32>
    %67 = arith.select %64, %62, %66 : vector<64x8xi1>, vector<64x8xf32>
    %c0_18 = arith.constant 0 : index
    %c0_19 = arith.constant 0 : index
    %c0_20 = arith.constant 0 : index
    %68 = vector.load %arg5[%c0_18, %c0_19, %c0_20] : memref<1x64x8xf32, #tpu.memory_space<vmem>>, vector<1x64x8xf32>
    %69 = vector.shape_cast %68 : vector<1x64x8xf32> to vector<64x8xf32>
    %70 = vector.shape_cast %67 : vector<64x8xf32> to vector<1x64x8xf32>
    tpu.vector_store %arg5[%c0_18, %c0_19, %c0_20], %70 {strides = array<i32>} : memref<1x64x8xf32, #tpu.memory_space<vmem>>, vector<1x64x8xf32>,
    return
  }
  func.func @transform_0(%arg0: i32, %arg1: i32) -> (i32, i32, i32, i32) {
    %c0_i32 = arith.constant 0 : i32
    %c0_i32_0 = arith.constant 0 : i32
    %c0_i32_1 = arith.constant 0 : i32
    %c0_i32_2 = arith.constant 0 : i32
    return %arg1, %c0_i32, %c0_i32_0, %c0_i32_1 : i32, i32, i32, i32
  }
  func.func @transform_1(%arg0: i32, %arg1: i32) -> (i32, i32) {
    %c0_i32 = arith.constant 0 : i32
    %c0_i32_0 = arith.constant 0 : i32
    return %arg0, %c0_i32 : i32, i32
  }
  func.func @transform_2(%arg0: i32, %arg1: i32) -> (i32, i32) {
    %c0_i32 = arith.constant 0 : i32
    %c0_i32_0 = arith.constant 0 : i32
    return %arg0, %c0_i32 : i32, i32
  }
  func.func @transform_3(%arg0: i32, %arg1: i32) -> (i32, i32, i32) {
    %c0_i32 = arith.constant 0 : i32
    %c0_i32_0 = arith.constant 0 : i32
    return %arg1, %arg0, %c0_i32 : i32, i32, i32
  }
}

module attributes {stable_mosaic.version = 11 : i64} {
  func.func @_conv_im2col_kernel(%arg0: i32, %arg1: i32, %arg2: memref<1x2x1x66xbf16, #tpu.memory_space<vmem>>, %arg3: memref<1x4xbf16, #tpu.memory_space<vmem>>, %arg4: memref<1x1xf32, #tpu.memory_space<vmem>>, %arg5: memref<1x1x65xf32, #tpu.memory_space<vmem>>) attributes {dimension_semantics = [#tpu.dimension_semantics<parallel>, #tpu.dimension_semantics<parallel>], iteration_bounds = array<i64: 1, 2>, scalar_prefetch = 0 : i64, scratch_operands = 0 : i64, tpu.core_type = #tpu.core_type<tc>, window_params = [{transform_indices = @transform_0, window_bounds = array<i64: 1, 2, 1, 66>}, {transform_indices = @transform_1, window_bounds = array<i64: 1, 4>}, {transform_indices = @transform_2, window_bounds = array<i64: 1, 1>}, {transform_indices = @transform_3, window_bounds = array<i64: 1, 1, 65>}]} {
    %c0 = arith.constant 0 : index
    %c0_0 = arith.constant 0 : index
    %c0_1 = arith.constant 0 : index
    %c0_2 = arith.constant 0 : index
    %0 = vector.load %arg2[%c0, %c0_0, %c0_1, %c0_2] : memref<1x2x1x66xbf16, #tpu.memory_space<vmem>>, vector<1x1x1x66xbf16>
    %1 = vector.shape_cast %0 : vector<1x1x1x66xbf16> to vector<1x66xbf16>
    %2 = arith.extf %1 : vector<1x66xbf16> to vector<1x66xf32>
    %c0_3 = arith.constant 0 : index
    %c1 = arith.constant 1 : index
    %c0_4 = arith.constant 0 : index
    %c0_5 = arith.constant 0 : index
    %3 = vector.load %arg2[%c0_3, %c1, %c0_4, %c0_5] : memref<1x2x1x66xbf16, #tpu.memory_space<vmem>>, vector<1x1x1x66xbf16>
    %4 = vector.shape_cast %3 : vector<1x1x1x66xbf16> to vector<1x66xbf16>
    %5 = arith.extf %4 : vector<1x66xbf16> to vector<1x66xf32>
    %6 = vector.extract_strided_slice %2 {offsets = [0, 0], sizes = [1, 65], strides = [1, 1]} : vector<1x66xf32> to vector<1x65xf32>
    %7 = vector.extract_strided_slice %5 {offsets = [0, 0], sizes = [1, 65], strides = [1, 1]} : vector<1x66xf32> to vector<1x65xf32>
    %8 = vector.extract_strided_slice %2 {offsets = [0, 1], sizes = [1, 65], strides = [1, 1]} : vector<1x66xf32> to vector<1x65xf32>
    %9 = vector.extract_strided_slice %5 {offsets = [0, 1], sizes = [1, 65], strides = [1, 1]} : vector<1x66xf32> to vector<1x65xf32>
    %10 = tpu.concatenate %6, %7, %8, %9 in 0 : vector<1x65xf32>, vector<1x65xf32>, vector<1x65xf32>, vector<1x65xf32> -> vector<4x65xf32>
    %c0_6 = arith.constant 0 : index
    %c0_7 = arith.constant 0 : index
    %11 = vector.load %arg3[%c0_6, %c0_7] : memref<1x4xbf16, #tpu.memory_space<vmem>>, vector<1x4xbf16>
    %12 = arith.truncf %10 : vector<4x65xf32> to vector<4x65xbf16>
    %cst = arith.constant dense<0.000000e+00> : vector<1x65xf32>
    %13 = tpu.matmul %11, %12, %cst {dimension_numbers = #tpu.dot_dimension_numbers<[1], [0], [0], [1], [0, 0, 1, 1], [], []>} : vector<1x4xbf16>, vector<4x65xbf16>, vector<1x65xf32> -> vector<1x65xf32>
    %c0_8 = arith.constant 0 : index
    %c0_9 = arith.constant 0 : index
    %14 = vector.load %arg4[%c0_8, %c0_9] : memref<1x1xf32, #tpu.memory_space<vmem>>, vector<1x1xf32>
    %15 = vector.broadcast %14 : vector<1x1xf32> to vector<1x65xf32>
    %16 = arith.addf %13, %15 : vector<1x65xf32>
    %cst_10 = arith.constant 0.000000e+00 : f32
    %17 = vector.broadcast %cst_10 : f32 to vector<1x65xf32>
    %18 = arith.cmpf oge, %16, %17 : vector<1x65xf32>
    %cst_11 = arith.constant 1.000000e+00 : f32
    %19 = vector.broadcast %cst_11 : f32 to vector<1x65xf32>
    %20 = arith.mulf %16, %19 : vector<1x65xf32>
    %21 = arith.select %18, %16, %20 : vector<1x65xi1>, vector<1x65xf32>
    %c0_12 = arith.constant 0 : index
    %c0_13 = arith.constant 0 : index
    %c0_14 = arith.constant 0 : index
    %22 = vector.load %arg5[%c0_12, %c0_13, %c0_14] : memref<1x1x65xf32, #tpu.memory_space<vmem>>, vector<1x1x65xf32>
    %23 = vector.shape_cast %22 : vector<1x1x65xf32> to vector<1x65xf32>
    %24 = vector.shape_cast %21 : vector<1x65xf32> to vector<1x1x65xf32>
    tpu.vector_store %arg5[%c0_12, %c0_13, %c0_14], %24 {strides = array<i32>} : memref<1x1x65xf32, #tpu.memory_space<vmem>>, vector<1x1x65xf32>,
    return
  }
  func.func @transform_0(%arg0: i32, %arg1: i32) -> (i32, i32, i32, i32) {
    %c0_i32 = arith.constant 0 : i32
    %c0_i32_0 = arith.constant 0 : i32
    %c0_i32_1 = arith.constant 0 : i32
    %c0_i32_2 = arith.constant 0 : i32
    return %arg1, %c0_i32, %c0_i32_0, %c0_i32_1 : i32, i32, i32, i32
  }
  func.func @transform_1(%arg0: i32, %arg1: i32) -> (i32, i32) {
    %c0_i32 = arith.constant 0 : i32
    %c0_i32_0 = arith.constant 0 : i32
    return %arg0, %c0_i32 : i32, i32
  }
  func.func @transform_2(%arg0: i32, %arg1: i32) -> (i32, i32) {
    %c0_i32 = arith.constant 0 : i32
    %c0_i32_0 = arith.constant 0 : i32
    return %arg0, %c0_i32 : i32, i32
  }
  func.func @transform_3(%arg0: i32, %arg1: i32) -> (i32, i32, i32) {
    %c0_i32 = arith.constant 0 : i32
    %c0_i32_0 = arith.constant 0 : i32
    return %arg1, %arg0, %c0_i32 : i32, i32, i32
  }
}

module attributes {stable_mosaic.version = 11 : i64} {
  func.func @_conv_im2col_kernel(%arg0: i32, %arg1: i32, %arg2: memref<1x1x1x79xbf16, #tpu.memory_space<vmem>>, %arg3: memref<16x15xbf16, #tpu.memory_space<vmem>>, %arg4: memref<16x1xf32, #tpu.memory_space<vmem>>, %arg5: memref<1x16x65xf32, #tpu.memory_space<vmem>>) attributes {dimension_semantics = [#tpu.dimension_semantics<parallel>, #tpu.dimension_semantics<parallel>], iteration_bounds = array<i64: 1, 2>, scalar_prefetch = 0 : i64, scratch_operands = 0 : i64, tpu.core_type = #tpu.core_type<tc>, window_params = [{transform_indices = @transform_0, window_bounds = array<i64: 1, 1, 1, 79>}, {transform_indices = @transform_1, window_bounds = array<i64: 16, 15>}, {transform_indices = @transform_2, window_bounds = array<i64: 16, 1>}, {transform_indices = @transform_3, window_bounds = array<i64: 1, 16, 65>}]} {
    %c0 = arith.constant 0 : index
    %c0_0 = arith.constant 0 : index
    %c0_1 = arith.constant 0 : index
    %c0_2 = arith.constant 0 : index
    %0 = vector.load %arg2[%c0, %c0_0, %c0_1, %c0_2] : memref<1x1x1x79xbf16, #tpu.memory_space<vmem>>, vector<1x1x1x79xbf16>
    %1 = vector.shape_cast %0 : vector<1x1x1x79xbf16> to vector<1x79xbf16>
    %2 = arith.extf %1 : vector<1x79xbf16> to vector<1x79xf32>
    %3 = vector.extract_strided_slice %2 {offsets = [0, 0], sizes = [1, 65], strides = [1, 1]} : vector<1x79xf32> to vector<1x65xf32>
    %4 = vector.extract_strided_slice %2 {offsets = [0, 1], sizes = [1, 65], strides = [1, 1]} : vector<1x79xf32> to vector<1x65xf32>
    %5 = vector.extract_strided_slice %2 {offsets = [0, 2], sizes = [1, 65], strides = [1, 1]} : vector<1x79xf32> to vector<1x65xf32>
    %6 = vector.extract_strided_slice %2 {offsets = [0, 3], sizes = [1, 65], strides = [1, 1]} : vector<1x79xf32> to vector<1x65xf32>
    %7 = vector.extract_strided_slice %2 {offsets = [0, 4], sizes = [1, 65], strides = [1, 1]} : vector<1x79xf32> to vector<1x65xf32>
    %8 = vector.extract_strided_slice %2 {offsets = [0, 5], sizes = [1, 65], strides = [1, 1]} : vector<1x79xf32> to vector<1x65xf32>
    %9 = vector.extract_strided_slice %2 {offsets = [0, 6], sizes = [1, 65], strides = [1, 1]} : vector<1x79xf32> to vector<1x65xf32>
    %10 = vector.extract_strided_slice %2 {offsets = [0, 7], sizes = [1, 65], strides = [1, 1]} : vector<1x79xf32> to vector<1x65xf32>
    %11 = vector.extract_strided_slice %2 {offsets = [0, 8], sizes = [1, 65], strides = [1, 1]} : vector<1x79xf32> to vector<1x65xf32>
    %12 = vector.extract_strided_slice %2 {offsets = [0, 9], sizes = [1, 65], strides = [1, 1]} : vector<1x79xf32> to vector<1x65xf32>
    %13 = vector.extract_strided_slice %2 {offsets = [0, 10], sizes = [1, 65], strides = [1, 1]} : vector<1x79xf32> to vector<1x65xf32>
    %14 = vector.extract_strided_slice %2 {offsets = [0, 11], sizes = [1, 65], strides = [1, 1]} : vector<1x79xf32> to vector<1x65xf32>
    %15 = vector.extract_strided_slice %2 {offsets = [0, 12], sizes = [1, 65], strides = [1, 1]} : vector<1x79xf32> to vector<1x65xf32>
    %16 = vector.extract_strided_slice %2 {offsets = [0, 13], sizes = [1, 65], strides = [1, 1]} : vector<1x79xf32> to vector<1x65xf32>
    %17 = vector.extract_strided_slice %2 {offsets = [0, 14], sizes = [1, 65], strides = [1, 1]} : vector<1x79xf32> to vector<1x65xf32>
    %18 = tpu.concatenate %3, %4, %5, %6, %7, %8, %9, %10, %11, %12, %13, %14, %15, %16, %17 in 0 : vector<1x65xf32>, vector<1x65xf32>, vector<1x65xf32>, vector<1x65xf32>, vector<1x65xf32>, vector<1x65xf32>, vector<1x65xf32>, vector<1x65xf32>, vector<1x65xf32>, vector<1x65xf32>, vector<1x65xf32>, vector<1x65xf32>, vector<1x65xf32>, vector<1x65xf32>, vector<1x65xf32> -> vector<15x65xf32>
    %c0_3 = arith.constant 0 : index
    %c0_4 = arith.constant 0 : index
    %19 = vector.load %arg3[%c0_3, %c0_4] : memref<16x15xbf16, #tpu.memory_space<vmem>>, vector<16x15xbf16>
    %20 = arith.truncf %18 : vector<15x65xf32> to vector<15x65xbf16>
    %cst = arith.constant dense<0.000000e+00> : vector<16x65xf32>
    %21 = tpu.matmul %19, %20, %cst {dimension_numbers = #tpu.dot_dimension_numbers<[1], [0], [0], [1], [0, 0, 1, 1], [], []>} : vector<16x15xbf16>, vector<15x65xbf16>, vector<16x65xf32> -> vector<16x65xf32>
    %c0_5 = arith.constant 0 : index
    %c0_6 = arith.constant 0 : index
    %22 = vector.load %arg4[%c0_5, %c0_6] : memref<16x1xf32, #tpu.memory_space<vmem>>, vector<16x1xf32>
    %23 = vector.broadcast %22 : vector<16x1xf32> to vector<16x65xf32>
    %24 = arith.addf %21, %23 : vector<16x65xf32>
    %cst_7 = arith.constant 0.000000e+00 : f32
    %25 = vector.broadcast %cst_7 : f32 to vector<16x65xf32>
    %26 = arith.cmpf oge, %24, %25 : vector<16x65xf32>
    %cst_8 = arith.constant 1.000000e-01 : f32
    %27 = vector.broadcast %cst_8 : f32 to vector<16x65xf32>
    %28 = arith.mulf %24, %27 : vector<16x65xf32>
    %29 = arith.select %26, %24, %28 : vector<16x65xi1>, vector<16x65xf32>
    %c0_9 = arith.constant 0 : index
    %c0_10 = arith.constant 0 : index
    %c0_11 = arith.constant 0 : index
    %30 = vector.load %arg5[%c0_9, %c0_10, %c0_11] : memref<1x16x65xf32, #tpu.memory_space<vmem>>, vector<1x16x65xf32>
    %31 = vector.shape_cast %30 : vector<1x16x65xf32> to vector<16x65xf32>
    %32 = vector.shape_cast %29 : vector<16x65xf32> to vector<1x16x65xf32>
    tpu.vector_store %arg5[%c0_9, %c0_10, %c0_11], %32 {strides = array<i32>} : memref<1x16x65xf32, #tpu.memory_space<vmem>>, vector<1x16x65xf32>,
    return
  }
  func.func @transform_0(%arg0: i32, %arg1: i32) -> (i32, i32, i32, i32) {
    %c0_i32 = arith.constant 0 : i32
    %c0_i32_0 = arith.constant 0 : i32
    %c0_i32_1 = arith.constant 0 : i32
    %c0_i32_2 = arith.constant 0 : i32
    return %arg1, %c0_i32, %c0_i32_0, %c0_i32_1 : i32, i32, i32, i32
  }
  func.func @transform_1(%arg0: i32, %arg1: i32) -> (i32, i32) {
    %c0_i32 = arith.constant 0 : i32
    %c0_i32_0 = arith.constant 0 : i32
    return %arg0, %c0_i32 : i32, i32
  }
  func.func @transform_2(%arg0: i32, %arg1: i32) -> (i32, i32) {
    %c0_i32 = arith.constant 0 : i32
    %c0_i32_0 = arith.constant 0 : i32
    return %arg0, %c0_i32 : i32, i32
  }
  func.func @transform_3(%arg0: i32, %arg1: i32) -> (i32, i32, i32) {
    %c0_i32 = arith.constant 0 : i32
    %c0_i32_0 = arith.constant 0 : i32
    return %arg1, %arg0, %c0_i32 : i32, i32, i32
  }
}

module attributes {stable_mosaic.version = 11 : i64} {
  func.func @_conv_im2col_kernel(%arg0: i32, %arg1: i32, %arg2: memref<1x2x16x53xbf16, #tpu.memory_space<vmem>>, %arg3: memref<16x656xbf16, #tpu.memory_space<vmem>>, %arg4: memref<16x1xf32, #tpu.memory_space<vmem>>, %arg5: memref<1x16x33xf32, #tpu.memory_space<vmem>>) attributes {dimension_semantics = [#tpu.dimension_semantics<parallel>, #tpu.dimension_semantics<parallel>], iteration_bounds = array<i64: 1, 2>, scalar_prefetch = 0 : i64, scratch_operands = 0 : i64, tpu.core_type = #tpu.core_type<tc>, window_params = [{transform_indices = @transform_0, window_bounds = array<i64: 1, 2, 16, 53>}, {transform_indices = @transform_1, window_bounds = array<i64: 16, 656>}, {transform_indices = @transform_2, window_bounds = array<i64: 16, 1>}, {transform_indices = @transform_3, window_bounds = array<i64: 1, 16, 33>}]} {
    %c0 = arith.constant 0 : index
    %c0_0 = arith.constant 0 : index
    %c0_1 = arith.constant 0 : index
    %c0_2 = arith.constant 0 : index
    %0 = vector.load %arg2[%c0, %c0_0, %c0_1, %c0_2] : memref<1x2x16x53xbf16, #tpu.memory_space<vmem>>, vector<1x1x16x53xbf16>
    %1 = vector.shape_cast %0 : vector<1x1x16x53xbf16> to vector<16x53xbf16>
    %2 = arith.extf %1 : vector<16x53xbf16> to vector<16x53xf32>
    %c0_3 = arith.constant 0 : index
    %c1 = arith.constant 1 : index
    %c0_4 = arith.constant 0 : index
    %c0_5 = arith.constant 0 : index
    %3 = vector.load %arg2[%c0_3, %c1, %c0_4, %c0_5] : memref<1x2x16x53xbf16, #tpu.memory_space<vmem>>, vector<1x1x16x53xbf16>
    %4 = vector.shape_cast %3 : vector<1x1x16x53xbf16> to vector<16x53xbf16>
    %5 = arith.extf %4 : vector<16x53xbf16> to vector<16x53xf32>
    %6 = vector.extract_strided_slice %2 {offsets = [0, 0], sizes = [16, 33], strides = [1, 1]} : vector<16x53xf32> to vector<16x33xf32>
    %7 = vector.extract_strided_slice %5 {offsets = [0, 0], sizes = [16, 33], strides = [1, 1]} : vector<16x53xf32> to vector<16x33xf32>
    %8 = vector.extract_strided_slice %2 {offsets = [0, 1], sizes = [16, 33], strides = [1, 1]} : vector<16x53xf32> to vector<16x33xf32>
    %9 = vector.extract_strided_slice %5 {offsets = [0, 1], sizes = [16, 33], strides = [1, 1]} : vector<16x53xf32> to vector<16x33xf32>
    %10 = vector.extract_strided_slice %2 {offsets = [0, 2], sizes = [16, 33], strides = [1, 1]} : vector<16x53xf32> to vector<16x33xf32>
    %11 = vector.extract_strided_slice %5 {offsets = [0, 2], sizes = [16, 33], strides = [1, 1]} : vector<16x53xf32> to vector<16x33xf32>
    %12 = vector.extract_strided_slice %2 {offsets = [0, 3], sizes = [16, 33], strides = [1, 1]} : vector<16x53xf32> to vector<16x33xf32>
    %13 = vector.extract_strided_slice %5 {offsets = [0, 3], sizes = [16, 33], strides = [1, 1]} : vector<16x53xf32> to vector<16x33xf32>
    %14 = vector.extract_strided_slice %2 {offsets = [0, 4], sizes = [16, 33], strides = [1, 1]} : vector<16x53xf32> to vector<16x33xf32>
    %15 = vector.extract_strided_slice %5 {offsets = [0, 4], sizes = [16, 33], strides = [1, 1]} : vector<16x53xf32> to vector<16x33xf32>
    %16 = vector.extract_strided_slice %2 {offsets = [0, 5], sizes = [16, 33], strides = [1, 1]} : vector<16x53xf32> to vector<16x33xf32>
    %17 = vector.extract_strided_slice %5 {offsets = [0, 5], sizes = [16, 33], strides = [1, 1]} : vector<16x53xf32> to vector<16x33xf32>
    %18 = vector.extract_strided_slice %2 {offsets = [0, 6], sizes = [16, 33], strides = [1, 1]} : vector<16x53xf32> to vector<16x33xf32>
    %19 = vector.extract_strided_slice %5 {offsets = [0, 6], sizes = [16, 33], strides = [1, 1]} : vector<16x53xf32> to vector<16x33xf32>
    %20 = vector.extract_strided_slice %2 {offsets = [0, 7], sizes = [16, 33], strides = [1, 1]} : vector<16x53xf32> to vector<16x33xf32>
    %21 = vector.extract_strided_slice %5 {offsets = [0, 7], sizes = [16, 33], strides = [1, 1]} : vector<16x53xf32> to vector<16x33xf32>
    %22 = vector.extract_strided_slice %2 {offsets = [0, 8], sizes = [16, 33], strides = [1, 1]} : vector<16x53xf32> to vector<16x33xf32>
    %23 = vector.extract_strided_slice %5 {offsets = [0, 8], sizes = [16, 33], strides = [1, 1]} : vector<16x53xf32> to vector<16x33xf32>
    %24 = vector.extract_strided_slice %2 {offsets = [0, 9], sizes = [16, 33], strides = [1, 1]} : vector<16x53xf32> to vector<16x33xf32>
    %25 = vector.extract_strided_slice %5 {offsets = [0, 9], sizes = [16, 33], strides = [1, 1]} : vector<16x53xf32> to vector<16x33xf32>
    %26 = vector.extract_strided_slice %2 {offsets = [0, 10], sizes = [16, 33], strides = [1, 1]} : vector<16x53xf32> to vector<16x33xf32>
    %27 = vector.extract_strided_slice %5 {offsets = [0, 10], sizes = [16, 33], strides = [1, 1]} : vector<16x53xf32> to vector<16x33xf32>
    %28 = vector.extract_strided_slice %2 {offsets = [0, 11], sizes = [16, 33], strides = [1, 1]} : vector<16x53xf32> to vector<16x33xf32>
    %29 = vector.extract_strided_slice %5 {offsets = [0, 11], sizes = [16, 33], strides = [1, 1]} : vector<16x53xf32> to vector<16x33xf32>
    %30 = vector.extract_strided_slice %2 {offsets = [0, 12], sizes = [16, 33], strides = [1, 1]} : vector<16x53xf32> to vector<16x33xf32>
    %31 = vector.extract_strided_slice %5 {offsets = [0, 12], sizes = [16, 33], strides = [1, 1]} : vector<16x53xf32> to vector<16x33xf32>
    %32 = vector.extract_strided_slice %2 {offsets = [0, 13], sizes = [16, 33], strides = [1, 1]} : vector<16x53xf32> to vector<16x33xf32>
    %33 = vector.extract_strided_slice %5 {offsets = [0, 13], sizes = [16, 33], strides = [1, 1]} : vector<16x53xf32> to vector<16x33xf32>
    %34 = vector.extract_strided_slice %2 {offsets = [0, 14], sizes = [16, 33], strides = [1, 1]} : vector<16x53xf32> to vector<16x33xf32>
    %35 = vector.extract_strided_slice %5 {offsets = [0, 14], sizes = [16, 33], strides = [1, 1]} : vector<16x53xf32> to vector<16x33xf32>
    %36 = vector.extract_strided_slice %2 {offsets = [0, 15], sizes = [16, 33], strides = [1, 1]} : vector<16x53xf32> to vector<16x33xf32>
    %37 = vector.extract_strided_slice %5 {offsets = [0, 15], sizes = [16, 33], strides = [1, 1]} : vector<16x53xf32> to vector<16x33xf32>
    %38 = vector.extract_strided_slice %2 {offsets = [0, 16], sizes = [16, 33], strides = [1, 1]} : vector<16x53xf32> to vector<16x33xf32>
    %39 = vector.extract_strided_slice %5 {offsets = [0, 16], sizes = [16, 33], strides = [1, 1]} : vector<16x53xf32> to vector<16x33xf32>
    %40 = vector.extract_strided_slice %2 {offsets = [0, 17], sizes = [16, 33], strides = [1, 1]} : vector<16x53xf32> to vector<16x33xf32>
    %41 = vector.extract_strided_slice %5 {offsets = [0, 17], sizes = [16, 33], strides = [1, 1]} : vector<16x53xf32> to vector<16x33xf32>
    %42 = vector.extract_strided_slice %2 {offsets = [0, 18], sizes = [16, 33], strides = [1, 1]} : vector<16x53xf32> to vector<16x33xf32>
    %43 = vector.extract_strided_slice %5 {offsets = [0, 18], sizes = [16, 33], strides = [1, 1]} : vector<16x53xf32> to vector<16x33xf32>
    %44 = vector.extract_strided_slice %2 {offsets = [0, 19], sizes = [16, 33], strides = [1, 1]} : vector<16x53xf32> to vector<16x33xf32>
    %45 = vector.extract_strided_slice %5 {offsets = [0, 19], sizes = [16, 33], strides = [1, 1]} : vector<16x53xf32> to vector<16x33xf32>
    %46 = vector.extract_strided_slice %2 {offsets = [0, 20], sizes = [16, 33], strides = [1, 1]} : vector<16x53xf32> to vector<16x33xf32>
    %47 = tpu.concatenate %6, %7, %8, %9, %10, %11, %12, %13, %14, %15, %16, %17, %18, %19, %20, %21 in 0 : vector<16x33xf32>, vector<16x33xf32>, vector<16x33xf32>, vector<16x33xf32>, vector<16x33xf32>, vector<16x33xf32>, vector<16x33xf32>, vector<16x33xf32>, vector<16x33xf32>, vector<16x33xf32>, vector<16x33xf32>, vector<16x33xf32>, vector<16x33xf32>, vector<16x33xf32>, vector<16x33xf32>, vector<16x33xf32> -> vector<256x33xf32>
    %48 = tpu.concatenate %22, %23, %24, %25, %26, %27, %28, %29, %30, %31, %32, %33, %34, %35, %36, %37 in 0 : vector<16x33xf32>, vector<16x33xf32>, vector<16x33xf32>, vector<16x33xf32>, vector<16x33xf32>, vector<16x33xf32>, vector<16x33xf32>, vector<16x33xf32>, vector<16x33xf32>, vector<16x33xf32>, vector<16x33xf32>, vector<16x33xf32>, vector<16x33xf32>, vector<16x33xf32>, vector<16x33xf32>, vector<16x33xf32> -> vector<256x33xf32>
    %49 = tpu.concatenate %38, %39, %40, %41, %42, %43, %44, %45, %46 in 0 : vector<16x33xf32>, vector<16x33xf32>, vector<16x33xf32>, vector<16x33xf32>, vector<16x33xf32>, vector<16x33xf32>, vector<16x33xf32>, vector<16x33xf32>, vector<16x33xf32> -> vector<144x33xf32>
    %50 = tpu.concatenate %47, %48, %49 in 0 : vector<256x33xf32>, vector<256x33xf32>, vector<144x33xf32> -> vector<656x33xf32>
    %c0_6 = arith.constant 0 : index
    %c0_7 = arith.constant 0 : index
    %51 = vector.load %arg3[%c0_6, %c0_7] : memref<16x656xbf16, #tpu.memory_space<vmem>>, vector<16x656xbf16>
    %52 = arith.truncf %50 : vector<656x33xf32> to vector<656x33xbf16>
    %cst = arith.constant dense<0.000000e+00> : vector<16x33xf32>
    %53 = tpu.matmul %51, %52, %cst {dimension_numbers = #tpu.dot_dimension_numbers<[1], [0], [0], [1], [0, 0, 1, 1], [], []>} : vector<16x656xbf16>, vector<656x33xbf16>, vector<16x33xf32> -> vector<16x33xf32>
    %c0_8 = arith.constant 0 : index
    %c0_9 = arith.constant 0 : index
    %54 = vector.load %arg4[%c0_8, %c0_9] : memref<16x1xf32, #tpu.memory_space<vmem>>, vector<16x1xf32>
    %55 = vector.broadcast %54 : vector<16x1xf32> to vector<16x33xf32>
    %56 = arith.addf %53, %55 : vector<16x33xf32>
    %cst_10 = arith.constant 0.000000e+00 : f32
    %57 = vector.broadcast %cst_10 : f32 to vector<16x33xf32>
    %58 = arith.cmpf oge, %56, %57 : vector<16x33xf32>
    %cst_11 = arith.constant 1.000000e-01 : f32
    %59 = vector.broadcast %cst_11 : f32 to vector<16x33xf32>
    %60 = arith.mulf %56, %59 : vector<16x33xf32>
    %61 = arith.select %58, %56, %60 : vector<16x33xi1>, vector<16x33xf32>
    %c0_12 = arith.constant 0 : index
    %c0_13 = arith.constant 0 : index
    %c0_14 = arith.constant 0 : index
    %62 = vector.load %arg5[%c0_12, %c0_13, %c0_14] : memref<1x16x33xf32, #tpu.memory_space<vmem>>, vector<1x16x33xf32>
    %63 = vector.shape_cast %62 : vector<1x16x33xf32> to vector<16x33xf32>
    %64 = vector.shape_cast %61 : vector<16x33xf32> to vector<1x16x33xf32>
    tpu.vector_store %arg5[%c0_12, %c0_13, %c0_14], %64 {strides = array<i32>} : memref<1x16x33xf32, #tpu.memory_space<vmem>>, vector<1x16x33xf32>,
    return
  }
  func.func @transform_0(%arg0: i32, %arg1: i32) -> (i32, i32, i32, i32) {
    %c0_i32 = arith.constant 0 : i32
    %c0_i32_0 = arith.constant 0 : i32
    %c0_i32_1 = arith.constant 0 : i32
    %c0_i32_2 = arith.constant 0 : i32
    return %arg1, %c0_i32, %c0_i32_0, %c0_i32_1 : i32, i32, i32, i32
  }
  func.func @transform_1(%arg0: i32, %arg1: i32) -> (i32, i32) {
    %c0_i32 = arith.constant 0 : i32
    %c0_i32_0 = arith.constant 0 : i32
    return %arg0, %c0_i32 : i32, i32
  }
  func.func @transform_2(%arg0: i32, %arg1: i32) -> (i32, i32) {
    %c0_i32 = arith.constant 0 : i32
    %c0_i32_0 = arith.constant 0 : i32
    return %arg0, %c0_i32 : i32, i32
  }
  func.func @transform_3(%arg0: i32, %arg1: i32) -> (i32, i32, i32) {
    %c0_i32 = arith.constant 0 : i32
    %c0_i32_0 = arith.constant 0 : i32
    return %arg1, %arg0, %c0_i32 : i32, i32, i32
  }
}

module attributes {stable_mosaic.version = 11 : i64} {
  func.func @_conv_im2col_kernel(%arg0: i32, %arg1: i32, %arg2: memref<1x2x16x37xbf16, #tpu.memory_space<vmem>>, %arg3: memref<32x656xbf16, #tpu.memory_space<vmem>>, %arg4: memref<32x1xf32, #tpu.memory_space<vmem>>, %arg5: memref<1x32x17xf32, #tpu.memory_space<vmem>>) attributes {dimension_semantics = [#tpu.dimension_semantics<parallel>, #tpu.dimension_semantics<parallel>], iteration_bounds = array<i64: 1, 2>, scalar_prefetch = 0 : i64, scratch_operands = 0 : i64, tpu.core_type = #tpu.core_type<tc>, window_params = [{transform_indices = @transform_0, window_bounds = array<i64: 1, 2, 16, 37>}, {transform_indices = @transform_1, window_bounds = array<i64: 32, 656>}, {transform_indices = @transform_2, window_bounds = array<i64: 32, 1>}, {transform_indices = @transform_3, window_bounds = array<i64: 1, 32, 17>}]} {
    %c0 = arith.constant 0 : index
    %c0_0 = arith.constant 0 : index
    %c0_1 = arith.constant 0 : index
    %c0_2 = arith.constant 0 : index
    %0 = vector.load %arg2[%c0, %c0_0, %c0_1, %c0_2] : memref<1x2x16x37xbf16, #tpu.memory_space<vmem>>, vector<1x1x16x37xbf16>
    %1 = vector.shape_cast %0 : vector<1x1x16x37xbf16> to vector<16x37xbf16>
    %2 = arith.extf %1 : vector<16x37xbf16> to vector<16x37xf32>
    %c0_3 = arith.constant 0 : index
    %c1 = arith.constant 1 : index
    %c0_4 = arith.constant 0 : index
    %c0_5 = arith.constant 0 : index
    %3 = vector.load %arg2[%c0_3, %c1, %c0_4, %c0_5] : memref<1x2x16x37xbf16, #tpu.memory_space<vmem>>, vector<1x1x16x37xbf16>
    %4 = vector.shape_cast %3 : vector<1x1x16x37xbf16> to vector<16x37xbf16>
    %5 = arith.extf %4 : vector<16x37xbf16> to vector<16x37xf32>
    %6 = vector.extract_strided_slice %2 {offsets = [0, 0], sizes = [16, 17], strides = [1, 1]} : vector<16x37xf32> to vector<16x17xf32>
    %7 = vector.extract_strided_slice %5 {offsets = [0, 0], sizes = [16, 17], strides = [1, 1]} : vector<16x37xf32> to vector<16x17xf32>
    %8 = vector.extract_strided_slice %2 {offsets = [0, 1], sizes = [16, 17], strides = [1, 1]} : vector<16x37xf32> to vector<16x17xf32>
    %9 = vector.extract_strided_slice %5 {offsets = [0, 1], sizes = [16, 17], strides = [1, 1]} : vector<16x37xf32> to vector<16x17xf32>
    %10 = vector.extract_strided_slice %2 {offsets = [0, 2], sizes = [16, 17], strides = [1, 1]} : vector<16x37xf32> to vector<16x17xf32>
    %11 = vector.extract_strided_slice %5 {offsets = [0, 2], sizes = [16, 17], strides = [1, 1]} : vector<16x37xf32> to vector<16x17xf32>
    %12 = vector.extract_strided_slice %2 {offsets = [0, 3], sizes = [16, 17], strides = [1, 1]} : vector<16x37xf32> to vector<16x17xf32>
    %13 = vector.extract_strided_slice %5 {offsets = [0, 3], sizes = [16, 17], strides = [1, 1]} : vector<16x37xf32> to vector<16x17xf32>
    %14 = vector.extract_strided_slice %2 {offsets = [0, 4], sizes = [16, 17], strides = [1, 1]} : vector<16x37xf32> to vector<16x17xf32>
    %15 = vector.extract_strided_slice %5 {offsets = [0, 4], sizes = [16, 17], strides = [1, 1]} : vector<16x37xf32> to vector<16x17xf32>
    %16 = vector.extract_strided_slice %2 {offsets = [0, 5], sizes = [16, 17], strides = [1, 1]} : vector<16x37xf32> to vector<16x17xf32>
    %17 = vector.extract_strided_slice %5 {offsets = [0, 5], sizes = [16, 17], strides = [1, 1]} : vector<16x37xf32> to vector<16x17xf32>
    %18 = vector.extract_strided_slice %2 {offsets = [0, 6], sizes = [16, 17], strides = [1, 1]} : vector<16x37xf32> to vector<16x17xf32>
    %19 = vector.extract_strided_slice %5 {offsets = [0, 6], sizes = [16, 17], strides = [1, 1]} : vector<16x37xf32> to vector<16x17xf32>
    %20 = vector.extract_strided_slice %2 {offsets = [0, 7], sizes = [16, 17], strides = [1, 1]} : vector<16x37xf32> to vector<16x17xf32>
    %21 = vector.extract_strided_slice %5 {offsets = [0, 7], sizes = [16, 17], strides = [1, 1]} : vector<16x37xf32> to vector<16x17xf32>
    %22 = vector.extract_strided_slice %2 {offsets = [0, 8], sizes = [16, 17], strides = [1, 1]} : vector<16x37xf32> to vector<16x17xf32>
    %23 = vector.extract_strided_slice %5 {offsets = [0, 8], sizes = [16, 17], strides = [1, 1]} : vector<16x37xf32> to vector<16x17xf32>
    %24 = vector.extract_strided_slice %2 {offsets = [0, 9], sizes = [16, 17], strides = [1, 1]} : vector<16x37xf32> to vector<16x17xf32>
    %25 = vector.extract_strided_slice %5 {offsets = [0, 9], sizes = [16, 17], strides = [1, 1]} : vector<16x37xf32> to vector<16x17xf32>
    %26 = vector.extract_strided_slice %2 {offsets = [0, 10], sizes = [16, 17], strides = [1, 1]} : vector<16x37xf32> to vector<16x17xf32>
    %27 = vector.extract_strided_slice %5 {offsets = [0, 10], sizes = [16, 17], strides = [1, 1]} : vector<16x37xf32> to vector<16x17xf32>
    %28 = vector.extract_strided_slice %2 {offsets = [0, 11], sizes = [16, 17], strides = [1, 1]} : vector<16x37xf32> to vector<16x17xf32>
    %29 = vector.extract_strided_slice %5 {offsets = [0, 11], sizes = [16, 17], strides = [1, 1]} : vector<16x37xf32> to vector<16x17xf32>
    %30 = vector.extract_strided_slice %2 {offsets = [0, 12], sizes = [16, 17], strides = [1, 1]} : vector<16x37xf32> to vector<16x17xf32>
    %31 = vector.extract_strided_slice %5 {offsets = [0, 12], sizes = [16, 17], strides = [1, 1]} : vector<16x37xf32> to vector<16x17xf32>
    %32 = vector.extract_strided_slice %2 {offsets = [0, 13], sizes = [16, 17], strides = [1, 1]} : vector<16x37xf32> to vector<16x17xf32>
    %33 = vector.extract_strided_slice %5 {offsets = [0, 13], sizes = [16, 17], strides = [1, 1]} : vector<16x37xf32> to vector<16x17xf32>
    %34 = vector.extract_strided_slice %2 {offsets = [0, 14], sizes = [16, 17], strides = [1, 1]} : vector<16x37xf32> to vector<16x17xf32>
    %35 = vector.extract_strided_slice %5 {offsets = [0, 14], sizes = [16, 17], strides = [1, 1]} : vector<16x37xf32> to vector<16x17xf32>
    %36 = vector.extract_strided_slice %2 {offsets = [0, 15], sizes = [16, 17], strides = [1, 1]} : vector<16x37xf32> to vector<16x17xf32>
    %37 = vector.extract_strided_slice %5 {offsets = [0, 15], sizes = [16, 17], strides = [1, 1]} : vector<16x37xf32> to vector<16x17xf32>
    %38 = vector.extract_strided_slice %2 {offsets = [0, 16], sizes = [16, 17], strides = [1, 1]} : vector<16x37xf32> to vector<16x17xf32>
    %39 = vector.extract_strided_slice %5 {offsets = [0, 16], sizes = [16, 17], strides = [1, 1]} : vector<16x37xf32> to vector<16x17xf32>
    %40 = vector.extract_strided_slice %2 {offsets = [0, 17], sizes = [16, 17], strides = [1, 1]} : vector<16x37xf32> to vector<16x17xf32>
    %41 = vector.extract_strided_slice %5 {offsets = [0, 17], sizes = [16, 17], strides = [1, 1]} : vector<16x37xf32> to vector<16x17xf32>
    %42 = vector.extract_strided_slice %2 {offsets = [0, 18], sizes = [16, 17], strides = [1, 1]} : vector<16x37xf32> to vector<16x17xf32>
    %43 = vector.extract_strided_slice %5 {offsets = [0, 18], sizes = [16, 17], strides = [1, 1]} : vector<16x37xf32> to vector<16x17xf32>
    %44 = vector.extract_strided_slice %2 {offsets = [0, 19], sizes = [16, 17], strides = [1, 1]} : vector<16x37xf32> to vector<16x17xf32>
    %45 = vector.extract_strided_slice %5 {offsets = [0, 19], sizes = [16, 17], strides = [1, 1]} : vector<16x37xf32> to vector<16x17xf32>
    %46 = vector.extract_strided_slice %2 {offsets = [0, 20], sizes = [16, 17], strides = [1, 1]} : vector<16x37xf32> to vector<16x17xf32>
    %47 = tpu.concatenate %6, %7, %8, %9, %10, %11, %12, %13, %14, %15, %16, %17, %18, %19, %20, %21 in 0 : vector<16x17xf32>, vector<16x17xf32>, vector<16x17xf32>, vector<16x17xf32>, vector<16x17xf32>, vector<16x17xf32>, vector<16x17xf32>, vector<16x17xf32>, vector<16x17xf32>, vector<16x17xf32>, vector<16x17xf32>, vector<16x17xf32>, vector<16x17xf32>, vector<16x17xf32>, vector<16x17xf32>, vector<16x17xf32> -> vector<256x17xf32>
    %48 = tpu.concatenate %22, %23, %24, %25, %26, %27, %28, %29, %30, %31, %32, %33, %34, %35, %36, %37 in 0 : vector<16x17xf32>, vector<16x17xf32>, vector<16x17xf32>, vector<16x17xf32>, vector<16x17xf32>, vector<16x17xf32>, vector<16x17xf32>, vector<16x17xf32>, vector<16x17xf32>, vector<16x17xf32>, vector<16x17xf32>, vector<16x17xf32>, vector<16x17xf32>, vector<16x17xf32>, vector<16x17xf32>, vector<16x17xf32> -> vector<256x17xf32>
    %49 = tpu.concatenate %38, %39, %40, %41, %42, %43, %44, %45, %46 in 0 : vector<16x17xf32>, vector<16x17xf32>, vector<16x17xf32>, vector<16x17xf32>, vector<16x17xf32>, vector<16x17xf32>, vector<16x17xf32>, vector<16x17xf32>, vector<16x17xf32> -> vector<144x17xf32>
    %50 = tpu.concatenate %47, %48, %49 in 0 : vector<256x17xf32>, vector<256x17xf32>, vector<144x17xf32> -> vector<656x17xf32>
    %c0_6 = arith.constant 0 : index
    %c0_7 = arith.constant 0 : index
    %51 = vector.load %arg3[%c0_6, %c0_7] : memref<32x656xbf16, #tpu.memory_space<vmem>>, vector<32x656xbf16>
    %52 = arith.truncf %50 : vector<656x17xf32> to vector<656x17xbf16>
    %cst = arith.constant dense<0.000000e+00> : vector<32x17xf32>
    %53 = tpu.matmul %51, %52, %cst {dimension_numbers = #tpu.dot_dimension_numbers<[1], [0], [0], [1], [0, 0, 1, 1], [], []>} : vector<32x656xbf16>, vector<656x17xbf16>, vector<32x17xf32> -> vector<32x17xf32>
    %c0_8 = arith.constant 0 : index
    %c0_9 = arith.constant 0 : index
    %54 = vector.load %arg4[%c0_8, %c0_9] : memref<32x1xf32, #tpu.memory_space<vmem>>, vector<32x1xf32>
    %55 = vector.broadcast %54 : vector<32x1xf32> to vector<32x17xf32>
    %56 = arith.addf %53, %55 : vector<32x17xf32>
    %cst_10 = arith.constant 0.000000e+00 : f32
    %57 = vector.broadcast %cst_10 : f32 to vector<32x17xf32>
    %58 = arith.cmpf oge, %56, %57 : vector<32x17xf32>
    %cst_11 = arith.constant 1.000000e-01 : f32
    %59 = vector.broadcast %cst_11 : f32 to vector<32x17xf32>
    %60 = arith.mulf %56, %59 : vector<32x17xf32>
    %61 = arith.select %58, %56, %60 : vector<32x17xi1>, vector<32x17xf32>
    %c0_12 = arith.constant 0 : index
    %c0_13 = arith.constant 0 : index
    %c0_14 = arith.constant 0 : index
    %62 = vector.load %arg5[%c0_12, %c0_13, %c0_14] : memref<1x32x17xf32, #tpu.memory_space<vmem>>, vector<1x32x17xf32>
    %63 = vector.shape_cast %62 : vector<1x32x17xf32> to vector<32x17xf32>
    %64 = vector.shape_cast %61 : vector<32x17xf32> to vector<1x32x17xf32>
    tpu.vector_store %arg5[%c0_12, %c0_13, %c0_14], %64 {strides = array<i32>} : memref<1x32x17xf32, #tpu.memory_space<vmem>>, vector<1x32x17xf32>,
    return
  }
  func.func @transform_0(%arg0: i32, %arg1: i32) -> (i32, i32, i32, i32) {
    %c0_i32 = arith.constant 0 : i32
    %c0_i32_0 = arith.constant 0 : i32
    %c0_i32_1 = arith.constant 0 : i32
    %c0_i32_2 = arith.constant 0 : i32
    return %arg1, %c0_i32, %c0_i32_0, %c0_i32_1 : i32, i32, i32, i32
  }
  func.func @transform_1(%arg0: i32, %arg1: i32) -> (i32, i32) {
    %c0_i32 = arith.constant 0 : i32
    %c0_i32_0 = arith.constant 0 : i32
    return %arg0, %c0_i32 : i32, i32
  }
  func.func @transform_2(%arg0: i32, %arg1: i32) -> (i32, i32) {
    %c0_i32 = arith.constant 0 : i32
    %c0_i32_0 = arith.constant 0 : i32
    return %arg0, %c0_i32 : i32, i32
  }
  func.func @transform_3(%arg0: i32, %arg1: i32) -> (i32, i32, i32) {
    %c0_i32 = arith.constant 0 : i32
    %c0_i32_0 = arith.constant 0 : i32
    return %arg1, %arg0, %c0_i32 : i32, i32, i32
  }
}

module attributes {stable_mosaic.version = 11 : i64} {
  func.func @_conv_im2col_kernel(%arg0: i32, %arg1: i32, %arg2: memref<1x1x1x47xbf16, #tpu.memory_space<vmem>>, %arg3: memref<16x15xbf16, #tpu.memory_space<vmem>>, %arg4: memref<16x1xf32, #tpu.memory_space<vmem>>, %arg5: memref<1x16x33xf32, #tpu.memory_space<vmem>>) attributes {dimension_semantics = [#tpu.dimension_semantics<parallel>, #tpu.dimension_semantics<parallel>], iteration_bounds = array<i64: 1, 2>, scalar_prefetch = 0 : i64, scratch_operands = 0 : i64, tpu.core_type = #tpu.core_type<tc>, window_params = [{transform_indices = @transform_0, window_bounds = array<i64: 1, 1, 1, 47>}, {transform_indices = @transform_1, window_bounds = array<i64: 16, 15>}, {transform_indices = @transform_2, window_bounds = array<i64: 16, 1>}, {transform_indices = @transform_3, window_bounds = array<i64: 1, 16, 33>}]} {
    %c0 = arith.constant 0 : index
    %c0_0 = arith.constant 0 : index
    %c0_1 = arith.constant 0 : index
    %c0_2 = arith.constant 0 : index
    %0 = vector.load %arg2[%c0, %c0_0, %c0_1, %c0_2] : memref<1x1x1x47xbf16, #tpu.memory_space<vmem>>, vector<1x1x1x47xbf16>
    %1 = vector.shape_cast %0 : vector<1x1x1x47xbf16> to vector<1x47xbf16>
    %2 = arith.extf %1 : vector<1x47xbf16> to vector<1x47xf32>
    %3 = vector.extract_strided_slice %2 {offsets = [0, 0], sizes = [1, 33], strides = [1, 1]} : vector<1x47xf32> to vector<1x33xf32>
    %4 = vector.extract_strided_slice %2 {offsets = [0, 1], sizes = [1, 33], strides = [1, 1]} : vector<1x47xf32> to vector<1x33xf32>
    %5 = vector.extract_strided_slice %2 {offsets = [0, 2], sizes = [1, 33], strides = [1, 1]} : vector<1x47xf32> to vector<1x33xf32>
    %6 = vector.extract_strided_slice %2 {offsets = [0, 3], sizes = [1, 33], strides = [1, 1]} : vector<1x47xf32> to vector<1x33xf32>
    %7 = vector.extract_strided_slice %2 {offsets = [0, 4], sizes = [1, 33], strides = [1, 1]} : vector<1x47xf32> to vector<1x33xf32>
    %8 = vector.extract_strided_slice %2 {offsets = [0, 5], sizes = [1, 33], strides = [1, 1]} : vector<1x47xf32> to vector<1x33xf32>
    %9 = vector.extract_strided_slice %2 {offsets = [0, 6], sizes = [1, 33], strides = [1, 1]} : vector<1x47xf32> to vector<1x33xf32>
    %10 = vector.extract_strided_slice %2 {offsets = [0, 7], sizes = [1, 33], strides = [1, 1]} : vector<1x47xf32> to vector<1x33xf32>
    %11 = vector.extract_strided_slice %2 {offsets = [0, 8], sizes = [1, 33], strides = [1, 1]} : vector<1x47xf32> to vector<1x33xf32>
    %12 = vector.extract_strided_slice %2 {offsets = [0, 9], sizes = [1, 33], strides = [1, 1]} : vector<1x47xf32> to vector<1x33xf32>
    %13 = vector.extract_strided_slice %2 {offsets = [0, 10], sizes = [1, 33], strides = [1, 1]} : vector<1x47xf32> to vector<1x33xf32>
    %14 = vector.extract_strided_slice %2 {offsets = [0, 11], sizes = [1, 33], strides = [1, 1]} : vector<1x47xf32> to vector<1x33xf32>
    %15 = vector.extract_strided_slice %2 {offsets = [0, 12], sizes = [1, 33], strides = [1, 1]} : vector<1x47xf32> to vector<1x33xf32>
    %16 = vector.extract_strided_slice %2 {offsets = [0, 13], sizes = [1, 33], strides = [1, 1]} : vector<1x47xf32> to vector<1x33xf32>
    %17 = vector.extract_strided_slice %2 {offsets = [0, 14], sizes = [1, 33], strides = [1, 1]} : vector<1x47xf32> to vector<1x33xf32>
    %18 = tpu.concatenate %3, %4, %5, %6, %7, %8, %9, %10, %11, %12, %13, %14, %15, %16, %17 in 0 : vector<1x33xf32>, vector<1x33xf32>, vector<1x33xf32>, vector<1x33xf32>, vector<1x33xf32>, vector<1x33xf32>, vector<1x33xf32>, vector<1x33xf32>, vector<1x33xf32>, vector<1x33xf32>, vector<1x33xf32>, vector<1x33xf32>, vector<1x33xf32>, vector<1x33xf32>, vector<1x33xf32> -> vector<15x33xf32>
    %c0_3 = arith.constant 0 : index
    %c0_4 = arith.constant 0 : index
    %19 = vector.load %arg3[%c0_3, %c0_4] : memref<16x15xbf16, #tpu.memory_space<vmem>>, vector<16x15xbf16>
    %20 = arith.truncf %18 : vector<15x33xf32> to vector<15x33xbf16>
    %cst = arith.constant dense<0.000000e+00> : vector<16x33xf32>
    %21 = tpu.matmul %19, %20, %cst {dimension_numbers = #tpu.dot_dimension_numbers<[1], [0], [0], [1], [0, 0, 1, 1], [], []>} : vector<16x15xbf16>, vector<15x33xbf16>, vector<16x33xf32> -> vector<16x33xf32>
    %c0_5 = arith.constant 0 : index
    %c0_6 = arith.constant 0 : index
    %22 = vector.load %arg4[%c0_5, %c0_6] : memref<16x1xf32, #tpu.memory_space<vmem>>, vector<16x1xf32>
    %23 = vector.broadcast %22 : vector<16x1xf32> to vector<16x33xf32>
    %24 = arith.addf %21, %23 : vector<16x33xf32>
    %cst_7 = arith.constant 0.000000e+00 : f32
    %25 = vector.broadcast %cst_7 : f32 to vector<16x33xf32>
    %26 = arith.cmpf oge, %24, %25 : vector<16x33xf32>
    %cst_8 = arith.constant 1.000000e-01 : f32
    %27 = vector.broadcast %cst_8 : f32 to vector<16x33xf32>
    %28 = arith.mulf %24, %27 : vector<16x33xf32>
    %29 = arith.select %26, %24, %28 : vector<16x33xi1>, vector<16x33xf32>
    %c0_9 = arith.constant 0 : index
    %c0_10 = arith.constant 0 : index
    %c0_11 = arith.constant 0 : index
    %30 = vector.load %arg5[%c0_9, %c0_10, %c0_11] : memref<1x16x33xf32, #tpu.memory_space<vmem>>, vector<1x16x33xf32>
    %31 = vector.shape_cast %30 : vector<1x16x33xf32> to vector<16x33xf32>
    %32 = vector.shape_cast %29 : vector<16x33xf32> to vector<1x16x33xf32>
    tpu.vector_store %arg5[%c0_9, %c0_10, %c0_11], %32 {strides = array<i32>} : memref<1x16x33xf32, #tpu.memory_space<vmem>>, vector<1x16x33xf32>,
    return
  }
  func.func @transform_0(%arg0: i32, %arg1: i32) -> (i32, i32, i32, i32) {
    %c0_i32 = arith.constant 0 : i32
    %c0_i32_0 = arith.constant 0 : i32
    %c0_i32_1 = arith.constant 0 : i32
    %c0_i32_2 = arith.constant 0 : i32
    return %arg1, %c0_i32, %c0_i32_0, %c0_i32_1 : i32, i32, i32, i32
  }
  func.func @transform_1(%arg0: i32, %arg1: i32) -> (i32, i32) {
    %c0_i32 = arith.constant 0 : i32
    %c0_i32_0 = arith.constant 0 : i32
    return %arg0, %c0_i32 : i32, i32
  }
  func.func @transform_2(%arg0: i32, %arg1: i32) -> (i32, i32) {
    %c0_i32 = arith.constant 0 : i32
    %c0_i32_0 = arith.constant 0 : i32
    return %arg0, %c0_i32 : i32, i32
  }
  func.func @transform_3(%arg0: i32, %arg1: i32) -> (i32, i32, i32) {
    %c0_i32 = arith.constant 0 : i32
    %c0_i32_0 = arith.constant 0 : i32
    return %arg1, %arg0, %c0_i32 : i32, i32, i32
  }
}

module attributes {stable_mosaic.version = 11 : i64} {
  func.func @_conv_im2col_kernel(%arg0: i32, %arg1: i32, %arg2: memref<1x2x16x37xbf16, #tpu.memory_space<vmem>>, %arg3: memref<16x656xbf16, #tpu.memory_space<vmem>>, %arg4: memref<16x1xf32, #tpu.memory_space<vmem>>, %arg5: memref<1x16x17xf32, #tpu.memory_space<vmem>>) attributes {dimension_semantics = [#tpu.dimension_semantics<parallel>, #tpu.dimension_semantics<parallel>], iteration_bounds = array<i64: 1, 2>, scalar_prefetch = 0 : i64, scratch_operands = 0 : i64, tpu.core_type = #tpu.core_type<tc>, window_params = [{transform_indices = @transform_0, window_bounds = array<i64: 1, 2, 16, 37>}, {transform_indices = @transform_1, window_bounds = array<i64: 16, 656>}, {transform_indices = @transform_2, window_bounds = array<i64: 16, 1>}, {transform_indices = @transform_3, window_bounds = array<i64: 1, 16, 17>}]} {
    %c0 = arith.constant 0 : index
    %c0_0 = arith.constant 0 : index
    %c0_1 = arith.constant 0 : index
    %c0_2 = arith.constant 0 : index
    %0 = vector.load %arg2[%c0, %c0_0, %c0_1, %c0_2] : memref<1x2x16x37xbf16, #tpu.memory_space<vmem>>, vector<1x1x16x37xbf16>
    %1 = vector.shape_cast %0 : vector<1x1x16x37xbf16> to vector<16x37xbf16>
    %2 = arith.extf %1 : vector<16x37xbf16> to vector<16x37xf32>
    %c0_3 = arith.constant 0 : index
    %c1 = arith.constant 1 : index
    %c0_4 = arith.constant 0 : index
    %c0_5 = arith.constant 0 : index
    %3 = vector.load %arg2[%c0_3, %c1, %c0_4, %c0_5] : memref<1x2x16x37xbf16, #tpu.memory_space<vmem>>, vector<1x1x16x37xbf16>
    %4 = vector.shape_cast %3 : vector<1x1x16x37xbf16> to vector<16x37xbf16>
    %5 = arith.extf %4 : vector<16x37xbf16> to vector<16x37xf32>
    %6 = vector.extract_strided_slice %2 {offsets = [0, 0], sizes = [16, 17], strides = [1, 1]} : vector<16x37xf32> to vector<16x17xf32>
    %7 = vector.extract_strided_slice %5 {offsets = [0, 0], sizes = [16, 17], strides = [1, 1]} : vector<16x37xf32> to vector<16x17xf32>
    %8 = vector.extract_strided_slice %2 {offsets = [0, 1], sizes = [16, 17], strides = [1, 1]} : vector<16x37xf32> to vector<16x17xf32>
    %9 = vector.extract_strided_slice %5 {offsets = [0, 1], sizes = [16, 17], strides = [1, 1]} : vector<16x37xf32> to vector<16x17xf32>
    %10 = vector.extract_strided_slice %2 {offsets = [0, 2], sizes = [16, 17], strides = [1, 1]} : vector<16x37xf32> to vector<16x17xf32>
    %11 = vector.extract_strided_slice %5 {offsets = [0, 2], sizes = [16, 17], strides = [1, 1]} : vector<16x37xf32> to vector<16x17xf32>
    %12 = vector.extract_strided_slice %2 {offsets = [0, 3], sizes = [16, 17], strides = [1, 1]} : vector<16x37xf32> to vector<16x17xf32>
    %13 = vector.extract_strided_slice %5 {offsets = [0, 3], sizes = [16, 17], strides = [1, 1]} : vector<16x37xf32> to vector<16x17xf32>
    %14 = vector.extract_strided_slice %2 {offsets = [0, 4], sizes = [16, 17], strides = [1, 1]} : vector<16x37xf32> to vector<16x17xf32>
    %15 = vector.extract_strided_slice %5 {offsets = [0, 4], sizes = [16, 17], strides = [1, 1]} : vector<16x37xf32> to vector<16x17xf32>
    %16 = vector.extract_strided_slice %2 {offsets = [0, 5], sizes = [16, 17], strides = [1, 1]} : vector<16x37xf32> to vector<16x17xf32>
    %17 = vector.extract_strided_slice %5 {offsets = [0, 5], sizes = [16, 17], strides = [1, 1]} : vector<16x37xf32> to vector<16x17xf32>
    %18 = vector.extract_strided_slice %2 {offsets = [0, 6], sizes = [16, 17], strides = [1, 1]} : vector<16x37xf32> to vector<16x17xf32>
    %19 = vector.extract_strided_slice %5 {offsets = [0, 6], sizes = [16, 17], strides = [1, 1]} : vector<16x37xf32> to vector<16x17xf32>
    %20 = vector.extract_strided_slice %2 {offsets = [0, 7], sizes = [16, 17], strides = [1, 1]} : vector<16x37xf32> to vector<16x17xf32>
    %21 = vector.extract_strided_slice %5 {offsets = [0, 7], sizes = [16, 17], strides = [1, 1]} : vector<16x37xf32> to vector<16x17xf32>
    %22 = vector.extract_strided_slice %2 {offsets = [0, 8], sizes = [16, 17], strides = [1, 1]} : vector<16x37xf32> to vector<16x17xf32>
    %23 = vector.extract_strided_slice %5 {offsets = [0, 8], sizes = [16, 17], strides = [1, 1]} : vector<16x37xf32> to vector<16x17xf32>
    %24 = vector.extract_strided_slice %2 {offsets = [0, 9], sizes = [16, 17], strides = [1, 1]} : vector<16x37xf32> to vector<16x17xf32>
    %25 = vector.extract_strided_slice %5 {offsets = [0, 9], sizes = [16, 17], strides = [1, 1]} : vector<16x37xf32> to vector<16x17xf32>
    %26 = vector.extract_strided_slice %2 {offsets = [0, 10], sizes = [16, 17], strides = [1, 1]} : vector<16x37xf32> to vector<16x17xf32>
    %27 = vector.extract_strided_slice %5 {offsets = [0, 10], sizes = [16, 17], strides = [1, 1]} : vector<16x37xf32> to vector<16x17xf32>
    %28 = vector.extract_strided_slice %2 {offsets = [0, 11], sizes = [16, 17], strides = [1, 1]} : vector<16x37xf32> to vector<16x17xf32>
    %29 = vector.extract_strided_slice %5 {offsets = [0, 11], sizes = [16, 17], strides = [1, 1]} : vector<16x37xf32> to vector<16x17xf32>
    %30 = vector.extract_strided_slice %2 {offsets = [0, 12], sizes = [16, 17], strides = [1, 1]} : vector<16x37xf32> to vector<16x17xf32>
    %31 = vector.extract_strided_slice %5 {offsets = [0, 12], sizes = [16, 17], strides = [1, 1]} : vector<16x37xf32> to vector<16x17xf32>
    %32 = vector.extract_strided_slice %2 {offsets = [0, 13], sizes = [16, 17], strides = [1, 1]} : vector<16x37xf32> to vector<16x17xf32>
    %33 = vector.extract_strided_slice %5 {offsets = [0, 13], sizes = [16, 17], strides = [1, 1]} : vector<16x37xf32> to vector<16x17xf32>
    %34 = vector.extract_strided_slice %2 {offsets = [0, 14], sizes = [16, 17], strides = [1, 1]} : vector<16x37xf32> to vector<16x17xf32>
    %35 = vector.extract_strided_slice %5 {offsets = [0, 14], sizes = [16, 17], strides = [1, 1]} : vector<16x37xf32> to vector<16x17xf32>
    %36 = vector.extract_strided_slice %2 {offsets = [0, 15], sizes = [16, 17], strides = [1, 1]} : vector<16x37xf32> to vector<16x17xf32>
    %37 = vector.extract_strided_slice %5 {offsets = [0, 15], sizes = [16, 17], strides = [1, 1]} : vector<16x37xf32> to vector<16x17xf32>
    %38 = vector.extract_strided_slice %2 {offsets = [0, 16], sizes = [16, 17], strides = [1, 1]} : vector<16x37xf32> to vector<16x17xf32>
    %39 = vector.extract_strided_slice %5 {offsets = [0, 16], sizes = [16, 17], strides = [1, 1]} : vector<16x37xf32> to vector<16x17xf32>
    %40 = vector.extract_strided_slice %2 {offsets = [0, 17], sizes = [16, 17], strides = [1, 1]} : vector<16x37xf32> to vector<16x17xf32>
    %41 = vector.extract_strided_slice %5 {offsets = [0, 17], sizes = [16, 17], strides = [1, 1]} : vector<16x37xf32> to vector<16x17xf32>
    %42 = vector.extract_strided_slice %2 {offsets = [0, 18], sizes = [16, 17], strides = [1, 1]} : vector<16x37xf32> to vector<16x17xf32>
    %43 = vector.extract_strided_slice %5 {offsets = [0, 18], sizes = [16, 17], strides = [1, 1]} : vector<16x37xf32> to vector<16x17xf32>
    %44 = vector.extract_strided_slice %2 {offsets = [0, 19], sizes = [16, 17], strides = [1, 1]} : vector<16x37xf32> to vector<16x17xf32>
    %45 = vector.extract_strided_slice %5 {offsets = [0, 19], sizes = [16, 17], strides = [1, 1]} : vector<16x37xf32> to vector<16x17xf32>
    %46 = vector.extract_strided_slice %2 {offsets = [0, 20], sizes = [16, 17], strides = [1, 1]} : vector<16x37xf32> to vector<16x17xf32>
    %47 = tpu.concatenate %6, %7, %8, %9, %10, %11, %12, %13, %14, %15, %16, %17, %18, %19, %20, %21 in 0 : vector<16x17xf32>, vector<16x17xf32>, vector<16x17xf32>, vector<16x17xf32>, vector<16x17xf32>, vector<16x17xf32>, vector<16x17xf32>, vector<16x17xf32>, vector<16x17xf32>, vector<16x17xf32>, vector<16x17xf32>, vector<16x17xf32>, vector<16x17xf32>, vector<16x17xf32>, vector<16x17xf32>, vector<16x17xf32> -> vector<256x17xf32>
    %48 = tpu.concatenate %22, %23, %24, %25, %26, %27, %28, %29, %30, %31, %32, %33, %34, %35, %36, %37 in 0 : vector<16x17xf32>, vector<16x17xf32>, vector<16x17xf32>, vector<16x17xf32>, vector<16x17xf32>, vector<16x17xf32>, vector<16x17xf32>, vector<16x17xf32>, vector<16x17xf32>, vector<16x17xf32>, vector<16x17xf32>, vector<16x17xf32>, vector<16x17xf32>, vector<16x17xf32>, vector<16x17xf32>, vector<16x17xf32> -> vector<256x17xf32>
    %49 = tpu.concatenate %38, %39, %40, %41, %42, %43, %44, %45, %46 in 0 : vector<16x17xf32>, vector<16x17xf32>, vector<16x17xf32>, vector<16x17xf32>, vector<16x17xf32>, vector<16x17xf32>, vector<16x17xf32>, vector<16x17xf32>, vector<16x17xf32> -> vector<144x17xf32>
    %50 = tpu.concatenate %47, %48, %49 in 0 : vector<256x17xf32>, vector<256x17xf32>, vector<144x17xf32> -> vector<656x17xf32>
    %c0_6 = arith.constant 0 : index
    %c0_7 = arith.constant 0 : index
    %51 = vector.load %arg3[%c0_6, %c0_7] : memref<16x656xbf16, #tpu.memory_space<vmem>>, vector<16x656xbf16>
    %52 = arith.truncf %50 : vector<656x17xf32> to vector<656x17xbf16>
    %cst = arith.constant dense<0.000000e+00> : vector<16x17xf32>
    %53 = tpu.matmul %51, %52, %cst {dimension_numbers = #tpu.dot_dimension_numbers<[1], [0], [0], [1], [0, 0, 1, 1], [], []>} : vector<16x656xbf16>, vector<656x17xbf16>, vector<16x17xf32> -> vector<16x17xf32>
    %c0_8 = arith.constant 0 : index
    %c0_9 = arith.constant 0 : index
    %54 = vector.load %arg4[%c0_8, %c0_9] : memref<16x1xf32, #tpu.memory_space<vmem>>, vector<16x1xf32>
    %55 = vector.broadcast %54 : vector<16x1xf32> to vector<16x17xf32>
    %56 = arith.addf %53, %55 : vector<16x17xf32>
    %cst_10 = arith.constant 0.000000e+00 : f32
    %57 = vector.broadcast %cst_10 : f32 to vector<16x17xf32>
    %58 = arith.cmpf oge, %56, %57 : vector<16x17xf32>
    %cst_11 = arith.constant 1.000000e-01 : f32
    %59 = vector.broadcast %cst_11 : f32 to vector<16x17xf32>
    %60 = arith.mulf %56, %59 : vector<16x17xf32>
    %61 = arith.select %58, %56, %60 : vector<16x17xi1>, vector<16x17xf32>
    %c0_12 = arith.constant 0 : index
    %c0_13 = arith.constant 0 : index
    %c0_14 = arith.constant 0 : index
    %62 = vector.load %arg5[%c0_12, %c0_13, %c0_14] : memref<1x16x17xf32, #tpu.memory_space<vmem>>, vector<1x16x17xf32>
    %63 = vector.shape_cast %62 : vector<1x16x17xf32> to vector<16x17xf32>
    %64 = vector.shape_cast %61 : vector<16x17xf32> to vector<1x16x17xf32>
    tpu.vector_store %arg5[%c0_12, %c0_13, %c0_14], %64 {strides = array<i32>} : memref<1x16x17xf32, #tpu.memory_space<vmem>>, vector<1x16x17xf32>,
    return
  }
  func.func @transform_0(%arg0: i32, %arg1: i32) -> (i32, i32, i32, i32) {
    %c0_i32 = arith.constant 0 : i32
    %c0_i32_0 = arith.constant 0 : i32
    %c0_i32_1 = arith.constant 0 : i32
    %c0_i32_2 = arith.constant 0 : i32
    return %arg1, %c0_i32, %c0_i32_0, %c0_i32_1 : i32, i32, i32, i32
  }
  func.func @transform_1(%arg0: i32, %arg1: i32) -> (i32, i32) {
    %c0_i32 = arith.constant 0 : i32
    %c0_i32_0 = arith.constant 0 : i32
    return %arg0, %c0_i32 : i32, i32
  }
  func.func @transform_2(%arg0: i32, %arg1: i32) -> (i32, i32) {
    %c0_i32 = arith.constant 0 : i32
    %c0_i32_0 = arith.constant 0 : i32
    return %arg0, %c0_i32 : i32, i32
  }
  func.func @transform_3(%arg0: i32, %arg1: i32) -> (i32, i32, i32) {
    %c0_i32 = arith.constant 0 : i32
    %c0_i32_0 = arith.constant 0 : i32
    return %arg1, %arg0, %c0_i32 : i32, i32, i32
  }
}

module attributes {stable_mosaic.version = 11 : i64} {
  func.func @_conv_im2col_kernel(%arg0: i32, %arg1: i32, %arg2: memref<1x2x1x34xbf16, #tpu.memory_space<vmem>>, %arg3: memref<1x4xbf16, #tpu.memory_space<vmem>>, %arg4: memref<1x1xf32, #tpu.memory_space<vmem>>, %arg5: memref<1x1x33xf32, #tpu.memory_space<vmem>>) attributes {dimension_semantics = [#tpu.dimension_semantics<parallel>, #tpu.dimension_semantics<parallel>], iteration_bounds = array<i64: 1, 2>, scalar_prefetch = 0 : i64, scratch_operands = 0 : i64, tpu.core_type = #tpu.core_type<tc>, window_params = [{transform_indices = @transform_0, window_bounds = array<i64: 1, 2, 1, 34>}, {transform_indices = @transform_1, window_bounds = array<i64: 1, 4>}, {transform_indices = @transform_2, window_bounds = array<i64: 1, 1>}, {transform_indices = @transform_3, window_bounds = array<i64: 1, 1, 33>}]} {
    %c0 = arith.constant 0 : index
    %c0_0 = arith.constant 0 : index
    %c0_1 = arith.constant 0 : index
    %c0_2 = arith.constant 0 : index
    %0 = vector.load %arg2[%c0, %c0_0, %c0_1, %c0_2] : memref<1x2x1x34xbf16, #tpu.memory_space<vmem>>, vector<1x1x1x34xbf16>
    %1 = vector.shape_cast %0 : vector<1x1x1x34xbf16> to vector<1x34xbf16>
    %2 = arith.extf %1 : vector<1x34xbf16> to vector<1x34xf32>
    %c0_3 = arith.constant 0 : index
    %c1 = arith.constant 1 : index
    %c0_4 = arith.constant 0 : index
    %c0_5 = arith.constant 0 : index
    %3 = vector.load %arg2[%c0_3, %c1, %c0_4, %c0_5] : memref<1x2x1x34xbf16, #tpu.memory_space<vmem>>, vector<1x1x1x34xbf16>
    %4 = vector.shape_cast %3 : vector<1x1x1x34xbf16> to vector<1x34xbf16>
    %5 = arith.extf %4 : vector<1x34xbf16> to vector<1x34xf32>
    %6 = vector.extract_strided_slice %2 {offsets = [0, 0], sizes = [1, 33], strides = [1, 1]} : vector<1x34xf32> to vector<1x33xf32>
    %7 = vector.extract_strided_slice %5 {offsets = [0, 0], sizes = [1, 33], strides = [1, 1]} : vector<1x34xf32> to vector<1x33xf32>
    %8 = vector.extract_strided_slice %2 {offsets = [0, 1], sizes = [1, 33], strides = [1, 1]} : vector<1x34xf32> to vector<1x33xf32>
    %9 = vector.extract_strided_slice %5 {offsets = [0, 1], sizes = [1, 33], strides = [1, 1]} : vector<1x34xf32> to vector<1x33xf32>
    %10 = tpu.concatenate %6, %7, %8, %9 in 0 : vector<1x33xf32>, vector<1x33xf32>, vector<1x33xf32>, vector<1x33xf32> -> vector<4x33xf32>
    %c0_6 = arith.constant 0 : index
    %c0_7 = arith.constant 0 : index
    %11 = vector.load %arg3[%c0_6, %c0_7] : memref<1x4xbf16, #tpu.memory_space<vmem>>, vector<1x4xbf16>
    %12 = arith.truncf %10 : vector<4x33xf32> to vector<4x33xbf16>
    %cst = arith.constant dense<0.000000e+00> : vector<1x33xf32>
    %13 = tpu.matmul %11, %12, %cst {dimension_numbers = #tpu.dot_dimension_numbers<[1], [0], [0], [1], [0, 0, 1, 1], [], []>} : vector<1x4xbf16>, vector<4x33xbf16>, vector<1x33xf32> -> vector<1x33xf32>
    %c0_8 = arith.constant 0 : index
    %c0_9 = arith.constant 0 : index
    %14 = vector.load %arg4[%c0_8, %c0_9] : memref<1x1xf32, #tpu.memory_space<vmem>>, vector<1x1xf32>
    %15 = vector.broadcast %14 : vector<1x1xf32> to vector<1x33xf32>
    %16 = arith.addf %13, %15 : vector<1x33xf32>
    %cst_10 = arith.constant 0.000000e+00 : f32
    %17 = vector.broadcast %cst_10 : f32 to vector<1x33xf32>
    %18 = arith.cmpf oge, %16, %17 : vector<1x33xf32>
    %cst_11 = arith.constant 1.000000e+00 : f32
    %19 = vector.broadcast %cst_11 : f32 to vector<1x33xf32>
    %20 = arith.mulf %16, %19 : vector<1x33xf32>
    %21 = arith.select %18, %16, %20 : vector<1x33xi1>, vector<1x33xf32>
    %c0_12 = arith.constant 0 : index
    %c0_13 = arith.constant 0 : index
    %c0_14 = arith.constant 0 : index
    %22 = vector.load %arg5[%c0_12, %c0_13, %c0_14] : memref<1x1x33xf32, #tpu.memory_space<vmem>>, vector<1x1x33xf32>
    %23 = vector.shape_cast %22 : vector<1x1x33xf32> to vector<1x33xf32>
    %24 = vector.shape_cast %21 : vector<1x33xf32> to vector<1x1x33xf32>
    tpu.vector_store %arg5[%c0_12, %c0_13, %c0_14], %24 {strides = array<i32>} : memref<1x1x33xf32, #tpu.memory_space<vmem>>, vector<1x1x33xf32>,
    return
  }
  func.func @transform_0(%arg0: i32, %arg1: i32) -> (i32, i32, i32, i32) {
    %c0_i32 = arith.constant 0 : i32
    %c0_i32_0 = arith.constant 0 : i32
    %c0_i32_1 = arith.constant 0 : i32
    %c0_i32_2 = arith.constant 0 : i32
    return %arg1, %c0_i32, %c0_i32_0, %c0_i32_1 : i32, i32, i32, i32
  }
  func.func @transform_1(%arg0: i32, %arg1: i32) -> (i32, i32) {
    %c0_i32 = arith.constant 0 : i32
    %c0_i32_0 = arith.constant 0 : i32
    return %arg0, %c0_i32 : i32, i32
  }
  func.func @transform_2(%arg0: i32, %arg1: i32) -> (i32, i32) {
    %c0_i32 = arith.constant 0 : i32
    %c0_i32_0 = arith.constant 0 : i32
    return %arg0, %c0_i32 : i32, i32
  }
  func.func @transform_3(%arg0: i32, %arg1: i32) -> (i32, i32, i32) {
    %c0_i32 = arith.constant 0 : i32
    %c0_i32_0 = arith.constant 0 : i32
    return %arg1, %arg0, %c0_i32 : i32, i32, i32
  }
}

module attributes {stable_mosaic.version = 11 : i64} {
  func.func @_conv_im2col_kernel(%arg0: i32, %arg1: i32, %arg2: memref<1x2x16x29xbf16, #tpu.memory_space<vmem>>, %arg3: memref<32x656xbf16, #tpu.memory_space<vmem>>, %arg4: memref<32x1xf32, #tpu.memory_space<vmem>>, %arg5: memref<1x32x9xf32, #tpu.memory_space<vmem>>) attributes {dimension_semantics = [#tpu.dimension_semantics<parallel>, #tpu.dimension_semantics<parallel>], iteration_bounds = array<i64: 1, 2>, scalar_prefetch = 0 : i64, scratch_operands = 0 : i64, tpu.core_type = #tpu.core_type<tc>, window_params = [{transform_indices = @transform_0, window_bounds = array<i64: 1, 2, 16, 29>}, {transform_indices = @transform_1, window_bounds = array<i64: 32, 656>}, {transform_indices = @transform_2, window_bounds = array<i64: 32, 1>}, {transform_indices = @transform_3, window_bounds = array<i64: 1, 32, 9>}]} {
    %c0 = arith.constant 0 : index
    %c0_0 = arith.constant 0 : index
    %c0_1 = arith.constant 0 : index
    %c0_2 = arith.constant 0 : index
    %0 = vector.load %arg2[%c0, %c0_0, %c0_1, %c0_2] : memref<1x2x16x29xbf16, #tpu.memory_space<vmem>>, vector<1x1x16x29xbf16>
    %1 = vector.shape_cast %0 : vector<1x1x16x29xbf16> to vector<16x29xbf16>
    %2 = arith.extf %1 : vector<16x29xbf16> to vector<16x29xf32>
    %c0_3 = arith.constant 0 : index
    %c1 = arith.constant 1 : index
    %c0_4 = arith.constant 0 : index
    %c0_5 = arith.constant 0 : index
    %3 = vector.load %arg2[%c0_3, %c1, %c0_4, %c0_5] : memref<1x2x16x29xbf16, #tpu.memory_space<vmem>>, vector<1x1x16x29xbf16>
    %4 = vector.shape_cast %3 : vector<1x1x16x29xbf16> to vector<16x29xbf16>
    %5 = arith.extf %4 : vector<16x29xbf16> to vector<16x29xf32>
    %6 = vector.extract_strided_slice %2 {offsets = [0, 0], sizes = [16, 9], strides = [1, 1]} : vector<16x29xf32> to vector<16x9xf32>
    %7 = vector.extract_strided_slice %5 {offsets = [0, 0], sizes = [16, 9], strides = [1, 1]} : vector<16x29xf32> to vector<16x9xf32>
    %8 = vector.extract_strided_slice %2 {offsets = [0, 1], sizes = [16, 9], strides = [1, 1]} : vector<16x29xf32> to vector<16x9xf32>
    %9 = vector.extract_strided_slice %5 {offsets = [0, 1], sizes = [16, 9], strides = [1, 1]} : vector<16x29xf32> to vector<16x9xf32>
    %10 = vector.extract_strided_slice %2 {offsets = [0, 2], sizes = [16, 9], strides = [1, 1]} : vector<16x29xf32> to vector<16x9xf32>
    %11 = vector.extract_strided_slice %5 {offsets = [0, 2], sizes = [16, 9], strides = [1, 1]} : vector<16x29xf32> to vector<16x9xf32>
    %12 = vector.extract_strided_slice %2 {offsets = [0, 3], sizes = [16, 9], strides = [1, 1]} : vector<16x29xf32> to vector<16x9xf32>
    %13 = vector.extract_strided_slice %5 {offsets = [0, 3], sizes = [16, 9], strides = [1, 1]} : vector<16x29xf32> to vector<16x9xf32>
    %14 = vector.extract_strided_slice %2 {offsets = [0, 4], sizes = [16, 9], strides = [1, 1]} : vector<16x29xf32> to vector<16x9xf32>
    %15 = vector.extract_strided_slice %5 {offsets = [0, 4], sizes = [16, 9], strides = [1, 1]} : vector<16x29xf32> to vector<16x9xf32>
    %16 = vector.extract_strided_slice %2 {offsets = [0, 5], sizes = [16, 9], strides = [1, 1]} : vector<16x29xf32> to vector<16x9xf32>
    %17 = vector.extract_strided_slice %5 {offsets = [0, 5], sizes = [16, 9], strides = [1, 1]} : vector<16x29xf32> to vector<16x9xf32>
    %18 = vector.extract_strided_slice %2 {offsets = [0, 6], sizes = [16, 9], strides = [1, 1]} : vector<16x29xf32> to vector<16x9xf32>
    %19 = vector.extract_strided_slice %5 {offsets = [0, 6], sizes = [16, 9], strides = [1, 1]} : vector<16x29xf32> to vector<16x9xf32>
    %20 = vector.extract_strided_slice %2 {offsets = [0, 7], sizes = [16, 9], strides = [1, 1]} : vector<16x29xf32> to vector<16x9xf32>
    %21 = vector.extract_strided_slice %5 {offsets = [0, 7], sizes = [16, 9], strides = [1, 1]} : vector<16x29xf32> to vector<16x9xf32>
    %22 = vector.extract_strided_slice %2 {offsets = [0, 8], sizes = [16, 9], strides = [1, 1]} : vector<16x29xf32> to vector<16x9xf32>
    %23 = vector.extract_strided_slice %5 {offsets = [0, 8], sizes = [16, 9], strides = [1, 1]} : vector<16x29xf32> to vector<16x9xf32>
    %24 = vector.extract_strided_slice %2 {offsets = [0, 9], sizes = [16, 9], strides = [1, 1]} : vector<16x29xf32> to vector<16x9xf32>
    %25 = vector.extract_strided_slice %5 {offsets = [0, 9], sizes = [16, 9], strides = [1, 1]} : vector<16x29xf32> to vector<16x9xf32>
    %26 = vector.extract_strided_slice %2 {offsets = [0, 10], sizes = [16, 9], strides = [1, 1]} : vector<16x29xf32> to vector<16x9xf32>
    %27 = vector.extract_strided_slice %5 {offsets = [0, 10], sizes = [16, 9], strides = [1, 1]} : vector<16x29xf32> to vector<16x9xf32>
    %28 = vector.extract_strided_slice %2 {offsets = [0, 11], sizes = [16, 9], strides = [1, 1]} : vector<16x29xf32> to vector<16x9xf32>
    %29 = vector.extract_strided_slice %5 {offsets = [0, 11], sizes = [16, 9], strides = [1, 1]} : vector<16x29xf32> to vector<16x9xf32>
    %30 = vector.extract_strided_slice %2 {offsets = [0, 12], sizes = [16, 9], strides = [1, 1]} : vector<16x29xf32> to vector<16x9xf32>
    %31 = vector.extract_strided_slice %5 {offsets = [0, 12], sizes = [16, 9], strides = [1, 1]} : vector<16x29xf32> to vector<16x9xf32>
    %32 = vector.extract_strided_slice %2 {offsets = [0, 13], sizes = [16, 9], strides = [1, 1]} : vector<16x29xf32> to vector<16x9xf32>
    %33 = vector.extract_strided_slice %5 {offsets = [0, 13], sizes = [16, 9], strides = [1, 1]} : vector<16x29xf32> to vector<16x9xf32>
    %34 = vector.extract_strided_slice %2 {offsets = [0, 14], sizes = [16, 9], strides = [1, 1]} : vector<16x29xf32> to vector<16x9xf32>
    %35 = vector.extract_strided_slice %5 {offsets = [0, 14], sizes = [16, 9], strides = [1, 1]} : vector<16x29xf32> to vector<16x9xf32>
    %36 = vector.extract_strided_slice %2 {offsets = [0, 15], sizes = [16, 9], strides = [1, 1]} : vector<16x29xf32> to vector<16x9xf32>
    %37 = vector.extract_strided_slice %5 {offsets = [0, 15], sizes = [16, 9], strides = [1, 1]} : vector<16x29xf32> to vector<16x9xf32>
    %38 = vector.extract_strided_slice %2 {offsets = [0, 16], sizes = [16, 9], strides = [1, 1]} : vector<16x29xf32> to vector<16x9xf32>
    %39 = vector.extract_strided_slice %5 {offsets = [0, 16], sizes = [16, 9], strides = [1, 1]} : vector<16x29xf32> to vector<16x9xf32>
    %40 = vector.extract_strided_slice %2 {offsets = [0, 17], sizes = [16, 9], strides = [1, 1]} : vector<16x29xf32> to vector<16x9xf32>
    %41 = vector.extract_strided_slice %5 {offsets = [0, 17], sizes = [16, 9], strides = [1, 1]} : vector<16x29xf32> to vector<16x9xf32>
    %42 = vector.extract_strided_slice %2 {offsets = [0, 18], sizes = [16, 9], strides = [1, 1]} : vector<16x29xf32> to vector<16x9xf32>
    %43 = vector.extract_strided_slice %5 {offsets = [0, 18], sizes = [16, 9], strides = [1, 1]} : vector<16x29xf32> to vector<16x9xf32>
    %44 = vector.extract_strided_slice %2 {offsets = [0, 19], sizes = [16, 9], strides = [1, 1]} : vector<16x29xf32> to vector<16x9xf32>
    %45 = vector.extract_strided_slice %5 {offsets = [0, 19], sizes = [16, 9], strides = [1, 1]} : vector<16x29xf32> to vector<16x9xf32>
    %46 = vector.extract_strided_slice %2 {offsets = [0, 20], sizes = [16, 9], strides = [1, 1]} : vector<16x29xf32> to vector<16x9xf32>
    %47 = tpu.concatenate %6, %7, %8, %9, %10, %11, %12, %13, %14, %15, %16, %17, %18, %19, %20, %21 in 0 : vector<16x9xf32>, vector<16x9xf32>, vector<16x9xf32>, vector<16x9xf32>, vector<16x9xf32>, vector<16x9xf32>, vector<16x9xf32>, vector<16x9xf32>, vector<16x9xf32>, vector<16x9xf32>, vector<16x9xf32>, vector<16x9xf32>, vector<16x9xf32>, vector<16x9xf32>, vector<16x9xf32>, vector<16x9xf32> -> vector<256x9xf32>
    %48 = tpu.concatenate %22, %23, %24, %25, %26, %27, %28, %29, %30, %31, %32, %33, %34, %35, %36, %37 in 0 : vector<16x9xf32>, vector<16x9xf32>, vector<16x9xf32>, vector<16x9xf32>, vector<16x9xf32>, vector<16x9xf32>, vector<16x9xf32>, vector<16x9xf32>, vector<16x9xf32>, vector<16x9xf32>, vector<16x9xf32>, vector<16x9xf32>, vector<16x9xf32>, vector<16x9xf32>, vector<16x9xf32>, vector<16x9xf32> -> vector<256x9xf32>
    %49 = tpu.concatenate %38, %39, %40, %41, %42, %43, %44, %45, %46 in 0 : vector<16x9xf32>, vector<16x9xf32>, vector<16x9xf32>, vector<16x9xf32>, vector<16x9xf32>, vector<16x9xf32>, vector<16x9xf32>, vector<16x9xf32>, vector<16x9xf32> -> vector<144x9xf32>
    %50 = tpu.concatenate %47, %48, %49 in 0 : vector<256x9xf32>, vector<256x9xf32>, vector<144x9xf32> -> vector<656x9xf32>
    %c0_6 = arith.constant 0 : index
    %c0_7 = arith.constant 0 : index
    %51 = vector.load %arg3[%c0_6, %c0_7] : memref<32x656xbf16, #tpu.memory_space<vmem>>, vector<32x656xbf16>
    %52 = arith.truncf %50 : vector<656x9xf32> to vector<656x9xbf16>
    %cst = arith.constant dense<0.000000e+00> : vector<32x9xf32>
    %53 = tpu.matmul %51, %52, %cst {dimension_numbers = #tpu.dot_dimension_numbers<[1], [0], [0], [1], [0, 0, 1, 1], [], []>} : vector<32x656xbf16>, vector<656x9xbf16>, vector<32x9xf32> -> vector<32x9xf32>
    %c0_8 = arith.constant 0 : index
    %c0_9 = arith.constant 0 : index
    %54 = vector.load %arg4[%c0_8, %c0_9] : memref<32x1xf32, #tpu.memory_space<vmem>>, vector<32x1xf32>
    %55 = vector.broadcast %54 : vector<32x1xf32> to vector<32x9xf32>
    %56 = arith.addf %53, %55 : vector<32x9xf32>
    %cst_10 = arith.constant 0.000000e+00 : f32
    %57 = vector.broadcast %cst_10 : f32 to vector<32x9xf32>
    %58 = arith.cmpf oge, %56, %57 : vector<32x9xf32>
    %cst_11 = arith.constant 1.000000e-01 : f32
    %59 = vector.broadcast %cst_11 : f32 to vector<32x9xf32>
    %60 = arith.mulf %56, %59 : vector<32x9xf32>
    %61 = arith.select %58, %56, %60 : vector<32x9xi1>, vector<32x9xf32>
    %c0_12 = arith.constant 0 : index
    %c0_13 = arith.constant 0 : index
    %c0_14 = arith.constant 0 : index
    %62 = vector.load %arg5[%c0_12, %c0_13, %c0_14] : memref<1x32x9xf32, #tpu.memory_space<vmem>>, vector<1x32x9xf32>
    %63 = vector.shape_cast %62 : vector<1x32x9xf32> to vector<32x9xf32>
    %64 = vector.shape_cast %61 : vector<32x9xf32> to vector<1x32x9xf32>
    tpu.vector_store %arg5[%c0_12, %c0_13, %c0_14], %64 {strides = array<i32>} : memref<1x32x9xf32, #tpu.memory_space<vmem>>, vector<1x32x9xf32>,
    return
  }
  func.func @transform_0(%arg0: i32, %arg1: i32) -> (i32, i32, i32, i32) {
    %c0_i32 = arith.constant 0 : i32
    %c0_i32_0 = arith.constant 0 : i32
    %c0_i32_1 = arith.constant 0 : i32
    %c0_i32_2 = arith.constant 0 : i32
    return %arg1, %c0_i32, %c0_i32_0, %c0_i32_1 : i32, i32, i32, i32
  }
  func.func @transform_1(%arg0: i32, %arg1: i32) -> (i32, i32) {
    %c0_i32 = arith.constant 0 : i32
    %c0_i32_0 = arith.constant 0 : i32
    return %arg0, %c0_i32 : i32, i32
  }
  func.func @transform_2(%arg0: i32, %arg1: i32) -> (i32, i32) {
    %c0_i32 = arith.constant 0 : i32
    %c0_i32_0 = arith.constant 0 : i32
    return %arg0, %c0_i32 : i32, i32
  }
  func.func @transform_3(%arg0: i32, %arg1: i32) -> (i32, i32, i32) {
    %c0_i32 = arith.constant 0 : i32
    %c0_i32_0 = arith.constant 0 : i32
    return %arg1, %arg0, %c0_i32 : i32, i32, i32
  }
}

module attributes {stable_mosaic.version = 11 : i64} {
  func.func @_conv_im2col_kernel(%arg0: i32, %arg1: i32, %arg2: memref<1x3x1x23xbf16, #tpu.memory_space<vmem>>, %arg3: memref<8x5xbf16, #tpu.memory_space<vmem>>, %arg4: memref<8x1xf32, #tpu.memory_space<vmem>>, %arg5: memref<1x8x22xf32, #tpu.memory_space<vmem>>) attributes {dimension_semantics = [#tpu.dimension_semantics<parallel>, #tpu.dimension_semantics<parallel>], iteration_bounds = array<i64: 1, 4>, scalar_prefetch = 0 : i64, scratch_operands = 0 : i64, tpu.core_type = #tpu.core_type<tc>, window_params = [{transform_indices = @transform_0, window_bounds = array<i64: 1, 3, 1, 23>}, {transform_indices = @transform_1, window_bounds = array<i64: 8, 5>}, {transform_indices = @transform_2, window_bounds = array<i64: 8, 1>}, {transform_indices = @transform_3, window_bounds = array<i64: 1, 8, 22>}]} {
    %c0 = arith.constant 0 : index
    %c0_0 = arith.constant 0 : index
    %c0_1 = arith.constant 0 : index
    %c0_2 = arith.constant 0 : index
    %0 = vector.load %arg2[%c0, %c0_0, %c0_1, %c0_2] : memref<1x3x1x23xbf16, #tpu.memory_space<vmem>>, vector<1x1x1x23xbf16>
    %1 = vector.shape_cast %0 : vector<1x1x1x23xbf16> to vector<1x23xbf16>
    %2 = arith.extf %1 : vector<1x23xbf16> to vector<1x23xf32>
    %c0_3 = arith.constant 0 : index
    %c1 = arith.constant 1 : index
    %c0_4 = arith.constant 0 : index
    %c0_5 = arith.constant 0 : index
    %3 = vector.load %arg2[%c0_3, %c1, %c0_4, %c0_5] : memref<1x3x1x23xbf16, #tpu.memory_space<vmem>>, vector<1x1x1x23xbf16>
    %4 = vector.shape_cast %3 : vector<1x1x1x23xbf16> to vector<1x23xbf16>
    %5 = arith.extf %4 : vector<1x23xbf16> to vector<1x23xf32>
    %c0_6 = arith.constant 0 : index
    %c2 = arith.constant 2 : index
    %c0_7 = arith.constant 0 : index
    %c0_8 = arith.constant 0 : index
    %6 = vector.load %arg2[%c0_6, %c2, %c0_7, %c0_8] : memref<1x3x1x23xbf16, #tpu.memory_space<vmem>>, vector<1x1x1x23xbf16>
    %7 = vector.shape_cast %6 : vector<1x1x1x23xbf16> to vector<1x23xbf16>
    %8 = arith.extf %7 : vector<1x23xbf16> to vector<1x23xf32>
    %9 = vector.extract_strided_slice %2 {offsets = [0, 0], sizes = [1, 22], strides = [1, 1]} : vector<1x23xf32> to vector<1x22xf32>
    %10 = vector.extract_strided_slice %5 {offsets = [0, 0], sizes = [1, 22], strides = [1, 1]} : vector<1x23xf32> to vector<1x22xf32>
    %11 = vector.extract_strided_slice %8 {offsets = [0, 0], sizes = [1, 22], strides = [1, 1]} : vector<1x23xf32> to vector<1x22xf32>
    %12 = vector.extract_strided_slice %2 {offsets = [0, 1], sizes = [1, 22], strides = [1, 1]} : vector<1x23xf32> to vector<1x22xf32>
    %13 = vector.extract_strided_slice %5 {offsets = [0, 1], sizes = [1, 22], strides = [1, 1]} : vector<1x23xf32> to vector<1x22xf32>
    %14 = tpu.concatenate %9, %10, %11, %12, %13 in 0 : vector<1x22xf32>, vector<1x22xf32>, vector<1x22xf32>, vector<1x22xf32>, vector<1x22xf32> -> vector<5x22xf32>
    %c0_9 = arith.constant 0 : index
    %c0_10 = arith.constant 0 : index
    %15 = vector.load %arg3[%c0_9, %c0_10] : memref<8x5xbf16, #tpu.memory_space<vmem>>, vector<8x5xbf16>
    %16 = arith.truncf %14 : vector<5x22xf32> to vector<5x22xbf16>
    %cst = arith.constant dense<0.000000e+00> : vector<8x22xf32>
    %17 = tpu.matmul %15, %16, %cst {dimension_numbers = #tpu.dot_dimension_numbers<[1], [0], [0], [1], [0, 0, 1, 1], [], []>} : vector<8x5xbf16>, vector<5x22xbf16>, vector<8x22xf32> -> vector<8x22xf32>
    %c0_11 = arith.constant 0 : index
    %c0_12 = arith.constant 0 : index
    %18 = vector.load %arg4[%c0_11, %c0_12] : memref<8x1xf32, #tpu.memory_space<vmem>>, vector<8x1xf32>
    %19 = vector.broadcast %18 : vector<8x1xf32> to vector<8x22xf32>
    %20 = arith.addf %17, %19 : vector<8x22xf32>
    %cst_13 = arith.constant 0.000000e+00 : f32
    %21 = vector.broadcast %cst_13 : f32 to vector<8x22xf32>
    %22 = arith.cmpf oge, %20, %21 : vector<8x22xf32>
    %cst_14 = arith.constant 1.000000e-01 : f32
    %23 = vector.broadcast %cst_14 : f32 to vector<8x22xf32>
    %24 = arith.mulf %20, %23 : vector<8x22xf32>
    %25 = arith.select %22, %20, %24 : vector<8x22xi1>, vector<8x22xf32>
    %c0_15 = arith.constant 0 : index
    %c0_16 = arith.constant 0 : index
    %c0_17 = arith.constant 0 : index
    %26 = vector.load %arg5[%c0_15, %c0_16, %c0_17] : memref<1x8x22xf32, #tpu.memory_space<vmem>>, vector<1x8x22xf32>
    %27 = vector.shape_cast %26 : vector<1x8x22xf32> to vector<8x22xf32>
    %28 = vector.shape_cast %25 : vector<8x22xf32> to vector<1x8x22xf32>
    tpu.vector_store %arg5[%c0_15, %c0_16, %c0_17], %28 {strides = array<i32>} : memref<1x8x22xf32, #tpu.memory_space<vmem>>, vector<1x8x22xf32>,
    return
  }
  func.func @transform_0(%arg0: i32, %arg1: i32) -> (i32, i32, i32, i32) {
    %c0_i32 = arith.constant 0 : i32
    %c0_i32_0 = arith.constant 0 : i32
    %c0_i32_1 = arith.constant 0 : i32
    %c0_i32_2 = arith.constant 0 : i32
    return %arg1, %c0_i32, %c0_i32_0, %c0_i32_1 : i32, i32, i32, i32
  }
  func.func @transform_1(%arg0: i32, %arg1: i32) -> (i32, i32) {
    %c0_i32 = arith.constant 0 : i32
    %c0_i32_0 = arith.constant 0 : i32
    return %arg0, %c0_i32 : i32, i32
  }
  func.func @transform_2(%arg0: i32, %arg1: i32) -> (i32, i32) {
    %c0_i32 = arith.constant 0 : i32
    %c0_i32_0 = arith.constant 0 : i32
    return %arg0, %c0_i32 : i32, i32
  }
  func.func @transform_3(%arg0: i32, %arg1: i32) -> (i32, i32, i32) {
    %c0_i32 = arith.constant 0 : i32
    %c0_i32_0 = arith.constant 0 : i32
    return %arg1, %arg0, %c0_i32 : i32, i32, i32
  }
}

module attributes {stable_mosaic.version = 11 : i64} {
  func.func @_conv_im2col_kernel(%arg0: i32, %arg1: i32, %arg2: memref<1x3x8x9xbf16, #tpu.memory_space<vmem>>, %arg3: memref<32x40xbf16, #tpu.memory_space<vmem>>, %arg4: memref<32x1xf32, #tpu.memory_space<vmem>>, %arg5: memref<1x32x8xf32, #tpu.memory_space<vmem>>) attributes {dimension_semantics = [#tpu.dimension_semantics<parallel>, #tpu.dimension_semantics<parallel>], iteration_bounds = array<i64: 1, 4>, scalar_prefetch = 0 : i64, scratch_operands = 0 : i64, tpu.core_type = #tpu.core_type<tc>, window_params = [{transform_indices = @transform_0, window_bounds = array<i64: 1, 3, 8, 9>}, {transform_indices = @transform_1, window_bounds = array<i64: 32, 40>}, {transform_indices = @transform_2, window_bounds = array<i64: 32, 1>}, {transform_indices = @transform_3, window_bounds = array<i64: 1, 32, 8>}]} {
    %c0 = arith.constant 0 : index
    %c0_0 = arith.constant 0 : index
    %c0_1 = arith.constant 0 : index
    %c0_2 = arith.constant 0 : index
    %0 = vector.load %arg2[%c0, %c0_0, %c0_1, %c0_2] : memref<1x3x8x9xbf16, #tpu.memory_space<vmem>>, vector<1x1x8x9xbf16>
    %1 = vector.shape_cast %0 : vector<1x1x8x9xbf16> to vector<8x9xbf16>
    %2 = arith.extf %1 : vector<8x9xbf16> to vector<8x9xf32>
    %c0_3 = arith.constant 0 : index
    %c1 = arith.constant 1 : index
    %c0_4 = arith.constant 0 : index
    %c0_5 = arith.constant 0 : index
    %3 = vector.load %arg2[%c0_3, %c1, %c0_4, %c0_5] : memref<1x3x8x9xbf16, #tpu.memory_space<vmem>>, vector<1x1x8x9xbf16>
    %4 = vector.shape_cast %3 : vector<1x1x8x9xbf16> to vector<8x9xbf16>
    %5 = arith.extf %4 : vector<8x9xbf16> to vector<8x9xf32>
    %c0_6 = arith.constant 0 : index
    %c2 = arith.constant 2 : index
    %c0_7 = arith.constant 0 : index
    %c0_8 = arith.constant 0 : index
    %6 = vector.load %arg2[%c0_6, %c2, %c0_7, %c0_8] : memref<1x3x8x9xbf16, #tpu.memory_space<vmem>>, vector<1x1x8x9xbf16>
    %7 = vector.shape_cast %6 : vector<1x1x8x9xbf16> to vector<8x9xbf16>
    %8 = arith.extf %7 : vector<8x9xbf16> to vector<8x9xf32>
    %9 = vector.extract_strided_slice %2 {offsets = [0, 0], sizes = [8, 8], strides = [1, 1]} : vector<8x9xf32> to vector<8x8xf32>
    %10 = vector.extract_strided_slice %5 {offsets = [0, 0], sizes = [8, 8], strides = [1, 1]} : vector<8x9xf32> to vector<8x8xf32>
    %11 = vector.extract_strided_slice %8 {offsets = [0, 0], sizes = [8, 8], strides = [1, 1]} : vector<8x9xf32> to vector<8x8xf32>
    %12 = vector.extract_strided_slice %2 {offsets = [0, 1], sizes = [8, 8], strides = [1, 1]} : vector<8x9xf32> to vector<8x8xf32>
    %13 = vector.extract_strided_slice %5 {offsets = [0, 1], sizes = [8, 8], strides = [1, 1]} : vector<8x9xf32> to vector<8x8xf32>
    %14 = tpu.concatenate %9, %10, %11, %12, %13 in 0 : vector<8x8xf32>, vector<8x8xf32>, vector<8x8xf32>, vector<8x8xf32>, vector<8x8xf32> -> vector<40x8xf32>
    %c0_9 = arith.constant 0 : index
    %c0_10 = arith.constant 0 : index
    %15 = vector.load %arg3[%c0_9, %c0_10] : memref<32x40xbf16, #tpu.memory_space<vmem>>, vector<32x40xbf16>
    %16 = arith.truncf %14 : vector<40x8xf32> to vector<40x8xbf16>
    %cst = arith.constant dense<0.000000e+00> : vector<32x8xf32>
    %17 = tpu.matmul %15, %16, %cst {dimension_numbers = #tpu.dot_dimension_numbers<[1], [0], [0], [1], [0, 0, 1, 1], [], []>} : vector<32x40xbf16>, vector<40x8xbf16>, vector<32x8xf32> -> vector<32x8xf32>
    %c0_11 = arith.constant 0 : index
    %c0_12 = arith.constant 0 : index
    %18 = vector.load %arg4[%c0_11, %c0_12] : memref<32x1xf32, #tpu.memory_space<vmem>>, vector<32x1xf32>
    %19 = vector.broadcast %18 : vector<32x1xf32> to vector<32x8xf32>
    %20 = arith.addf %17, %19 : vector<32x8xf32>
    %cst_13 = arith.constant 0.000000e+00 : f32
    %21 = vector.broadcast %cst_13 : f32 to vector<32x8xf32>
    %22 = arith.cmpf oge, %20, %21 : vector<32x8xf32>
    %cst_14 = arith.constant 1.000000e-01 : f32
    %23 = vector.broadcast %cst_14 : f32 to vector<32x8xf32>
    %24 = arith.mulf %20, %23 : vector<32x8xf32>
    %25 = arith.select %22, %20, %24 : vector<32x8xi1>, vector<32x8xf32>
    %c0_15 = arith.constant 0 : index
    %c0_16 = arith.constant 0 : index
    %c0_17 = arith.constant 0 : index
    %26 = vector.load %arg5[%c0_15, %c0_16, %c0_17] : memref<1x32x8xf32, #tpu.memory_space<vmem>>, vector<1x32x8xf32>
    %27 = vector.shape_cast %26 : vector<1x32x8xf32> to vector<32x8xf32>
    %28 = vector.shape_cast %25 : vector<32x8xf32> to vector<1x32x8xf32>
    tpu.vector_store %arg5[%c0_15, %c0_16, %c0_17], %28 {strides = array<i32>} : memref<1x32x8xf32, #tpu.memory_space<vmem>>, vector<1x32x8xf32>,
    return
  }
  func.func @transform_0(%arg0: i32, %arg1: i32) -> (i32, i32, i32, i32) {
    %c0_i32 = arith.constant 0 : i32
    %c0_i32_0 = arith.constant 0 : i32
    %c0_i32_1 = arith.constant 0 : i32
    %c0_i32_2 = arith.constant 0 : i32
    return %arg1, %c0_i32, %c0_i32_0, %c0_i32_1 : i32, i32, i32, i32
  }
  func.func @transform_1(%arg0: i32, %arg1: i32) -> (i32, i32) {
    %c0_i32 = arith.constant 0 : i32
    %c0_i32_0 = arith.constant 0 : i32
    return %arg0, %c0_i32 : i32, i32
  }
  func.func @transform_2(%arg0: i32, %arg1: i32) -> (i32, i32) {
    %c0_i32 = arith.constant 0 : i32
    %c0_i32_0 = arith.constant 0 : i32
    return %arg0, %c0_i32 : i32, i32
  }
  func.func @transform_3(%arg0: i32, %arg1: i32) -> (i32, i32, i32) {
    %c0_i32 = arith.constant 0 : i32
    %c0_i32_0 = arith.constant 0 : i32
    return %arg1, %arg0, %c0_i32 : i32, i32, i32
  }
}

module attributes {stable_mosaic.version = 11 : i64} {
  func.func @_conv_im2col_kernel(%arg0: i32, %arg1: i32, %arg2: memref<1x3x1x16xbf16, #tpu.memory_space<vmem>>, %arg3: memref<8x5xbf16, #tpu.memory_space<vmem>>, %arg4: memref<8x1xf32, #tpu.memory_space<vmem>>, %arg5: memref<1x8x15xf32, #tpu.memory_space<vmem>>) attributes {dimension_semantics = [#tpu.dimension_semantics<parallel>, #tpu.dimension_semantics<parallel>], iteration_bounds = array<i64: 1, 6>, scalar_prefetch = 0 : i64, scratch_operands = 0 : i64, tpu.core_type = #tpu.core_type<tc>, window_params = [{transform_indices = @transform_0, window_bounds = array<i64: 1, 3, 1, 16>}, {transform_indices = @transform_1, window_bounds = array<i64: 8, 5>}, {transform_indices = @transform_2, window_bounds = array<i64: 8, 1>}, {transform_indices = @transform_3, window_bounds = array<i64: 1, 8, 15>}]} {
    %c0 = arith.constant 0 : index
    %c0_0 = arith.constant 0 : index
    %c0_1 = arith.constant 0 : index
    %c0_2 = arith.constant 0 : index
    %0 = vector.load %arg2[%c0, %c0_0, %c0_1, %c0_2] : memref<1x3x1x16xbf16, #tpu.memory_space<vmem>>, vector<1x1x1x16xbf16>
    %1 = vector.shape_cast %0 : vector<1x1x1x16xbf16> to vector<1x16xbf16>
    %2 = arith.extf %1 : vector<1x16xbf16> to vector<1x16xf32>
    %c0_3 = arith.constant 0 : index
    %c1 = arith.constant 1 : index
    %c0_4 = arith.constant 0 : index
    %c0_5 = arith.constant 0 : index
    %3 = vector.load %arg2[%c0_3, %c1, %c0_4, %c0_5] : memref<1x3x1x16xbf16, #tpu.memory_space<vmem>>, vector<1x1x1x16xbf16>
    %4 = vector.shape_cast %3 : vector<1x1x1x16xbf16> to vector<1x16xbf16>
    %5 = arith.extf %4 : vector<1x16xbf16> to vector<1x16xf32>
    %c0_6 = arith.constant 0 : index
    %c2 = arith.constant 2 : index
    %c0_7 = arith.constant 0 : index
    %c0_8 = arith.constant 0 : index
    %6 = vector.load %arg2[%c0_6, %c2, %c0_7, %c0_8] : memref<1x3x1x16xbf16, #tpu.memory_space<vmem>>, vector<1x1x1x16xbf16>
    %7 = vector.shape_cast %6 : vector<1x1x1x16xbf16> to vector<1x16xbf16>
    %8 = arith.extf %7 : vector<1x16xbf16> to vector<1x16xf32>
    %9 = vector.extract_strided_slice %2 {offsets = [0, 0], sizes = [1, 15], strides = [1, 1]} : vector<1x16xf32> to vector<1x15xf32>
    %10 = vector.extract_strided_slice %5 {offsets = [0, 0], sizes = [1, 15], strides = [1, 1]} : vector<1x16xf32> to vector<1x15xf32>
    %11 = vector.extract_strided_slice %8 {offsets = [0, 0], sizes = [1, 15], strides = [1, 1]} : vector<1x16xf32> to vector<1x15xf32>
    %12 = vector.extract_strided_slice %2 {offsets = [0, 1], sizes = [1, 15], strides = [1, 1]} : vector<1x16xf32> to vector<1x15xf32>
    %13 = vector.extract_strided_slice %5 {offsets = [0, 1], sizes = [1, 15], strides = [1, 1]} : vector<1x16xf32> to vector<1x15xf32>
    %14 = tpu.concatenate %9, %10, %11, %12, %13 in 0 : vector<1x15xf32>, vector<1x15xf32>, vector<1x15xf32>, vector<1x15xf32>, vector<1x15xf32> -> vector<5x15xf32>
    %c0_9 = arith.constant 0 : index
    %c0_10 = arith.constant 0 : index
    %15 = vector.load %arg3[%c0_9, %c0_10] : memref<8x5xbf16, #tpu.memory_space<vmem>>, vector<8x5xbf16>
    %16 = arith.truncf %14 : vector<5x15xf32> to vector<5x15xbf16>
    %cst = arith.constant dense<0.000000e+00> : vector<8x15xf32>
    %17 = tpu.matmul %15, %16, %cst {dimension_numbers = #tpu.dot_dimension_numbers<[1], [0], [0], [1], [0, 0, 1, 1], [], []>} : vector<8x5xbf16>, vector<5x15xbf16>, vector<8x15xf32> -> vector<8x15xf32>
    %c0_11 = arith.constant 0 : index
    %c0_12 = arith.constant 0 : index
    %18 = vector.load %arg4[%c0_11, %c0_12] : memref<8x1xf32, #tpu.memory_space<vmem>>, vector<8x1xf32>
    %19 = vector.broadcast %18 : vector<8x1xf32> to vector<8x15xf32>
    %20 = arith.addf %17, %19 : vector<8x15xf32>
    %cst_13 = arith.constant 0.000000e+00 : f32
    %21 = vector.broadcast %cst_13 : f32 to vector<8x15xf32>
    %22 = arith.cmpf oge, %20, %21 : vector<8x15xf32>
    %cst_14 = arith.constant 1.000000e-01 : f32
    %23 = vector.broadcast %cst_14 : f32 to vector<8x15xf32>
    %24 = arith.mulf %20, %23 : vector<8x15xf32>
    %25 = arith.select %22, %20, %24 : vector<8x15xi1>, vector<8x15xf32>
    %c0_15 = arith.constant 0 : index
    %c0_16 = arith.constant 0 : index
    %c0_17 = arith.constant 0 : index
    %26 = vector.load %arg5[%c0_15, %c0_16, %c0_17] : memref<1x8x15xf32, #tpu.memory_space<vmem>>, vector<1x8x15xf32>
    %27 = vector.shape_cast %26 : vector<1x8x15xf32> to vector<8x15xf32>
    %28 = vector.shape_cast %25 : vector<8x15xf32> to vector<1x8x15xf32>
    tpu.vector_store %arg5[%c0_15, %c0_16, %c0_17], %28 {strides = array<i32>} : memref<1x8x15xf32, #tpu.memory_space<vmem>>, vector<1x8x15xf32>,
    return
  }
  func.func @transform_0(%arg0: i32, %arg1: i32) -> (i32, i32, i32, i32) {
    %c0_i32 = arith.constant 0 : i32
    %c0_i32_0 = arith.constant 0 : i32
    %c0_i32_1 = arith.constant 0 : i32
    %c0_i32_2 = arith.constant 0 : i32
    return %arg1, %c0_i32, %c0_i32_0, %c0_i32_1 : i32, i32, i32, i32
  }
  func.func @transform_1(%arg0: i32, %arg1: i32) -> (i32, i32) {
    %c0_i32 = arith.constant 0 : i32
    %c0_i32_0 = arith.constant 0 : i32
    return %arg0, %c0_i32 : i32, i32
  }
  func.func @transform_2(%arg0: i32, %arg1: i32) -> (i32, i32) {
    %c0_i32 = arith.constant 0 : i32
    %c0_i32_0 = arith.constant 0 : i32
    return %arg0, %c0_i32 : i32, i32
  }
  func.func @transform_3(%arg0: i32, %arg1: i32) -> (i32, i32, i32) {
    %c0_i32 = arith.constant 0 : i32
    %c0_i32_0 = arith.constant 0 : i32
    return %arg1, %arg0, %c0_i32 : i32, i32, i32
  }
}

module attributes {stable_mosaic.version = 11 : i64} {
  func.func @_conv_im2col_kernel(%arg0: i32, %arg1: i32, %arg2: memref<1x3x1x10xbf16, #tpu.memory_space<vmem>>, %arg3: memref<8x5xbf16, #tpu.memory_space<vmem>>, %arg4: memref<8x1xf32, #tpu.memory_space<vmem>>, %arg5: memref<1x8x9xf32, #tpu.memory_space<vmem>>) attributes {dimension_semantics = [#tpu.dimension_semantics<parallel>, #tpu.dimension_semantics<parallel>], iteration_bounds = array<i64: 1, 10>, scalar_prefetch = 0 : i64, scratch_operands = 0 : i64, tpu.core_type = #tpu.core_type<tc>, window_params = [{transform_indices = @transform_0, window_bounds = array<i64: 1, 3, 1, 10>}, {transform_indices = @transform_1, window_bounds = array<i64: 8, 5>}, {transform_indices = @transform_2, window_bounds = array<i64: 8, 1>}, {transform_indices = @transform_3, window_bounds = array<i64: 1, 8, 9>}]} {
    %c0 = arith.constant 0 : index
    %c0_0 = arith.constant 0 : index
    %c0_1 = arith.constant 0 : index
    %c0_2 = arith.constant 0 : index
    %0 = vector.load %arg2[%c0, %c0_0, %c0_1, %c0_2] : memref<1x3x1x10xbf16, #tpu.memory_space<vmem>>, vector<1x1x1x10xbf16>
    %1 = vector.shape_cast %0 : vector<1x1x1x10xbf16> to vector<1x10xbf16>
    %2 = arith.extf %1 : vector<1x10xbf16> to vector<1x10xf32>
    %c0_3 = arith.constant 0 : index
    %c1 = arith.constant 1 : index
    %c0_4 = arith.constant 0 : index
    %c0_5 = arith.constant 0 : index
    %3 = vector.load %arg2[%c0_3, %c1, %c0_4, %c0_5] : memref<1x3x1x10xbf16, #tpu.memory_space<vmem>>, vector<1x1x1x10xbf16>
    %4 = vector.shape_cast %3 : vector<1x1x1x10xbf16> to vector<1x10xbf16>
    %5 = arith.extf %4 : vector<1x10xbf16> to vector<1x10xf32>
    %c0_6 = arith.constant 0 : index
    %c2 = arith.constant 2 : index
    %c0_7 = arith.constant 0 : index
    %c0_8 = arith.constant 0 : index
    %6 = vector.load %arg2[%c0_6, %c2, %c0_7, %c0_8] : memref<1x3x1x10xbf16, #tpu.memory_space<vmem>>, vector<1x1x1x10xbf16>
    %7 = vector.shape_cast %6 : vector<1x1x1x10xbf16> to vector<1x10xbf16>
    %8 = arith.extf %7 : vector<1x10xbf16> to vector<1x10xf32>
    %9 = vector.extract_strided_slice %2 {offsets = [0, 0], sizes = [1, 9], strides = [1, 1]} : vector<1x10xf32> to vector<1x9xf32>
    %10 = vector.extract_strided_slice %5 {offsets = [0, 0], sizes = [1, 9], strides = [1, 1]} : vector<1x10xf32> to vector<1x9xf32>
    %11 = vector.extract_strided_slice %8 {offsets = [0, 0], sizes = [1, 9], strides = [1, 1]} : vector<1x10xf32> to vector<1x9xf32>
    %12 = vector.extract_strided_slice %2 {offsets = [0, 1], sizes = [1, 9], strides = [1, 1]} : vector<1x10xf32> to vector<1x9xf32>
    %13 = vector.extract_strided_slice %5 {offsets = [0, 1], sizes = [1, 9], strides = [1, 1]} : vector<1x10xf32> to vector<1x9xf32>
    %14 = tpu.concatenate %9, %10, %11, %12, %13 in 0 : vector<1x9xf32>, vector<1x9xf32>, vector<1x9xf32>, vector<1x9xf32>, vector<1x9xf32> -> vector<5x9xf32>
    %c0_9 = arith.constant 0 : index
    %c0_10 = arith.constant 0 : index
    %15 = vector.load %arg3[%c0_9, %c0_10] : memref<8x5xbf16, #tpu.memory_space<vmem>>, vector<8x5xbf16>
    %16 = arith.truncf %14 : vector<5x9xf32> to vector<5x9xbf16>
    %cst = arith.constant dense<0.000000e+00> : vector<8x9xf32>
    %17 = tpu.matmul %15, %16, %cst {dimension_numbers = #tpu.dot_dimension_numbers<[1], [0], [0], [1], [0, 0, 1, 1], [], []>} : vector<8x5xbf16>, vector<5x9xbf16>, vector<8x9xf32> -> vector<8x9xf32>
    %c0_11 = arith.constant 0 : index
    %c0_12 = arith.constant 0 : index
    %18 = vector.load %arg4[%c0_11, %c0_12] : memref<8x1xf32, #tpu.memory_space<vmem>>, vector<8x1xf32>
    %19 = vector.broadcast %18 : vector<8x1xf32> to vector<8x9xf32>
    %20 = arith.addf %17, %19 : vector<8x9xf32>
    %cst_13 = arith.constant 0.000000e+00 : f32
    %21 = vector.broadcast %cst_13 : f32 to vector<8x9xf32>
    %22 = arith.cmpf oge, %20, %21 : vector<8x9xf32>
    %cst_14 = arith.constant 1.000000e-01 : f32
    %23 = vector.broadcast %cst_14 : f32 to vector<8x9xf32>
    %24 = arith.mulf %20, %23 : vector<8x9xf32>
    %25 = arith.select %22, %20, %24 : vector<8x9xi1>, vector<8x9xf32>
    %c0_15 = arith.constant 0 : index
    %c0_16 = arith.constant 0 : index
    %c0_17 = arith.constant 0 : index
    %26 = vector.load %arg5[%c0_15, %c0_16, %c0_17] : memref<1x8x9xf32, #tpu.memory_space<vmem>>, vector<1x8x9xf32>
    %27 = vector.shape_cast %26 : vector<1x8x9xf32> to vector<8x9xf32>
    %28 = vector.shape_cast %25 : vector<8x9xf32> to vector<1x8x9xf32>
    tpu.vector_store %arg5[%c0_15, %c0_16, %c0_17], %28 {strides = array<i32>} : memref<1x8x9xf32, #tpu.memory_space<vmem>>, vector<1x8x9xf32>,
    return
  }
  func.func @transform_0(%arg0: i32, %arg1: i32) -> (i32, i32, i32, i32) {
    %c0_i32 = arith.constant 0 : i32
    %c0_i32_0 = arith.constant 0 : i32
    %c0_i32_1 = arith.constant 0 : i32
    %c0_i32_2 = arith.constant 0 : i32
    return %arg1, %c0_i32, %c0_i32_0, %c0_i32_1 : i32, i32, i32, i32
  }
  func.func @transform_1(%arg0: i32, %arg1: i32) -> (i32, i32) {
    %c0_i32 = arith.constant 0 : i32
    %c0_i32_0 = arith.constant 0 : i32
    return %arg0, %c0_i32 : i32, i32
  }
  func.func @transform_2(%arg0: i32, %arg1: i32) -> (i32, i32) {
    %c0_i32 = arith.constant 0 : i32
    %c0_i32_0 = arith.constant 0 : i32
    return %arg0, %c0_i32 : i32, i32
  }
  func.func @transform_3(%arg0: i32, %arg1: i32) -> (i32, i32, i32) {
    %c0_i32 = arith.constant 0 : i32
    %c0_i32_0 = arith.constant 0 : i32
    return %arg1, %arg0, %c0_i32 : i32, i32, i32
  }
}

</mosaic_0001>

<bundles_post_ra>
// kernel: _lambda_.16
= control target key start
LH: loop header
LB: loop body
LE: loop exit
PB: predicated region body
PF: predicated region fallthrough
CT: control target
= control target key end

     0   :  { %s755_s12 = smov 0   ;;  %s757_s13 = smov 0   ;;  %s835_s0 = inlined_call_operand.vmem [shape: bf16[2,1,1,142], index: 0, kind: input, shape index: {}]   ;;  %s836_s1 = inlined_call_operand.vmem [shape: bf16[16,15], index: 1, kind: input, shape index: {}]   ;;  %s837_s2 = inlined_call_operand.vmem [shape: f32[16,1], index: 2, kind: input, shape index: {}]   ;;  %s838_s3 = inlined_call_operand.vmem [shape: f32[2,16,128], index: 3, kind: output, shape index: {}]  }
   0x1   :  { %s759_s14 = smov 0  }
   0x2 LB: > { %s22_s15 = sadd.s32 1, %s711_s13  ;;  %p561_p0 = scmp.ge.s32.totalorder %s715_s14, 1  ;;  %s715_s14 = sphi %s759_s14, %s13_s14   ;;  %s711_s13 = sphi %s757_s13, %s846_s13   ;;  %s707_s12 = sphi %s755_s12, %s845_s12  }
   0x3   : > { %p23_p1 = scmp.ge.s32.totalorder %s22_s15, 2  ;;  %p172_p2 = scmp.lt.s32.totalorder %s715_s14, 3 }
   0x5   : > { %s848_s15 = smov (%p23_p1, %s22_s15), 0  ;;  %p173_p3 = pnand %p561_p0, %p172_p2 }
   0x6   : > { %p209_p4 = scmp.lt.s32.totalorder (!%p173_p3), %s707_s12, 1  ;;  %s717_s20 = smov (!%p173_p3), 120  }
   0x7   : > { %176 = sbr.rel (%p173_p3) target bundleno = 375 (0x177), region = 32  ;;  %s718_s21 = smov (!%p173_p3), 127  }
   0x8   : > { %s719_s22 = smov (!%p173_p3), 119   ;;  %s720_s23 = smov (!%p173_p3), 126  }
   0x9   : > { %s721_s24 = smov (!%p173_p3), 118   ;;  %s722_s25 = smov (!%p173_p3), 125  }
   0xa   : > { %s723_s26 = smov (!%p173_p3), 117   ;;  %s724_s27 = smov (!%p173_p3), 124  }
   0xb   : > { %s726_s28 = smov (!%p173_p3), 116   ;;  %s727_s29 = smov (!%p173_p3), 123  }
   0xc   : > { %v239_v0 = vlaneseq  ;;  %s850_s12 = smov (!%p209_p4, %s707_s12), 1  ;;  %v725_v9 = vmov 0.0   ;;  %s728_s30 = smov 115   ;;  %vm730_vm0 = vmmov 0   ;;  %v731_v10 = vmov 0   ;;  %v368_v11 = vld [vmem:[%s837_s2] sm:$0xff] }
   0xd   : > { %s562_s16 = sshll.u32 %s850_s12, 1  ;;  %572 = vmatprep.subr.bf16.mxu0 %v725_v9  ;;  %s729_s4 = smov 122   ;;  %574 = vmatprep.mubr.msk.bf16.mxu0 %vm730_vm0, %v725_v9  ;;  %v369_v12 = vld [vmem:[%s837_s2 + $0x8] sm:$0xff]  ;;  %vm300_vm1 = vcmask 982016   ;;  %vm251_vm2 = vcmask 1039360   ;;  %vm345_vm3 = vcmask 1040384  }
   0xe   : > { %v240_v1 = vshrl.u32 %v239_v0, 7  ;;  %s212_s19 = scalar_lea.vmem %s835_s0, %s562_s16  ;;  %690 = vset.pattern.permute.xlu0 %v731_v10  ;;  %691 = vset.pattern.permute.xlu1 %v731_v10  ;;  %s732_s5 = smov 114   ;;  %vm307_vm4 = vcmask 973824   ;;  %vm258_vm5 = vcmask 1031168   ;;  %vm347_vm6 = vcmask 1041408  }
   0xf   : > { %v236_v4 = vld [vmem:[%s212_s19] sm:$0x3]  ;;  %s733_s6 = smov 121   ;;  %vm314_vm7 = vcmask 965632   ;;  %vm265_vm8 = vcmask 1022976   ;;  %vm321_vm10 = vcmask 957440  }
  0x10   : > { %v241_v2 = vsub.s32 0, %v240_v1  ;;  %v245_v3 = vsub.s32 2, %v240_v1  ;;  %v779_v5 = vunpack.c.l.bf16 %v236_v4  ;;  %vm272_vm11 = vcmask 1014784   ;;  %s569_s17 = sshll.u32 %s850_s12, 4 }
  0x11   : > { %vm328_vm12 = vcmask 949248   ;;  %vm286_vm0 = vcmask 998400   ;;  %vm353_vm9 = vcmask 1044480   ;;  %vm342_vm13 = vcmask 932864  }
  0x12   : > { %v242_v6 = vrot.slane %v779_v5, %v241_v2  ;;  %v246_v7 = vrot.slane %v779_v5, %v245_v3  ;;  %vm355_vm14 = vcmask 1045504   ;;  %vm357_vm15 = vcmask 1046528  }
  0x13   : > { %v734_v60 = vmov 65535  }
  0x14   : > { %v630_v8 = vpack.i.bf16 %v246_v7, %v242_v6  ;;  %v390_v61 = vsel %vm357_vm15, 4294967295, %v734_v60 }
  0x16   : > { %631 = vrot.lane.b32.xlu1 %v630_v8, %s717_s20  ;;  %621 = vrot.lane.b32.xlu0 %v630_v8, %s718_s21  ;;  %s233_s20 = scalar_lea.vmem %s838_s3, %s569_s17 }
  0x1a   : > { %636 = vrot.lane.b32.xlu1 %v630_v8, %s719_s22  ;;  %626 = vrot.lane.b32.xlu0 %v630_v8, %s720_s23 }
  0x1e   : > { %646 = vrot.lane.b32.xlu1 %v630_v8, %s721_s24  ;;  %641 = vrot.lane.b32.xlu0 %v630_v8, %s722_s25 }
  0x22   : > { %656 = vrot.lane.b32.xlu1 %v630_v8, %s723_s26  ;;  %651 = vrot.lane.b32.xlu0 %v630_v8, %s724_s27 }
  0x26   : > { %666 = vrot.lane.b32.xlu1 %v630_v8, %s726_s28  ;;  %661 = vrot.lane.b32.xlu0 %v630_v8, %s727_s29 }
  0x2a   : > { %676 = vrot.lane.b32.xlu1 %v630_v8, %s728_s30  ;;  %671 = vrot.lane.b32.xlu0 %v630_v8, %s729_s4 }
  0x2e   : > { %686 = vrot.lane.b32.xlu1 %v630_v8, %s732_s5  ;;  %681 = vrot.lane.b32.xlu0 %v630_v8, %s733_s6 }
  0x32   : > { %372 = vperm.xlu0 %690, %v368_v11   ;;  %377 = vperm.xlu1 %691, %v369_v12  }
  0x88   : > { %v632_v13 = vpop.permute.xlu1 %631  ;;  %v622_v14 = vpop.permute.xlu0 %621 }
  0x89   : > { %v624_v19 = vunpack.i.h.bf16 %v622_v14  ;;  %v623_v20 = vunpack.i.l.bf16 %v622_v14  ;;  %v634_v23 = vunpack.i.h.bf16 %v632_v13  ;;  %v633_v24 = vunpack.i.l.bf16 %v632_v13 }
  0x8b   : > { %v252_v25 = vsel %vm251_vm2, %v623_v20, %v624_v19  ;;  %vm293_vm2 = vcmask 990208   ;;  %v301_v40 = vsel %vm300_vm1, %v633_v24, %v634_v23  ;;  %vm389_vm1 = vcmask 1047552   ;;  %v692_v23 = vld [vmem:[%s836_s1] sm:$0xff]  }
  0x8c   : > { %v637_v15 = vpop.permute.xlu1 %636  ;;  %v627_v16 = vpop.permute.xlu0 %626  ;;  %v346_v41 = vsel %vm345_vm3, %v779_v5, %v252_v25  ;;  %v391_v20 = vsel %vm389_vm1, %v390_v61, 0 }
  0x8d   : > { %v639_v26 = vunpack.i.h.bf16 %v637_v15  ;;  %v638_v27 = vunpack.i.l.bf16 %v637_v15  ;;  %v629_v28 = vunpack.i.h.bf16 %v627_v16  ;;  %v628_v29 = vunpack.i.l.bf16 %v627_v16 }
  0x8f   : > { %v308_v42 = vsel %vm307_vm4, %v638_v27, %v639_v26  ;;  %v259_v43 = vsel %vm258_vm5, %v628_v29, %v629_v28  ;;  %vm839_vm4 = vcmask 1042432   ;;  %vm840_vm5 = vcmask 1006592  }
  0x90   : > { %v647_v17 = vpop.permute.xlu1 %646  ;;  %v642_v18 = vpop.permute.xlu0 %641  ;;  %v359_v58 = vsel %vm345_vm3, %v301_v40, %v308_v42  ;;  %v348_v59 = vsel %vm347_vm6, %v346_v41, %v259_v43 }
  0x91   : > { %v649_v30 = vunpack.i.h.bf16 %v647_v17  ;;  %v648_v31 = vunpack.i.l.bf16 %v647_v17  ;;  %v644_v32 = vunpack.i.h.bf16 %v642_v18  ;;  %v643_v33 = vunpack.i.l.bf16 %v642_v18 }
  0x93   : > { %v315_v48 = vsel %vm314_vm7, %v648_v31, %v649_v30  ;;  %v266_v49 = vsel %vm265_vm8, %v643_v33, %v644_v32  ;;  %vm841_vm7 = vmmov %vm839_vm4  ;;  %vm842_vm8 = vcmask 1043456  }
  0x94   : > { %v657_v21 = vpop.permute.xlu1 %656  ;;  %v652_v22 = vpop.permute.xlu0 %651  ;;  %v360_v62 = vsel %vm347_vm6, %v359_v58, %v315_v48  ;;  %v350_v63 = vsel %vm839_vm4, %v348_v59, %v266_v49  ;;  %vm844_vm3 = vmmov %vm842_vm8  ;;  %vm385_vm6 = vcmask 121856  }
  0x95   : > { %v659_v34 = vunpack.i.h.bf16 %v657_v21  ;;  %v658_v35 = vunpack.i.l.bf16 %v657_v21  ;;  %v654_v36 = vunpack.i.h.bf16 %v652_v22  ;;  %v653_v37 = vunpack.i.l.bf16 %v652_v22 }
  0x97   : > { %v322_v50 = vsel %vm321_vm10, %v658_v35, %v659_v34  ;;  %v273_v51 = vsel %vm272_vm11, %v653_v37, %v654_v36  ;;  %vm843_vm10 = vcmask 941056  }
  0x98   : > { %v667_v38 = vpop.permute.xlu1 %666  ;;  %v662_v39 = vpop.permute.xlu0 %661  ;;  %v361_v2 = vsel %vm841_vm7, %v360_v62, %v322_v50  ;;  %v352_v3 = vsel %vm842_vm8, %v350_v63, %v273_v51 }
  0x99   : > { %v669_v44 = vunpack.i.h.bf16 %v667_v38  ;;  %v668_v45 = vunpack.i.l.bf16 %v667_v38  ;;  %v664_v46 = vunpack.i.h.bf16 %v662_v39  ;;  %v663_v47 = vunpack.i.l.bf16 %v662_v39 }
  0x9b   : > { %v329_v0 = vsel %vm328_vm12, %v668_v45, %v669_v44  ;;  %v280_v1 = vsel %vm840_vm5, %v663_v47, %v664_v46 }
  0x9c   : > { %v677_v52 = vpop.permute.xlu1 %676  ;;  %v672_v53 = vpop.permute.xlu0 %671  ;;  %v362_v12 = vsel %vm844_vm3, %v361_v2, %v329_v0  ;;  %v354_v13 = vsel %vm353_vm9, %v352_v3, %v280_v1 }
  0x9d   : > { %v679_v54 = vunpack.i.h.bf16 %v677_v52  ;;  %v678_v55 = vunpack.i.l.bf16 %v677_v52  ;;  %v674_v56 = vunpack.i.h.bf16 %v672_v53  ;;  %v673_v57 = vunpack.i.l.bf16 %v672_v53 }
  0x9f   : > { %v336_v4 = vsel %vm843_vm10, %v678_v55, %v679_v54  ;;  %v287_v5 = vsel %vm286_vm0, %v673_v57, %v674_v56 }
  0xa0   : > { %v687_v6 = vpop.permute.xlu1 %686  ;;  %v682_v7 = vpop.permute.xlu0 %681  ;;  %v356_v16 = vsel %vm355_vm14, %v354_v13, %v287_v5  ;;  %v363_v17 = vsel %vm353_vm9, %v362_v12, %v336_v4 }
  0xa1   : > { %v689_v8 = vunpack.i.h.bf16 %v687_v6  ;;  %v688_v9 = vunpack.i.l.bf16 %v687_v6  ;;  %v684_v10 = vunpack.i.h.bf16 %v682_v7  ;;  %v683_v11 = vunpack.i.l.bf16 %v682_v7 }
  0xa3   : > { %v343_v14 = vsel %vm342_vm13, %v688_v9, %v689_v8  ;;  %v294_v15 = vsel %vm293_vm2, %v683_v11, %v684_v10 }
  0xa4   : > { %v358_v18 = vsel %vm357_vm15, %v356_v16, %v294_v15  ;;  %v364_v19 = vsel %vm355_vm14, %v363_v17, %v343_v14 }
  0xa5   : > { %v367_v21 = vpack.c.bf16 %v364_v19, %v358_v18 }
  0xa7   : > { %v393_v22 = vand.u32 %v391_v20, %v367_v21 }
  0xa9   : > { %573 = vmatpush3.bf16.msra.mxu0 %v393_v22 }
  0xac   : > { %575 = vmatmul.mubr.msk.bf16.vlgmr.msra.gmra.mxu0 %vm385_vm6, %v692_v23 }
  0xad   : > { %v373_v24 = vpop.permute.xlu0 %372  ;;  %v378_v28 = vpop.permute.xlu1 %377 }
 0x16c   : > { %v429_v25 = vpop.f32.mrf.mxu0 }
 0x16d   : > { %v430_v26 = vadd.f32 %v429_v25, %v373_v24 }
 0x16e   : > { %v576_v27 = vpop.f32.mrf.mxu0 }
 0x16f   : > { %vm436_vm9 = vcmp.ge.f32.partialorder %v430_v26, 0.0  ;;  %v438_v29 = vmul.f32 0.1, %v430_v26 }
 0x170   : > { %v432_v30 = vpop.f32.mrf.mxu0 }
 0x171   : > { %v440_v31 = vsel %vm436_vm9, %v430_v26, %v438_v29  ;;  %v433_v32 = vadd.f32 %v432_v30, %v378_v28 }
 0x172   : > { %442 = vst [vmem:[%s233_s20] sm:$0xff] %v440_v31  ;;  %v577_v33 = vpop.f32.mrf.mxu0 }
 0x173   : > { %vm437_vm11 = vcmp.ge.f32.partialorder %v433_v32, 0.0  ;;  %v439_v34 = vmul.f32 0.1, %v433_v32 }
 0x175   : > { %v441_v35 = vsel %vm437_vm11, %v433_v32, %v439_v34 }
 0x176   : > { %443 = vst [vmem:[%s233_s20 + $0x8] sm:$0xff] %v441_v35 }
 0x177 PF: > { %s13_s14 = sadd.s32 1, %s715_s14   ;;  %s845_s12 = smov %s711_s13 }
 0x178   : > { %p10_p5 = scmp.ge.s32.totalorder %s13_s14, 4   ;;  %s846_s13 = smov %s848_s15 }
 0x17a   :  { %12 = sbr.rel (!%p10_p5) target bundleno = 2 (0x2), region = 68 }

// kernel: _lambda_.17
= control target key start
LH: loop header
LB: loop body
LE: loop exit
PB: predicated region body
PF: predicated region fallthrough
CT: control target
= control target key end

     0   :  { %s1192_s12 = smov 0   ;;  %s1194_s13 = smov 0   ;;  %s1328_s0 = inlined_call_operand.vmem [shape: bf16[2,2,16,84], index: 0, kind: input, shape index: {}]   ;;  %s1329_s1 = inlined_call_operand.vmem [shape: bf16[16,656], index: 1, kind: input, shape index: {}]   ;;  %s1330_s2 = inlined_call_operand.vmem [shape: f32[16,1], index: 2, kind: input, shape index: {}]   ;;  %s1331_s3 = inlined_call_operand.vmem [shape: f32[2,16,64], index: 3, kind: output, shape index: {}]  }
   0x1   :  { %s1196_s14 = smov 0  }
   0x2 LB: > { %s22_s15 = sadd.s32 1, %s1156_s13  ;;  %p830_p0 = scmp.ge.s32.totalorder %s1160_s14, 1  ;;  %s1160_s14 = sphi %s1196_s14, %s13_s14   ;;  %s1156_s13 = sphi %s1194_s13, %s1333_s13   ;;  %s1152_s12 = sphi %s1192_s12, %s1332_s12  }
   0x3   : > { %p23_p1 = scmp.ge.s32.totalorder %s22_s15, 2  ;;  %p174_p2 = scmp.lt.s32.totalorder %s1160_s14, 3 }
   0x5   : > { %s1335_s15 = smov (%p23_p1, %s22_s15), 0  ;;  %p175_p3 = pnand %p830_p0, %p174_p2 }
   0x6   : > { %p213_p4 = scmp.lt.s32.totalorder (!%p175_p3), %s1152_s12, 1  ;;  %s1162_s20 = smov (!%p175_p3), 121  }
   0x7   : > { %178 = sbr.rel (%p175_p3) target bundleno = 510 (0x1fe), region = 32  ;;  %s1163_s21 = smov (!%p175_p3), 125  }
   0x8   : > { %s1164_s22 = smov (!%p175_p3), 122   ;;  %s1165_s23 = smov (!%p175_p3), 126  }
   0x9   : > { %s1166_s24 = smov (!%p175_p3), 123   ;;  %s1167_s25 = smov (!%p175_p3), 127  }
   0xa   : > { %s1168_s26 = smov (!%p175_p3), 124   ;;  %s1169_s27 = smov (!%p175_p3), 120  }
   0xb   : > { %s1171_s30 = smov (!%p175_p3), 112  }
   0xc   : > { %s1337_s12 = smov (!%p213_p4, %s1152_s12), 1  ;;  %v1129_v8 = vld [vmem:[%s1329_s1 + $0x4] ss:$24 sps:$4 sm:$0xff]   ;;  %v1170_v11 = vmov 0   ;;  %vm577_vm0 = vcmask 130048   ;;  %vm710_vm2 = vcmask 523264  }
   0xd   : > { %s848_s16 = sshll.u32 %s1337_s12, 4  ;;  %613 = vmatprep.mubr.bf16.mxu1 %v1129_v8  ;;  %663 = vmatprep.subr.bf16.mxu0 %v1170_v11 }
   0xe   : > { %s217_s19 = scalar_lea.vmem %s1328_s0, %s848_s16  ;;  %1124 = vset.pattern.permute.xlu0 %v1170_v11  ;;  %1123 = vset.pattern.permute.xlu1 %v1170_v11 }
   0xf   : > { %v1218_v0 = vld [vmem:[%s217_s19 + $0x8] sm:$0xff]   ;;  %v1220_v1 = vld [vmem:[%s217_s19] sm:$0xff]  }
  0x10   : > { %v249_v2 = vunpack.c.l.bf16 %v1218_v0  ;;  %v250_v3 = vunpack.c.h.bf16 %v1218_v0  ;;  %v244_v4 = vunpack.c.l.bf16 %v1220_v1  ;;  %v245_v5 = vunpack.c.h.bf16 %v1220_v1 }
  0x12   : > { %v1226_v6 = vpack.i.bf16 %v250_v3, %v249_v2  ;;  %v1228_v7 = vpack.i.bf16 %v245_v5, %v244_v4  ;;  %v1127_v4 = vld [vmem:[%s1329_s1] ss:$24 sps:$4 sm:$0xff]   ;;  %v1135_v5 = vld [vmem:[%s1329_s1 + $0x14] ss:$24 sps:$4 sm:$0xff]  }
  0x13   : > { %845 = vmatprep.mubr.msk.bf16.mxu0 %vm577_vm0, %v1135_v5 }
  0x14   : > { %929 = vrot.lane.b32.xlu0 %v1226_v6, %s1162_s20  ;;  %939 = vrot.lane.b32.xlu1 %v1228_v7, %s1162_s20 }
  0x18   : > { %934 = vrot.lane.b32.xlu0 %v1226_v6, %s1163_s21  ;;  %944 = vrot.lane.b32.xlu1 %v1228_v7, %s1163_s21 }
  0x1c   : > { %949 = vrot.lane.b32.xlu0 %v1226_v6, %s1164_s22  ;;  %954 = vrot.lane.b32.xlu1 %v1226_v6, %s1165_s23 }
  0x20   : > { %959 = vrot.lane.b32.xlu0 %v1228_v7, %s1164_s22  ;;  %964 = vrot.lane.b32.xlu1 %v1228_v7, %s1165_s23 }
  0x24   : > { %969 = vrot.lane.b32.xlu0 %v1226_v6, %s1166_s24  ;;  %974 = vrot.lane.b32.xlu1 %v1226_v6, %s1167_s25 }
  0x28   : > { %979 = vrot.lane.b32.xlu0 %v1228_v7, %s1166_s24  ;;  %984 = vrot.lane.b32.xlu1 %v1228_v7, %s1167_s25  ;;  %s239_s25 = scalar_lea.vmem %s1331_s3, %s848_s16 }
  0x2c   : > { %989 = vrot.lane.b32.xlu0 %v1226_v6, %s1168_s26  ;;  %994 = vrot.lane.b32.xlu1 %v1228_v7, %s1168_s26 }
  0x30   : > { %999 = vrot.lane.b32.xlu1 %v1226_v6, %s1169_s27 }
  0x86   : > { %v930_v9 = vpop.permute.xlu0 %929  ;;  %v940_v10 = vpop.permute.xlu1 %939 }
  0x87   : > { %v932_v12 = vunpack.i.h.bf16 %v930_v9  ;;  %v931_v13 = vunpack.i.l.bf16 %v930_v9  ;;  %v942_v14 = vunpack.i.h.bf16 %v940_v10  ;;  %v941_v15 = vunpack.i.l.bf16 %v940_v10  ;;  %1004 = vrot.lane.b32.xlu0 %v930_v9, %s1169_s27 }
  0x89   : > { %v510_v16 = vpack.c.bf16 %v932_v12, %v931_v13  ;;  %v509_v23 = vpack.c.bf16 %v942_v14, %v941_v15 }
  0x8a   : > { %v935_v17 = vpop.permute.xlu0 %934  ;;  %v945_v18 = vpop.permute.xlu1 %944 }
  0x8b   : > { %v937_v19 = vunpack.i.h.bf16 %v935_v17  ;;  %v936_v20 = vunpack.i.l.bf16 %v935_v17  ;;  %850 = vmatprep.subr.bf16.mxu1 %v510_v16  ;;  %v947_v21 = vunpack.i.h.bf16 %v945_v18  ;;  %v946_v22 = vunpack.i.l.bf16 %v945_v18  ;;  %1014 = vrot.lane.b32.xlu0 %v935_v17, %s1171_s30 }
  0x8c   : > { %1009 = vrot.lane.b32.xlu1 %v935_v17, %s1169_s27 }
  0x8d   : > { %v502_v24 = vpack.c.bf16 %v937_v19, %v936_v20  ;;  %v501_v26 = vpack.c.bf16 %v947_v21, %v946_v22 }
  0x8e   : > { %v950_v25 = vpop.permute.xlu0 %949  ;;  %v955_v27 = vpop.permute.xlu1 %954 }
  0x8f   : > { %851 = vmatpush3.bf16.msra.mxu1 %v502_v24  ;;  %v952_v28 = vunpack.i.h.bf16 %v950_v25  ;;  %v951_v29 = vunpack.i.l.bf16 %v950_v25  ;;  %v957_v30 = vunpack.i.h.bf16 %v955_v27  ;;  %v956_v31 = vunpack.i.l.bf16 %v955_v27  ;;  %1024 = vrot.lane.b32.xlu0 %v945_v18, %s1169_s27 }
  0x90   : > { %852 = vmatprep.subr.bf16.mxu1 %v509_v23  ;;  %1019 = vrot.lane.b32.xlu1 %v940_v10, %s1169_s27 }
  0x91   : > { %v508_v32 = vpack.c.bf16 %v952_v28, %v951_v29  ;;  %v500_v35 = vpack.c.bf16 %v957_v30, %v956_v31 }
  0x92   : > { %v960_v33 = vpop.permute.xlu0 %959  ;;  %v965_v34 = vpop.permute.xlu1 %964 }
  0x93   : > { %853 = vmatpush3.bf16.msra.mxu1 %v501_v26  ;;  %v962_v36 = vunpack.i.h.bf16 %v960_v33  ;;  %v961_v37 = vunpack.i.l.bf16 %v960_v33  ;;  %v967_v38 = vunpack.i.h.bf16 %v965_v34  ;;  %v966_v39 = vunpack.i.l.bf16 %v965_v34  ;;  %1034 = vrot.lane.b32.xlu0 %v950_v25, %s1169_s27 }
  0x94   : > { %854 = vmatprep.subr.bf16.mxu1 %v508_v32  ;;  %1029 = vrot.lane.b32.xlu1 %v945_v18, %s1171_s30 }
  0x95   : > { %v507_v40 = vpack.c.bf16 %v962_v36, %v961_v37  ;;  %v499_v42 = vpack.c.bf16 %v967_v38, %v966_v39 }
  0x96   : > { %v970_v41 = vpop.permute.xlu0 %969  ;;  %v975_v43 = vpop.permute.xlu1 %974 }
  0x97   : > { %855 = vmatpush3.bf16.msra.mxu1 %v500_v35  ;;  %v972_v44 = vunpack.i.h.bf16 %v970_v41  ;;  %v971_v45 = vunpack.i.l.bf16 %v970_v41  ;;  %v977_v46 = vunpack.i.h.bf16 %v975_v43  ;;  %v976_v47 = vunpack.i.l.bf16 %v975_v43  ;;  %1044 = vrot.lane.b32.xlu0 %v955_v27, %s1171_s30 }
  0x98   : > { %856 = vmatprep.subr.bf16.mxu1 %v507_v40  ;;  %1039 = vrot.lane.b32.xlu1 %v955_v27, %s1169_s27 }
  0x99   : > { %v506_v48 = vpack.c.bf16 %v972_v44, %v971_v45  ;;  %v498_v51 = vpack.c.bf16 %v977_v46, %v976_v47 }
  0x9a   : > { %v980_v49 = vpop.permute.xlu0 %979  ;;  %v985_v50 = vpop.permute.xlu1 %984 }
  0x9b   : > { %857 = vmatpush3.bf16.msra.mxu1 %v499_v42  ;;  %v982_v52 = vunpack.i.h.bf16 %v980_v49  ;;  %v981_v53 = vunpack.i.l.bf16 %v980_v49  ;;  %v987_v54 = vunpack.i.h.bf16 %v985_v50  ;;  %v986_v55 = vunpack.i.l.bf16 %v985_v50  ;;  %1054 = vrot.lane.b32.xlu0 %v965_v34, %s1169_s27 }
  0x9c   : > { %858 = vmatprep.subr.bf16.mxu1 %v506_v48  ;;  %1049 = vrot.lane.b32.xlu1 %v960_v33, %s1169_s27 }
  0x9d   : > { %v505_v56 = vpack.c.bf16 %v982_v52, %v981_v53  ;;  %v497_v60 = vpack.c.bf16 %v987_v54, %v986_v55 }
  0x9e   : > { %v990_v57 = vpop.permute.xlu0 %989  ;;  %v995_v61 = vpop.permute.xlu1 %994 }
  0x9f   : > { %859 = vmatpush3.bf16.msra.mxu1 %v498_v51  ;;  %v992_v58 = vunpack.i.h.bf16 %v990_v57  ;;  %v991_v59 = vunpack.i.l.bf16 %v990_v57  ;;  %v997_v63 = vunpack.i.h.bf16 %v995_v61  ;;  %v996_v2 = vunpack.i.l.bf16 %v995_v61  ;;  %1064 = vrot.lane.b32.xlu0 %v970_v41, %s1169_s27 }
  0xa0   : > { %860 = vmatprep.subr.bf16.mxu1 %v505_v56  ;;  %1059 = vrot.lane.b32.xlu1 %v965_v34, %s1171_s30 }
  0xa1   : > { %v504_v62 = vpack.c.bf16 %v992_v58, %v991_v59  ;;  %v503_v3 = vpack.c.bf16 %v997_v63, %v996_v2 }
  0xa2   : > { %v1296_v8 = vpop.permute.xlu1 %999 }
  0xa3   : > { %861 = vmatpush3.bf16.msra.mxu1 %v497_v60  ;;  %1074 = vrot.lane.b32.xlu0 %v975_v43, %s1171_s30 }
  0xa4   : > { %862 = vmatprep.subr.bf16.mxu1 %v504_v62  ;;  %1069 = vrot.lane.b32.xlu1 %v975_v43, %s1169_s27 }
  0xa7   : > { %863 = vmatpush3.bf16.msra.mxu1 %v1218_v0  ;;  %1084 = vrot.lane.b32.xlu0 %v985_v50, %s1169_s27  ;;  %v1132_v0 = vld [vmem:[%s1329_s1 + $0xc] ss:$24 sps:$4 sm:$0xff]  }
  0xa8   : > { %864 = vmatprep.subr.bf16.mxu1 %v503_v3  ;;  %1079 = vrot.lane.b32.xlu1 %v980_v49, %s1169_s27 }
  0xab   : > { %865 = vmatpush3.bf16.msra.mxu1 %v1220_v1  ;;  %1094 = vrot.lane.b32.xlu0 %v990_v57, %s1169_s27  ;;  %v536_v1 = vld [vmem:[%s1330_s2] sm:$0xff] }
  0xac   : > { %1089 = vrot.lane.b32.xlu1 %v985_v50, %s1171_s30 }
  0xae   : > { %614 = vmatmul.mubr.bf16.vlgmr.msra.gmra.mxu1 %v1127_v4 }
  0xaf   : > { %654 = vmatprep.mubr.bf16.mxu1 %v1132_v0  ;;  %1099 = vrot.lane.b32.xlu0 %v1226_v6, %s1171_s30  ;;  %v537_v6 = vld [vmem:[%s1330_s2 + $0x8] sm:$0xff] }
  0xb0   : > { %1109 = vrot.lane.b32.xlu1 %v995_v61, %s1169_s27 }
  0xb3   : > { %1104 = vrot.lane.b32.xlu0 %v1228_v7, %s1169_s27 }
  0xb4   : > { %1114 = vrot.lane.b32.xlu1 %v1228_v7, %s1171_s30 }
  0xb7   : > { %1119 = vrot.lane.b32.xlu0 %v995_v61, %s1171_s30 }
  0xb8   : > { %540 = vperm.xlu1 %1123, %v536_v1  }
  0xbb   : > { %545 = vperm.xlu0 %1124, %v537_v6  }
  0xf9   : > { %v1005_v9 = vpop.permute.xlu0 %1004 }
  0xfa   : > { %v1007_v10 = vunpack.i.h.bf16 %v1005_v9  ;;  %v1006_v12 = vunpack.i.l.bf16 %v1005_v9 }
  0xfc   : > { %v526_v13 = vpack.c.bf16 %v1007_v10, %v1006_v12 }
  0xfd   : > { %v1015_v14 = vpop.permute.xlu0 %1014 }
  0xfe   : > { %v1017_v7 = vunpack.i.h.bf16 %v1015_v14  ;;  %v1016_v15 = vunpack.i.l.bf16 %v1015_v14  ;;  %v1010_v16 = vpop.permute.xlu1 %1009  ;;  %872 = vmatprep.subr.bf16.mxu1 %v526_v13 }
  0xff   : > { %v1012_v17 = vunpack.i.h.bf16 %v1010_v16  ;;  %v1011_v18 = vunpack.i.l.bf16 %v1010_v16  ;;  %v1002_v16 = vunpack.i.h.bf16 %v1296_v8 }
 0x100   : > { %v534_v19 = vpack.c.bf16 %v1017_v7, %v1016_v15 }
 0x101   : > { %v518_v20 = vpack.c.bf16 %v1012_v17, %v1011_v18  ;;  %v1025_v21 = vpop.permute.xlu0 %1024  ;;  %v1001_v17 = vunpack.i.l.bf16 %v1296_v8 }
 0x102   : > { %v1027_v22 = vunpack.i.h.bf16 %v1025_v21  ;;  %v1026_v23 = vunpack.i.l.bf16 %v1025_v21  ;;  %v1020_v24 = vpop.permute.xlu1 %1019  ;;  %664 = vmatpush1.bf16.msra.mxu0 %v534_v19 }
 0x103   : > { %v1022_v25 = vunpack.i.h.bf16 %v1020_v24  ;;  %v1021_v26 = vunpack.i.l.bf16 %v1020_v24  ;;  %873 = vmatpush3.bf16.msra.mxu1 %v518_v20  ;;  %665 = vmatprep.subr.bf16.mxu0 %v1170_v11 }
 0x104   : > { %v517_v27 = vpack.c.bf16 %v1027_v22, %v1026_v23 }
 0x105   : > { %v525_v28 = vpack.c.bf16 %v1022_v25, %v1021_v26  ;;  %v1035_v29 = vpop.permute.xlu0 %1034  ;;  %v512_v26 = vpack.c.bf16 %v1002_v16, %v1001_v17 }
 0x106   : > { %v1037_v30 = vunpack.i.h.bf16 %v1035_v29  ;;  %v1036_v31 = vunpack.i.l.bf16 %v1035_v29  ;;  %v1030_v32 = vpop.permute.xlu1 %1029 }
 0x107   : > { %v1032_v33 = vunpack.i.h.bf16 %v1030_v32  ;;  %v1031_v34 = vunpack.i.l.bf16 %v1030_v32  ;;  %874 = vmatprep.subr.bf16.mxu1 %v525_v28 }
 0x108   : > { %v524_v35 = vpack.c.bf16 %v1037_v30, %v1036_v31  ;;  %875 = vmatpush3.bf16.msra.mxu1 %v517_v27 }
 0x109   : > { %v533_v36 = vpack.c.bf16 %v1032_v33, %v1031_v34  ;;  %v1045_v37 = vpop.permute.xlu0 %1044 }
 0x10a   : > { %v1047_v38 = vunpack.i.h.bf16 %v1045_v37  ;;  %v1046_v39 = vunpack.i.l.bf16 %v1045_v37  ;;  %v1040_v40 = vpop.permute.xlu1 %1039  ;;  %876 = vmatprep.subr.bf16.mxu1 %v524_v35 }
 0x10b   : > { %v1042_v41 = vunpack.i.h.bf16 %v1040_v40  ;;  %v1041_v42 = vunpack.i.l.bf16 %v1040_v40  ;;  %666 = vmatpush1.bf16.msra.mxu0 %v533_v36 }
 0x10c   : > { %v532_v43 = vpack.c.bf16 %v1047_v38, %v1046_v39  ;;  %667 = vmatprep.subr.bf16.mxu0 %v1170_v11 }
 0x10d   : > { %v516_v44 = vpack.c.bf16 %v1042_v41, %v1041_v42  ;;  %v1055_v45 = vpop.permute.xlu0 %1054  ;;  %v1130_v42 = vld [vmem:[%s1329_s1 + $0x8] ss:$24 sps:$4 sm:$0xff]  }
 0x10e   : > { %v1057_v46 = vunpack.i.h.bf16 %v1055_v45  ;;  %v1056_v47 = vunpack.i.l.bf16 %v1055_v45  ;;  %v1050_v48 = vpop.permute.xlu1 %1049 }
 0x10f   : > { %v1052_v49 = vunpack.i.h.bf16 %v1050_v48  ;;  %v1051_v50 = vunpack.i.l.bf16 %v1050_v48  ;;  %877 = vmatpush3.bf16.msra.mxu1 %v516_v44  ;;  %668 = vmatpush1.bf16.msra.mxu0 %v532_v43 }
 0x110   : > { %v515_v51 = vpack.c.bf16 %v1057_v46, %v1056_v47  ;;  %669 = vmatprep.subr.bf16.mxu0 %v1170_v11  ;;  %v1133_v46 = vld [vmem:[%s1329_s1 + $0x10] ss:$24 sps:$4 sm:$0xff]  }
 0x111   : > { %v523_v52 = vpack.c.bf16 %v1052_v49, %v1051_v50  ;;  %v1065_v53 = vpop.permute.xlu0 %1064 }
 0x112   : > { %v1067_v54 = vunpack.i.h.bf16 %v1065_v53  ;;  %v1066_v55 = vunpack.i.l.bf16 %v1065_v53  ;;  %v1060_v56 = vpop.permute.xlu1 %1059 }
 0x113   : > { %v1062_v57 = vunpack.i.h.bf16 %v1060_v56  ;;  %v1061_v58 = vunpack.i.l.bf16 %v1060_v56  ;;  %878 = vmatprep.subr.bf16.mxu1 %v523_v52 }
 0x114   : > { %v522_v59 = vpack.c.bf16 %v1067_v54, %v1066_v55  ;;  %879 = vmatpush3.bf16.msra.mxu1 %v515_v51 }
 0x115   : > { %v531_v60 = vpack.c.bf16 %v1062_v57, %v1061_v58  ;;  %v1075_v61 = vpop.permute.xlu0 %1074 }
 0x116   : > { %v1077_v62 = vunpack.i.h.bf16 %v1075_v61  ;;  %v1076_v63 = vunpack.i.l.bf16 %v1075_v61  ;;  %v1070_v2 = vpop.permute.xlu1 %1069  ;;  %880 = vmatprep.subr.bf16.mxu1 %v522_v59 }
 0x117   : > { %v1072_v3 = vunpack.i.h.bf16 %v1070_v2  ;;  %v1071_v4 = vunpack.i.l.bf16 %v1070_v2  ;;  %670 = vmatpush1.bf16.msra.mxu0 %v531_v60 }
 0x118   : > { %v530_v0 = vpack.c.bf16 %v1077_v62, %v1076_v63  ;;  %671 = vmatprep.subr.bf16.mxu0 %v1170_v11 }
 0x119   : > { %v514_v5 = vpack.c.bf16 %v1072_v3, %v1071_v4  ;;  %v1085_v1 = vpop.permute.xlu0 %1084 }
 0x11a   : > { %v1087_v6 = vunpack.i.h.bf16 %v1085_v1  ;;  %v1086_v9 = vunpack.i.l.bf16 %v1085_v1  ;;  %v1080_v10 = vpop.permute.xlu1 %1079 }
 0x11b   : > { %v1082_v12 = vunpack.i.h.bf16 %v1080_v10  ;;  %v1081_v13 = vunpack.i.l.bf16 %v1080_v10  ;;  %881 = vmatpush3.bf16.msra.mxu1 %v514_v5  ;;  %672 = vmatpush1.bf16.msra.mxu0 %v530_v0 }
 0x11c   : > { %v513_v14 = vpack.c.bf16 %v1087_v6, %v1086_v9  ;;  %673 = vmatprep.subr.bf16.mxu0 %v1170_v11 }
 0x11d   : > { %v521_v7 = vpack.c.bf16 %v1082_v12, %v1081_v13  ;;  %v1095_v15 = vpop.permute.xlu0 %1094 }
 0x11e   : > { %v1097_v18 = vunpack.i.h.bf16 %v1095_v15  ;;  %v1096_v19 = vunpack.i.l.bf16 %v1095_v15  ;;  %v1090_v20 = vpop.permute.xlu1 %1089 }
 0x11f   : > { %v1092_v21 = vunpack.i.h.bf16 %v1090_v20  ;;  %v1091_v22 = vunpack.i.l.bf16 %v1090_v20  ;;  %882 = vmatprep.subr.bf16.mxu1 %v521_v7 }
 0x120   : > { %v520_v23 = vpack.c.bf16 %v1097_v18, %v1096_v19  ;;  %883 = vmatpush3.bf16.msra.mxu1 %v513_v14 }
 0x121   : > { %v529_v24 = vpack.c.bf16 %v1092_v21, %v1091_v22  ;;  %v1100_v25 = vpop.permute.xlu0 %1099 }
 0x122   : > { %v1102_v27 = vunpack.i.h.bf16 %v1100_v25  ;;  %v1101_v28 = vunpack.i.l.bf16 %v1100_v25  ;;  %v1110_v29 = vpop.permute.xlu1 %1109  ;;  %884 = vmatprep.subr.bf16.mxu1 %v520_v23 }
 0x123   : > { %v1112_v30 = vunpack.i.h.bf16 %v1110_v29  ;;  %v1111_v31 = vunpack.i.l.bf16 %v1110_v29  ;;  %674 = vmatpush1.bf16.msra.mxu0 %v529_v24 }
 0x124   : > { %v528_v32 = vpack.c.bf16 %v1102_v27, %v1101_v28  ;;  %885 = vmatpush3.bf16.msra.mxu1 %v512_v26  ;;  %675 = vmatprep.subr.bf16.mxu0 %v1170_v11 }
 0x125   : > { %v519_v8 = vpack.c.bf16 %v1112_v30, %v1111_v31  ;;  %v1105_v33 = vpop.permute.xlu0 %1104 }
 0x126   : > { %v1107_v34 = vunpack.i.h.bf16 %v1105_v33  ;;  %v1106_v35 = vunpack.i.l.bf16 %v1105_v33  ;;  %v1115_v36 = vpop.permute.xlu1 %1114 }
 0x127   : > { %v1117_v37 = vunpack.i.h.bf16 %v1115_v36  ;;  %v1116_v38 = vunpack.i.l.bf16 %v1115_v36  ;;  %676 = vmatpush1.bf16.msra.mxu0 %v528_v32  ;;  %886 = vmatprep.subr.bf16.mxu1 %v519_v8 }
 0x128   : > { %v511_v39 = vpack.c.bf16 %v1107_v34, %v1106_v35  ;;  %677 = vmatprep.subr.bf16.mxu0 %v1170_v11 }
 0x129   : > { %v527_v40 = vpack.c.bf16 %v1117_v37, %v1116_v38  ;;  %v1120_v41 = vpop.permute.xlu0 %1119 }
 0x12a   : > { %v1122_v43 = vunpack.i.h.bf16 %v1120_v41  ;;  %v1121_v44 = vunpack.i.l.bf16 %v1120_v41  ;;  %887 = vmatpush3.bf16.msra.mxu1 %v511_v39 }
 0x12b   : > { %678 = vmatpush1.bf16.msra.mxu0 %v527_v40 }
 0x12c   : > { %v535_v45 = vpack.c.bf16 %v1122_v43, %v1121_v44  ;;  %693 = vmatprep.subr.bf16.mxu0 %v1170_v11 }
 0x12d   : > { %655 = vmatmul.mubr.bf16.vlgmr.msra.gmra.mxu1 %v1130_v42 }
 0x12f   : > { %694 = vmatpush2.bf16.msra.mxu0 %v535_v45 }
 0x132   : > { %696 = vmatmul.mubr.bf16.vlgmr.msra.gmra.mxu0 %v1133_v46 }
 0x133   : > { %v541_v52 = vpop.permute.xlu1 %540 }
 0x136   : > { %v546_v11 = vpop.permute.xlu0 %545 }
 0x16e   : > { %v866_v47 = vpop.f32.mrf.mxu1 }
 0x170   : > { %v867_v48 = vpop.f32.mrf.mxu1 }
 0x171   : > { %v868_v51 = vadd.f32 %v867_v48, %v866_v47 }
 0x172   : > { %v869_v49 = vpop.f32.mrf.mxu1 }
 0x173   : > { %v616_v56 = vadd.f32 %v868_v51, %v541_v52 }
 0x174   : > { %v870_v50 = vpop.f32.mrf.mxu1 }
 0x175   : > { %v871_v55 = vadd.f32 %v870_v50, %v869_v49 }
 0x177   : > { %v619_v62 = vadd.f32 %v871_v55, %v546_v11 }
 0x1ed   : > { %v888_v53 = vpop.f32.mrf.mxu1 }
 0x1ef   : > { %v889_v54 = vpop.f32.mrf.mxu1 }
 0x1f0   : > { %v890_v57 = vadd.f32 %v889_v54, %v888_v53 }
 0x1f1   : > { %v891_v58 = vpop.f32.mrf.mxu1 }
 0x1f2   : > { %v657_v59 = vadd.f32 %v890_v57, %v616_v56  ;;  %v697_v60 = vpop.f32.mrf.mxu0 }
 0x1f3   : > { %v892_v61 = vpop.f32.mrf.mxu1 }
 0x1f4   : > { %v698_v63 = vadd.f32 %v697_v60, %v657_v59  ;;  %v893_v2 = vadd.f32 %v892_v61, %v891_v58  ;;  %v699_v3 = vpop.f32.mrf.mxu0 }
 0x1f6   : > { %vm704_vm1 = vcmp.ge.f32.partialorder %v698_v63, 0.0  ;;  %v706_v4 = vmul.f32 0.1, %v698_v63  ;;  %v660_v0 = vadd.f32 %v893_v2, %v619_v62  ;;  %v700_v5 = vpop.f32.mrf.mxu0 }
 0x1f8   : > { %v708_v1 = vsel %vm704_vm1, %v698_v63, %v706_v4  ;;  %v701_v6 = vadd.f32 %v700_v5, %v660_v0  ;;  %v702_v9 = vpop.f32.mrf.mxu0 }
 0x1f9   : > { %711 = vst.msk [vmem:[%s239_s25] sm:$0xff] %vm710_vm2, %v708_v1 }
 0x1fa   : > { %vm705_vm3 = vcmp.ge.f32.partialorder %v701_v6, 0.0  ;;  %v707_v10 = vmul.f32 0.1, %v701_v6 }
 0x1fc   : > { %v709_v12 = vsel %vm705_vm3, %v701_v6, %v707_v10 }
 0x1fd   : > { %712 = vst.msk [vmem:[%s239_s25 + $0x8] sm:$0xff] %vm710_vm2, %v709_v12 }
 0x1fe PF: > { %s13_s14 = sadd.s32 1, %s1160_s14   ;;  %s1332_s12 = smov %s1156_s13 }
 0x1ff   : > { %p10_p5 = scmp.ge.s32.totalorder %s13_s14, 4   ;;  %s1333_s13 = smov %s1335_s15 }
 0x201   :  { %12 = sbr.rel (!%p10_p5) target bundleno = 2 (0x2), region = 69 }

// kernel: _lambda_.18
= control target key start
LH: loop header
LB: loop body
LE: loop exit
PB: predicated region body
PF: predicated region fallthrough
CT: control target
= control target key end

     0   :  { %s1320_s12 = smov 0   ;;  %s1322_s13 = smov 0   ;;  %s1503_s0 = inlined_call_operand.vmem [shape: bf16[2,2,16,52], index: 0, kind: input, shape index: {}]   ;;  %s1504_s1 = inlined_call_operand.vmem [shape: bf16[32,656], index: 1, kind: input, shape index: {}]   ;;  %s1505_s2 = inlined_call_operand.vmem [shape: f32[32,1], index: 2, kind: input, shape index: {}]   ;;  %s1506_s3 = inlined_call_operand.vmem [shape: f32[2,32,32], index: 3, kind: output, shape index: {}]  }
   0x1   :  { %s1324_s14 = smov 0  }
   0x2 LB: > { %s22_s15 = sadd.s32 1, %s1284_s13  ;;  %p912_p0 = scmp.ge.s32.totalorder %s1288_s14, 1  ;;  %s1288_s14 = sphi %s1324_s14, %s13_s14   ;;  %s1284_s13 = sphi %s1322_s13, %s1508_s13   ;;  %s1280_s12 = sphi %s1320_s12, %s1507_s12  }
   0x3   : > { %p23_p1 = scmp.ge.s32.totalorder %s22_s15, 2  ;;  %p174_p2 = scmp.lt.s32.totalorder %s1288_s14, 3 }
   0x5   : > { %s1510_s15 = smov (%p23_p1, %s22_s15), 0  ;;  %p175_p3 = pnand %p912_p0, %p174_p2 }
   0x6   : > { %p213_p4 = scmp.lt.s32.totalorder (!%p175_p3), %s1280_s12, 1  ;;  %s1290_s20 = smov (!%p175_p3), 121  }
   0x7   : > { %178 = sbr.rel (%p175_p3) target bundleno = 528 (0x210), region = 32  ;;  %s1291_s21 = smov (!%p175_p3), 125  }
   0x8   : > { %s1292_s22 = smov (!%p175_p3), 122   ;;  %s1293_s23 = smov (!%p175_p3), 126  }
   0x9   : > { %s1294_s24 = smov (!%p175_p3), 123   ;;  %s1295_s25 = smov (!%p175_p3), 127  }
   0xa   : > { %s1296_s26 = smov (!%p175_p3), 124   ;;  %s1297_s27 = smov (!%p175_p3), 120  }
   0xb   : > { %s1299_s7 = smov (!%p175_p3), 112  }
   0xc   : > { %s1512_s12 = smov (!%p213_p4, %s1280_s12), 1  ;;  %v1248_v57 = vld [vmem:[%s1504_s1 + $0x4] ss:$24 sps:$4 sm:$0xff]   ;;  %vm624_vm0 = vcmask 130048   ;;  %vm790_vm2 = vcmask 261120  }
   0xd   : > { %s937_s16 = sshll.u32 %s1512_s12, 4  ;;  %663 = vmatprep.mubr.bf16.mxu0 %v1248_v57  ;;  %s938_s11 = sshll.u32 %s1512_s12, 5 }
   0xe   : > { %s217_s19 = scalar_lea.vmem %s1503_s0, %s937_s16  ;;  %s239_s18 = scalar_lea.vmem %s1506_s3, %s938_s11 }
   0xf   : > { %v1344_v0 = vld [vmem:[%s217_s19 + $0x8] sm:$0xff]   ;;  %v1346_v1 = vld [vmem:[%s217_s19] sm:$0xff]  }
  0x10   : > { %v249_v2 = vunpack.c.l.bf16 %v1344_v0  ;;  %v250_v3 = vunpack.c.h.bf16 %v1344_v0  ;;  %v244_v4 = vunpack.c.l.bf16 %v1346_v1  ;;  %v245_v5 = vunpack.c.h.bf16 %v1346_v1 }
  0x12   : > { %v1352_v6 = vpack.i.bf16 %v250_v3, %v249_v2  ;;  %v1354_v7 = vpack.i.bf16 %v245_v5, %v244_v4  ;;  %v1251_v2 = vld [vmem:[%s1504_s1 + $0xc] ss:$24 sps:$4 sm:$0xff]   ;;  %v1298_v4 = vmov 0   ;;  %v1246_v5 = vld [vmem:[%s1504_s1] ss:$24 sps:$4 sm:$0xff]  }
  0x13   : > { %712 = vmatprep.mubr.bf16.mxu1 %v1251_v2  ;;  %1242 = vset.pattern.permute.xlu1 %v1298_v4 }
  0x14   : > { %1048 = vrot.lane.b32.xlu0 %v1352_v6, %s1290_s20  ;;  %1058 = vrot.lane.b32.xlu1 %v1354_v7, %s1290_s20 }
  0x15   : > { %1243 = vset.pattern.permute.xlu0 %v1298_v4 }
  0x18   : > { %1053 = vrot.lane.b32.xlu0 %v1352_v6, %s1291_s21  ;;  %1063 = vrot.lane.b32.xlu1 %v1354_v7, %s1291_s21 }
  0x1c   : > { %1068 = vrot.lane.b32.xlu0 %v1352_v6, %s1292_s22  ;;  %1073 = vrot.lane.b32.xlu1 %v1352_v6, %s1293_s23 }
  0x20   : > { %1078 = vrot.lane.b32.xlu0 %v1354_v7, %s1292_s22  ;;  %1083 = vrot.lane.b32.xlu1 %v1354_v7, %s1293_s23 }
  0x24   : > { %1088 = vrot.lane.b32.xlu0 %v1352_v6, %s1294_s24  ;;  %1093 = vrot.lane.b32.xlu1 %v1352_v6, %s1295_s25 }
  0x28   : > { %1098 = vrot.lane.b32.xlu0 %v1354_v7, %s1294_s24  ;;  %1103 = vrot.lane.b32.xlu1 %v1354_v7, %s1295_s25 }
  0x2c   : > { %1108 = vrot.lane.b32.xlu0 %v1352_v6, %s1296_s26  ;;  %1113 = vrot.lane.b32.xlu1 %v1354_v7, %s1296_s26 }
  0x86   : > { %v1049_v8 = vpop.permute.xlu0 %1048  ;;  %v1059_v9 = vpop.permute.xlu1 %1058 }
  0x87   : > { %v1051_v10 = vunpack.i.h.bf16 %v1049_v8  ;;  %v1050_v11 = vunpack.i.l.bf16 %v1049_v8  ;;  %v1061_v12 = vunpack.i.h.bf16 %v1059_v9  ;;  %v1060_v13 = vunpack.i.l.bf16 %v1059_v9  ;;  %1118 = vrot.lane.b32.xlu0 %v1049_v8, %s1297_s27  ;;  %v1260_v8 = vld [vmem:[%s1504_s1 + $0x14] ss:$24 sps:$4 sm:$0xff]  }
  0x89   : > { %v516_v14 = vpack.c.bf16 %v1051_v10, %v1050_v11  ;;  %v515_v21 = vpack.c.bf16 %v1061_v12, %v1060_v13  ;;  %v545_v10 = vld [vmem:[%s1505_s2 + $0x18] sm:$0xff] }
  0x8a   : > { %v1370_v15 = vpop.permute.xlu0 %1053  ;;  %v1372_v16 = vpop.permute.xlu1 %1063 }
  0x8b   : > { %v1056_v17 = vunpack.i.h.bf16 %v1370_v15  ;;  %v1055_v18 = vunpack.i.l.bf16 %v1370_v15  ;;  %939 = vmatprep.subr.bf16.mxu0 %v516_v14  ;;  %v1066_v19 = vunpack.i.h.bf16 %v1372_v16  ;;  %v1065_v20 = vunpack.i.l.bf16 %v1372_v16  ;;  %1123 = vrot.lane.b32.xlu1 %v1370_v15, %s1297_s27 }
  0x8c   : > { %1128 = vrot.lane.b32.xlu0 %v1059_v9, %s1297_s27  ;;  %v542_v9 = vld [vmem:[%s1505_s2] sm:$0xff] }
  0x8d   : > { %v508_v22 = vpack.c.bf16 %v1056_v17, %v1055_v18  ;;  %v507_v25 = vpack.c.bf16 %v1066_v19, %v1065_v20 }
  0x8e   : > { %v1069_v23 = vpop.permute.xlu0 %1068  ;;  %v1379_v24 = vpop.permute.xlu1 %1073 }
  0x8f   : > { %v1071_v26 = vunpack.i.h.bf16 %v1069_v23  ;;  %v1070_v27 = vunpack.i.l.bf16 %v1069_v23  ;;  %940 = vmatpush3.bf16.msra.mxu0 %v508_v22  ;;  %v1076_v28 = vunpack.i.h.bf16 %v1379_v24  ;;  %v1075_v29 = vunpack.i.l.bf16 %v1379_v24  ;;  %1133 = vrot.lane.b32.xlu1 %v1372_v16, %s1297_s27 }
  0x90   : > { %941 = vmatprep.subr.bf16.mxu0 %v515_v21  ;;  %1138 = vrot.lane.b32.xlu0 %v1069_v23, %s1297_s27 }
  0x91   : > { %v514_v30 = vpack.c.bf16 %v1071_v26, %v1070_v27  ;;  %v506_v33 = vpack.c.bf16 %v1076_v28, %v1075_v29 }
  0x92   : > { %v1079_v31 = vpop.permute.xlu0 %1078  ;;  %v1386_v32 = vpop.permute.xlu1 %1083 }
  0x93   : > { %v1081_v34 = vunpack.i.h.bf16 %v1079_v31  ;;  %v1080_v35 = vunpack.i.l.bf16 %v1079_v31  ;;  %942 = vmatpush3.bf16.msra.mxu0 %v507_v25  ;;  %v1086_v36 = vunpack.i.h.bf16 %v1386_v32  ;;  %v1085_v37 = vunpack.i.l.bf16 %v1386_v32  ;;  %1143 = vrot.lane.b32.xlu1 %v1379_v24, %s1297_s27 }
  0x94   : > { %943 = vmatprep.subr.bf16.mxu0 %v514_v30  ;;  %1148 = vrot.lane.b32.xlu0 %v1079_v31, %s1297_s27 }
  0x95   : > { %v513_v38 = vpack.c.bf16 %v1081_v34, %v1080_v35  ;;  %v505_v41 = vpack.c.bf16 %v1086_v36, %v1085_v37 }
  0x96   : > { %v1089_v39 = vpop.permute.xlu0 %1088  ;;  %v1094_v40 = vpop.permute.xlu1 %1093 }
  0x97   : > { %v1091_v42 = vunpack.i.h.bf16 %v1089_v39  ;;  %v1090_v43 = vunpack.i.l.bf16 %v1089_v39  ;;  %944 = vmatpush3.bf16.msra.mxu0 %v506_v33  ;;  %v1096_v44 = vunpack.i.h.bf16 %v1094_v40  ;;  %v1095_v45 = vunpack.i.l.bf16 %v1094_v40  ;;  %1153 = vrot.lane.b32.xlu1 %v1386_v32, %s1297_s27 }
  0x98   : > { %945 = vmatprep.subr.bf16.mxu0 %v513_v38  ;;  %1158 = vrot.lane.b32.xlu0 %v1089_v39, %s1297_s27 }
  0x99   : > { %v512_v46 = vpack.c.bf16 %v1091_v42, %v1090_v43  ;;  %v504_v49 = vpack.c.bf16 %v1096_v44, %v1095_v45 }
  0x9a   : > { %v1099_v47 = vpop.permute.xlu0 %1098  ;;  %v1104_v48 = vpop.permute.xlu1 %1103 }
  0x9b   : > { %v1101_v50 = vunpack.i.h.bf16 %v1099_v47  ;;  %v1100_v51 = vunpack.i.l.bf16 %v1099_v47  ;;  %946 = vmatpush3.bf16.msra.mxu0 %v505_v41  ;;  %v1106_v52 = vunpack.i.h.bf16 %v1104_v48  ;;  %v1105_v53 = vunpack.i.l.bf16 %v1104_v48  ;;  %1163 = vrot.lane.b32.xlu1 %v1094_v40, %s1297_s27 }
  0x9c   : > { %947 = vmatprep.subr.bf16.mxu0 %v512_v46  ;;  %1168 = vrot.lane.b32.xlu0 %v1099_v47, %s1297_s27 }
  0x9d   : > { %v511_v54 = vpack.c.bf16 %v1101_v50, %v1100_v51  ;;  %v503_v60 = vpack.c.bf16 %v1106_v52, %v1105_v53 }
  0x9e   : > { %v1109_v55 = vpop.permute.xlu0 %1108  ;;  %v1114_v56 = vpop.permute.xlu1 %1113 }
  0x9f   : > { %v1111_v58 = vunpack.i.h.bf16 %v1109_v55  ;;  %v1110_v59 = vunpack.i.l.bf16 %v1109_v55  ;;  %948 = vmatpush3.bf16.msra.mxu0 %v504_v49  ;;  %v1116_v61 = vunpack.i.h.bf16 %v1114_v56  ;;  %v1115_v62 = vunpack.i.l.bf16 %v1114_v56  ;;  %1173 = vrot.lane.b32.xlu1 %v1104_v48, %s1297_s27 }
  0xa0   : > { %949 = vmatprep.subr.bf16.mxu0 %v511_v54  ;;  %1183 = vrot.lane.b32.xlu0 %v1109_v55, %s1297_s27 }
  0xa1   : > { %v510_v63 = vpack.c.bf16 %v1111_v58, %v1110_v59  ;;  %v509_v3 = vpack.c.bf16 %v1116_v61, %v1115_v62 }
  0xa3   : > { %950 = vmatpush3.bf16.msra.mxu0 %v503_v60  ;;  %1178 = vrot.lane.b32.xlu1 %v1352_v6, %s1297_s27 }
  0xa4   : > { %951 = vmatprep.subr.bf16.mxu0 %v510_v63  ;;  %1188 = vrot.lane.b32.xlu0 %v1114_v56, %s1297_s27 }
  0xa7   : > { %952 = vmatpush3.bf16.msra.mxu0 %v1344_v0  ;;  %1193 = vrot.lane.b32.xlu1 %v1354_v7, %s1297_s27  ;;  %v1252_v0 = vld [vmem:[%s1504_s1 + $0x34] ss:$24 sps:$4 sm:$0xff]  }
  0xa8   : > { %953 = vmatprep.subr.bf16.mxu0 %v509_v3  ;;  %1198 = vrot.lane.b32.xlu0 %v1370_v15, %s1299_s7 }
  0xab   : > { %954 = vmatpush3.bf16.msra.mxu0 %v1346_v1  ;;  %1203 = vrot.lane.b32.xlu1 %v1372_v16, %s1299_s7  ;;  %v1254_v1 = vld [vmem:[%s1504_s1 + $0x30] ss:$24 sps:$4 sm:$0xff]  }
  0xac   : > { %729 = vmatprep.subr.bf16.mxu0 %v1298_v4  ;;  %1208 = vrot.lane.b32.xlu0 %v1379_v24, %s1299_s7 }
  0xae   : > { %664 = vmatmul.mubr.bf16.vlgmr.msra.gmra.mxu0 %v1246_v5 }
  0xaf   : > { %1213 = vrot.lane.b32.xlu1 %v1386_v32, %s1299_s7  ;;  %671 = vmatprep.mubr.bf16.mxu0 %v1252_v0 }
  0xb0   : > { %1218 = vrot.lane.b32.xlu0 %v1094_v40, %s1299_s7 }
  0xb3   : > { %1223 = vrot.lane.b32.xlu1 %v1104_v48, %s1299_s7 }
  0xb4   : > { %1228 = vrot.lane.b32.xlu0 %v1352_v6, %s1299_s7  ;;  %v543_v6 = vld [vmem:[%s1505_s2 + $0x8] sm:$0xff] }
  0xb6   : > { %672 = vmatmul.mubr.bf16.gmra.mxu0 %v1254_v1 }
  0xb7   : > { %1233 = vrot.lane.b32.xlu1 %v1354_v7, %s1299_s7  ;;  %933 = vmatprep.mubr.msk.bf16.mxu0 %vm624_vm0, %v1260_v8  ;;  %v544_v7 = vld [vmem:[%s1505_s2 + $0x10] sm:$0xff] }
  0xb8   : > { %1238 = vrot.lane.b32.xlu0 %v1114_v56, %s1299_s7 }
  0xbb   : > { %548 = vperm.xlu1 %1242, %v542_v9  }
  0xbc   : > { %553 = vperm.xlu0 %1243, %v543_v6  }
  0xbf   : > { %558 = vperm.xlu1 %1242, %v544_v7  }
  0xc3   : > { %563 = vperm.xlu1 %1242, %v545_v10  }
  0xf9   : > { %v1119_v11 = vpop.permute.xlu0 %1118 }
  0xfa   : > { %v1121_v12 = vunpack.i.h.bf16 %v1119_v11  ;;  %v1120_v13 = vunpack.i.l.bf16 %v1119_v11 }
  0xfc   : > { %v532_v14 = vpack.c.bf16 %v1121_v12, %v1120_v13 }
  0xfd   : > { %v1124_v15 = vpop.permute.xlu1 %1123 }
  0xfe   : > { %v1126_v16 = vunpack.i.h.bf16 %v1124_v15  ;;  %v1125_v17 = vunpack.i.l.bf16 %v1124_v15  ;;  %v1129_v18 = vpop.permute.xlu0 %1128  ;;  %967 = vmatprep.subr.bf16.mxu1 %v532_v14 }
  0xff   : > { %v1131_v19 = vunpack.i.h.bf16 %v1129_v18  ;;  %v1130_v20 = vunpack.i.l.bf16 %v1129_v18 }
 0x100   : > { %v524_v21 = vpack.c.bf16 %v1126_v16, %v1125_v17  ;;  %v1249_v17 = vld [vmem:[%s1504_s1 + $0x8] ss:$24 sps:$4 sm:$0xff]  }
 0x101   : > { %v531_v22 = vpack.c.bf16 %v1131_v19, %v1130_v20  ;;  %v1134_v23 = vpop.permute.xlu1 %1133 }
 0x102   : > { %v1136_v24 = vunpack.i.h.bf16 %v1134_v23  ;;  %v1135_v25 = vunpack.i.l.bf16 %v1134_v23  ;;  %v1139_v26 = vpop.permute.xlu0 %1138  ;;  %968 = vmatpush3.bf16.msra.mxu1 %v524_v21  ;;  %v1255_v21 = vld [vmem:[%s1504_s1 + $0x3c] ss:$24 sps:$4 sm:$0xff]  }
 0x103   : > { %v1141_v27 = vunpack.i.h.bf16 %v1139_v26  ;;  %v1140_v28 = vunpack.i.l.bf16 %v1139_v26  ;;  %969 = vmatprep.subr.bf16.mxu1 %v531_v22 }
 0x104   : > { %v523_v29 = vpack.c.bf16 %v1136_v24, %v1135_v25 }
 0x105   : > { %v530_v30 = vpack.c.bf16 %v1141_v27, %v1140_v28  ;;  %v1144_v31 = vpop.permute.xlu1 %1143 }
 0x106   : > { %v1146_v32 = vunpack.i.h.bf16 %v1144_v31  ;;  %v1145_v33 = vunpack.i.l.bf16 %v1144_v31  ;;  %v1149_v34 = vpop.permute.xlu0 %1148  ;;  %970 = vmatpush3.bf16.msra.mxu1 %v523_v29  ;;  %v1257_v29 = vld [vmem:[%s1504_s1 + $0x38] ss:$24 sps:$4 sm:$0xff]   ;;  %v1263_v31 = vld [vmem:[%s1504_s1 + $0x44] ss:$24 sps:$4 sm:$0xff]  }
 0x107   : > { %v1151_v35 = vunpack.i.h.bf16 %v1149_v34  ;;  %v1150_v36 = vunpack.i.l.bf16 %v1149_v34  ;;  %971 = vmatprep.subr.bf16.mxu1 %v530_v30 }
 0x108   : > { %v522_v37 = vpack.c.bf16 %v1146_v32, %v1145_v33 }
 0x109   : > { %v529_v38 = vpack.c.bf16 %v1151_v35, %v1150_v36  ;;  %v1154_v39 = vpop.permute.xlu1 %1153 }
 0x10a   : > { %v1156_v40 = vunpack.i.h.bf16 %v1154_v39  ;;  %v1155_v41 = vunpack.i.l.bf16 %v1154_v39  ;;  %v1159_v42 = vpop.permute.xlu0 %1158  ;;  %972 = vmatpush3.bf16.msra.mxu1 %v522_v37 }
 0x10b   : > { %v1161_v43 = vunpack.i.h.bf16 %v1159_v42  ;;  %v1160_v44 = vunpack.i.l.bf16 %v1159_v42  ;;  %973 = vmatprep.subr.bf16.mxu1 %v529_v38 }
 0x10c   : > { %v521_v45 = vpack.c.bf16 %v1156_v40, %v1155_v41 }
 0x10d   : > { %v528_v46 = vpack.c.bf16 %v1161_v43, %v1160_v44  ;;  %v1164_v47 = vpop.permute.xlu1 %1163 }
 0x10e   : > { %v1166_v48 = vunpack.i.h.bf16 %v1164_v47  ;;  %v1165_v49 = vunpack.i.l.bf16 %v1164_v47  ;;  %v1169_v50 = vpop.permute.xlu0 %1168  ;;  %974 = vmatpush3.bf16.msra.mxu1 %v521_v45 }
 0x10f   : > { %v1171_v51 = vunpack.i.h.bf16 %v1169_v50  ;;  %v1170_v52 = vunpack.i.l.bf16 %v1169_v50  ;;  %975 = vmatprep.subr.bf16.mxu1 %v528_v46 }
 0x110   : > { %v520_v53 = vpack.c.bf16 %v1166_v48, %v1165_v49 }
 0x111   : > { %v527_v54 = vpack.c.bf16 %v1171_v51, %v1170_v52  ;;  %v1174_v55 = vpop.permute.xlu1 %1173  ;;  %v1258_v52 = vld [vmem:[%s1504_s1 + $0x10] ss:$24 sps:$4 sm:$0xff]  }
 0x112   : > { %v1176_v56 = vunpack.i.h.bf16 %v1174_v55  ;;  %v1175_v57 = vunpack.i.l.bf16 %v1174_v55  ;;  %v1184_v58 = vpop.permute.xlu0 %1183  ;;  %976 = vmatpush3.bf16.msra.mxu1 %v520_v53  ;;  %v1261_v53 = vld [vmem:[%s1504_s1 + $0x40] ss:$24 sps:$4 sm:$0xff]  }
 0x113   : > { %v1186_v59 = vunpack.i.h.bf16 %v1184_v58  ;;  %v1185_v60 = vunpack.i.l.bf16 %v1184_v58  ;;  %977 = vmatprep.subr.bf16.mxu1 %v527_v54 }
 0x114   : > { %v519_v61 = vpack.c.bf16 %v1176_v56, %v1175_v57 }
 0x115   : > { %v526_v62 = vpack.c.bf16 %v1186_v59, %v1185_v60  ;;  %v1179_v63 = vpop.permute.xlu1 %1178 }
 0x116   : > { %v1181_v2 = vunpack.i.h.bf16 %v1179_v63  ;;  %v1180_v3 = vunpack.i.l.bf16 %v1179_v63  ;;  %v1189_v5 = vpop.permute.xlu0 %1188  ;;  %978 = vmatpush3.bf16.msra.mxu1 %v519_v61 }
 0x117   : > { %v1191_v0 = vunpack.i.h.bf16 %v1189_v5  ;;  %v1190_v1 = vunpack.i.l.bf16 %v1189_v5  ;;  %979 = vmatprep.subr.bf16.mxu1 %v526_v62 }
 0x118   : > { %v518_v8 = vpack.c.bf16 %v1181_v2, %v1180_v3 }
 0x119   : > { %v525_v9 = vpack.c.bf16 %v1191_v0, %v1190_v1  ;;  %v1194_v6 = vpop.permute.xlu1 %1193 }
 0x11a   : > { %v1196_v7 = vunpack.i.h.bf16 %v1194_v6  ;;  %v1195_v10 = vunpack.i.l.bf16 %v1194_v6  ;;  %v1199_v11 = vpop.permute.xlu0 %1198  ;;  %980 = vmatpush3.bf16.msra.mxu1 %v518_v8 }
 0x11b   : > { %v1201_v12 = vunpack.i.h.bf16 %v1199_v11  ;;  %v1200_v13 = vunpack.i.l.bf16 %v1199_v11  ;;  %981 = vmatprep.subr.bf16.mxu1 %v525_v9 }
 0x11c   : > { %v517_v14 = vpack.c.bf16 %v1196_v7, %v1195_v10 }
 0x11d   : > { %v540_v15 = vpack.c.bf16 %v1201_v12, %v1200_v13  ;;  %v1204_v16 = vpop.permute.xlu1 %1203 }
 0x11e   : > { %v1206_v18 = vunpack.i.h.bf16 %v1204_v16  ;;  %v1205_v19 = vunpack.i.l.bf16 %v1204_v16  ;;  %v1209_v20 = vpop.permute.xlu0 %1208  ;;  %982 = vmatpush3.bf16.msra.mxu1 %v517_v14 }
 0x11f   : > { %730 = vmatpush1.bf16.msra.mxu0 %v540_v15  ;;  %995 = vmatprep.subr.bf16.mxu1 %v1298_v4  ;;  %v1211_v23 = vunpack.i.h.bf16 %v1209_v20  ;;  %v1210_v24 = vunpack.i.l.bf16 %v1209_v20 }
 0x120   : > { %v539_v22 = vpack.c.bf16 %v1206_v18, %v1205_v19  ;;  %731 = vmatprep.subr.bf16.mxu0 %v1298_v4 }
 0x121   : > { %713 = vmatmul.mubr.bf16.vlgmr.msra.gmra.mxu1 %v1249_v17  ;;  %v1214_v25 = vpop.permute.xlu1 %1213  ;;  %v538_v26 = vpack.c.bf16 %v1211_v23, %v1210_v24 }
 0x122   : > { %1004 = vmatpush1.bf16.msra.mxu1 %v540_v15  ;;  %720 = vmatprep.mubr.bf16.mxu1 %v1255_v21  ;;  %v1216_v27 = vunpack.i.h.bf16 %v1214_v25  ;;  %v1215_v28 = vunpack.i.l.bf16 %v1214_v25  ;;  %v1219_v30 = vpop.permute.xlu0 %1218 }
 0x123   : > { %732 = vmatpush1.bf16.msra.mxu0 %v539_v22  ;;  %996 = vmatprep.subr.bf16.mxu1 %v1298_v4  ;;  %v1221_v33 = vunpack.i.h.bf16 %v1219_v30  ;;  %v1220_v34 = vunpack.i.l.bf16 %v1219_v30 }
 0x124   : > { %733 = vmatprep.subr.bf16.mxu0 %v1298_v4  ;;  %v537_v32 = vpack.c.bf16 %v1216_v27, %v1215_v28 }
 0x125   : > { %v1224_v35 = vpop.permute.xlu1 %1223  ;;  %v536_v36 = vpack.c.bf16 %v1221_v33, %v1220_v34 }
 0x126   : > { %1005 = vmatpush1.bf16.msra.mxu1 %v539_v22  ;;  %v1226_v37 = vunpack.i.h.bf16 %v1224_v35  ;;  %v1225_v38 = vunpack.i.l.bf16 %v1224_v35  ;;  %v1229_v39 = vpop.permute.xlu0 %1228 }
 0x127   : > { %734 = vmatpush1.bf16.msra.mxu0 %v538_v26  ;;  %997 = vmatprep.subr.bf16.mxu1 %v1298_v4  ;;  %v1231_v40 = vunpack.i.h.bf16 %v1229_v39  ;;  %v1230_v41 = vunpack.i.l.bf16 %v1229_v39 }
 0x128   : > { %735 = vmatprep.subr.bf16.mxu0 %v1298_v4  ;;  %v535_v43 = vpack.c.bf16 %v1226_v37, %v1225_v38 }
 0x129   : > { %721 = vmatmul.mubr.bf16.gmra.mxu1 %v1257_v29  ;;  %v1234_v42 = vpop.permute.xlu1 %1233  ;;  %v534_v44 = vpack.c.bf16 %v1231_v40, %v1230_v41 }
 0x12a   : > { %1006 = vmatpush1.bf16.msra.mxu1 %v538_v26  ;;  %934 = vmatprep.mubr.msk.bf16.mxu1 %vm624_vm0, %v1263_v31  ;;  %v1236_v45 = vunpack.i.h.bf16 %v1234_v42  ;;  %v1235_v46 = vunpack.i.l.bf16 %v1234_v42  ;;  %v1239_v47 = vpop.permute.xlu0 %1238 }
 0x12b   : > { %736 = vmatpush1.bf16.msra.mxu0 %v537_v32  ;;  %998 = vmatprep.subr.bf16.mxu1 %v1298_v4  ;;  %v1241_v49 = vunpack.i.h.bf16 %v1239_v47  ;;  %v1240_v50 = vunpack.i.l.bf16 %v1239_v47 }
 0x12c   : > { %737 = vmatprep.subr.bf16.mxu0 %v1298_v4  ;;  %v533_v48 = vpack.c.bf16 %v1236_v45, %v1235_v46 }
 0x12d   : > { %v541_v51 = vpack.c.bf16 %v1241_v49, %v1240_v50 }
 0x12e   : > { %1007 = vmatpush1.bf16.msra.mxu1 %v537_v32 }
 0x12f   : > { %738 = vmatpush1.bf16.msra.mxu0 %v536_v36  ;;  %999 = vmatprep.subr.bf16.mxu1 %v1298_v4 }
 0x130   : > { %739 = vmatprep.subr.bf16.mxu0 %v1298_v4 }
 0x132   : > { %1008 = vmatpush1.bf16.msra.mxu1 %v536_v36 }
 0x133   : > { %740 = vmatpush1.bf16.msra.mxu0 %v535_v43  ;;  %1000 = vmatprep.subr.bf16.mxu1 %v1298_v4 }
 0x134   : > { %741 = vmatprep.subr.bf16.mxu0 %v1298_v4 }
 0x136   : > { %1009 = vmatpush1.bf16.msra.mxu1 %v535_v43  ;;  %v549_v3 = vpop.permute.xlu1 %548 }
 0x137   : > { %742 = vmatpush1.bf16.msra.mxu0 %v534_v44  ;;  %1001 = vmatprep.subr.bf16.mxu1 %v1298_v4  ;;  %v554_v12 = vpop.permute.xlu0 %553 }
 0x138   : > { %743 = vmatprep.subr.bf16.mxu0 %v1298_v4 }
 0x13a   : > { %1010 = vmatpush1.bf16.msra.mxu1 %v534_v44  ;;  %v559_v1 = vpop.permute.xlu1 %558 }
 0x13b   : > { %744 = vmatpush1.bf16.msra.mxu0 %v533_v48  ;;  %1002 = vmatprep.subr.bf16.mxu1 %v1298_v4 }
 0x13c   : > { %759 = vmatprep.subr.bf16.mxu0 %v1298_v4 }
 0x13e   : > { %1011 = vmatpush1.bf16.msra.mxu1 %v533_v48  ;;  %v564_v17 = vpop.permute.xlu1 %563 }
 0x13f   : > { %760 = vmatpush2.bf16.msra.mxu0 %v541_v51  ;;  %1003 = vmatprep.subr.bf16.mxu1 %v1298_v4 }
 0x142   : > { %762 = vmatmul.mubr.bf16.vlgmr.msra.gmra.mxu0 %v1258_v52  ;;  %1012 = vmatpush2.bf16.msra.mxu1 %v541_v51 }
 0x145   : > { %770 = vmatmul.mubr.bf16.vlgmr.msra.gmra.mxu1 %v1261_v53 }
 0x16e   : > { %v955_v54 = vpop.f32.mrf.mxu0 }
 0x170   : > { %v956_v55 = vpop.f32.mrf.mxu0 }
 0x171   : > { %v957_v4 = vadd.f32 %v956_v55, %v955_v54 }
 0x172   : > { %v958_v57 = vpop.f32.mrf.mxu0 }
 0x173   : > { %v666_v9 = vadd.f32 %v957_v4, %v549_v3 }
 0x174   : > { %v959_v59 = vpop.f32.mrf.mxu0 }
 0x175   : > { %v960_v11 = vadd.f32 %v959_v59, %v958_v57 }
 0x176   : > { %v961_v61 = vpop.f32.mrf.mxu0 }
 0x177   : > { %v669_v21 = vadd.f32 %v960_v11, %v554_v12 }
 0x178   : > { %v962_v63 = vpop.f32.mrf.mxu0 }
 0x179   : > { %v963_v8 = vadd.f32 %v962_v63, %v961_v61 }
 0x17a   : > { %v964_v5 = vpop.f32.mrf.mxu0 }
 0x17b   : > { %v674_v13 = vadd.f32 %v963_v8, %v559_v1 }
 0x17c   : > { %v965_v7 = vpop.f32.mrf.mxu0 }
 0x17d   : > { %v966_v15 = vadd.f32 %v965_v7, %v964_v5 }
 0x17f   : > { %v677_v23 = vadd.f32 %v966_v15, %v564_v17 }
 0x1e1   : > { %v983_v56 = vpop.f32.mrf.mxu1 }
 0x1e3   : > { %v984_v58 = vpop.f32.mrf.mxu1 }
 0x1e4   : > { %v985_v6 = vadd.f32 %v984_v58, %v983_v56 }
 0x1e5   : > { %v986_v60 = vpop.f32.mrf.mxu1 }
 0x1e6   : > { %v715_v19 = vadd.f32 %v985_v6, %v666_v9 }
 0x1e7   : > { %v987_v62 = vpop.f32.mrf.mxu1 }
 0x1e8   : > { %v988_v16 = vadd.f32 %v987_v62, %v986_v60 }
 0x1e9   : > { %v989_v2 = vpop.f32.mrf.mxu1 }
 0x1ea   : > { %v718_v28 = vadd.f32 %v988_v16, %v669_v21 }
 0x1eb   : > { %v990_v0 = vpop.f32.mrf.mxu1 }
 0x1ec   : > { %v991_v14 = vadd.f32 %v990_v0, %v989_v2 }
 0x1ed   : > { %v992_v10 = vpop.f32.mrf.mxu1 }
 0x1ee   : > { %v723_v26 = vadd.f32 %v991_v14, %v674_v13 }
 0x1ef   : > { %v993_v18 = vpop.f32.mrf.mxu1 }
 0x1f0   : > { %v994_v24 = vadd.f32 %v993_v18, %v992_v10 }
 0x1f2   : > { %v726_v37 = vadd.f32 %v994_v24, %v677_v23 }
 0x202   : > { %v763_v20 = vpop.f32.mrf.mxu0 }
 0x203   : > { %v764_v22 = vadd.f32 %v763_v20, %v715_v19 }
 0x204   : > { %v765_v25 = vpop.f32.mrf.mxu0 }
 0x205   : > { %vm778_vm1 = vcmp.ge.f32.partialorder %v764_v22, 0.0  ;;  %v782_v27 = vmul.f32 0.1, %v764_v22  ;;  %v771_v29 = vpop.f32.mrf.mxu1 }
 0x206   : > { %v766_v30 = vpop.f32.mrf.mxu0  ;;  %v772_v31 = vadd.f32 %v771_v29, %v723_v26 }
 0x207   : > { %v786_v32 = vsel %vm778_vm1, %v764_v22, %v782_v27  ;;  %v767_v33 = vadd.f32 %v766_v30, %v718_v28  ;;  %v773_v34 = vpop.f32.mrf.mxu1 }
 0x208   : > { %791 = vst.msk [vmem:[%s239_s18] sm:$0xff] %vm790_vm2, %v786_v32  ;;  %vm780_vm3 = vcmp.ge.f32.partialorder %v772_v31, 0.0  ;;  %v784_v35 = vmul.f32 0.1, %v772_v31  ;;  %v768_v36 = vpop.f32.mrf.mxu0 }
 0x209   : > { %vm779_vm4 = vcmp.ge.f32.partialorder %v767_v33, 0.0  ;;  %v783_v38 = vmul.f32 0.1, %v767_v33  ;;  %v774_v39 = vpop.f32.mrf.mxu1 }
 0x20a   : > { %v788_v40 = vsel %vm780_vm3, %v772_v31, %v784_v35  ;;  %v775_v41 = vadd.f32 %v774_v39, %v726_v37 }
 0x20b   : > { %v787_v42 = vsel %vm779_vm4, %v767_v33, %v783_v38  ;;  %793 = vst.msk [vmem:[%s239_s18 + $0x10] sm:$0xff] %vm790_vm2, %v788_v40  ;;  %v776_v43 = vpop.f32.mrf.mxu1 }
 0x20c   : > { %792 = vst.msk [vmem:[%s239_s18 + $0x8] sm:$0xff] %vm790_vm2, %v787_v42  ;;  %vm781_vm5 = vcmp.ge.f32.partialorder %v775_v41, 0.0  ;;  %v785_v44 = vmul.f32 0.1, %v775_v41 }
 0x20e   : > { %v789_v45 = vsel %vm781_vm5, %v775_v41, %v785_v44 }
 0x20f   : > { %794 = vst.msk [vmem:[%s239_s18 + $0x18] sm:$0xff] %vm790_vm2, %v789_v45 }
 0x210 PF: > { %s13_s14 = sadd.s32 1, %s1288_s14   ;;  %s1507_s12 = smov %s1284_s13 }
 0x211   : > { %p10_p5 = scmp.ge.s32.totalorder %s13_s14, 4   ;;  %s1508_s13 = smov %s1510_s15 }
 0x213   :  { %12 = sbr.rel (!%p10_p5) target bundleno = 2 (0x2), region = 69 }

// kernel: _lambda_.19
= control target key start
LH: loop header
LB: loop body
LE: loop exit
PB: predicated region body
PF: predicated region fallthrough
CT: control target
= control target key end

     0   :  { %s2531_s12 = smov 0   ;;  %s2533_s13 = smov 0   ;;  %s3157_s0 = inlined_call_operand.vmem [shape: bf16[2,4,32,18], index: 0, kind: input, shape index: {}]   ;;  %s3158_s1 = inlined_call_operand.vmem [shape: bf16[64,1312], index: 1, kind: input, shape index: {}]   ;;  %s3159_s2 = inlined_call_operand.vmem [shape: f32[64,1], index: 2, kind: input, shape index: {}]   ;;  %s3160_s3 = inlined_call_operand.vmem [shape: f32[2,64,8], index: 3, kind: output, shape index: {}]  }
   0x1   :  { %s2535_s14 = smov 0  }
   0x2 LB: > { %s22_s15 = sadd.s32 1, %s2499_s13  ;;  %p1688_p0 = scmp.ge.s32.totalorder %s2503_s14, 1  ;;  %s2503_s14 = sphi %s2535_s14, %s13_s14   ;;  %s2499_s13 = sphi %s2533_s13, %s3188_s13   ;;  %s2495_s12 = sphi %s2531_s12, %s3187_s12  }
   0x3   : > { %p23_p1 = scmp.ge.s32.totalorder %s22_s15, 2  ;;  %p174_p2 = scmp.lt.s32.totalorder %s2503_s14, 3 }
   0x5   : > { %s3190_s15 = smov (%p23_p1, %s22_s15), 0  ;;  %p175_p3 = pnand %p1688_p0, %p174_p2 }
   0x7   : > { %178 = sbr.rel (%p175_p3) target bundleno = 575 (0x23f), region = 32 }
   0xc   : > { %p213_p4 = scmp.lt.s32.totalorder %s2495_s12, 1  ;;  %s2505_s20 = smov 125   ;;  %v2411_v32 = vld [vmem:[%s3158_s1 + $0x4] ss:$44 sps:$4 sm:$0xff]   ;;  %v2414_v33 = vld [vmem:[%s3158_s1 + $0xc] ss:$44 sps:$4 sm:$0xff]  }
   0xd   : > { %s2506_s21 = smov 127   ;;  %s2507_s22 = smov 126   ;;  %1180 = vmatprep.mubr.bf16.mxu0 %v2411_v32  ;;  %1245 = vmatprep.mubr.bf16.mxu1 %v2414_v33  ;;  %vm1135_vm0 = vcmask 261120   ;;  %vm1562_vm1 = vcmask 64512  }
   0xe   : > { %s3192_s12 = smov (!%p213_p4, %s2495_s12), 1  ;;  %s2508_s23 = smov 124  }
   0xf   : > { %s1763_s16 = sshll.u32 %s3192_s12, 6  ;;  %s2509_s18 = smov 120  }
  0x10   : > { %s2557_s19 = scalar_lea.vmem %s3157_s0, %s1763_s16 }
  0x11   : > { %v2560_v0 = vld [vmem:[%s2557_s19 + $0x38] sm:$0xff]   ;;  %v2563_v1 = vld [vmem:[%s2557_s19 + $0x30] sm:$0xff]   ;;  %v2570_v6 = vld [vmem:[%s2557_s19 + $0x28] sm:$0xff]  }
  0x12   : > { %v275_v2 = vunpack.c.l.bf16 %v2560_v0  ;;  %v276_v3 = vunpack.c.h.bf16 %v2560_v0  ;;  %v273_v4 = vunpack.c.l.bf16 %v2563_v1  ;;  %v274_v5 = vunpack.c.h.bf16 %v2563_v1  ;;  %v2575_v8 = vld [vmem:[%s2557_s19 + $0x20] sm:$0xff]   ;;  %v2600_v16 = vld [vmem:[%s2557_s19 + $0x18] sm:$0xff]   ;;  %v2609_v19 = vld [vmem:[%s2557_s19 + $0x10] sm:$0xff]  }
  0x13   : > { %v266_v10 = vunpack.c.l.bf16 %v2570_v6  ;;  %v267_v11 = vunpack.c.h.bf16 %v2570_v6  ;;  %v264_v13 = vunpack.c.l.bf16 %v2575_v8  ;;  %v265_v14 = vunpack.c.h.bf16 %v2575_v8  ;;  %v2626_v24 = vld [vmem:[%s2557_s19 + $0x8] sm:$0xff]   ;;  %v2635_v27 = vld [vmem:[%s2557_s19] sm:$0xff]  }
  0x14   : > { %v2572_v7 = vpack.i.bf16 %v276_v3, %v275_v2  ;;  %v2581_v9 = vpack.i.bf16 %v274_v5, %v273_v4  ;;  %v257_v17 = vunpack.c.l.bf16 %v2600_v16  ;;  %v258_v18 = vunpack.c.h.bf16 %v2600_v16 }
  0x15   : > { %v2589_v12 = vpack.i.bf16 %v267_v11, %v266_v10  ;;  %v2597_v15 = vpack.i.bf16 %v265_v14, %v264_v13  ;;  %v255_v21 = vunpack.c.l.bf16 %v2609_v19  ;;  %v256_v22 = vunpack.c.h.bf16 %v2609_v19 }
  0x16   : > { %2040 = vrot.lane.b32.xlu1 %v2572_v7, %s2505_s20  ;;  %2030 = vrot.lane.b32.xlu0 %v2572_v7, %s2506_s21  ;;  %v2615_v20 = vpack.i.bf16 %v258_v18, %v257_v17  ;;  %v248_v25 = vunpack.c.l.bf16 %v2626_v24  ;;  %v249_v26 = vunpack.c.h.bf16 %v2626_v24  ;;  %v246_v29 = vunpack.c.l.bf16 %v2635_v27 }
  0x17   : > { %v2623_v23 = vpack.i.bf16 %v256_v22, %v255_v21  ;;  %v247_v30 = vunpack.c.h.bf16 %v2635_v27 }
  0x18   : > { %v2641_v28 = vpack.i.bf16 %v249_v26, %v248_v25 }
  0x19   : > { %v2649_v31 = vpack.i.bf16 %v247_v30, %v246_v29 }
  0x1a   : > { %2045 = vrot.lane.b32.xlu1 %v2572_v7, %s2507_s22  ;;  %2035 = vrot.lane.b32.xlu0 %v2581_v9, %s2506_s21 }
  0x1e   : > { %2055 = vrot.lane.b32.xlu1 %v2581_v9, %s2505_s20  ;;  %2050 = vrot.lane.b32.xlu0 %v2589_v12, %s2506_s21 }
  0x22   : > { %2060 = vrot.lane.b32.xlu0 %v2581_v9, %s2507_s22  ;;  %2065 = vrot.lane.b32.xlu1 %v2597_v15, %s2506_s21 }
  0x26   : > { %2070 = vrot.lane.b32.xlu0 %v2589_v12, %s2505_s20  ;;  %2075 = vrot.lane.b32.xlu1 %v2589_v12, %s2507_s22 }
  0x2a   : > { %2085 = vrot.lane.b32.xlu1 %v2597_v15, %s2505_s20  ;;  %2080 = vrot.lane.b32.xlu0 %v2615_v20, %s2506_s21 }
  0x2e   : > { %2090 = vrot.lane.b32.xlu0 %v2597_v15, %s2507_s22  ;;  %2095 = vrot.lane.b32.xlu1 %v2623_v23, %s2506_s21 }
  0x32   : > { %2100 = vrot.lane.b32.xlu0 %v2615_v20, %s2505_s20  ;;  %2105 = vrot.lane.b32.xlu1 %v2615_v20, %s2507_s22 }
  0x36   : > { %2115 = vrot.lane.b32.xlu1 %v2623_v23, %s2505_s20  ;;  %2110 = vrot.lane.b32.xlu0 %v2641_v28, %s2506_s21 }
  0x3a   : > { %2120 = vrot.lane.b32.xlu0 %v2623_v23, %s2507_s22  ;;  %2125 = vrot.lane.b32.xlu1 %v2649_v31, %s2506_s21 }
  0x3e   : > { %2130 = vrot.lane.b32.xlu0 %v2641_v28, %s2505_s20  ;;  %2135 = vrot.lane.b32.xlu1 %v2641_v28, %s2507_s22 }
  0x42   : > { %2140 = vrot.lane.b32.xlu0 %v2649_v31, %s2505_s20  ;;  %2145 = vrot.lane.b32.xlu1 %v2649_v31, %s2507_s22  ;;  %s3124_s22 = scalar_lea.vmem %s3160_s3, %s1763_s16 }
  0x46   : > { %2155 = vrot.lane.b32.xlu0 %v2581_v9, %s2508_s23  ;;  %2150 = vrot.lane.b32.xlu1 %v2572_v7, %s2508_s23 }
  0x4a   : > { %2160 = vrot.lane.b32.xlu0 %v2589_v12, %s2508_s23 }
  0x4e   : > { %2165 = vrot.lane.b32.xlu0 %v2597_v15, %s2508_s23 }
  0x52   : > { %2170 = vrot.lane.b32.xlu0 %v2615_v20, %s2508_s23 }
  0x56   : > { %2175 = vrot.lane.b32.xlu0 %v2623_v23, %s2508_s23 }
  0x5a   : > { %2180 = vrot.lane.b32.xlu0 %v2641_v28, %s2508_s23 }
  0x5e   : > { %2185 = vrot.lane.b32.xlu0 %v2649_v31, %s2508_s23 }
  0x88   : > { %v2041_v34 = vpop.permute.xlu1 %2040  ;;  %v2685_v35 = vpop.permute.xlu0 %2030 }
  0x89   : > { %v2043_v36 = vunpack.i.h.bf16 %v2041_v34  ;;  %v2042_v37 = vunpack.i.l.bf16 %v2041_v34  ;;  %v2033_v38 = vunpack.i.h.bf16 %v2685_v35  ;;  %v2032_v39 = vunpack.i.l.bf16 %v2685_v35  ;;  %2190 = vrot.lane.b32.xlu0 %v2685_v35, %s2508_s23  ;;  %2200 = vrot.lane.b32.xlu1 %v2041_v34, %s2508_s23 }
  0x8b   : > { %v800_v40 = vpack.c.bf16 %v2033_v38, %v2032_v39  ;;  %v816_v41 = vpack.c.bf16 %v2043_v36, %v2042_v37 }
  0x8c   : > { %v2046_v42 = vpop.permute.xlu1 %2045  ;;  %v2689_v43 = vpop.permute.xlu0 %2035 }
  0x8d   : > { %v2048_v44 = vunpack.i.h.bf16 %v2046_v42  ;;  %v2047_v45 = vunpack.i.l.bf16 %v2046_v42  ;;  %v2038_v46 = vunpack.i.h.bf16 %v2689_v43  ;;  %v2037_v47 = vunpack.i.l.bf16 %v2689_v43  ;;  %1765 = vmatprep.subr.bf16.mxu0 %v800_v40  ;;  %1805 = vmatprep.subr.bf16.mxu1 %v816_v41 }
  0x8e   : > { %1766 = vmatpush3.bf16.msra.mxu0 %v2560_v0  ;;  %2195 = vrot.lane.b32.xlu0 %v2689_v43, %s2508_s23 }
  0x8f   : > { %v799_v48 = vpack.c.bf16 %v2038_v46, %v2037_v47  ;;  %v808_v49 = vpack.c.bf16 %v2048_v44, %v2047_v45  ;;  %2205 = vrot.lane.b32.xlu1 %v2046_v42, %s2508_s23 }
  0x90   : > { %v2056_v50 = vpop.permute.xlu1 %2055  ;;  %v2697_v51 = vpop.permute.xlu0 %2050 }
  0x91   : > { %v2058_v52 = vunpack.i.h.bf16 %v2056_v50  ;;  %v2057_v53 = vunpack.i.l.bf16 %v2056_v50  ;;  %v2053_v54 = vunpack.i.h.bf16 %v2697_v51  ;;  %v2052_v55 = vunpack.i.l.bf16 %v2697_v51  ;;  %1767 = vmatprep.subr.bf16.mxu0 %v799_v48  ;;  %1806 = vmatpush3.bf16.msra.mxu1 %v808_v49 }
  0x92   : > { %1768 = vmatpush3.bf16.msra.mxu0 %v2563_v1  ;;  %2210 = vrot.lane.b32.xlu0 %v2697_v51, %s2508_s23 }
  0x93   : > { %v815_v56 = vpack.c.bf16 %v2058_v52, %v2057_v53  ;;  %v798_v57 = vpack.c.bf16 %v2053_v54, %v2052_v55  ;;  %2215 = vrot.lane.b32.xlu1 %v2056_v50, %s2508_s23 }
  0x94   : > { %v2061_v58 = vpop.permute.xlu0 %2060  ;;  %v2705_v59 = vpop.permute.xlu1 %2065 }
  0x95   : > { %v2063_v60 = vunpack.i.h.bf16 %v2061_v58  ;;  %v2062_v61 = vunpack.i.l.bf16 %v2061_v58  ;;  %v2068_v62 = vunpack.i.h.bf16 %v2705_v59  ;;  %v2067_v63 = vunpack.i.l.bf16 %v2705_v59  ;;  %1769 = vmatprep.subr.bf16.mxu0 %v798_v57  ;;  %1807 = vmatprep.subr.bf16.mxu1 %v815_v56 }
  0x96   : > { %1770 = vmatpush3.bf16.msra.mxu0 %v2570_v6  ;;  %2225 = vrot.lane.b32.xlu0 %v2705_v59, %s2508_s23 }
  0x97   : > { %v807_v0 = vpack.c.bf16 %v2063_v60, %v2062_v61  ;;  %v797_v1 = vpack.c.bf16 %v2068_v62, %v2067_v63  ;;  %2220 = vrot.lane.b32.xlu1 %v2061_v58, %s2508_s23 }
  0x98   : > { %v2071_v2 = vpop.permute.xlu0 %2070  ;;  %v2076_v3 = vpop.permute.xlu1 %2075 }
  0x99   : > { %v2073_v4 = vunpack.i.h.bf16 %v2071_v2  ;;  %v2072_v5 = vunpack.i.l.bf16 %v2071_v2  ;;  %v2078_v10 = vunpack.i.h.bf16 %v2076_v3  ;;  %v2077_v11 = vunpack.i.l.bf16 %v2076_v3  ;;  %1808 = vmatpush3.bf16.msra.mxu1 %v807_v0  ;;  %1771 = vmatprep.subr.bf16.mxu0 %v797_v1 }
  0x9a   : > { %1772 = vmatpush3.bf16.msra.mxu0 %v2575_v8 }
  0x9b   : > { %v814_v13 = vpack.c.bf16 %v2073_v4, %v2072_v5  ;;  %v806_v14 = vpack.c.bf16 %v2078_v10, %v2077_v11  ;;  %2230 = vrot.lane.b32.xlu1 %v2071_v2, %s2508_s23 }
  0x9c   : > { %v2086_v17 = vpop.permute.xlu1 %2085  ;;  %v2717_v6 = vpop.permute.xlu0 %2080 }
  0x9d   : > { %v2088_v18 = vunpack.i.h.bf16 %v2086_v17  ;;  %v2087_v21 = vunpack.i.l.bf16 %v2086_v17  ;;  %v2083_v22 = vunpack.i.h.bf16 %v2717_v6  ;;  %v2082_v25 = vunpack.i.l.bf16 %v2717_v6  ;;  %1809 = vmatprep.subr.bf16.mxu1 %v814_v13  ;;  %2240 = vrot.lane.b32.xlu0 %v2717_v6, %s2508_s23 }
  0x9e   : > { %1810 = vmatpush3.bf16.msra.mxu1 %v806_v14 }
  0x9f   : > { %v813_v26 = vpack.c.bf16 %v2088_v18, %v2087_v21  ;;  %v796_v29 = vpack.c.bf16 %v2083_v22, %v2082_v25  ;;  %2235 = vrot.lane.b32.xlu1 %v2076_v3, %s2508_s23 }
  0xa0   : > { %v2091_v30 = vpop.permute.xlu0 %2090  ;;  %v2722_v32 = vpop.permute.xlu1 %2095 }
  0xa1   : > { %v2093_v33 = vunpack.i.h.bf16 %v2091_v30  ;;  %v2092_v8 = vunpack.i.l.bf16 %v2091_v30  ;;  %v2098_v34 = vunpack.i.h.bf16 %v2722_v32  ;;  %v2097_v36 = vunpack.i.l.bf16 %v2722_v32  ;;  %1773 = vmatprep.subr.bf16.mxu0 %v796_v29  ;;  %1811 = vmatprep.subr.bf16.mxu1 %v813_v26  ;;  %v2412_v29 = vld [vmem:[%s3158_s1 + $0x8] ss:$44 sps:$4 sm:$0xff]  }
  0xa2   : > { %1774 = vmatpush3.bf16.msra.mxu0 %v2600_v16  ;;  %2255 = vrot.lane.b32.xlu0 %v2722_v32, %s2508_s23 }
  0xa3   : > { %v805_v37 = vpack.c.bf16 %v2093_v33, %v2092_v8  ;;  %v795_v38 = vpack.c.bf16 %v2098_v34, %v2097_v36  ;;  %2245 = vrot.lane.b32.xlu1 %v2086_v17, %s2508_s23  ;;  %v2415_v17 = vld [vmem:[%s3158_s1 + $0x5c] ss:$44 sps:$4 sm:$0xff]   ;;  %v2417_v33 = vld [vmem:[%s3158_s1 + $0x58] ss:$44 sps:$4 sm:$0xff]   ;;  %v2418_v8 = vld [vmem:[%s3158_s1 + $0xb4] ss:$44 sps:$4 sm:$0xff]  }
  0xa4   : > { %v2101_v39 = vpop.permute.xlu0 %2100  ;;  %v2106_v40 = vpop.permute.xlu1 %2105  ;;  %v2426_v34 = vld [vmem:[%s3158_s1 + $0x60] ss:$44 sps:$4 sm:$0xff]   ;;  %v2427_v36 = vld [vmem:[%s3158_s1 + $0xbc] ss:$44 sps:$4 sm:$0xff]  }
  0xa5   : > { %v2103_v41 = vunpack.i.h.bf16 %v2101_v39  ;;  %v2102_v42 = vunpack.i.l.bf16 %v2101_v39  ;;  %v2108_v44 = vunpack.i.h.bf16 %v2106_v40  ;;  %v2107_v45 = vunpack.i.l.bf16 %v2106_v40  ;;  %1812 = vmatpush3.bf16.msra.mxu1 %v805_v37  ;;  %1775 = vmatprep.subr.bf16.mxu0 %v795_v38  ;;  %v2420_v37 = vld [vmem:[%s3158_s1 + $0xb0] ss:$44 sps:$4 sm:$0xff]   ;;  %v2421_v38 = vld [vmem:[%s3158_s1 + $0x10c] ss:$44 sps:$4 sm:$0xff]  }
  0xa6   : > { %1776 = vmatpush3.bf16.msra.mxu0 %v2609_v19 }
  0xa7   : > { %v812_v46 = vpack.c.bf16 %v2103_v41, %v2102_v42  ;;  %v804_v47 = vpack.c.bf16 %v2108_v44, %v2107_v45  ;;  %2250 = vrot.lane.b32.xlu1 %v2091_v30, %s2508_s23  ;;  %v2423_v30 = vld [vmem:[%s3158_s1 + $0x64] ss:$44 sps:$4 sm:$0xff]   ;;  %v872_v41 = vld [vmem:[%s3159_s2 + $0x28] sm:$0xff]  ;;  %v874_v42 = vld [vmem:[%s3159_s2 + $0x38] sm:$0xff] }
  0xa8   : > { %v2116_v48 = vpop.permute.xlu1 %2115  ;;  %v2734_v16 = vpop.permute.xlu0 %2110  ;;  %v871_v44 = vld [vmem:[%s3159_s2 + $0x20] sm:$0xff] }
  0xa9   : > { %v2118_v49 = vunpack.i.h.bf16 %v2116_v48  ;;  %v2117_v50 = vunpack.i.l.bf16 %v2116_v48  ;;  %v2113_v52 = vunpack.i.h.bf16 %v2734_v16  ;;  %v2112_v53 = vunpack.i.l.bf16 %v2734_v16  ;;  %1813 = vmatprep.subr.bf16.mxu1 %v812_v46  ;;  %2270 = vrot.lane.b32.xlu0 %v2734_v16, %s2508_s23  ;;  %v873_v46 = vld [vmem:[%s3159_s2 + $0x30] sm:$0xff] }
  0xaa   : > { %1814 = vmatpush3.bf16.msra.mxu1 %v804_v47 }
  0xab   : > { %v811_v54 = vpack.c.bf16 %v2118_v49, %v2117_v50  ;;  %v794_v55 = vpack.c.bf16 %v2113_v52, %v2112_v53  ;;  %2260 = vrot.lane.b32.xlu1 %v2101_v39, %s2508_s23  ;;  %v2431_v39 = vld [vmem:[%s3158_s1 + $0x14] ss:$44 sps:$4 sm:$0xff]  }
  0xac   : > { %v2121_v56 = vpop.permute.xlu0 %2120  ;;  %v2739_v57 = vpop.permute.xlu1 %2125 }
  0xad   : > { %v2123_v58 = vunpack.i.h.bf16 %v2121_v56  ;;  %v2122_v19 = vunpack.i.l.bf16 %v2121_v56  ;;  %v2128_v60 = vunpack.i.h.bf16 %v2739_v57  ;;  %v2127_v61 = vunpack.i.l.bf16 %v2739_v57  ;;  %1777 = vmatprep.subr.bf16.mxu0 %v794_v55  ;;  %1815 = vmatprep.subr.bf16.mxu1 %v811_v54 }
  0xae   : > { %1778 = vmatpush3.bf16.msra.mxu0 %v2626_v24  ;;  %2285 = vrot.lane.b32.xlu0 %v2739_v57, %s2508_s23  ;;  %v2409_v24 = vld [vmem:[%s3158_s1] ss:$44 sps:$4 sm:$0xff]  }
  0xaf   : > { %v803_v62 = vpack.c.bf16 %v2123_v58, %v2122_v19  ;;  %v793_v63 = vpack.c.bf16 %v2128_v60, %v2127_v61  ;;  %2265 = vrot.lane.b32.xlu1 %v2106_v40, %s2508_s23  ;;  %v869_v40 = vld [vmem:[%s3159_s2 + $0x10] sm:$0xff] }
  0xb0   : > { %v2131_v0 = vpop.permute.xlu0 %2130  ;;  %v2747_v1 = vpop.permute.xlu1 %2135 }
  0xb1   : > { %v2133_v2 = vunpack.i.h.bf16 %v2131_v0  ;;  %v2132_v3 = vunpack.i.l.bf16 %v2131_v0  ;;  %v2138_v4 = vunpack.i.h.bf16 %v2747_v1  ;;  %v2137_v5 = vunpack.i.l.bf16 %v2747_v1  ;;  %1816 = vmatpush3.bf16.msra.mxu1 %v803_v62  ;;  %1779 = vmatprep.subr.bf16.mxu0 %v793_v63 }
  0xb2   : > { %1780 = vmatpush3.bf16.msra.mxu0 %v2635_v27 }
  0xb3   : > { %v810_v10 = vpack.c.bf16 %v2133_v2, %v2132_v3  ;;  %v802_v11 = vpack.c.bf16 %v2138_v4, %v2137_v5  ;;  %2275 = vrot.lane.b32.xlu1 %v2116_v48, %s2508_s23 }
  0xb4   : > { %v2141_v13 = vpop.permute.xlu0 %2140  ;;  %v2758_v14 = vpop.permute.xlu1 %2145 }
  0xb5   : > { %v2143_v18 = vunpack.i.h.bf16 %v2141_v13  ;;  %v2142_v21 = vunpack.i.l.bf16 %v2141_v13  ;;  %v2148_v22 = vunpack.i.h.bf16 %v2758_v14  ;;  %v2147_v25 = vunpack.i.l.bf16 %v2758_v14  ;;  %1817 = vmatprep.subr.bf16.mxu1 %v810_v10  ;;  %1181 = vmatmul.mubr.bf16.vlgmr.msra.gmra.mxu0 %v2409_v24 }
  0xb6   : > { %1818 = vmatpush3.bf16.msra.mxu1 %v802_v11  ;;  %1188 = vmatprep.mubr.bf16.mxu0 %v2415_v17 }
  0xb7   : > { %v809_v27 = vpack.c.bf16 %v2143_v18, %v2142_v21  ;;  %v801_v26 = vpack.c.bf16 %v2148_v22, %v2147_v25  ;;  %2300 = vrot.lane.b32.xlu0 %v2141_v13, %s2508_s23  ;;  %2280 = vrot.lane.b32.xlu1 %v2121_v56, %s2508_s23 }
  0xb8   : > { %v2151_v48 = vpop.permute.xlu1 %2150 }
  0xb9   : > { %1819 = vmatprep.subr.bf16.mxu1 %v809_v27  ;;  %v2152_v49 = vunpack.i.l.bf16 %v2151_v48 }
  0xba   : > { %1820 = vmatpush3.bf16.msra.mxu1 %v801_v26 }
  0xbb   : > { %2330 = vrot.lane.b32.xlu0 %v2758_v14, %s2508_s23  ;;  %2290 = vrot.lane.b32.xlu1 %v2131_v0, %s2508_s23 }
  0xbd   : > { %1246 = vmatmul.mubr.bf16.vlgmr.msra.gmra.mxu1 %v2412_v29  ;;  %1189 = vmatmul.mubr.bf16.gmra.mxu0 %v2417_v33 }
  0xbe   : > { %1253 = vmatprep.mubr.bf16.mxu1 %v2423_v30  ;;  %1196 = vmatprep.mubr.bf16.mxu0 %v2418_v8 }
  0xbf   : > { %2335 = vrot.lane.b32.xlu0 %v2689_v43, %s2509_s18  ;;  %2295 = vrot.lane.b32.xlu1 %v2747_v1, %s2508_s23  ;;  %v2432_v43 = vld [vmem:[%s3158_s1 + $0xb8] ss:$44 sps:$4 sm:$0xff]  }
  0xc3   : > { %2340 = vrot.lane.b32.xlu0 %v2697_v51, %s2509_s18  ;;  %2305 = vrot.lane.b32.xlu1 %v2685_v35, %s2509_s18  ;;  %v2433_v51 = vld [vmem:[%s3158_s1 + $0x114] ss:$44 sps:$4 sm:$0xff]  }
  0xc4   : > { %v2425_v35 = vld [vmem:[%s3158_s1 + $0x108] ss:$44 sps:$4 sm:$0xff]  }
  0xc5   : > { %1254 = vmatmul.mubr.bf16.gmra.mxu1 %v2426_v34  ;;  %1197 = vmatmul.mubr.bf16.gmra.mxu0 %v2420_v37 }
  0xc6   : > { %1261 = vmatprep.mubr.bf16.mxu1 %v2427_v36  ;;  %1204 = vmatprep.mubr.bf16.mxu0 %v2421_v38 }
  0xc7   : > { %2345 = vrot.lane.b32.xlu0 %v2705_v59, %s2509_s18  ;;  %2310 = vrot.lane.b32.xlu1 %v2572_v7, %s2509_s18  ;;  %v2437_v7 = vld [vmem:[%s3158_s1 + $0x110] ss:$44 sps:$4 sm:$0xff]  }
  0xc8   : > { %v2444_v59 = vld [vmem:[%s3158_s1 + $0x1c] ss:$44 sps:$4 sm:$0xff]  }
  0xcb   : > { %2350 = vrot.lane.b32.xlu0 %v2717_v6, %s2509_s18  ;;  %2315 = vrot.lane.b32.xlu1 %v2581_v9, %s2509_s18  ;;  %v2156_v9 = vpop.permute.xlu0 %2155  ;;  %v2510_v6 = vmov 0  }
  0xcc   : > { %2399 = vset.pattern.permute.xlu0 %v2510_v6  ;;  %2400 = vset.pattern.permute.xlu1 %v2510_v6  ;;  %v2158_v19 = vunpack.i.h.bf16 %v2156_v9  ;;  %v2157_v60 = vunpack.i.l.bf16 %v2156_v9 }
  0xcd   : > { %1262 = vmatmul.mubr.bf16.gmra.mxu1 %v2432_v43  ;;  %1205 = vmatmul.mubr.bf16.gmra.mxu0 %v2425_v35 }
  0xce   : > { %1269 = vmatprep.mubr.bf16.mxu1 %v2433_v51  ;;  %1310 = vmatprep.mubr.bf16.mxu0 %v2431_v39  ;;  %v823_v10 = vpack.c.bf16 %v2158_v19, %v2157_v60 }
  0xcf   : > { %2360 = vrot.lane.b32.xlu0 %v2722_v32, %s2509_s18  ;;  %2320 = vrot.lane.b32.xlu1 %v2589_v12, %s2509_s18  ;;  %v2841_v12 = vpop.permute.xlu0 %2160 }
  0xd0   : > { %v2163_v11 = vunpack.i.h.bf16 %v2841_v12  ;;  %v2162_v24 = vunpack.i.l.bf16 %v2841_v12 }
  0xd2   : > { %v822_v26 = vpack.c.bf16 %v2163_v11, %v2162_v24 }
  0xd3   : > { %2370 = vrot.lane.b32.xlu0 %v2734_v16, %s2509_s18  ;;  %2325 = vrot.lane.b32.xlu1 %v2597_v15, %s2509_s18  ;;  %v2849_v15 = vpop.permute.xlu0 %2165  ;;  %v2153_v16 = vunpack.i.h.bf16 %v2151_v48 }
  0xd4   : > { %v2168_v29 = vunpack.i.h.bf16 %v2849_v15  ;;  %v2167_v30 = vunpack.i.l.bf16 %v2849_v15 }
  0xd5   : > { %1270 = vmatmul.mubr.bf16.gmra.mxu1 %v2437_v7  ;;  %v824_v61 = vpack.c.bf16 %v2153_v16, %v2152_v49 }
  0xd6   : > { %1375 = vmatprep.mubr.bf16.mxu1 %v2444_v59  ;;  %v821_v35 = vpack.c.bf16 %v2168_v29, %v2167_v30  ;;  %v2429_v30 = vld [vmem:[%s3158_s1 + $0x10] ss:$44 sps:$4 sm:$0xff]  }
  0xd7   : > { %2380 = vrot.lane.b32.xlu0 %v2739_v57, %s2509_s18  ;;  %2355 = vrot.lane.b32.xlu1 %v2615_v20, %s2509_s18  ;;  %v867_v20 = vld [vmem:[%s3159_s2] sm:$0xff]  ;;  %v2856_v32 = vpop.permute.xlu0 %2170 }
  0xd8   : > { %v2173_v9 = vunpack.i.h.bf16 %v2856_v32  ;;  %v2172_v12 = vunpack.i.l.bf16 %v2856_v32 }
  0xdb   : > { %2390 = vrot.lane.b32.xlu0 %v2747_v1, %s2509_s18  ;;  %2365 = vrot.lane.b32.xlu1 %v2623_v23, %s2509_s18  ;;  %v870_v23 = vld [vmem:[%s3159_s2 + $0x18] sm:$0xff] }
  0xdf   : > { %2375 = vrot.lane.b32.xlu1 %v2641_v28, %s2509_s18  ;;  %877 = vperm.xlu0 %2399, %v867_v20   ;;  %v868_v28 = vld [vmem:[%s3159_s2 + $0x8] sm:$0xff] }
  0xe3   : > { %2385 = vrot.lane.b32.xlu1 %v2649_v31, %s2509_s18  ;;  %892 = vperm.xlu0 %2399, %v870_v23   ;;  %v2866_v31 = vpop.permute.xlu0 %2175 }
  0xe4   : > { %v2177_v48 = vunpack.i.l.bf16 %v2866_v31 }
  0xe7   : > { %2395 = vrot.lane.b32.xlu1 %v2758_v14, %s2509_s18  ;;  %902 = vperm.xlu0 %2399, %v872_v41   ;;  %v2880_v45 = vpop.permute.xlu0 %2180 }
  0xeb   : > { %882 = vperm.xlu1 %2400, %v868_v28   ;;  %912 = vperm.xlu0 %2399, %v874_v42   ;;  %v2885_v47 = vpop.permute.xlu0 %2185 }
  0xec   : > { %v2188_v11 = vunpack.i.h.bf16 %v2885_v47  ;;  %v2187_v24 = vunpack.i.l.bf16 %v2885_v47 }
  0xef   : > { %887 = vperm.xlu1 %2400, %v869_v40  }
  0xf3   : > { %897 = vperm.xlu1 %2400, %v871_v44   ;;  %v820_v44 = vpack.c.bf16 %v2173_v9, %v2172_v12  ;;  %v2439_v12 = vld [vmem:[%s3158_s1 + $0xc4] ss:$44 sps:$4 sm:$0xff]  }
  0xf7   : > { %907 = vperm.xlu1 %2400, %v873_v46   ;;  %v2178_v46 = vunpack.i.h.bf16 %v2866_v31  ;;  %v2183_v31 = vunpack.i.h.bf16 %v2880_v45 }
  0xfb   : > { %v2191_v50 = vpop.permute.xlu0 %2190  ;;  %v2201_v52 = vpop.permute.xlu1 %2200 }
  0xfc   : > { %v2193_v53 = vunpack.i.h.bf16 %v2191_v50  ;;  %v2192_v54 = vunpack.i.l.bf16 %v2191_v50  ;;  %v2203_v55 = vunpack.i.h.bf16 %v2201_v52  ;;  %v2202_v56 = vunpack.i.l.bf16 %v2201_v52 }
  0xfe   : > { %v832_v57 = vpack.c.bf16 %v2193_v53, %v2192_v54  ;;  %v848_v58 = vpack.c.bf16 %v2203_v55, %v2202_v56  ;;  %v819_v56 = vpack.c.bf16 %v2178_v46, %v2177_v48 }
 0x100   : > { %v2196_v62 = vpop.permute.xlu0 %2195  ;;  %1845 = vmatprep.subr.bf16.mxu0 %v832_v57  ;;  %1885 = vmatprep.subr.bf16.mxu1 %v848_v58 }
 0x101   : > { %v2206_v63 = vpop.permute.xlu1 %2205  ;;  %v2198_v0 = vunpack.i.h.bf16 %v2196_v62  ;;  %v2197_v1 = vunpack.i.l.bf16 %v2196_v62  ;;  %1846 = vmatpush3.bf16.msra.mxu0 %v824_v61  ;;  %v2182_v61 = vunpack.i.l.bf16 %v2880_v45 }
 0x102   : > { %v2208_v2 = vunpack.i.h.bf16 %v2206_v63  ;;  %v2207_v3 = vunpack.i.l.bf16 %v2206_v63 }
 0x103   : > { %v831_v4 = vpack.c.bf16 %v2198_v0, %v2197_v1 }
 0x104   : > { %v840_v5 = vpack.c.bf16 %v2208_v2, %v2207_v3  ;;  %v2211_v13 = vpop.permute.xlu0 %2210 }
 0x105   : > { %v2216_v14 = vpop.permute.xlu1 %2215  ;;  %v2213_v17 = vunpack.i.h.bf16 %v2211_v13  ;;  %v2212_v18 = vunpack.i.l.bf16 %v2211_v13  ;;  %1847 = vmatprep.subr.bf16.mxu0 %v831_v4 }
 0x106   : > { %v2218_v21 = vunpack.i.h.bf16 %v2216_v14  ;;  %v2217_v22 = vunpack.i.l.bf16 %v2216_v14  ;;  %1886 = vmatpush3.bf16.msra.mxu1 %v840_v5  ;;  %1848 = vmatpush3.bf16.msra.mxu0 %v823_v10  ;;  %v818_v10 = vpack.c.bf16 %v2183_v31, %v2182_v61 }
 0x107   : > { %v830_v25 = vpack.c.bf16 %v2213_v17, %v2212_v18 }
 0x108   : > { %v847_v27 = vpack.c.bf16 %v2218_v21, %v2217_v22  ;;  %v2226_v33 = vpop.permute.xlu0 %2225 }
 0x109   : > { %v2221_v8 = vpop.permute.xlu1 %2220  ;;  %v2228_v34 = vunpack.i.h.bf16 %v2226_v33  ;;  %v2227_v36 = vunpack.i.l.bf16 %v2226_v33  ;;  %1849 = vmatprep.subr.bf16.mxu0 %v830_v25 }
 0x10a   : > { %v2223_v37 = vunpack.i.h.bf16 %v2221_v8  ;;  %v2222_v38 = vunpack.i.l.bf16 %v2221_v8  ;;  %1887 = vmatprep.subr.bf16.mxu1 %v847_v27  ;;  %1850 = vmatpush3.bf16.msra.mxu0 %v822_v26  ;;  %v817_v27 = vpack.c.bf16 %v2188_v11, %v2187_v24  ;;  %v2435_v8 = vld [vmem:[%s3158_s1 + $0x6c] ss:$44 sps:$4 sm:$0xff]  }
 0x10b   : > { %v829_v43 = vpack.c.bf16 %v2228_v34, %v2227_v36 }
 0x10c   : > { %v839_v51 = vpack.c.bf16 %v2223_v37, %v2222_v38 }
 0x10d   : > { %v2231_v39 = vpop.permute.xlu1 %2230  ;;  %1851 = vmatprep.subr.bf16.mxu0 %v829_v43 }
 0x10e   : > { %v2233_v7 = vunpack.i.h.bf16 %v2231_v39  ;;  %v2232_v59 = vunpack.i.l.bf16 %v2231_v39  ;;  %1888 = vmatpush3.bf16.msra.mxu1 %v839_v51  ;;  %1852 = vmatpush3.bf16.msra.mxu0 %v821_v35 }
 0x10f   : > { %v2241_v6 = vpop.permute.xlu0 %2240 }
 0x110   : > { %v846_v15 = vpack.c.bf16 %v2233_v7, %v2232_v59  ;;  %v2243_v20 = vunpack.i.h.bf16 %v2241_v6  ;;  %v2242_v23 = vunpack.i.l.bf16 %v2241_v6  ;;  %v2438_v7 = vld [vmem:[%s3158_s1 + $0x68] ss:$44 sps:$4 sm:$0xff]  }
 0x111   : > { %v2236_v28 = vpop.permute.xlu1 %2235 }
 0x112   : > { %v2238_v40 = vunpack.i.h.bf16 %v2236_v28  ;;  %v2237_v41 = vunpack.i.l.bf16 %v2236_v28  ;;  %1889 = vmatprep.subr.bf16.mxu1 %v846_v15  ;;  %v828_v42 = vpack.c.bf16 %v2243_v20, %v2242_v23 }
 0x114   : > { %v838_v16 = vpack.c.bf16 %v2238_v40, %v2237_v41  ;;  %v2256_v49 = vpop.permute.xlu0 %2255  ;;  %1853 = vmatprep.subr.bf16.mxu0 %v828_v42 }
 0x115   : > { %v2258_v50 = vunpack.i.h.bf16 %v2256_v49  ;;  %v2257_v52 = vunpack.i.l.bf16 %v2256_v49  ;;  %v2246_v53 = vpop.permute.xlu1 %2245  ;;  %1854 = vmatpush3.bf16.msra.mxu0 %v820_v44 }
 0x116   : > { %v2248_v32 = vunpack.i.h.bf16 %v2246_v53  ;;  %v2247_v54 = vunpack.i.l.bf16 %v2246_v53  ;;  %1890 = vmatpush3.bf16.msra.mxu1 %v838_v16 }
 0x117   : > { %v827_v55 = vpack.c.bf16 %v2258_v50, %v2257_v52  ;;  %v2441_v50 = vld [vmem:[%s3158_s1 + $0xc0] ss:$44 sps:$4 sm:$0xff]  }
 0x118   : > { %v845_v57 = vpack.c.bf16 %v2248_v32, %v2247_v54  ;;  %v2445_v54 = vld [vmem:[%s3158_s1 + $0x11c] ss:$44 sps:$4 sm:$0xff]  }
 0x119   : > { %v2251_v58 = vpop.permute.xlu1 %2250  ;;  %1855 = vmatprep.subr.bf16.mxu0 %v827_v55 }
 0x11a   : > { %v2253_v19 = vunpack.i.h.bf16 %v2251_v58  ;;  %v2252_v60 = vunpack.i.l.bf16 %v2251_v58  ;;  %1891 = vmatprep.subr.bf16.mxu1 %v845_v57  ;;  %1856 = vmatpush3.bf16.msra.mxu0 %v819_v56 }
 0x11b   : > { %v2271_v63 = vpop.permute.xlu0 %2270 }
 0x11c   : > { %v837_v62 = vpack.c.bf16 %v2253_v19, %v2252_v60  ;;  %v2273_v0 = vunpack.i.h.bf16 %v2271_v63  ;;  %v2272_v1 = vunpack.i.l.bf16 %v2271_v63  ;;  %v2442_v60 = vld [vmem:[%s3158_s1 + $0x18] ss:$44 sps:$4 sm:$0xff]  }
 0x11d   : > { %v2261_v2 = vpop.permute.xlu1 %2260 }
 0x11e   : > { %v2263_v3 = vunpack.i.h.bf16 %v2261_v2  ;;  %v2262_v4 = vunpack.i.l.bf16 %v2261_v2  ;;  %1892 = vmatpush3.bf16.msra.mxu1 %v837_v62  ;;  %v826_v5 = vpack.c.bf16 %v2273_v0, %v2272_v1  ;;  %v2448_v0 = vld [vmem:[%s3158_s1 + $0x74] ss:$44 sps:$4 sm:$0xff]  }
 0x120   : > { %v844_v13 = vpack.c.bf16 %v2263_v3, %v2262_v4  ;;  %v2286_v14 = vpop.permute.xlu0 %2285  ;;  %1857 = vmatprep.subr.bf16.mxu0 %v826_v5  ;;  %v2447_v5 = vld [vmem:[%s3158_s1 + $0x118] ss:$44 sps:$4 sm:$0xff]  }
 0x121   : > { %v2266_v17 = vpop.permute.xlu1 %2265  ;;  %v2288_v18 = vunpack.i.h.bf16 %v2286_v14  ;;  %v2287_v21 = vunpack.i.l.bf16 %v2286_v14  ;;  %1858 = vmatpush3.bf16.msra.mxu0 %v818_v10  ;;  %v2459_v14 = vld [vmem:[%s3158_s1 + $0x24] ss:$44 sps:$4 sm:$0xff]  }
 0x122   : > { %v2268_v45 = vunpack.i.h.bf16 %v2266_v17  ;;  %v2267_v22 = vunpack.i.l.bf16 %v2266_v17  ;;  %1893 = vmatprep.subr.bf16.mxu1 %v844_v13 }
 0x123   : > { %v825_v25 = vpack.c.bf16 %v2288_v18, %v2287_v21 }
 0x124   : > { %v836_v26 = vpack.c.bf16 %v2268_v45, %v2267_v22  ;;  %v2450_v22 = vld [vmem:[%s3158_s1 + $0x70] ss:$44 sps:$4 sm:$0xff]  }
 0x125   : > { %v2276_v29 = vpop.permute.xlu1 %2275  ;;  %1859 = vmatprep.subr.bf16.mxu0 %v825_v25 }
 0x126   : > { %v2278_v47 = vunpack.i.h.bf16 %v2276_v29  ;;  %v2277_v33 = vunpack.i.l.bf16 %v2276_v29  ;;  %1894 = vmatpush3.bf16.msra.mxu1 %v836_v26  ;;  %1860 = vmatpush3.bf16.msra.mxu0 %v817_v27  ;;  %v2451_v29 = vld [vmem:[%s3158_s1 + $0xcc] ss:$44 sps:$4 sm:$0xff]  }
 0x128   : > { %v843_v34 = vpack.c.bf16 %v2278_v47, %v2277_v33 }
 0x129   : > { %v2301_v36 = vpop.permute.xlu0 %2300  ;;  %v2281_v37 = vpop.permute.xlu1 %2280  ;;  %1311 = vmatmul.mubr.bf16.vlgmr.msra.gmra.mxu0 %v2429_v30 }
 0x12a   : > { %v2283_v38 = vunpack.i.h.bf16 %v2281_v37  ;;  %v2282_v43 = vunpack.i.l.bf16 %v2281_v37  ;;  %1895 = vmatprep.subr.bf16.mxu1 %v843_v34  ;;  %1318 = vmatprep.mubr.bf16.mxu0 %v2435_v8  ;;  %v2303_v15 = vunpack.i.h.bf16 %v2301_v36  ;;  %v2302_v6 = vunpack.i.l.bf16 %v2301_v36 }
 0x12c   : > { %v835_v51 = vpack.c.bf16 %v2283_v38, %v2282_v43  ;;  %v841_v46 = vpack.c.bf16 %v2303_v15, %v2302_v6  ;;  %v2454_v6 = vld [vmem:[%s3158_s1 + $0x124] ss:$44 sps:$4 sm:$0xff]  }
 0x12d   : > { %v2331_v35 = vpop.permute.xlu0 %2330  ;;  %v2291_v39 = vpop.permute.xlu1 %2290 }
 0x12e   : > { %v2293_v59 = vunpack.i.h.bf16 %v2291_v39  ;;  %v2292_v9 = vunpack.i.l.bf16 %v2291_v39  ;;  %1896 = vmatpush3.bf16.msra.mxu1 %v835_v51  ;;  %v2333_v40 = vunpack.i.h.bf16 %v2331_v35  ;;  %v2332_v41 = vunpack.i.l.bf16 %v2331_v35 }
 0x130   : > { %v842_v20 = vpack.c.bf16 %v2293_v59, %v2292_v9  ;;  %v833_v52 = vpack.c.bf16 %v2333_v40, %v2332_v41 }
 0x131   : > { %v2336_v23 = vpop.permute.xlu0 %2335  ;;  %v2296_v28 = vpop.permute.xlu1 %2295  ;;  %1319 = vmatmul.mubr.bf16.gmra.mxu0 %v2438_v7  ;;  %v2453_v7 = vld [vmem:[%s3158_s1 + $0xc8] ss:$44 sps:$4 sm:$0xff]  }
 0x132   : > { %v2298_v42 = vunpack.i.h.bf16 %v2296_v28  ;;  %v2297_v44 = vunpack.i.l.bf16 %v2296_v28  ;;  %1897 = vmatprep.subr.bf16.mxu1 %v842_v20  ;;  %1326 = vmatprep.mubr.bf16.mxu0 %v2439_v12  ;;  %v2338_v57 = vunpack.i.h.bf16 %v2336_v23  ;;  %v2337_v58 = vunpack.i.l.bf16 %v2336_v23 }
 0x134   : > { %v834_v48 = vpack.c.bf16 %v2298_v42, %v2297_v44  ;;  %v863_v1 = vpack.c.bf16 %v2338_v57, %v2337_v58 }
 0x135   : > { %v2341_v16 = vpop.permute.xlu0 %2340  ;;  %v2306_v49 = vpop.permute.xlu1 %2305 }
 0x136   : > { %v2308_v53 = vunpack.i.h.bf16 %v2306_v49  ;;  %v2307_v32 = vunpack.i.l.bf16 %v2306_v49  ;;  %1898 = vmatpush3.bf16.msra.mxu1 %v834_v48  ;;  %v2343_v2 = vunpack.i.h.bf16 %v2341_v16  ;;  %v2342_v3 = vunpack.i.l.bf16 %v2341_v16 }
 0x137   : > { %1899 = vmatprep.subr.bf16.mxu1 %v841_v46 }
 0x138   : > { %v864_v55 = vpack.c.bf16 %v2308_v53, %v2307_v32  ;;  %v862_v17 = vpack.c.bf16 %v2343_v2, %v2342_v3 }
 0x139   : > { %v2346_v56 = vpop.permute.xlu0 %2345  ;;  %v2311_v19 = vpop.permute.xlu1 %2310  ;;  %1327 = vmatmul.mubr.bf16.gmra.mxu0 %v2441_v50  ;;  %v2456_v50 = vld [vmem:[%s3158_s1 + $0x120] ss:$44 sps:$4 sm:$0xff]  }
 0x13a   : > { %v2313_v31 = vunpack.i.h.bf16 %v2311_v19  ;;  %v2312_v61 = vunpack.i.l.bf16 %v2311_v19  ;;  %1900 = vmatpush3.bf16.msra.mxu1 %v833_v52  ;;  %1925 = vmatprep.subr.bf16.mxu0 %v864_v55  ;;  %v2348_v18 = vunpack.i.h.bf16 %v2346_v56  ;;  %v2347_v21 = vunpack.i.l.bf16 %v2346_v56 }
 0x13b   : > { %1983 = vmatprep.subr.bf16.mxu1 %v864_v55  ;;  %1334 = vmatprep.mubr.bf16.mxu0 %v2445_v54  ;;  %v2462_v55 = vld [vmem:[%s3158_s1 + $0x12c] ss:$44 sps:$4 sm:$0xff]  }
 0x13c   : > { %v856_v62 = vpack.c.bf16 %v2313_v31, %v2312_v61  ;;  %v861_v30 = vpack.c.bf16 %v2348_v18, %v2347_v21  ;;  %v2472_v18 = vld [vmem:[%s3158_s1 + $0x130] ss:$44 sps:$4 sm:$0xff]  }
 0x13d   : > { %v2351_v63 = vpop.permute.xlu0 %2350  ;;  %v2316_v4 = vpop.permute.xlu1 %2315  ;;  %1376 = vmatmul.mubr.bf16.vlgmr.msra.gmra.mxu1 %v2442_v60 }
 0x13e   : > { %v2318_v10 = vunpack.i.h.bf16 %v2316_v4  ;;  %v2317_v11 = vunpack.i.l.bf16 %v2316_v4  ;;  %1926 = vmatpush3.bf16.msra.mxu0 %v856_v62  ;;  %1991 = vmatpush3.bf16.msra.mxu1 %v856_v62  ;;  %v2353_v47 = vunpack.i.h.bf16 %v2351_v63  ;;  %v2352_v33 = vunpack.i.l.bf16 %v2351_v63  ;;  %v2463_v4 = vld [vmem:[%s3158_s1 + $0x7c] ss:$44 sps:$4 sm:$0xff]  }
 0x13f   : > { %1927 = vmatprep.subr.bf16.mxu0 %v863_v1  ;;  %1984 = vmatprep.subr.bf16.mxu1 %v863_v1  ;;  %v2460_v1 = vld [vmem:[%s3158_s1 + $0x128] ss:$44 sps:$4 sm:$0xff]  }
 0x140   : > { %v855_v24 = vpack.c.bf16 %v2318_v10, %v2317_v11  ;;  %1383 = vmatprep.mubr.bf16.mxu1 %v2448_v0  ;;  %v860_v43 = vpack.c.bf16 %v2353_v47, %v2352_v33  ;;  %v2457_v0 = vld [vmem:[%s3158_s1 + $0x20] ss:$44 sps:$4 sm:$0xff]   ;;  %v2466_v11 = vld [vmem:[%s3158_s1 + $0x78] ss:$44 sps:$4 sm:$0xff]  }
 0x141   : > { %v2361_v13 = vpop.permute.xlu0 %2360  ;;  %v2321_v45 = vpop.permute.xlu1 %2320  ;;  %1335 = vmatmul.mubr.bf16.gmra.mxu0 %v2447_v5  ;;  %v2465_v5 = vld [vmem:[%s3158_s1 + $0x28] ss:$44 sps:$4 sm:$0xff]  }
 0x142   : > { %v2323_v25 = vunpack.i.h.bf16 %v2321_v45  ;;  %v2322_v27 = vunpack.i.l.bf16 %v2321_v45  ;;  %1928 = vmatpush3.bf16.msra.mxu0 %v855_v24  ;;  %1992 = vmatpush3.bf16.msra.mxu1 %v855_v24  ;;  %v2363_v51 = vunpack.i.h.bf16 %v2361_v13  ;;  %v2362_v35 = vunpack.i.l.bf16 %v2361_v13  ;;  %v2467_v24 = vld [vmem:[%s3158_s1 + $0x80] ss:$44 sps:$4 sm:$0xff]  }
 0x143   : > { %1929 = vmatprep.subr.bf16.mxu0 %v862_v17  ;;  %1985 = vmatprep.subr.bf16.mxu1 %v862_v17  ;;  %v2468_v13 = vld [vmem:[%s3158_s1 + $0xd4] ss:$44 sps:$4 sm:$0xff]   ;;  %v2471_v17 = vld [vmem:[%s3158_s1 + $0xd0] ss:$44 sps:$4 sm:$0xff]  }
 0x144   : > { %v854_v26 = vpack.c.bf16 %v2323_v25, %v2322_v27  ;;  %1440 = vmatprep.mubr.bf16.mxu0 %v2459_v14  ;;  %v859_v20 = vpack.c.bf16 %v2363_v51, %v2362_v35  ;;  %v2470_v14 = vld [vmem:[%s3158_s1 + $0xd8] ss:$44 sps:$4 sm:$0xff]  }
 0x145   : > { %v2326_v8 = vpop.permute.xlu1 %2325  ;;  %1384 = vmatmul.mubr.bf16.gmra.mxu1 %v2450_v22  ;;  %v2371_v37 = vpop.permute.xlu0 %2370 }
 0x146   : > { %v2328_v34 = vunpack.i.h.bf16 %v2326_v8  ;;  %v2327_v36 = vunpack.i.l.bf16 %v2326_v8  ;;  %1930 = vmatpush3.bf16.msra.mxu0 %v854_v26  ;;  %1993 = vmatpush3.bf16.msra.mxu1 %v854_v26  ;;  %v2373_v23 = vunpack.i.h.bf16 %v2371_v37  ;;  %v2372_v28 = vunpack.i.l.bf16 %v2371_v37 }
 0x147   : > { %1931 = vmatprep.subr.bf16.mxu0 %v861_v30  ;;  %1986 = vmatprep.subr.bf16.mxu1 %v861_v30 }
 0x148   : > { %v853_v38 = vpack.c.bf16 %v2328_v34, %v2327_v36  ;;  %1391 = vmatprep.mubr.bf16.mxu1 %v2451_v29  ;;  %v858_v46 = vpack.c.bf16 %v2373_v23, %v2372_v28 }
 0x149   : > { %v2356_v39 = vpop.permute.xlu1 %2355  ;;  %v2381_v15 = vpop.permute.xlu0 %2380 }
 0x14a   : > { %v2358_v59 = vunpack.i.h.bf16 %v2356_v39  ;;  %v2357_v9 = vunpack.i.l.bf16 %v2356_v39  ;;  %1932 = vmatpush3.bf16.msra.mxu0 %v853_v38  ;;  %1994 = vmatpush3.bf16.msra.mxu1 %v853_v38  ;;  %v2383_v48 = vunpack.i.h.bf16 %v2381_v15  ;;  %v2382_v16 = vunpack.i.l.bf16 %v2381_v15 }
 0x14b   : > { %1933 = vmatprep.subr.bf16.mxu0 %v860_v43  ;;  %1987 = vmatprep.subr.bf16.mxu1 %v860_v43 }
 0x14c   : > { %v852_v12 = vpack.c.bf16 %v2358_v59, %v2357_v9  ;;  %v857_v56 = vpack.c.bf16 %v2383_v48, %v2382_v16 }
 0x14d   : > { %v2366_v40 = vpop.permute.xlu1 %2365  ;;  %1392 = vmatmul.mubr.bf16.gmra.mxu1 %v2453_v7  ;;  %v2391_v52 = vpop.permute.xlu0 %2390 }
 0x14e   : > { %v2368_v41 = vunpack.i.h.bf16 %v2366_v40  ;;  %v2367_v42 = vunpack.i.l.bf16 %v2366_v40  ;;  %1934 = vmatpush3.bf16.msra.mxu0 %v852_v12  ;;  %1995 = vmatpush3.bf16.msra.mxu1 %v852_v12  ;;  %v2393_v57 = vunpack.i.h.bf16 %v2391_v52  ;;  %v2392_v58 = vunpack.i.l.bf16 %v2391_v52 }
 0x14f   : > { %1935 = vmatprep.subr.bf16.mxu0 %v859_v20  ;;  %1988 = vmatprep.subr.bf16.mxu1 %v859_v20 }
 0x150   : > { %v851_v44 = vpack.c.bf16 %v2368_v41, %v2367_v42  ;;  %1399 = vmatprep.mubr.bf16.mxu1 %v2454_v6  ;;  %v866_v62 = vpack.c.bf16 %v2393_v57, %v2392_v58 }
 0x151   : > { %v2376_v49 = vpop.permute.xlu1 %2375 }
 0x152   : > { %v2378_v53 = vunpack.i.h.bf16 %v2376_v49  ;;  %v2377_v32 = vunpack.i.l.bf16 %v2376_v49  ;;  %1936 = vmatpush3.bf16.msra.mxu0 %v851_v44  ;;  %1996 = vmatpush3.bf16.msra.mxu1 %v851_v44 }
 0x153   : > { %1937 = vmatprep.subr.bf16.mxu0 %v858_v46  ;;  %1989 = vmatprep.subr.bf16.mxu1 %v858_v46 }
 0x154   : > { %v850_v54 = vpack.c.bf16 %v2378_v53, %v2377_v32 }
 0x155   : > { %v2386_v19 = vpop.permute.xlu1 %2385  ;;  %1400 = vmatmul.mubr.bf16.gmra.mxu1 %v2456_v50 }
 0x156   : > { %v2388_v60 = vunpack.i.h.bf16 %v2386_v19  ;;  %v2387_v31 = vunpack.i.l.bf16 %v2386_v19  ;;  %1938 = vmatpush3.bf16.msra.mxu0 %v850_v54  ;;  %1997 = vmatpush3.bf16.msra.mxu1 %v850_v54 }
 0x157   : > { %1939 = vmatprep.subr.bf16.mxu0 %v857_v56  ;;  %1990 = vmatprep.subr.bf16.mxu1 %v857_v56 }
 0x158   : > { %v849_v61 = vpack.c.bf16 %v2388_v60, %v2387_v31  ;;  %1464 = vmatprep.mubr.bf16.mxu1 %v2462_v55 }
 0x159   : > { %v2396_v63 = vpop.permute.xlu1 %2395 }
 0x15a   : > { %v2398_v2 = vunpack.i.h.bf16 %v2396_v63  ;;  %v2397_v3 = vunpack.i.l.bf16 %v2396_v63  ;;  %1940 = vmatpush3.bf16.msra.mxu0 %v849_v61  ;;  %1998 = vmatpush3.bf16.msra.mxu1 %v849_v61 }
 0x15b   : > { %1971 = vmatprep.subr.bf16.mxu1 %v866_v62 }
 0x15c   : > { %v865_v10 = vpack.c.bf16 %v2398_v2, %v2397_v3 }
 0x15d   : > { %1441 = vmatmul.mubr.bf16.vlgmr.msra.gmra.mxu0 %v2457_v0  ;;  %1465 = vmatmul.mubr.bf16.vlgmr.msra.gmra.mxu1 %v2460_v1 }
 0x15e   : > { %1972 = vmatpush3.bf16.msra.mxu1 %v866_v62  ;;  %1448 = vmatprep.mubr.bf16.mxu0 %v2463_v4 }
 0x15f   : > { %1973 = vmatprep.subr.bf16.mxu1 %v865_v10  ;;  %1975 = vmatprep.mubr.msk.bf16.mxu1 %vm1135_vm0, %v2465_v5 }
 0x162   : > { %1974 = vmatpush3.bf16.msra.mxu1 %v865_v10  ;;  %v878_v10 = vpop.permute.xlu0 %877 }
 0x165   : > { %1449 = vmatmul.mubr.bf16.gmra.mxu0 %v2466_v11  ;;  %1976 = vmatmul.mubr.msk.bf16.vlgmr.msra.gmra.mxu1 %vm1135_vm0, %v2467_v24 }
 0x166   : > { %1456 = vmatprep.mubr.bf16.mxu0 %v2468_v13  ;;  %1979 = vmatprep.mubr.msk.bf16.mxu1 %vm1135_vm0, %v2470_v14  ;;  %v883_v4 = vpop.permute.xlu1 %882 }
 0x16a   : > { %v888_v13 = vpop.permute.xlu1 %887 }
 0x16d   : > { %1457 = vmatmul.mubr.bf16.gmra.mxu0 %v2471_v17  ;;  %1980 = vmatmul.mubr.msk.bf16.gmra.mxu1 %vm1135_vm0, %v2472_v18  ;;  %v893_v17 = vpop.permute.xlu0 %892 }
 0x175   : > { %v2981_v21 = vpop.f32.mrf.mxu0 }
 0x177   : > { %v1782_v45 = vpop.f32.mrf.mxu0 }
 0x178   : > { %v1783_v18 = vadd.f32 %v1782_v45, %v2981_v21 }
 0x179   : > { %v2983_v22 = vpop.f32.mrf.mxu0 }
 0x17b   : > { %v2985_v25 = vpop.f32.mrf.mxu0 }
 0x17d   : > { %v2987_v27 = vpop.f32.mrf.mxu0  ;;  %v2989_v29 = vpop.f32.mrf.mxu1 }
 0x17f   : > { %v1788_v26 = vpop.f32.mrf.mxu0  ;;  %v2991_v47 = vpop.f32.mrf.mxu1 }
 0x181   : > { %v1790_v30 = vpop.f32.mrf.mxu0  ;;  %v2993_v8 = vpop.f32.mrf.mxu1 }
 0x183   : > { %v1791_v33 = vpop.f32.mrf.mxu0  ;;  %v2995_v36 = vpop.f32.mrf.mxu1 }
 0x184   : > { %v1826_v45 = vadd.f32 %v2995_v36, %v2993_v8 }
 0x185   : > { %v1793_v34 = vpop.f32.mrf.mxu0  ;;  %v2997_v38 = vpop.f32.mrf.mxu1 }
 0x187   : > { %v1794_v37 = vpop.f32.mrf.mxu0  ;;  %v3001_v51 = vpop.f32.mrf.mxu1 }
 0x189   : > { %v2999_v43 = vpop.f32.mrf.mxu0  ;;  %v3005_v39 = vpop.f32.mrf.mxu1 }
 0x18b   : > { %v3003_v35 = vpop.f32.mrf.mxu0  ;;  %v3007_v59 = vpop.f32.mrf.mxu1 }
 0x18d   : > { %v1799_v7 = vpop.f32.mrf.mxu0  ;;  %v3009_v12 = vpop.f32.mrf.mxu1 }
 0x18f   : > { %v1800_v9 = vpop.f32.mrf.mxu0  ;;  %v3011_v6 = vpop.f32.mrf.mxu1 }
 0x190   : > { %v1835_v36 = vadd.f32 %v3011_v6, %v3009_v12 }
 0x191   : > { %v1802_v15 = vpop.f32.mrf.mxu0  ;;  %v3013_v23 = vpop.f32.mrf.mxu1 }
 0x193   : > { %v1803_v20 = vpop.f32.mrf.mxu0  ;;  %v3015_v41 = vpop.f32.mrf.mxu1 }
 0x195   : > { %v3021_v46 = vpop.f32.mrf.mxu1 }
 0x197   : > { %v3025_v16 = vpop.f32.mrf.mxu1 }
 0x199   : > { %v3029_v50 = vpop.f32.mrf.mxu1 }
 0x19b   : > { %v3033_v53 = vpop.f32.mrf.mxu1 }
 0x1e9   : > { %v1861_v28 = vpop.f32.mrf.mxu0 }
 0x1eb   : > { %v1862_v40 = vpop.f32.mrf.mxu0 }
 0x1ed   : > { %v3017_v42 = vpop.f32.mrf.mxu0 }
 0x1ef   : > { %v3019_v44 = vpop.f32.mrf.mxu0 }
 0x1f0   : > { %v1866_v12 = vadd.f32 %v3019_v44, %v3017_v42 }
 0x1f1   : > { %v3023_v48 = vpop.f32.mrf.mxu0 }
 0x1f3   : > { %v3027_v49 = vpop.f32.mrf.mxu0 }
 0x1f4   : > { %v1869_v6 = vadd.f32 %v3027_v49, %v3023_v48 }
 0x1f5   : > { %v3031_v52 = vpop.f32.mrf.mxu0 }
 0x1f7   : > { %v3035_v32 = vpop.f32.mrf.mxu0 }
 0x1f9   : > { %v3037_v55 = vpop.f32.mrf.mxu0 }
 0x1fa   : > { %3161 = vst [vmem:[#allocation2_spill] sm:$0xff] %v3037_v55  ;;  %v1183_v55 = vadd.f32 %v1783_v18, %v878_v10  ;;  %v1798_v18 = vadd.f32 %v3003_v35, %v2999_v43 }
 0x1fb   : > { %v3041_v58 = vpop.f32.mrf.mxu0 }
 0x1fc   : > { %3162 = vst [vmem:[#allocation3_spill] sm:$0xff] %v3041_v58  ;;  %v903_v58 = vpop.permute.xlu0 %902 }
 0x1fd   : > { %v1901_v54 = vpop.f32.mrf.mxu1  ;;  %v3047_v31 = vpop.f32.mrf.mxu0 }
 0x1fe   : > { %3163 = vst [vmem:[#allocation4_spill] sm:$0xff] %v3047_v31 }
 0x1ff   : > { %v1902_v56 = vpop.f32.mrf.mxu1  ;;  %v3053_v63 = vpop.f32.mrf.mxu0 }
 0x200   : > { %3165 = vst [vmem:[#allocation6_spill] sm:$0xff] %v3053_v63  ;;  %v913_v10 = vpop.permute.xlu0 %912 }
 0x201   : > { %v3039_v57 = vpop.f32.mrf.mxu1  ;;  %v3059_v2 = vpop.f32.mrf.mxu0 }
 0x203   : > { %v3043_v19 = vpop.f32.mrf.mxu1  ;;  %v3065_v11 = vpop.f32.mrf.mxu0 }
 0x204   : > { %3170 = vst [vmem:[#allocation11_spill] sm:$0xff] %v3065_v11 }
 0x205   : > { %v3045_v60 = vpop.f32.mrf.mxu1  ;;  %v1882_v63 = vpop.f32.mrf.mxu0 }
 0x207   : > { %v3049_v61 = vpop.f32.mrf.mxu1  ;;  %v1883_v11 = vpop.f32.mrf.mxu0 }
 0x208   : > { %v1909_v42 = vadd.f32 %v3049_v61, %v3045_v60 }
 0x209   : > { %v3051_v62 = vpop.f32.mrf.mxu1 }
 0x20a   : > { %3164 = vst [vmem:[#allocation5_spill] sm:$0xff] %v3051_v62 }
 0x20b   : > { %v3055_v0 = vpop.f32.mrf.mxu1  ;;  %v3174_v48 = vld [vmem:[#allocation11_spill] sm:$0xff] }
 0x20c   : > { %3166 = vst [vmem:[#allocation7_spill] sm:$0xff] %v3055_v0  ;;  %v1792_v0 = vadd.f32 %v1791_v33, %v1790_v30  ;;  %v1832_v30 = vadd.f32 %v3007_v59, %v3005_v39  ;;  %v1804_v33 = vadd.f32 %v1803_v20, %v1802_v15  ;;  %v1903_v59 = vadd.f32 %v1902_v56, %v1901_v54 }
 0x20d   : > { %v3057_v1 = vpop.f32.mrf.mxu1  ;;  %v1202_v54 = vadd.f32 %v1798_v18, %v903_v58  ;;  %v1872_v56 = vadd.f32 %v3035_v32, %v3031_v52  ;;  %v1881_v49 = vadd.f32 %v3174_v48, %v3059_v2 }
 0x20e   : > { %3167 = vst [vmem:[#allocation8_spill] sm:$0xff] %v3057_v1  ;;  %v1789_v1 = vadd.f32 %v1788_v26, %v2987_v27  ;;  %v1829_v26 = vadd.f32 %v3001_v51, %v2997_v38  ;;  %v1841_v51 = vadd.f32 %v3025_v16, %v3021_v46  ;;  %v1838_v46 = vadd.f32 %v3015_v41, %v3013_v23 }
 0x20f   : > { %v3061_v3 = vpop.f32.mrf.mxu1  ;;  %v1884_v23 = vadd.f32 %v1883_v11, %v1882_v63 }
 0x210   : > { %3168 = vst [vmem:[#allocation9_spill] sm:$0xff] %v3061_v3  ;;  %v1786_v3 = vadd.f32 %v2985_v25, %v2983_v22  ;;  %v1801_v22 = vadd.f32 %v1800_v9, %v1799_v7  ;;  %v1191_v25 = vadd.f32 %v1789_v1, %v888_v13 }
 0x211   : > { %v3063_v5 = vpop.f32.mrf.mxu1 }
 0x212   : > { %3169 = vst [vmem:[#allocation10_spill] sm:$0xff] %v3063_v5  ;;  %v898_v5 = vpop.permute.xlu1 %897  ;;  %v1256_v15 = vadd.f32 %v1829_v26, %v1191_v25 }
 0x213   : > { %v3067_v24 = vpop.f32.mrf.mxu1 }
 0x214   : > { %3171 = vst [vmem:[#allocation12_spill] sm:$0xff] %v3067_v24  ;;  %v1795_v24 = vadd.f32 %v1794_v37, %v1793_v34  ;;  %v1194_v34 = vadd.f32 %v1792_v0, %v893_v17  ;;  %v1863_v37 = vadd.f32 %v1862_v40, %v1861_v28  ;;  %v1844_v28 = vadd.f32 %v3033_v53, %v3029_v50  ;;  %v3176_v17 = vld [vmem:[#allocation3_spill] sm:$0xff] }
 0x215   : > { %v3069_v14 = vpop.f32.mrf.mxu1  ;;  %v1210_v40 = vadd.f32 %v1804_v33, %v913_v10  ;;  %v1321_v52 = vadd.f32 %v1869_v6, %v1256_v15 }
 0x216   : > { %3172 = vst [vmem:[#allocation13_spill] sm:$0xff] %v3069_v14  ;;  %v1823_v14 = vadd.f32 %v2991_v47, %v2989_v29  ;;  %v908_v27 = vpop.permute.xlu1 %907  ;;  %v1199_v7 = vadd.f32 %v1795_v24, %v898_v5  ;;  %v1259_v20 = vadd.f32 %v1832_v30, %v1194_v34 }
 0x217   : > { %v3072_v31 = vpop.f32.mrf.mxu1  ;;  %v1207_v39 = vadd.f32 %v1801_v22, %v908_v27  ;;  %v1275_v44 = vadd.f32 %v1844_v28, %v1210_v40  ;;  %v1386_v27 = vadd.f32 %v1909_v42, %v1321_v52  ;;  %v1267_v40 = vadd.f32 %v1838_v46, %v1202_v54 }
 0x218   : > { %3173 = vst [vmem:[#allocation14_spill] sm:$0xff] %v3072_v31  ;;  %v1186_v31 = vadd.f32 %v1786_v3, %v883_v4  ;;  %v1248_v8 = vadd.f32 %v1823_v14, %v1183_v55  ;;  %v1264_v16 = vadd.f32 %v1835_v36, %v1199_v7  ;;  %v1906_v4 = vadd.f32 %v3043_v19, %v3039_v57  ;;  %v3175_v14 = vld [vmem:[#allocation2_spill] sm:$0xff]  ;;  %v3177_v19 = vld [vmem:[#allocation5_spill] sm:$0xff] }
 0x219   : > { %v3077_v62 = vpop.f32.mrf.mxu1  ;;  %v1272_v0 = vadd.f32 %v1841_v51, %v1207_v39  ;;  %v1324_v13 = vadd.f32 %v1872_v56, %v1259_v20  ;;  %v1875_v57 = vadd.f32 %v3176_v17, %v3175_v14  ;;  %v1340_v34 = vadd.f32 %v1884_v23, %v1275_v44  ;;  %v3182_v51 = vld [vmem:[#allocation9_spill] sm:$0xff]  ;;  %v3185_v23 = vld [vmem:[#allocation10_spill] sm:$0xff] }
 0x21a   : > { %v1251_v38 = vadd.f32 %v1826_v45, %v1186_v31  ;;  %v1313_v55 = vadd.f32 %v1863_v37, %v1248_v8  ;;  %v3178_v45 = vld [vmem:[#allocation7_spill] sm:$0xff] }
 0x21b   : > { %v3081_v21 = vpop.f32.mrf.mxu1  ;;  %v1912_v60 = vadd.f32 %v3178_v45, %v3177_v19  ;;  %v1337_v33 = vadd.f32 %v1881_v49, %v1272_v0 }
 0x21c   : > { %v1378_v3 = vadd.f32 %v1903_v59, %v1313_v55  ;;  %v1316_v5 = vadd.f32 %v1866_v12, %v1251_v38  ;;  %v3181_v38 = vld [vmem:[#allocation8_spill] sm:$0xff] }
 0x21d   : > { %v1941_v29 = vpop.f32.mrf.mxu0  ;;  %v1959_v47 = vpop.f32.mrf.mxu1  ;;  %v3179_v61 = vld [vmem:[#allocation13_spill] sm:$0xff]  ;;  %v1915_v39 = vadd.f32 %v3182_v51, %v3181_v38 }
 0x21e   : > { %v1381_v11 = vadd.f32 %v1906_v4, %v1316_v5 }
 0x21f   : > { %v1942_v9 = vpop.f32.mrf.mxu0  ;;  %v1960_v1 = vpop.f32.mrf.mxu1  ;;  %v3180_v22 = vld [vmem:[#allocation14_spill] sm:$0xff] }
 0x220   : > { %v1943_v31 = vadd.f32 %v1942_v9, %v1941_v29  ;;  %v1921_v25 = vadd.f32 %v3180_v22, %v3179_v61  ;;  %v1924_v29 = vadd.f32 %v3081_v21, %v3077_v62  ;;  %v1961_v37 = vadd.f32 %v1960_v1, %v1959_v47 }
 0x221   : > { %v1944_v43 = vpop.f32.mrf.mxu0  ;;  %v1962_v35 = vpop.f32.mrf.mxu1  ;;  %v1389_v9 = vadd.f32 %v1912_v60, %v1324_v13 }
 0x222   : > { %v1443_v24 = vadd.f32 %v1943_v31, %v1378_v3  ;;  %v1402_v59 = vadd.f32 %v1921_v25, %v1337_v33  ;;  %v1405_v55 = vadd.f32 %v1924_v29, %v1340_v34 }
 0x223   : > { %v1945_v50 = vpop.f32.mrf.mxu0  ;;  %v1963_v53 = vpop.f32.mrf.mxu1 }
 0x224   : > { %v1946_v32 = vadd.f32 %v1945_v50, %v1944_v43  ;;  %v1964_v62 = vadd.f32 %v1963_v53, %v1962_v35  ;;  %v1329_v43 = vadd.f32 %v1875_v57, %v1264_v16  ;;  %v1467_v6 = vadd.f32 %v1961_v37, %v1402_v59  ;;  %v3183_v35 = vld [vmem:[#allocation4_spill] sm:$0xff]  ;;  %v3184_v53 = vld [vmem:[#allocation6_spill] sm:$0xff] }
 0x225   : > { %v1947_v41 = vpop.f32.mrf.mxu0  ;;  %v1977_v58 = vpop.f32.mrf.mxu1  ;;  %v1878_v0 = vadd.f32 %v3184_v53, %v3183_v35 }
 0x226   : > { %v1446_v7 = vadd.f32 %v1946_v32, %v1381_v11  ;;  %v1394_v3 = vadd.f32 %v1915_v39, %v1329_v43  ;;  %v1470_v49 = vadd.f32 %v1964_v62, %v1405_v55 }
 0x227   : > { %v1948_v2 = vpop.f32.mrf.mxu0  ;;  %v1507_v63 = vpop.f32.mrf.mxu1  ;;  %v1332_v57 = vadd.f32 %v1878_v0, %v1267_v40 }
 0x228   : > { %v1949_v26 = vadd.f32 %v1948_v2, %v1947_v41  ;;  %v1508_v30 = vadd.f32 %v1507_v63, %v1443_v24  ;;  %v3186_v41 = vld [vmem:[#allocation12_spill] sm:$0xff] }
 0x229   : > { %v1950_v10 = vpop.f32.mrf.mxu0  ;;  %v1978_v18 = vpop.f32.mrf.mxu1 }
 0x22a   : > { %v1451_v8 = vadd.f32 %v1949_v26, %v1386_v27  ;;  %vm1538_vm2 = vcmp.ge.f32.partialorder %v1508_v30, 0.0  ;;  %v1546_v36 = vmul.f32 0.1, %v1508_v30 }
 0x22b   : > { %v1951_v21 = vpop.f32.mrf.mxu0  ;;  %v1510_v47 = vpop.f32.mrf.mxu1 }
 0x22c   : > { %v1516_v1 = vadd.f32 %v1977_v58, %v1451_v8  ;;  %v1554_v15 = vsel %vm1538_vm2, %v1508_v30, %v1546_v36  ;;  %v1952_v20 = vadd.f32 %v1951_v21, %v1950_v10  ;;  %v1511_v28 = vadd.f32 %v1510_v47, %v1446_v7 }
 0x22d   : > { %1563 = vst.msk [vmem:[%s3124_s22] sm:$0xff] %vm1562_vm1, %v1554_v15  ;;  %v1953_v12 = vpop.f32.mrf.mxu0  ;;  %v1981_v31 = vpop.f32.mrf.mxu1  ;;  %v1918_v58 = vadd.f32 %v3186_v41, %v3185_v23 }
 0x22e   : > { %vm1540_vm3 = vcmp.ge.f32.partialorder %v1516_v1, 0.0  ;;  %v1548_v56 = vmul.f32 0.1, %v1516_v1  ;;  %v1454_v50 = vadd.f32 %v1952_v20, %v1389_v9  ;;  %vm1539_vm4 = vcmp.ge.f32.partialorder %v1511_v28, 0.0 }
 0x22f   : > { %v1547_v4 = vmul.f32 0.1, %v1511_v28  ;;  %v1532_v42 = vadd.f32 %v1981_v31, %v1467_v6  ;;  %v1954_v46 = vpop.f32.mrf.mxu0  ;;  %v1523_v16 = vpop.f32.mrf.mxu1  ;;  %v1397_v25 = vadd.f32 %v1918_v58, %v1332_v57 }
 0x230   : > { %v1556_v54 = vsel %vm1540_vm3, %v1516_v1, %v1548_v56  ;;  %v1519_v44 = vadd.f32 %v1978_v18, %v1454_v50  ;;  %v1955_v48 = vadd.f32 %v1954_v46, %v1953_v12 }
 0x231   : > { %1565 = vst.msk [vmem:[%s3124_s22 + $0x10] sm:$0xff] %vm1562_vm1, %v1556_v54  ;;  %v1555_v5 = vsel %vm1539_vm4, %v1511_v28, %v1547_v4  ;;  %vm1544_vm5 = vcmp.ge.f32.partialorder %v1532_v42, 0.0  ;;  %v1552_v52 = vmul.f32 0.1, %v1532_v42  ;;  %v1956_v32 = vpop.f32.mrf.mxu0  ;;  %v1982_v24 = vpop.f32.mrf.mxu1 }
 0x232   : > { %vm1541_vm6 = vcmp.ge.f32.partialorder %v1519_v44, 0.0  ;;  %v1549_v13 = vmul.f32 0.1, %v1519_v44  ;;  %1564 = vst.msk [vmem:[%s3124_s22 + $0x8] sm:$0xff] %vm1562_vm1, %v1555_v5  ;;  %v1459_v14 = vadd.f32 %v1955_v48, %v1394_v3  ;;  %v1535_v17 = vadd.f32 %v1982_v24, %v1470_v49 }
 0x233   : > { %v1560_v19 = vsel %vm1544_vm5, %v1532_v42, %v1552_v52  ;;  %v1957_v45 = vpop.f32.mrf.mxu0  ;;  %v1526_v30 = vpop.f32.mrf.mxu1 }
 0x234   : > { %v1557_v60 = vsel %vm1541_vm6, %v1519_v44, %v1549_v13  ;;  %1569 = vst.msk [vmem:[%s3124_s22 + $0x30] sm:$0xff] %vm1562_vm1, %v1560_v19  ;;  %v1524_v61 = vadd.f32 %v1523_v16, %v1459_v14  ;;  %vm1545_vm7 = vcmp.ge.f32.partialorder %v1535_v17, 0.0  ;;  %v1553_v22 = vmul.f32 0.1, %v1535_v17 }
 0x235   : > { %1566 = vst.msk [vmem:[%s3124_s22 + $0x18] sm:$0xff] %vm1562_vm1, %v1557_v60  ;;  %v1958_v2 = vadd.f32 %v1957_v45, %v1956_v32 }
 0x236   : > { %vm1542_vm8 = vcmp.ge.f32.partialorder %v1524_v61, 0.0  ;;  %v1550_v63 = vmul.f32 0.1, %v1524_v61  ;;  %v1561_v11 = vsel %vm1545_vm7, %v1535_v17, %v1553_v22 }
 0x237   : > { %1570 = vst.msk [vmem:[%s3124_s22 + $0x38] sm:$0xff] %vm1562_vm1, %v1561_v11  ;;  %v1462_v27 = vadd.f32 %v1958_v2, %v1397_v25 }
 0x238   : > { %v1558_v26 = vsel %vm1542_vm8, %v1524_v61, %v1550_v63 }
 0x239   : > { %1567 = vst.msk [vmem:[%s3124_s22 + $0x20] sm:$0xff] %vm1562_vm1, %v1558_v26  ;;  %v1527_v33 = vadd.f32 %v1526_v30, %v1462_v27 }
 0x23b   : > { %vm1543_vm9 = vcmp.ge.f32.partialorder %v1527_v33, 0.0  ;;  %v1551_v34 = vmul.f32 0.1, %v1527_v33 }
 0x23d   : > { %v1559_v29 = vsel %vm1543_vm9, %v1527_v33, %v1551_v34 }
 0x23e   : > { %1568 = vst.msk [vmem:[%s3124_s22 + $0x28] sm:$0xff] %vm1562_vm1, %v1559_v29 }
 0x23f PF: > { %s13_s14 = sadd.s32 1, %s2503_s14   ;;  %s3187_s12 = smov %s2499_s13 }
 0x240   : > { %p10_p5 = scmp.ge.s32.totalorder %s13_s14, 4   ;;  %s3188_s13 = smov %s3190_s15 }
 0x242   :  { %12 = sbr.rel (!%p10_p5) target bundleno = 2 (0x2), region = 71 }

// kernel: _lambda_.20
= control target key start
LH: loop header
LB: loop body
LE: loop exit
PB: predicated region body
PF: predicated region fallthrough
CT: control target
= control target key end

     0   :  { %s499_s14 = smov 0   ;;  %s501_s15 = smov 0   ;;  %s539_s0 = inlined_call_operand.vmem [shape: bf16[2,2,1,66], index: 0, kind: input, shape index: {}]   ;;  %s540_s1 = inlined_call_operand.vmem [shape: bf16[1,4], index: 1, kind: input, shape index: {}]   ;;  %s541_s2 = inlined_call_operand.<no memory space> [shape: f32[1,1], index: 2, kind: input, shape index: {}]   ;;  %s542_s3 = inlined_call_operand.vmem [shape: f32[2,1,65], index: 3, kind: output, shape index: {}]  }
   0x1   :  { %v8_v0 = vstv %s541_s2  ;;  %s503_s16 = smov 0  }
   0x2   :  { %9 = vst [vmem:[#allocation2] sm:$0x1] %v8_v0 }
   0x3 LB: > { %s24_s2 = sadd.s32 1, %s466_s15  ;;  %p400_p0 = scmp.ge.s32.totalorder %s470_s16, 1  ;;  %s470_s16 = sphi %s503_s16, %s15_s16   ;;  %s466_s15 = sphi %s501_s15, %s544_s15   ;;  %s462_s14 = sphi %s499_s14, %s543_s14  }
   0x4   : > { %p25_p1 = scmp.ge.s32.totalorder %s24_s2, 2  ;;  %p168_p2 = scmp.lt.s32.totalorder %s470_s16, 3 }
   0x6   : > { %s546_s2 = smov (%p25_p1, %s24_s2), 0  ;;  %p169_p3 = pnand %p400_p0, %p168_p2 }
   0x7   : > { %p198_p4 = scmp.lt.s32.totalorder (!%p169_p3), %s462_s14, 1  ;;  %s475_s21 = smov (!%p169_p3), 127  }
   0x8   : > { %172 = sbr.rel (%p169_p3) target bundleno = 347 (0x15b), region = 32 }
   0xd   : > { %v221_v1 = vlaneseq  ;;  %v472_v2 = vmov 0.0   ;;  %s548_s14 = smov (!%p198_p4, %s462_s14), 1  ;;  %vm237_vm0 = vcmask 1040384   ;;  %vm473_vm1 = vmmov 0   ;;  %v245_v14 = vld [vmem:[#allocation2] sm:$0x1] }
   0xe   : > { %408 = vmatprep.subr.bf16.mxu0 %v472_v2  ;;  %s401_s17 = sshll.u32 %s548_s14, 1  ;;  %410 = vmatprep.mubr.msk.bf16.mxu0 %vm473_vm1, %v472_v2  ;;  %v474_v13 = vmov 0   ;;  %vm239_vm2 = vcmask 1041408   ;;  %vm241_vm3 = vcmask 1042432   ;;  %v243_v22 = vld [vmem:[%s540_s1] sm:$0x1]  ;;  %s213_s26 = scalar_lea.vmem %s542_s3, %s548_s14 }
   0xf   : > { %v222_v3 = vshrl.u32 %v221_v1, 7  ;;  %s201_s20 = scalar_lea.vmem %s539_s0, %s401_s17  ;;  %447 = vset.pattern.permute.xlu0 %v474_v13  ;;  %vm255_vm4 = vcmask 31744   ;;  %vm302_vm5 = vcmask 524288  }
  0x10   : > { %v215_v5 = vld [vmem:[%s201_s20] sm:$0x1]  ;;  %v402_v6 = vld [vmem:[%s201_s20 + $0x1] sm:$0x1] }
  0x11   : > { %v223_v4 = vsub.s32 0, %v222_v3  ;;  %v216_v7 = vunpack.c.l.bf16 %v215_v5  ;;  %v219_v8 = vunpack.c.l.bf16 %v402_v6 }
  0x13   : > { %v224_v9 = vrot.slane %v219_v8, %v223_v4  ;;  %v230_v10 = vrot.slane %v216_v7, %v223_v4 }
  0x15   : > { %v442_v11 = vpack.i.bf16 %v224_v9, %v230_v10  ;;  %v238_v12 = vsel %vm237_vm0, %v216_v7, %v224_v9 }
  0x17   : > { %443 = vrot.lane.b32.xlu0 %v442_v11, %s475_s21 }
  0x1b   : > { %248 = vperm.xlu0 %447, %v245_v14  }
  0x89   : > { %v444_v15 = vpop.permute.xlu0 %443 }
  0x8a   : > { %v446_v16 = vunpack.i.h.bf16 %v444_v15  ;;  %v445_v17 = vunpack.i.l.bf16 %v444_v15 }
  0x8c   : > { %v240_v18 = vsel %vm239_vm2, %v238_v12, %v445_v17 }
  0x8d   : > { %v242_v19 = vsel %vm241_vm3, %v240_v18, %v446_v16 }
  0x8e   : > { %v244_v20 = vpack.c.bf16 %v242_v19, %v242_v19 }
  0x90   : > { %v260_v21 = vsel %vm239_vm2, %v244_v20, 0 }
  0x91   : > { %409 = vmatpush3.bf16.msra.mxu0 %v260_v21 }
  0x94   : > { %411 = vmatmul.mubr.msk.bf16.vlgmr.msra.gmra.mxu0 %vm255_vm4, %v243_v22 }
  0x96   : > { %v249_v23 = vpop.permute.xlu0 %248 }
  0x97   : > { %v254_v24 = vrot.slane %v249_v23, %v223_v4 }
 0x154   : > { %v296_v25 = vpop.f32.mrf.mxu0 }
 0x155   : > { %v297_v26 = vadd.f32 %v296_v25, %v254_v24 }
 0x156   : > { %v412_v27 = vpop.f32.mrf.mxu0 }
 0x157   : > { %303 = vst.msk [vmem:[%s213_s26] sm:$0x1] %vm302_vm5, %v297_v26 }
 0x158   : > { %v299_v28 = vpop.f32.mrf.mxu0 }
 0x15a   : > { %v413_v29 = vpop.f32.mrf.mxu0 }
 0x15b PF: > { %s15_s16 = sadd.s32 1, %s470_s16   ;;  %s543_s14 = smov %s466_s15 }
 0x15c   : > { %p12_p5 = scmp.ge.s32.totalorder %s15_s16, 4   ;;  %s544_s15 = smov %s546_s2 }
 0x15e   :  { %14 = sbr.rel (!%p12_p5) target bundleno = 3 (0x3), region = 69 }

// kernel: _lambda_.21
= control target key start
LH: loop header
LB: loop body
LE: loop exit
PB: predicated region body
PF: predicated region fallthrough
CT: control target
= control target key end

     0   :  { %s619_s12 = smov 0   ;;  %s621_s13 = smov 0   ;;  %s667_s0 = inlined_call_operand.vmem [shape: bf16[2,1,1,79], index: 0, kind: input, shape index: {}]   ;;  %s668_s1 = inlined_call_operand.vmem [shape: bf16[16,15], index: 1, kind: input, shape index: {}]   ;;  %s669_s2 = inlined_call_operand.vmem [shape: f32[16,1], index: 2, kind: input, shape index: {}]   ;;  %s670_s3 = inlined_call_operand.vmem [shape: f32[2,16,65], index: 3, kind: output, shape index: {}]  }
   0x1   :  { %s623_s14 = smov 0  }
   0x2 LB: > { %s22_s15 = sadd.s32 1, %s575_s13  ;;  %p496_p0 = scmp.ge.s32.totalorder %s579_s14, 1  ;;  %s579_s14 = sphi %s623_s14, %s13_s14   ;;  %s575_s13 = sphi %s621_s13, %s672_s13   ;;  %s571_s12 = sphi %s619_s12, %s671_s12  }
   0x3   : > { %p23_p1 = scmp.ge.s32.totalorder %s22_s15, 2  ;;  %p171_p2 = scmp.lt.s32.totalorder %s579_s14, 3 }
   0x5   : > { %s674_s15 = smov (%p23_p1, %s22_s15), 0  ;;  %p172_p3 = pnand %p496_p0, %p171_p2 }
   0x6   : > { %p207_p4 = scmp.lt.s32.totalorder (!%p172_p3), %s571_s12, 1  ;;  %s581_s19 = smov (!%p172_p3), 120  }
   0x7   : > { %175 = sbr.rel (%p172_p3) target bundleno = 370 (0x172), region = 32  ;;  %s582_s20 = smov (!%p172_p3), 127  }
   0x8   : > { %s583_s21 = smov (!%p172_p3), 119   ;;  %s584_s22 = smov (!%p172_p3), 126  }
   0x9   : > { %s585_s23 = smov (!%p172_p3), 118   ;;  %s586_s24 = smov (!%p172_p3), 125  }
   0xa   : > { %s587_s25 = smov (!%p172_p3), 117   ;;  %s588_s26 = smov (!%p172_p3), 124  }
   0xb   : > { %s590_s27 = smov (!%p172_p3), 116   ;;  %s591_s28 = smov (!%p172_p3), 123  }
   0xc   : > { %v236_v0 = vlaneseq  ;;  %s676_s12 = smov (!%p207_p4, %s571_s12), 1  ;;  %v589_v6 = vmov 0.0   ;;  %vm592_vm0 = vmmov 0   ;;  %s593_s29 = smov 115   ;;  %v595_v7 = vmov 0   ;;  %v305_v8 = vld [vmem:[%s669_s2] sm:$0xff] }
   0xd   : > { %s209_s18 = scalar_lea.vmem %s667_s0, %s676_s12  ;;  %506 = vmatprep.subr.bf16.mxu0 %v589_v6  ;;  %508 = vmatprep.mubr.msk.bf16.mxu0 %vm592_vm0, %v589_v6  ;;  %s594_s30 = smov 122   ;;  %v306_v9 = vld [vmem:[%s669_s2 + $0x8] sm:$0xff]  ;;  %vm282_vm1 = vcmask 1040384   ;;  %vm284_vm2 = vcmask 1041408   ;;  %vm286_vm3 = vcmask 1042432   ;;  %vm288_vm4 = vcmask 1043456  }
   0xe   : > { %v237_v1 = vshrl.u32 %v236_v0, 7  ;;  %v233_v3 = vld [vmem:[%s209_s18] sm:$0x1]  ;;  %554 = vset.pattern.permute.xlu0 %v595_v7  ;;  %555 = vset.pattern.permute.xlu1 %v595_v7  ;;  %s596_s4 = smov 114   ;;  %s597_s5 = smov 121   ;;  %vm294_vm5 = vcmask 1046528  }
   0xf   : > { %v234_v4 = vunpack.c.l.bf16 %v233_v3  ;;  %vm290_vm6 = vcmask 1044480   ;;  %vm292_vm7 = vcmask 1045504   ;;  %vm326_vm8 = vcmask 1047552   ;;  %v556_v42 = vld [vmem:[%s668_s1] sm:$0xff]   ;;  %s503_s16 = sshll.u32 %s676_s12, 4 }
  0x10   : > { %v238_v2 = vsub.s32 0, %v237_v1  ;;  %v598_v29 = vmov 65535   ;;  %vm322_vm9 = vcmask 121856   ;;  %vm379_vm10 = vcmask 531456  }
  0x11   : > { %v327_v30 = vsel %vm294_vm5, 4294967295, %v598_v29 }
  0x12   : > { %v239_v5 = vrot.slane %v234_v4, %v238_v2  ;;  %v328_v39 = vsel %vm326_vm8, %v327_v30, 0 }
  0x14   : > { %261 = vrot.lane.b32.xlu1 %v239_v5, %s581_s19  ;;  %240 = vrot.lane.b32.xlu0 %v239_v5, %s582_s20  ;;  %s230_s19 = scalar_lea.vmem %s670_s3, %s503_s16 }
  0x18   : > { %264 = vrot.lane.b32.xlu1 %v239_v5, %s583_s21  ;;  %243 = vrot.lane.b32.xlu0 %v239_v5, %s584_s22 }
  0x1c   : > { %267 = vrot.lane.b32.xlu1 %v239_v5, %s585_s23  ;;  %246 = vrot.lane.b32.xlu0 %v239_v5, %s586_s24 }
  0x20   : > { %270 = vrot.lane.b32.xlu1 %v239_v5, %s587_s25  ;;  %249 = vrot.lane.b32.xlu0 %v239_v5, %s588_s26 }
  0x24   : > { %273 = vrot.lane.b32.xlu1 %v239_v5, %s590_s27  ;;  %252 = vrot.lane.b32.xlu0 %v239_v5, %s591_s28 }
  0x28   : > { %276 = vrot.lane.b32.xlu1 %v239_v5, %s593_s29  ;;  %255 = vrot.lane.b32.xlu0 %v239_v5, %s594_s30 }
  0x2c   : > { %279 = vrot.lane.b32.xlu1 %v239_v5, %s596_s4  ;;  %258 = vrot.lane.b32.xlu0 %v239_v5, %s597_s5 }
  0x30   : > { %309 = vperm.xlu0 %554, %v305_v8   ;;  %314 = vperm.xlu1 %555, %v306_v9  }
  0x86   : > { %v262_v10 = vpop.permute.xlu1 %261  ;;  %v241_v11 = vpop.permute.xlu0 %240 }
  0x87   : > { %v283_v20 = vsel %vm282_vm1, %v234_v4, %v241_v11 }
  0x8a   : > { %v265_v12 = vpop.permute.xlu1 %264  ;;  %v244_v13 = vpop.permute.xlu0 %243 }
  0x8b   : > { %v296_v21 = vsel %vm282_vm1, %v262_v10, %v265_v12  ;;  %v285_v22 = vsel %vm284_vm2, %v283_v20, %v244_v13 }
  0x8e   : > { %v268_v14 = vpop.permute.xlu1 %267  ;;  %v247_v15 = vpop.permute.xlu0 %246 }
  0x8f   : > { %v297_v25 = vsel %vm284_vm2, %v296_v21, %v268_v14  ;;  %v287_v26 = vsel %vm286_vm3, %v285_v22, %v247_v15 }
  0x92   : > { %v271_v16 = vpop.permute.xlu1 %270  ;;  %v250_v17 = vpop.permute.xlu0 %249 }
  0x93   : > { %v298_v27 = vsel %vm286_vm3, %v297_v25, %v271_v16  ;;  %v289_v28 = vsel %vm288_vm4, %v287_v26, %v250_v17 }
  0x96   : > { %v274_v18 = vpop.permute.xlu1 %273  ;;  %v253_v19 = vpop.permute.xlu0 %252 }
  0x97   : > { %v299_v31 = vsel %vm288_vm4, %v298_v27, %v274_v18  ;;  %v291_v32 = vsel %vm290_vm6, %v289_v28, %v253_v19 }
  0x9a   : > { %v277_v23 = vpop.permute.xlu1 %276  ;;  %v256_v24 = vpop.permute.xlu0 %255 }
  0x9b   : > { %v300_v33 = vsel %vm290_vm6, %v299_v31, %v277_v23  ;;  %v293_v34 = vsel %vm292_vm7, %v291_v32, %v256_v24 }
  0x9e   : > { %v280_v35 = vpop.permute.xlu1 %279  ;;  %v259_v36 = vpop.permute.xlu0 %258 }
  0x9f   : > { %v301_v37 = vsel %vm292_vm7, %v300_v33, %v280_v35  ;;  %v295_v38 = vsel %vm294_vm5, %v293_v34, %v259_v36 }
  0xa0   : > { %v304_v40 = vpack.c.bf16 %v301_v37, %v295_v38 }
  0xa2   : > { %v330_v41 = vand.u32 %v328_v39, %v304_v40 }
  0xa4   : > { %507 = vmatpush3.bf16.msra.mxu0 %v330_v41 }
  0xa7   : > { %509 = vmatmul.mubr.msk.bf16.vlgmr.msra.gmra.mxu0 %vm322_vm9, %v556_v42 }
  0xab   : > { %v310_v43 = vpop.permute.xlu0 %309  ;;  %v315_v47 = vpop.permute.xlu1 %314 }
 0x167   : > { %v366_v44 = vpop.f32.mrf.mxu0 }
 0x168   : > { %v367_v45 = vadd.f32 %v366_v44, %v310_v43 }
 0x169   : > { %v510_v46 = vpop.f32.mrf.mxu0 }
 0x16a   : > { %vm373_vm11 = vcmp.ge.f32.partialorder %v367_v45, 0.0  ;;  %v375_v48 = vmul.f32 0.1, %v367_v45 }
 0x16b   : > { %v369_v49 = vpop.f32.mrf.mxu0 }
 0x16c   : > { %v377_v50 = vsel %vm373_vm11, %v367_v45, %v375_v48  ;;  %v370_v51 = vadd.f32 %v369_v49, %v315_v47 }
 0x16d   : > { %380 = vst.msk [vmem:[%s230_s19] sm:$0xff] %vm379_vm10, %v377_v50  ;;  %v511_v52 = vpop.f32.mrf.mxu0 }
 0x16e   : > { %vm374_vm12 = vcmp.ge.f32.partialorder %v370_v51, 0.0  ;;  %v376_v53 = vmul.f32 0.1, %v370_v51 }
 0x170   : > { %v378_v54 = vsel %vm374_vm12, %v370_v51, %v376_v53 }
 0x171   : > { %381 = vst.msk [vmem:[%s230_s19 + $0x8] sm:$0xff] %vm379_vm10, %v378_v54 }
 0x172 PF: > { %s13_s14 = sadd.s32 1, %s579_s14   ;;  %s671_s12 = smov %s575_s13 }
 0x173   : > { %p10_p5 = scmp.ge.s32.totalorder %s13_s14, 4   ;;  %s672_s13 = smov %s674_s15 }
 0x175   :  { %12 = sbr.rel (!%p10_p5) target bundleno = 2 (0x2), region = 68 }

// kernel: _lambda_.22
= control target key start
LH: loop header
LB: loop body
LE: loop exit
PB: predicated region body
PF: predicated region fallthrough
CT: control target
= control target key end

     0   :  { %s1192_s12 = smov 0   ;;  %s1194_s13 = smov 0   ;;  %s1328_s0 = inlined_call_operand.vmem [shape: bf16[2,2,16,53], index: 0, kind: input, shape index: {}]   ;;  %s1329_s1 = inlined_call_operand.vmem [shape: bf16[16,656], index: 1, kind: input, shape index: {}]   ;;  %s1330_s2 = inlined_call_operand.vmem [shape: f32[16,1], index: 2, kind: input, shape index: {}]   ;;  %s1331_s3 = inlined_call_operand.vmem [shape: f32[2,16,33], index: 3, kind: output, shape index: {}]  }
   0x1   :  { %s1196_s14 = smov 0  }
   0x2 LB: > { %s22_s15 = sadd.s32 1, %s1156_s13  ;;  %p830_p0 = scmp.ge.s32.totalorder %s1160_s14, 1  ;;  %s1160_s14 = sphi %s1196_s14, %s13_s14   ;;  %s1156_s13 = sphi %s1194_s13, %s1333_s13   ;;  %s1152_s12 = sphi %s1192_s12, %s1332_s12  }
   0x3   : > { %p23_p1 = scmp.ge.s32.totalorder %s22_s15, 2  ;;  %p174_p2 = scmp.lt.s32.totalorder %s1160_s14, 3 }
   0x5   : > { %s1335_s15 = smov (%p23_p1, %s22_s15), 0  ;;  %p175_p3 = pnand %p830_p0, %p174_p2 }
   0x6   : > { %p213_p4 = scmp.lt.s32.totalorder (!%p175_p3), %s1152_s12, 1  ;;  %s1162_s20 = smov (!%p175_p3), 121  }
   0x7   : > { %178 = sbr.rel (%p175_p3) target bundleno = 510 (0x1fe), region = 32  ;;  %s1163_s21 = smov (!%p175_p3), 125  }
   0x8   : > { %s1164_s22 = smov (!%p175_p3), 122   ;;  %s1165_s23 = smov (!%p175_p3), 126  }
   0x9   : > { %s1166_s24 = smov (!%p175_p3), 123   ;;  %s1167_s25 = smov (!%p175_p3), 127  }
   0xa   : > { %s1168_s26 = smov (!%p175_p3), 124   ;;  %s1169_s27 = smov (!%p175_p3), 120  }
   0xb   : > { %s1171_s30 = smov (!%p175_p3), 112  }
   0xc   : > { %s1337_s12 = smov (!%p213_p4, %s1152_s12), 1  ;;  %v1129_v8 = vld [vmem:[%s1329_s1 + $0x4] ss:$24 sps:$4 sm:$0xff]   ;;  %v1170_v11 = vmov 0   ;;  %vm577_vm0 = vcmask 130048   ;;  %vm710_vm2 = vcmask 269312  }
   0xd   : > { %s848_s16 = sshll.u32 %s1337_s12, 4  ;;  %613 = vmatprep.mubr.bf16.mxu1 %v1129_v8  ;;  %663 = vmatprep.subr.bf16.mxu0 %v1170_v11 }
   0xe   : > { %s217_s19 = scalar_lea.vmem %s1328_s0, %s848_s16  ;;  %1124 = vset.pattern.permute.xlu0 %v1170_v11  ;;  %1123 = vset.pattern.permute.xlu1 %v1170_v11 }
   0xf   : > { %v1218_v0 = vld [vmem:[%s217_s19 + $0x8] sm:$0xff]   ;;  %v1220_v1 = vld [vmem:[%s217_s19] sm:$0xff]  }
  0x10   : > { %v249_v2 = vunpack.c.l.bf16 %v1218_v0  ;;  %v250_v3 = vunpack.c.h.bf16 %v1218_v0  ;;  %v244_v4 = vunpack.c.l.bf16 %v1220_v1  ;;  %v245_v5 = vunpack.c.h.bf16 %v1220_v1 }
  0x12   : > { %v1226_v6 = vpack.i.bf16 %v250_v3, %v249_v2  ;;  %v1228_v7 = vpack.i.bf16 %v245_v5, %v244_v4  ;;  %v1127_v4 = vld [vmem:[%s1329_s1] ss:$24 sps:$4 sm:$0xff]   ;;  %v1135_v5 = vld [vmem:[%s1329_s1 + $0x14] ss:$24 sps:$4 sm:$0xff]  }
  0x13   : > { %845 = vmatprep.mubr.msk.bf16.mxu0 %vm577_vm0, %v1135_v5 }
  0x14   : > { %929 = vrot.lane.b32.xlu0 %v1226_v6, %s1162_s20  ;;  %939 = vrot.lane.b32.xlu1 %v1228_v7, %s1162_s20 }
  0x18   : > { %934 = vrot.lane.b32.xlu0 %v1226_v6, %s1163_s21  ;;  %944 = vrot.lane.b32.xlu1 %v1228_v7, %s1163_s21 }
  0x1c   : > { %949 = vrot.lane.b32.xlu0 %v1226_v6, %s1164_s22  ;;  %954 = vrot.lane.b32.xlu1 %v1226_v6, %s1165_s23 }
  0x20   : > { %959 = vrot.lane.b32.xlu0 %v1228_v7, %s1164_s22  ;;  %964 = vrot.lane.b32.xlu1 %v1228_v7, %s1165_s23 }
  0x24   : > { %969 = vrot.lane.b32.xlu0 %v1226_v6, %s1166_s24  ;;  %974 = vrot.lane.b32.xlu1 %v1226_v6, %s1167_s25 }
  0x28   : > { %979 = vrot.lane.b32.xlu0 %v1228_v7, %s1166_s24  ;;  %984 = vrot.lane.b32.xlu1 %v1228_v7, %s1167_s25  ;;  %s239_s25 = scalar_lea.vmem %s1331_s3, %s848_s16 }
  0x2c   : > { %989 = vrot.lane.b32.xlu0 %v1226_v6, %s1168_s26  ;;  %994 = vrot.lane.b32.xlu1 %v1228_v7, %s1168_s26 }
  0x30   : > { %999 = vrot.lane.b32.xlu1 %v1226_v6, %s1169_s27 }
  0x86   : > { %v930_v9 = vpop.permute.xlu0 %929  ;;  %v940_v10 = vpop.permute.xlu1 %939 }
  0x87   : > { %v932_v12 = vunpack.i.h.bf16 %v930_v9  ;;  %v931_v13 = vunpack.i.l.bf16 %v930_v9  ;;  %v942_v14 = vunpack.i.h.bf16 %v940_v10  ;;  %v941_v15 = vunpack.i.l.bf16 %v940_v10  ;;  %1004 = vrot.lane.b32.xlu0 %v930_v9, %s1169_s27 }
  0x89   : > { %v510_v16 = vpack.c.bf16 %v932_v12, %v931_v13  ;;  %v509_v23 = vpack.c.bf16 %v942_v14, %v941_v15 }
  0x8a   : > { %v935_v17 = vpop.permute.xlu0 %934  ;;  %v945_v18 = vpop.permute.xlu1 %944 }
  0x8b   : > { %v937_v19 = vunpack.i.h.bf16 %v935_v17  ;;  %v936_v20 = vunpack.i.l.bf16 %v935_v17  ;;  %850 = vmatprep.subr.bf16.mxu1 %v510_v16  ;;  %v947_v21 = vunpack.i.h.bf16 %v945_v18  ;;  %v946_v22 = vunpack.i.l.bf16 %v945_v18  ;;  %1014 = vrot.lane.b32.xlu0 %v935_v17, %s1171_s30 }
  0x8c   : > { %1009 = vrot.lane.b32.xlu1 %v935_v17, %s1169_s27 }
  0x8d   : > { %v502_v24 = vpack.c.bf16 %v937_v19, %v936_v20  ;;  %v501_v26 = vpack.c.bf16 %v947_v21, %v946_v22 }
  0x8e   : > { %v950_v25 = vpop.permute.xlu0 %949  ;;  %v955_v27 = vpop.permute.xlu1 %954 }
  0x8f   : > { %851 = vmatpush3.bf16.msra.mxu1 %v502_v24  ;;  %v952_v28 = vunpack.i.h.bf16 %v950_v25  ;;  %v951_v29 = vunpack.i.l.bf16 %v950_v25  ;;  %v957_v30 = vunpack.i.h.bf16 %v955_v27  ;;  %v956_v31 = vunpack.i.l.bf16 %v955_v27  ;;  %1024 = vrot.lane.b32.xlu0 %v945_v18, %s1169_s27 }
  0x90   : > { %852 = vmatprep.subr.bf16.mxu1 %v509_v23  ;;  %1019 = vrot.lane.b32.xlu1 %v940_v10, %s1169_s27 }
  0x91   : > { %v508_v32 = vpack.c.bf16 %v952_v28, %v951_v29  ;;  %v500_v35 = vpack.c.bf16 %v957_v30, %v956_v31 }
  0x92   : > { %v960_v33 = vpop.permute.xlu0 %959  ;;  %v965_v34 = vpop.permute.xlu1 %964 }
  0x93   : > { %853 = vmatpush3.bf16.msra.mxu1 %v501_v26  ;;  %v962_v36 = vunpack.i.h.bf16 %v960_v33  ;;  %v961_v37 = vunpack.i.l.bf16 %v960_v33  ;;  %v967_v38 = vunpack.i.h.bf16 %v965_v34  ;;  %v966_v39 = vunpack.i.l.bf16 %v965_v34  ;;  %1034 = vrot.lane.b32.xlu0 %v950_v25, %s1169_s27 }
  0x94   : > { %854 = vmatprep.subr.bf16.mxu1 %v508_v32  ;;  %1029 = vrot.lane.b32.xlu1 %v945_v18, %s1171_s30 }
  0x95   : > { %v507_v40 = vpack.c.bf16 %v962_v36, %v961_v37  ;;  %v499_v42 = vpack.c.bf16 %v967_v38, %v966_v39 }
  0x96   : > { %v970_v41 = vpop.permute.xlu0 %969  ;;  %v975_v43 = vpop.permute.xlu1 %974 }
  0x97   : > { %855 = vmatpush3.bf16.msra.mxu1 %v500_v35  ;;  %v972_v44 = vunpack.i.h.bf16 %v970_v41  ;;  %v971_v45 = vunpack.i.l.bf16 %v970_v41  ;;  %v977_v46 = vunpack.i.h.bf16 %v975_v43  ;;  %v976_v47 = vunpack.i.l.bf16 %v975_v43  ;;  %1044 = vrot.lane.b32.xlu0 %v955_v27, %s1171_s30 }
  0x98   : > { %856 = vmatprep.subr.bf16.mxu1 %v507_v40  ;;  %1039 = vrot.lane.b32.xlu1 %v955_v27, %s1169_s27 }
  0x99   : > { %v506_v48 = vpack.c.bf16 %v972_v44, %v971_v45  ;;  %v498_v51 = vpack.c.bf16 %v977_v46, %v976_v47 }
  0x9a   : > { %v980_v49 = vpop.permute.xlu0 %979  ;;  %v985_v50 = vpop.permute.xlu1 %984 }
  0x9b   : > { %857 = vmatpush3.bf16.msra.mxu1 %v499_v42  ;;  %v982_v52 = vunpack.i.h.bf16 %v980_v49  ;;  %v981_v53 = vunpack.i.l.bf16 %v980_v49  ;;  %v987_v54 = vunpack.i.h.bf16 %v985_v50  ;;  %v986_v55 = vunpack.i.l.bf16 %v985_v50  ;;  %1054 = vrot.lane.b32.xlu0 %v965_v34, %s1169_s27 }
  0x9c   : > { %858 = vmatprep.subr.bf16.mxu1 %v506_v48  ;;  %1049 = vrot.lane.b32.xlu1 %v960_v33, %s1169_s27 }
  0x9d   : > { %v505_v56 = vpack.c.bf16 %v982_v52, %v981_v53  ;;  %v497_v60 = vpack.c.bf16 %v987_v54, %v986_v55 }
  0x9e   : > { %v990_v57 = vpop.permute.xlu0 %989  ;;  %v995_v61 = vpop.permute.xlu1 %994 }
  0x9f   : > { %859 = vmatpush3.bf16.msra.mxu1 %v498_v51  ;;  %v992_v58 = vunpack.i.h.bf16 %v990_v57  ;;  %v991_v59 = vunpack.i.l.bf16 %v990_v57  ;;  %v997_v63 = vunpack.i.h.bf16 %v995_v61  ;;  %v996_v2 = vunpack.i.l.bf16 %v995_v61  ;;  %1064 = vrot.lane.b32.xlu0 %v970_v41, %s1169_s27 }
  0xa0   : > { %860 = vmatprep.subr.bf16.mxu1 %v505_v56  ;;  %1059 = vrot.lane.b32.xlu1 %v965_v34, %s1171_s30 }
  0xa1   : > { %v504_v62 = vpack.c.bf16 %v992_v58, %v991_v59  ;;  %v503_v3 = vpack.c.bf16 %v997_v63, %v996_v2 }
  0xa2   : > { %v1296_v8 = vpop.permute.xlu1 %999 }
  0xa3   : > { %861 = vmatpush3.bf16.msra.mxu1 %v497_v60  ;;  %1074 = vrot.lane.b32.xlu0 %v975_v43, %s1171_s30 }
  0xa4   : > { %862 = vmatprep.subr.bf16.mxu1 %v504_v62  ;;  %1069 = vrot.lane.b32.xlu1 %v975_v43, %s1169_s27 }
  0xa7   : > { %863 = vmatpush3.bf16.msra.mxu1 %v1218_v0  ;;  %1084 = vrot.lane.b32.xlu0 %v985_v50, %s1169_s27  ;;  %v1132_v0 = vld [vmem:[%s1329_s1 + $0xc] ss:$24 sps:$4 sm:$0xff]  }
  0xa8   : > { %864 = vmatprep.subr.bf16.mxu1 %v503_v3  ;;  %1079 = vrot.lane.b32.xlu1 %v980_v49, %s1169_s27 }
  0xab   : > { %865 = vmatpush3.bf16.msra.mxu1 %v1220_v1  ;;  %1094 = vrot.lane.b32.xlu0 %v990_v57, %s1169_s27  ;;  %v536_v1 = vld [vmem:[%s1330_s2] sm:$0xff] }
  0xac   : > { %1089 = vrot.lane.b32.xlu1 %v985_v50, %s1171_s30 }
  0xae   : > { %614 = vmatmul.mubr.bf16.vlgmr.msra.gmra.mxu1 %v1127_v4 }
  0xaf   : > { %654 = vmatprep.mubr.bf16.mxu1 %v1132_v0  ;;  %1099 = vrot.lane.b32.xlu0 %v1226_v6, %s1171_s30  ;;  %v537_v6 = vld [vmem:[%s1330_s2 + $0x8] sm:$0xff] }
  0xb0   : > { %1109 = vrot.lane.b32.xlu1 %v995_v61, %s1169_s27 }
  0xb3   : > { %1104 = vrot.lane.b32.xlu0 %v1228_v7, %s1169_s27 }
  0xb4   : > { %1114 = vrot.lane.b32.xlu1 %v1228_v7, %s1171_s30 }
  0xb7   : > { %1119 = vrot.lane.b32.xlu0 %v995_v61, %s1171_s30 }
  0xb8   : > { %540 = vperm.xlu1 %1123, %v536_v1  }
  0xbb   : > { %545 = vperm.xlu0 %1124, %v537_v6  }
  0xf9   : > { %v1005_v9 = vpop.permute.xlu0 %1004 }
  0xfa   : > { %v1007_v10 = vunpack.i.h.bf16 %v1005_v9  ;;  %v1006_v12 = vunpack.i.l.bf16 %v1005_v9 }
  0xfc   : > { %v526_v13 = vpack.c.bf16 %v1007_v10, %v1006_v12 }
  0xfd   : > { %v1015_v14 = vpop.permute.xlu0 %1014 }
  0xfe   : > { %v1017_v7 = vunpack.i.h.bf16 %v1015_v14  ;;  %v1016_v15 = vunpack.i.l.bf16 %v1015_v14  ;;  %v1010_v16 = vpop.permute.xlu1 %1009  ;;  %872 = vmatprep.subr.bf16.mxu1 %v526_v13 }
  0xff   : > { %v1012_v17 = vunpack.i.h.bf16 %v1010_v16  ;;  %v1011_v18 = vunpack.i.l.bf16 %v1010_v16  ;;  %v1002_v16 = vunpack.i.h.bf16 %v1296_v8 }
 0x100   : > { %v534_v19 = vpack.c.bf16 %v1017_v7, %v1016_v15 }
 0x101   : > { %v518_v20 = vpack.c.bf16 %v1012_v17, %v1011_v18  ;;  %v1025_v21 = vpop.permute.xlu0 %1024  ;;  %v1001_v17 = vunpack.i.l.bf16 %v1296_v8 }
 0x102   : > { %v1027_v22 = vunpack.i.h.bf16 %v1025_v21  ;;  %v1026_v23 = vunpack.i.l.bf16 %v1025_v21  ;;  %v1020_v24 = vpop.permute.xlu1 %1019  ;;  %664 = vmatpush1.bf16.msra.mxu0 %v534_v19 }
 0x103   : > { %v1022_v25 = vunpack.i.h.bf16 %v1020_v24  ;;  %v1021_v26 = vunpack.i.l.bf16 %v1020_v24  ;;  %873 = vmatpush3.bf16.msra.mxu1 %v518_v20  ;;  %665 = vmatprep.subr.bf16.mxu0 %v1170_v11 }
 0x104   : > { %v517_v27 = vpack.c.bf16 %v1027_v22, %v1026_v23 }
 0x105   : > { %v525_v28 = vpack.c.bf16 %v1022_v25, %v1021_v26  ;;  %v1035_v29 = vpop.permute.xlu0 %1034  ;;  %v512_v26 = vpack.c.bf16 %v1002_v16, %v1001_v17 }
 0x106   : > { %v1037_v30 = vunpack.i.h.bf16 %v1035_v29  ;;  %v1036_v31 = vunpack.i.l.bf16 %v1035_v29  ;;  %v1030_v32 = vpop.permute.xlu1 %1029 }
 0x107   : > { %v1032_v33 = vunpack.i.h.bf16 %v1030_v32  ;;  %v1031_v34 = vunpack.i.l.bf16 %v1030_v32  ;;  %874 = vmatprep.subr.bf16.mxu1 %v525_v28 }
 0x108   : > { %v524_v35 = vpack.c.bf16 %v1037_v30, %v1036_v31  ;;  %875 = vmatpush3.bf16.msra.mxu1 %v517_v27 }
 0x109   : > { %v533_v36 = vpack.c.bf16 %v1032_v33, %v1031_v34  ;;  %v1045_v37 = vpop.permute.xlu0 %1044 }
 0x10a   : > { %v1047_v38 = vunpack.i.h.bf16 %v1045_v37  ;;  %v1046_v39 = vunpack.i.l.bf16 %v1045_v37  ;;  %v1040_v40 = vpop.permute.xlu1 %1039  ;;  %876 = vmatprep.subr.bf16.mxu1 %v524_v35 }
 0x10b   : > { %v1042_v41 = vunpack.i.h.bf16 %v1040_v40  ;;  %v1041_v42 = vunpack.i.l.bf16 %v1040_v40  ;;  %666 = vmatpush1.bf16.msra.mxu0 %v533_v36 }
 0x10c   : > { %v532_v43 = vpack.c.bf16 %v1047_v38, %v1046_v39  ;;  %667 = vmatprep.subr.bf16.mxu0 %v1170_v11 }
 0x10d   : > { %v516_v44 = vpack.c.bf16 %v1042_v41, %v1041_v42  ;;  %v1055_v45 = vpop.permute.xlu0 %1054  ;;  %v1130_v42 = vld [vmem:[%s1329_s1 + $0x8] ss:$24 sps:$4 sm:$0xff]  }
 0x10e   : > { %v1057_v46 = vunpack.i.h.bf16 %v1055_v45  ;;  %v1056_v47 = vunpack.i.l.bf16 %v1055_v45  ;;  %v1050_v48 = vpop.permute.xlu1 %1049 }
 0x10f   : > { %v1052_v49 = vunpack.i.h.bf16 %v1050_v48  ;;  %v1051_v50 = vunpack.i.l.bf16 %v1050_v48  ;;  %877 = vmatpush3.bf16.msra.mxu1 %v516_v44  ;;  %668 = vmatpush1.bf16.msra.mxu0 %v532_v43 }
 0x110   : > { %v515_v51 = vpack.c.bf16 %v1057_v46, %v1056_v47  ;;  %669 = vmatprep.subr.bf16.mxu0 %v1170_v11  ;;  %v1133_v46 = vld [vmem:[%s1329_s1 + $0x10] ss:$24 sps:$4 sm:$0xff]  }
 0x111   : > { %v523_v52 = vpack.c.bf16 %v1052_v49, %v1051_v50  ;;  %v1065_v53 = vpop.permute.xlu0 %1064 }
 0x112   : > { %v1067_v54 = vunpack.i.h.bf16 %v1065_v53  ;;  %v1066_v55 = vunpack.i.l.bf16 %v1065_v53  ;;  %v1060_v56 = vpop.permute.xlu1 %1059 }
 0x113   : > { %v1062_v57 = vunpack.i.h.bf16 %v1060_v56  ;;  %v1061_v58 = vunpack.i.l.bf16 %v1060_v56  ;;  %878 = vmatprep.subr.bf16.mxu1 %v523_v52 }
 0x114   : > { %v522_v59 = vpack.c.bf16 %v1067_v54, %v1066_v55  ;;  %879 = vmatpush3.bf16.msra.mxu1 %v515_v51 }
 0x115   : > { %v531_v60 = vpack.c.bf16 %v1062_v57, %v1061_v58  ;;  %v1075_v61 = vpop.permute.xlu0 %1074 }
 0x116   : > { %v1077_v62 = vunpack.i.h.bf16 %v1075_v61  ;;  %v1076_v63 = vunpack.i.l.bf16 %v1075_v61  ;;  %v1070_v2 = vpop.permute.xlu1 %1069  ;;  %880 = vmatprep.subr.bf16.mxu1 %v522_v59 }
 0x117   : > { %v1072_v3 = vunpack.i.h.bf16 %v1070_v2  ;;  %v1071_v4 = vunpack.i.l.bf16 %v1070_v2  ;;  %670 = vmatpush1.bf16.msra.mxu0 %v531_v60 }
 0x118   : > { %v530_v0 = vpack.c.bf16 %v1077_v62, %v1076_v63  ;;  %671 = vmatprep.subr.bf16.mxu0 %v1170_v11 }
 0x119   : > { %v514_v5 = vpack.c.bf16 %v1072_v3, %v1071_v4  ;;  %v1085_v1 = vpop.permute.xlu0 %1084 }
 0x11a   : > { %v1087_v6 = vunpack.i.h.bf16 %v1085_v1  ;;  %v1086_v9 = vunpack.i.l.bf16 %v1085_v1  ;;  %v1080_v10 = vpop.permute.xlu1 %1079 }
 0x11b   : > { %v1082_v12 = vunpack.i.h.bf16 %v1080_v10  ;;  %v1081_v13 = vunpack.i.l.bf16 %v1080_v10  ;;  %881 = vmatpush3.bf16.msra.mxu1 %v514_v5  ;;  %672 = vmatpush1.bf16.msra.mxu0 %v530_v0 }
 0x11c   : > { %v513_v14 = vpack.c.bf16 %v1087_v6, %v1086_v9  ;;  %673 = vmatprep.subr.bf16.mxu0 %v1170_v11 }
 0x11d   : > { %v521_v7 = vpack.c.bf16 %v1082_v12, %v1081_v13  ;;  %v1095_v15 = vpop.permute.xlu0 %1094 }
 0x11e   : > { %v1097_v18 = vunpack.i.h.bf16 %v1095_v15  ;;  %v1096_v19 = vunpack.i.l.bf16 %v1095_v15  ;;  %v1090_v20 = vpop.permute.xlu1 %1089 }
 0x11f   : > { %v1092_v21 = vunpack.i.h.bf16 %v1090_v20  ;;  %v1091_v22 = vunpack.i.l.bf16 %v1090_v20  ;;  %882 = vmatprep.subr.bf16.mxu1 %v521_v7 }
 0x120   : > { %v520_v23 = vpack.c.bf16 %v1097_v18, %v1096_v19  ;;  %883 = vmatpush3.bf16.msra.mxu1 %v513_v14 }
 0x121   : > { %v529_v24 = vpack.c.bf16 %v1092_v21, %v1091_v22  ;;  %v1100_v25 = vpop.permute.xlu0 %1099 }
 0x122   : > { %v1102_v27 = vunpack.i.h.bf16 %v1100_v25  ;;  %v1101_v28 = vunpack.i.l.bf16 %v1100_v25  ;;  %v1110_v29 = vpop.permute.xlu1 %1109  ;;  %884 = vmatprep.subr.bf16.mxu1 %v520_v23 }
 0x123   : > { %v1112_v30 = vunpack.i.h.bf16 %v1110_v29  ;;  %v1111_v31 = vunpack.i.l.bf16 %v1110_v29  ;;  %674 = vmatpush1.bf16.msra.mxu0 %v529_v24 }
 0x124   : > { %v528_v32 = vpack.c.bf16 %v1102_v27, %v1101_v28  ;;  %885 = vmatpush3.bf16.msra.mxu1 %v512_v26  ;;  %675 = vmatprep.subr.bf16.mxu0 %v1170_v11 }
 0x125   : > { %v519_v8 = vpack.c.bf16 %v1112_v30, %v1111_v31  ;;  %v1105_v33 = vpop.permute.xlu0 %1104 }
 0x126   : > { %v1107_v34 = vunpack.i.h.bf16 %v1105_v33  ;;  %v1106_v35 = vunpack.i.l.bf16 %v1105_v33  ;;  %v1115_v36 = vpop.permute.xlu1 %1114 }
 0x127   : > { %v1117_v37 = vunpack.i.h.bf16 %v1115_v36  ;;  %v1116_v38 = vunpack.i.l.bf16 %v1115_v36  ;;  %676 = vmatpush1.bf16.msra.mxu0 %v528_v32  ;;  %886 = vmatprep.subr.bf16.mxu1 %v519_v8 }
 0x128   : > { %v511_v39 = vpack.c.bf16 %v1107_v34, %v1106_v35  ;;  %677 = vmatprep.subr.bf16.mxu0 %v1170_v11 }
 0x129   : > { %v527_v40 = vpack.c.bf16 %v1117_v37, %v1116_v38  ;;  %v1120_v41 = vpop.permute.xlu0 %1119 }
 0x12a   : > { %v1122_v43 = vunpack.i.h.bf16 %v1120_v41  ;;  %v1121_v44 = vunpack.i.l.bf16 %v1120_v41  ;;  %887 = vmatpush3.bf16.msra.mxu1 %v511_v39 }
 0x12b   : > { %678 = vmatpush1.bf16.msra.mxu0 %v527_v40 }
 0x12c   : > { %v535_v45 = vpack.c.bf16 %v1122_v43, %v1121_v44  ;;  %693 = vmatprep.subr.bf16.mxu0 %v1170_v11 }
 0x12d   : > { %655 = vmatmul.mubr.bf16.vlgmr.msra.gmra.mxu1 %v1130_v42 }
 0x12f   : > { %694 = vmatpush2.bf16.msra.mxu0 %v535_v45 }
 0x132   : > { %696 = vmatmul.mubr.bf16.vlgmr.msra.gmra.mxu0 %v1133_v46 }
 0x133   : > { %v541_v52 = vpop.permute.xlu1 %540 }
 0x136   : > { %v546_v11 = vpop.permute.xlu0 %545 }
 0x16e   : > { %v866_v47 = vpop.f32.mrf.mxu1 }
 0x170   : > { %v867_v48 = vpop.f32.mrf.mxu1 }
 0x171   : > { %v868_v51 = vadd.f32 %v867_v48, %v866_v47 }
 0x172   : > { %v869_v49 = vpop.f32.mrf.mxu1 }
 0x173   : > { %v616_v56 = vadd.f32 %v868_v51, %v541_v52 }
 0x174   : > { %v870_v50 = vpop.f32.mrf.mxu1 }
 0x175   : > { %v871_v55 = vadd.f32 %v870_v50, %v869_v49 }
 0x177   : > { %v619_v62 = vadd.f32 %v871_v55, %v546_v11 }
 0x1ed   : > { %v888_v53 = vpop.f32.mrf.mxu1 }
 0x1ef   : > { %v889_v54 = vpop.f32.mrf.mxu1 }
 0x1f0   : > { %v890_v57 = vadd.f32 %v889_v54, %v888_v53 }
 0x1f1   : > { %v891_v58 = vpop.f32.mrf.mxu1 }
 0x1f2   : > { %v657_v59 = vadd.f32 %v890_v57, %v616_v56  ;;  %v697_v60 = vpop.f32.mrf.mxu0 }
 0x1f3   : > { %v892_v61 = vpop.f32.mrf.mxu1 }
 0x1f4   : > { %v698_v63 = vadd.f32 %v697_v60, %v657_v59  ;;  %v893_v2 = vadd.f32 %v892_v61, %v891_v58  ;;  %v699_v3 = vpop.f32.mrf.mxu0 }
 0x1f6   : > { %vm704_vm1 = vcmp.ge.f32.partialorder %v698_v63, 0.0  ;;  %v706_v4 = vmul.f32 0.1, %v698_v63  ;;  %v660_v0 = vadd.f32 %v893_v2, %v619_v62  ;;  %v700_v5 = vpop.f32.mrf.mxu0 }
 0x1f8   : > { %v708_v1 = vsel %vm704_vm1, %v698_v63, %v706_v4  ;;  %v701_v6 = vadd.f32 %v700_v5, %v660_v0  ;;  %v702_v9 = vpop.f32.mrf.mxu0 }
 0x1f9   : > { %711 = vst.msk [vmem:[%s239_s25] sm:$0xff] %vm710_vm2, %v708_v1 }
 0x1fa   : > { %vm705_vm3 = vcmp.ge.f32.partialorder %v701_v6, 0.0  ;;  %v707_v10 = vmul.f32 0.1, %v701_v6 }
 0x1fc   : > { %v709_v12 = vsel %vm705_vm3, %v701_v6, %v707_v10 }
 0x1fd   : > { %712 = vst.msk [vmem:[%s239_s25 + $0x8] sm:$0xff] %vm710_vm2, %v709_v12 }
 0x1fe PF: > { %s13_s14 = sadd.s32 1, %s1160_s14   ;;  %s1332_s12 = smov %s1156_s13 }
 0x1ff   : > { %p10_p5 = scmp.ge.s32.totalorder %s13_s14, 4   ;;  %s1333_s13 = smov %s1335_s15 }
 0x201   :  { %12 = sbr.rel (!%p10_p5) target bundleno = 2 (0x2), region = 69 }

// kernel: _lambda_.23
= control target key start
LH: loop header
LB: loop body
LE: loop exit
PB: predicated region body
PF: predicated region fallthrough
CT: control target
= control target key end

     0   :  { %s1320_s12 = smov 0   ;;  %s1322_s13 = smov 0   ;;  %s1503_s0 = inlined_call_operand.vmem [shape: bf16[2,2,16,37], index: 0, kind: input, shape index: {}]   ;;  %s1504_s1 = inlined_call_operand.vmem [shape: bf16[32,656], index: 1, kind: input, shape index: {}]   ;;  %s1505_s2 = inlined_call_operand.vmem [shape: f32[32,1], index: 2, kind: input, shape index: {}]   ;;  %s1506_s3 = inlined_call_operand.vmem [shape: f32[2,32,17], index: 3, kind: output, shape index: {}]  }
   0x1   :  { %s1324_s14 = smov 0  }
   0x2 LB: > { %s22_s15 = sadd.s32 1, %s1284_s13  ;;  %p912_p0 = scmp.ge.s32.totalorder %s1288_s14, 1  ;;  %s1288_s14 = sphi %s1324_s14, %s13_s14   ;;  %s1284_s13 = sphi %s1322_s13, %s1508_s13   ;;  %s1280_s12 = sphi %s1320_s12, %s1507_s12  }
   0x3   : > { %p23_p1 = scmp.ge.s32.totalorder %s22_s15, 2  ;;  %p174_p2 = scmp.lt.s32.totalorder %s1288_s14, 3 }
   0x5   : > { %s1510_s15 = smov (%p23_p1, %s22_s15), 0  ;;  %p175_p3 = pnand %p912_p0, %p174_p2 }
   0x6   : > { %p213_p4 = scmp.lt.s32.totalorder (!%p175_p3), %s1280_s12, 1  ;;  %s1290_s20 = smov (!%p175_p3), 121  }
   0x7   : > { %178 = sbr.rel (%p175_p3) target bundleno = 528 (0x210), region = 32  ;;  %s1291_s21 = smov (!%p175_p3), 125  }
   0x8   : > { %s1292_s22 = smov (!%p175_p3), 122   ;;  %s1293_s23 = smov (!%p175_p3), 126  }
   0x9   : > { %s1294_s24 = smov (!%p175_p3), 123   ;;  %s1295_s25 = smov (!%p175_p3), 127  }
   0xa   : > { %s1296_s26 = smov (!%p175_p3), 124   ;;  %s1297_s27 = smov (!%p175_p3), 120  }
   0xb   : > { %s1299_s7 = smov (!%p175_p3), 112  }
   0xc   : > { %s1512_s12 = smov (!%p213_p4, %s1280_s12), 1  ;;  %v1248_v57 = vld [vmem:[%s1504_s1 + $0x4] ss:$24 sps:$4 sm:$0xff]   ;;  %vm624_vm0 = vcmask 130048   ;;  %vm790_vm2 = vcmask 138240  }
   0xd   : > { %s937_s16 = sshll.u32 %s1512_s12, 4  ;;  %663 = vmatprep.mubr.bf16.mxu0 %v1248_v57  ;;  %s938_s11 = sshll.u32 %s1512_s12, 5 }
   0xe   : > { %s217_s19 = scalar_lea.vmem %s1503_s0, %s937_s16  ;;  %s239_s18 = scalar_lea.vmem %s1506_s3, %s938_s11 }
   0xf   : > { %v1344_v0 = vld [vmem:[%s217_s19 + $0x8] sm:$0xff]   ;;  %v1346_v1 = vld [vmem:[%s217_s19] sm:$0xff]  }
  0x10   : > { %v249_v2 = vunpack.c.l.bf16 %v1344_v0  ;;  %v250_v3 = vunpack.c.h.bf16 %v1344_v0  ;;  %v244_v4 = vunpack.c.l.bf16 %v1346_v1  ;;  %v245_v5 = vunpack.c.h.bf16 %v1346_v1 }
  0x12   : > { %v1352_v6 = vpack.i.bf16 %v250_v3, %v249_v2  ;;  %v1354_v7 = vpack.i.bf16 %v245_v5, %v244_v4  ;;  %v1251_v2 = vld [vmem:[%s1504_s1 + $0xc] ss:$24 sps:$4 sm:$0xff]   ;;  %v1298_v4 = vmov 0   ;;  %v1246_v5 = vld [vmem:[%s1504_s1] ss:$24 sps:$4 sm:$0xff]  }
  0x13   : > { %712 = vmatprep.mubr.bf16.mxu1 %v1251_v2  ;;  %1242 = vset.pattern.permute.xlu1 %v1298_v4 }
  0x14   : > { %1048 = vrot.lane.b32.xlu0 %v1352_v6, %s1290_s20  ;;  %1058 = vrot.lane.b32.xlu1 %v1354_v7, %s1290_s20 }
  0x15   : > { %1243 = vset.pattern.permute.xlu0 %v1298_v4 }
  0x18   : > { %1053 = vrot.lane.b32.xlu0 %v1352_v6, %s1291_s21  ;;  %1063 = vrot.lane.b32.xlu1 %v1354_v7, %s1291_s21 }
  0x1c   : > { %1068 = vrot.lane.b32.xlu0 %v1352_v6, %s1292_s22  ;;  %1073 = vrot.lane.b32.xlu1 %v1352_v6, %s1293_s23 }
  0x20   : > { %1078 = vrot.lane.b32.xlu0 %v1354_v7, %s1292_s22  ;;  %1083 = vrot.lane.b32.xlu1 %v1354_v7, %s1293_s23 }
  0x24   : > { %1088 = vrot.lane.b32.xlu0 %v1352_v6, %s1294_s24  ;;  %1093 = vrot.lane.b32.xlu1 %v1352_v6, %s1295_s25 }
  0x28   : > { %1098 = vrot.lane.b32.xlu0 %v1354_v7, %s1294_s24  ;;  %1103 = vrot.lane.b32.xlu1 %v1354_v7, %s1295_s25 }
  0x2c   : > { %1108 = vrot.lane.b32.xlu0 %v1352_v6, %s1296_s26  ;;  %1113 = vrot.lane.b32.xlu1 %v1354_v7, %s1296_s26 }
  0x86   : > { %v1049_v8 = vpop.permute.xlu0 %1048  ;;  %v1059_v9 = vpop.permute.xlu1 %1058 }
  0x87   : > { %v1051_v10 = vunpack.i.h.bf16 %v1049_v8  ;;  %v1050_v11 = vunpack.i.l.bf16 %v1049_v8  ;;  %v1061_v12 = vunpack.i.h.bf16 %v1059_v9  ;;  %v1060_v13 = vunpack.i.l.bf16 %v1059_v9  ;;  %1118 = vrot.lane.b32.xlu0 %v1049_v8, %s1297_s27  ;;  %v1260_v8 = vld [vmem:[%s1504_s1 + $0x14] ss:$24 sps:$4 sm:$0xff]  }
  0x89   : > { %v516_v14 = vpack.c.bf16 %v1051_v10, %v1050_v11  ;;  %v515_v21 = vpack.c.bf16 %v1061_v12, %v1060_v13  ;;  %v545_v10 = vld [vmem:[%s1505_s2 + $0x18] sm:$0xff] }
  0x8a   : > { %v1370_v15 = vpop.permute.xlu0 %1053  ;;  %v1372_v16 = vpop.permute.xlu1 %1063 }
  0x8b   : > { %v1056_v17 = vunpack.i.h.bf16 %v1370_v15  ;;  %v1055_v18 = vunpack.i.l.bf16 %v1370_v15  ;;  %939 = vmatprep.subr.bf16.mxu0 %v516_v14  ;;  %v1066_v19 = vunpack.i.h.bf16 %v1372_v16  ;;  %v1065_v20 = vunpack.i.l.bf16 %v1372_v16  ;;  %1123 = vrot.lane.b32.xlu1 %v1370_v15, %s1297_s27 }
  0x8c   : > { %1128 = vrot.lane.b32.xlu0 %v1059_v9, %s1297_s27  ;;  %v542_v9 = vld [vmem:[%s1505_s2] sm:$0xff] }
  0x8d   : > { %v508_v22 = vpack.c.bf16 %v1056_v17, %v1055_v18  ;;  %v507_v25 = vpack.c.bf16 %v1066_v19, %v1065_v20 }
  0x8e   : > { %v1069_v23 = vpop.permute.xlu0 %1068  ;;  %v1379_v24 = vpop.permute.xlu1 %1073 }
  0x8f   : > { %v1071_v26 = vunpack.i.h.bf16 %v1069_v23  ;;  %v1070_v27 = vunpack.i.l.bf16 %v1069_v23  ;;  %940 = vmatpush3.bf16.msra.mxu0 %v508_v22  ;;  %v1076_v28 = vunpack.i.h.bf16 %v1379_v24  ;;  %v1075_v29 = vunpack.i.l.bf16 %v1379_v24  ;;  %1133 = vrot.lane.b32.xlu1 %v1372_v16, %s1297_s27 }
  0x90   : > { %941 = vmatprep.subr.bf16.mxu0 %v515_v21  ;;  %1138 = vrot.lane.b32.xlu0 %v1069_v23, %s1297_s27 }
  0x91   : > { %v514_v30 = vpack.c.bf16 %v1071_v26, %v1070_v27  ;;  %v506_v33 = vpack.c.bf16 %v1076_v28, %v1075_v29 }
  0x92   : > { %v1079_v31 = vpop.permute.xlu0 %1078  ;;  %v1386_v32 = vpop.permute.xlu1 %1083 }
  0x93   : > { %v1081_v34 = vunpack.i.h.bf16 %v1079_v31  ;;  %v1080_v35 = vunpack.i.l.bf16 %v1079_v31  ;;  %942 = vmatpush3.bf16.msra.mxu0 %v507_v25  ;;  %v1086_v36 = vunpack.i.h.bf16 %v1386_v32  ;;  %v1085_v37 = vunpack.i.l.bf16 %v1386_v32  ;;  %1143 = vrot.lane.b32.xlu1 %v1379_v24, %s1297_s27 }
  0x94   : > { %943 = vmatprep.subr.bf16.mxu0 %v514_v30  ;;  %1148 = vrot.lane.b32.xlu0 %v1079_v31, %s1297_s27 }
  0x95   : > { %v513_v38 = vpack.c.bf16 %v1081_v34, %v1080_v35  ;;  %v505_v41 = vpack.c.bf16 %v1086_v36, %v1085_v37 }
  0x96   : > { %v1089_v39 = vpop.permute.xlu0 %1088  ;;  %v1094_v40 = vpop.permute.xlu1 %1093 }
  0x97   : > { %v1091_v42 = vunpack.i.h.bf16 %v1089_v39  ;;  %v1090_v43 = vunpack.i.l.bf16 %v1089_v39  ;;  %944 = vmatpush3.bf16.msra.mxu0 %v506_v33  ;;  %v1096_v44 = vunpack.i.h.bf16 %v1094_v40  ;;  %v1095_v45 = vunpack.i.l.bf16 %v1094_v40  ;;  %1153 = vrot.lane.b32.xlu1 %v1386_v32, %s1297_s27 }
  0x98   : > { %945 = vmatprep.subr.bf16.mxu0 %v513_v38  ;;  %1158 = vrot.lane.b32.xlu0 %v1089_v39, %s1297_s27 }
  0x99   : > { %v512_v46 = vpack.c.bf16 %v1091_v42, %v1090_v43  ;;  %v504_v49 = vpack.c.bf16 %v1096_v44, %v1095_v45 }
  0x9a   : > { %v1099_v47 = vpop.permute.xlu0 %1098  ;;  %v1104_v48 = vpop.permute.xlu1 %1103 }
  0x9b   : > { %v1101_v50 = vunpack.i.h.bf16 %v1099_v47  ;;  %v1100_v51 = vunpack.i.l.bf16 %v1099_v47  ;;  %946 = vmatpush3.bf16.msra.mxu0 %v505_v41  ;;  %v1106_v52 = vunpack.i.h.bf16 %v1104_v48  ;;  %v1105_v53 = vunpack.i.l.bf16 %v1104_v48  ;;  %1163 = vrot.lane.b32.xlu1 %v1094_v40, %s1297_s27 }
  0x9c   : > { %947 = vmatprep.subr.bf16.mxu0 %v512_v46  ;;  %1168 = vrot.lane.b32.xlu0 %v1099_v47, %s1297_s27 }
  0x9d   : > { %v511_v54 = vpack.c.bf16 %v1101_v50, %v1100_v51  ;;  %v503_v60 = vpack.c.bf16 %v1106_v52, %v1105_v53 }
  0x9e   : > { %v1109_v55 = vpop.permute.xlu0 %1108  ;;  %v1114_v56 = vpop.permute.xlu1 %1113 }
  0x9f   : > { %v1111_v58 = vunpack.i.h.bf16 %v1109_v55  ;;  %v1110_v59 = vunpack.i.l.bf16 %v1109_v55  ;;  %948 = vmatpush3.bf16.msra.mxu0 %v504_v49  ;;  %v1116_v61 = vunpack.i.h.bf16 %v1114_v56  ;;  %v1115_v62 = vunpack.i.l.bf16 %v1114_v56  ;;  %1173 = vrot.lane.b32.xlu1 %v1104_v48, %s1297_s27 }
  0xa0   : > { %949 = vmatprep.subr.bf16.mxu0 %v511_v54  ;;  %1183 = vrot.lane.b32.xlu0 %v1109_v55, %s1297_s27 }
  0xa1   : > { %v510_v63 = vpack.c.bf16 %v1111_v58, %v1110_v59  ;;  %v509_v3 = vpack.c.bf16 %v1116_v61, %v1115_v62 }
  0xa3   : > { %950 = vmatpush3.bf16.msra.mxu0 %v503_v60  ;;  %1178 = vrot.lane.b32.xlu1 %v1352_v6, %s1297_s27 }
  0xa4   : > { %951 = vmatprep.subr.bf16.mxu0 %v510_v63  ;;  %1188 = vrot.lane.b32.xlu0 %v1114_v56, %s1297_s27 }
  0xa7   : > { %952 = vmatpush3.bf16.msra.mxu0 %v1344_v0  ;;  %1193 = vrot.lane.b32.xlu1 %v1354_v7, %s1297_s27  ;;  %v1252_v0 = vld [vmem:[%s1504_s1 + $0x34] ss:$24 sps:$4 sm:$0xff]  }
  0xa8   : > { %953 = vmatprep.subr.bf16.mxu0 %v509_v3  ;;  %1198 = vrot.lane.b32.xlu0 %v1370_v15, %s1299_s7 }
  0xab   : > { %954 = vmatpush3.bf16.msra.mxu0 %v1346_v1  ;;  %1203 = vrot.lane.b32.xlu1 %v1372_v16, %s1299_s7  ;;  %v1254_v1 = vld [vmem:[%s1504_s1 + $0x30] ss:$24 sps:$4 sm:$0xff]  }
  0xac   : > { %729 = vmatprep.subr.bf16.mxu0 %v1298_v4  ;;  %1208 = vrot.lane.b32.xlu0 %v1379_v24, %s1299_s7 }
  0xae   : > { %664 = vmatmul.mubr.bf16.vlgmr.msra.gmra.mxu0 %v1246_v5 }
  0xaf   : > { %1213 = vrot.lane.b32.xlu1 %v1386_v32, %s1299_s7  ;;  %671 = vmatprep.mubr.bf16.mxu0 %v1252_v0 }
  0xb0   : > { %1218 = vrot.lane.b32.xlu0 %v1094_v40, %s1299_s7 }
  0xb3   : > { %1223 = vrot.lane.b32.xlu1 %v1104_v48, %s1299_s7 }
  0xb4   : > { %1228 = vrot.lane.b32.xlu0 %v1352_v6, %s1299_s7  ;;  %v543_v6 = vld [vmem:[%s1505_s2 + $0x8] sm:$0xff] }
  0xb6   : > { %672 = vmatmul.mubr.bf16.gmra.mxu0 %v1254_v1 }
  0xb7   : > { %1233 = vrot.lane.b32.xlu1 %v1354_v7, %s1299_s7  ;;  %933 = vmatprep.mubr.msk.bf16.mxu0 %vm624_vm0, %v1260_v8  ;;  %v544_v7 = vld [vmem:[%s1505_s2 + $0x10] sm:$0xff] }
  0xb8   : > { %1238 = vrot.lane.b32.xlu0 %v1114_v56, %s1299_s7 }
  0xbb   : > { %548 = vperm.xlu1 %1242, %v542_v9  }
  0xbc   : > { %553 = vperm.xlu0 %1243, %v543_v6  }
  0xbf   : > { %558 = vperm.xlu1 %1242, %v544_v7  }
  0xc3   : > { %563 = vperm.xlu1 %1242, %v545_v10  }
  0xf9   : > { %v1119_v11 = vpop.permute.xlu0 %1118 }
  0xfa   : > { %v1121_v12 = vunpack.i.h.bf16 %v1119_v11  ;;  %v1120_v13 = vunpack.i.l.bf16 %v1119_v11 }
  0xfc   : > { %v532_v14 = vpack.c.bf16 %v1121_v12, %v1120_v13 }
  0xfd   : > { %v1124_v15 = vpop.permute.xlu1 %1123 }
  0xfe   : > { %v1126_v16 = vunpack.i.h.bf16 %v1124_v15  ;;  %v1125_v17 = vunpack.i.l.bf16 %v1124_v15  ;;  %v1129_v18 = vpop.permute.xlu0 %1128  ;;  %967 = vmatprep.subr.bf16.mxu1 %v532_v14 }
  0xff   : > { %v1131_v19 = vunpack.i.h.bf16 %v1129_v18  ;;  %v1130_v20 = vunpack.i.l.bf16 %v1129_v18 }
 0x100   : > { %v524_v21 = vpack.c.bf16 %v1126_v16, %v1125_v17  ;;  %v1249_v17 = vld [vmem:[%s1504_s1 + $0x8] ss:$24 sps:$4 sm:$0xff]  }
 0x101   : > { %v531_v22 = vpack.c.bf16 %v1131_v19, %v1130_v20  ;;  %v1134_v23 = vpop.permute.xlu1 %1133 }
 0x102   : > { %v1136_v24 = vunpack.i.h.bf16 %v1134_v23  ;;  %v1135_v25 = vunpack.i.l.bf16 %v1134_v23  ;;  %v1139_v26 = vpop.permute.xlu0 %1138  ;;  %968 = vmatpush3.bf16.msra.mxu1 %v524_v21  ;;  %v1255_v21 = vld [vmem:[%s1504_s1 + $0x3c] ss:$24 sps:$4 sm:$0xff]  }
 0x103   : > { %v1141_v27 = vunpack.i.h.bf16 %v1139_v26  ;;  %v1140_v28 = vunpack.i.l.bf16 %v1139_v26  ;;  %969 = vmatprep.subr.bf16.mxu1 %v531_v22 }
 0x104   : > { %v523_v29 = vpack.c.bf16 %v1136_v24, %v1135_v25 }
 0x105   : > { %v530_v30 = vpack.c.bf16 %v1141_v27, %v1140_v28  ;;  %v1144_v31 = vpop.permute.xlu1 %1143 }
 0x106   : > { %v1146_v32 = vunpack.i.h.bf16 %v1144_v31  ;;  %v1145_v33 = vunpack.i.l.bf16 %v1144_v31  ;;  %v1149_v34 = vpop.permute.xlu0 %1148  ;;  %970 = vmatpush3.bf16.msra.mxu1 %v523_v29  ;;  %v1257_v29 = vld [vmem:[%s1504_s1 + $0x38] ss:$24 sps:$4 sm:$0xff]   ;;  %v1263_v31 = vld [vmem:[%s1504_s1 + $0x44] ss:$24 sps:$4 sm:$0xff]  }
 0x107   : > { %v1151_v35 = vunpack.i.h.bf16 %v1149_v34  ;;  %v1150_v36 = vunpack.i.l.bf16 %v1149_v34  ;;  %971 = vmatprep.subr.bf16.mxu1 %v530_v30 }
 0x108   : > { %v522_v37 = vpack.c.bf16 %v1146_v32, %v1145_v33 }
 0x109   : > { %v529_v38 = vpack.c.bf16 %v1151_v35, %v1150_v36  ;;  %v1154_v39 = vpop.permute.xlu1 %1153 }
 0x10a   : > { %v1156_v40 = vunpack.i.h.bf16 %v1154_v39  ;;  %v1155_v41 = vunpack.i.l.bf16 %v1154_v39  ;;  %v1159_v42 = vpop.permute.xlu0 %1158  ;;  %972 = vmatpush3.bf16.msra.mxu1 %v522_v37 }
 0x10b   : > { %v1161_v43 = vunpack.i.h.bf16 %v1159_v42  ;;  %v1160_v44 = vunpack.i.l.bf16 %v1159_v42  ;;  %973 = vmatprep.subr.bf16.mxu1 %v529_v38 }
 0x10c   : > { %v521_v45 = vpack.c.bf16 %v1156_v40, %v1155_v41 }
 0x10d   : > { %v528_v46 = vpack.c.bf16 %v1161_v43, %v1160_v44  ;;  %v1164_v47 = vpop.permute.xlu1 %1163 }
 0x10e   : > { %v1166_v48 = vunpack.i.h.bf16 %v1164_v47  ;;  %v1165_v49 = vunpack.i.l.bf16 %v1164_v47  ;;  %v1169_v50 = vpop.permute.xlu0 %1168  ;;  %974 = vmatpush3.bf16.msra.mxu1 %v521_v45 }
 0x10f   : > { %v1171_v51 = vunpack.i.h.bf16 %v1169_v50  ;;  %v1170_v52 = vunpack.i.l.bf16 %v1169_v50  ;;  %975 = vmatprep.subr.bf16.mxu1 %v528_v46 }
 0x110   : > { %v520_v53 = vpack.c.bf16 %v1166_v48, %v1165_v49 }
 0x111   : > { %v527_v54 = vpack.c.bf16 %v1171_v51, %v1170_v52  ;;  %v1174_v55 = vpop.permute.xlu1 %1173  ;;  %v1258_v52 = vld [vmem:[%s1504_s1 + $0x10] ss:$24 sps:$4 sm:$0xff]  }
 0x112   : > { %v1176_v56 = vunpack.i.h.bf16 %v1174_v55  ;;  %v1175_v57 = vunpack.i.l.bf16 %v1174_v55  ;;  %v1184_v58 = vpop.permute.xlu0 %1183  ;;  %976 = vmatpush3.bf16.msra.mxu1 %v520_v53  ;;  %v1261_v53 = vld [vmem:[%s1504_s1 + $0x40] ss:$24 sps:$4 sm:$0xff]  }
 0x113   : > { %v1186_v59 = vunpack.i.h.bf16 %v1184_v58  ;;  %v1185_v60 = vunpack.i.l.bf16 %v1184_v58  ;;  %977 = vmatprep.subr.bf16.mxu1 %v527_v54 }
 0x114   : > { %v519_v61 = vpack.c.bf16 %v1176_v56, %v1175_v57 }
 0x115   : > { %v526_v62 = vpack.c.bf16 %v1186_v59, %v1185_v60  ;;  %v1179_v63 = vpop.permute.xlu1 %1178 }
 0x116   : > { %v1181_v2 = vunpack.i.h.bf16 %v1179_v63  ;;  %v1180_v3 = vunpack.i.l.bf16 %v1179_v63  ;;  %v1189_v5 = vpop.permute.xlu0 %1188  ;;  %978 = vmatpush3.bf16.msra.mxu1 %v519_v61 }
 0x117   : > { %v1191_v0 = vunpack.i.h.bf16 %v1189_v5  ;;  %v1190_v1 = vunpack.i.l.bf16 %v1189_v5  ;;  %979 = vmatprep.subr.bf16.mxu1 %v526_v62 }
 0x118   : > { %v518_v8 = vpack.c.bf16 %v1181_v2, %v1180_v3 }
 0x119   : > { %v525_v9 = vpack.c.bf16 %v1191_v0, %v1190_v1  ;;  %v1194_v6 = vpop.permute.xlu1 %1193 }
 0x11a   : > { %v1196_v7 = vunpack.i.h.bf16 %v1194_v6  ;;  %v1195_v10 = vunpack.i.l.bf16 %v1194_v6  ;;  %v1199_v11 = vpop.permute.xlu0 %1198  ;;  %980 = vmatpush3.bf16.msra.mxu1 %v518_v8 }
 0x11b   : > { %v1201_v12 = vunpack.i.h.bf16 %v1199_v11  ;;  %v1200_v13 = vunpack.i.l.bf16 %v1199_v11  ;;  %981 = vmatprep.subr.bf16.mxu1 %v525_v9 }
 0x11c   : > { %v517_v14 = vpack.c.bf16 %v1196_v7, %v1195_v10 }
 0x11d   : > { %v540_v15 = vpack.c.bf16 %v1201_v12, %v1200_v13  ;;  %v1204_v16 = vpop.permute.xlu1 %1203 }
 0x11e   : > { %v1206_v18 = vunpack.i.h.bf16 %v1204_v16  ;;  %v1205_v19 = vunpack.i.l.bf16 %v1204_v16  ;;  %v1209_v20 = vpop.permute.xlu0 %1208  ;;  %982 = vmatpush3.bf16.msra.mxu1 %v517_v14 }
 0x11f   : > { %730 = vmatpush1.bf16.msra.mxu0 %v540_v15  ;;  %995 = vmatprep.subr.bf16.mxu1 %v1298_v4  ;;  %v1211_v23 = vunpack.i.h.bf16 %v1209_v20  ;;  %v1210_v24 = vunpack.i.l.bf16 %v1209_v20 }
 0x120   : > { %v539_v22 = vpack.c.bf16 %v1206_v18, %v1205_v19  ;;  %731 = vmatprep.subr.bf16.mxu0 %v1298_v4 }
 0x121   : > { %713 = vmatmul.mubr.bf16.vlgmr.msra.gmra.mxu1 %v1249_v17  ;;  %v1214_v25 = vpop.permute.xlu1 %1213  ;;  %v538_v26 = vpack.c.bf16 %v1211_v23, %v1210_v24 }
 0x122   : > { %1004 = vmatpush1.bf16.msra.mxu1 %v540_v15  ;;  %720 = vmatprep.mubr.bf16.mxu1 %v1255_v21  ;;  %v1216_v27 = vunpack.i.h.bf16 %v1214_v25  ;;  %v1215_v28 = vunpack.i.l.bf16 %v1214_v25  ;;  %v1219_v30 = vpop.permute.xlu0 %1218 }
 0x123   : > { %732 = vmatpush1.bf16.msra.mxu0 %v539_v22  ;;  %996 = vmatprep.subr.bf16.mxu1 %v1298_v4  ;;  %v1221_v33 = vunpack.i.h.bf16 %v1219_v30  ;;  %v1220_v34 = vunpack.i.l.bf16 %v1219_v30 }
 0x124   : > { %733 = vmatprep.subr.bf16.mxu0 %v1298_v4  ;;  %v537_v32 = vpack.c.bf16 %v1216_v27, %v1215_v28 }
 0x125   : > { %v1224_v35 = vpop.permute.xlu1 %1223  ;;  %v536_v36 = vpack.c.bf16 %v1221_v33, %v1220_v34 }
 0x126   : > { %1005 = vmatpush1.bf16.msra.mxu1 %v539_v22  ;;  %v1226_v37 = vunpack.i.h.bf16 %v1224_v35  ;;  %v1225_v38 = vunpack.i.l.bf16 %v1224_v35  ;;  %v1229_v39 = vpop.permute.xlu0 %1228 }
 0x127   : > { %734 = vmatpush1.bf16.msra.mxu0 %v538_v26  ;;  %997 = vmatprep.subr.bf16.mxu1 %v1298_v4  ;;  %v1231_v40 = vunpack.i.h.bf16 %v1229_v39  ;;  %v1230_v41 = vunpack.i.l.bf16 %v1229_v39 }
 0x128   : > { %735 = vmatprep.subr.bf16.mxu0 %v1298_v4  ;;  %v535_v43 = vpack.c.bf16 %v1226_v37, %v1225_v38 }
 0x129   : > { %721 = vmatmul.mubr.bf16.gmra.mxu1 %v1257_v29  ;;  %v1234_v42 = vpop.permute.xlu1 %1233  ;;  %v534_v44 = vpack.c.bf16 %v1231_v40, %v1230_v41 }
 0x12a   : > { %1006 = vmatpush1.bf16.msra.mxu1 %v538_v26  ;;  %934 = vmatprep.mubr.msk.bf16.mxu1 %vm624_vm0, %v1263_v31  ;;  %v1236_v45 = vunpack.i.h.bf16 %v1234_v42  ;;  %v1235_v46 = vunpack.i.l.bf16 %v1234_v42  ;;  %v1239_v47 = vpop.permute.xlu0 %1238 }
 0x12b   : > { %736 = vmatpush1.bf16.msra.mxu0 %v537_v32  ;;  %998 = vmatprep.subr.bf16.mxu1 %v1298_v4  ;;  %v1241_v49 = vunpack.i.h.bf16 %v1239_v47  ;;  %v1240_v50 = vunpack.i.l.bf16 %v1239_v47 }
 0x12c   : > { %737 = vmatprep.subr.bf16.mxu0 %v1298_v4  ;;  %v533_v48 = vpack.c.bf16 %v1236_v45, %v1235_v46 }
 0x12d   : > { %v541_v51 = vpack.c.bf16 %v1241_v49, %v1240_v50 }
 0x12e   : > { %1007 = vmatpush1.bf16.msra.mxu1 %v537_v32 }
 0x12f   : > { %738 = vmatpush1.bf16.msra.mxu0 %v536_v36  ;;  %999 = vmatprep.subr.bf16.mxu1 %v1298_v4 }
 0x130   : > { %739 = vmatprep.subr.bf16.mxu0 %v1298_v4 }
 0x132   : > { %1008 = vmatpush1.bf16.msra.mxu1 %v536_v36 }
 0x133   : > { %740 = vmatpush1.bf16.msra.mxu0 %v535_v43  ;;  %1000 = vmatprep.subr.bf16.mxu1 %v1298_v4 }
 0x134   : > { %741 = vmatprep.subr.bf16.mxu0 %v1298_v4 }
 0x136   : > { %1009 = vmatpush1.bf16.msra.mxu1 %v535_v43  ;;  %v549_v3 = vpop.permute.xlu1 %548 }
 0x137   : > { %742 = vmatpush1.bf16.msra.mxu0 %v534_v44  ;;  %1001 = vmatprep.subr.bf16.mxu1 %v1298_v4  ;;  %v554_v12 = vpop.permute.xlu0 %553 }
 0x138   : > { %743 = vmatprep.subr.bf16.mxu0 %v1298_v4 }
 0x13a   : > { %1010 = vmatpush1.bf16.msra.mxu1 %v534_v44  ;;  %v559_v1 = vpop.permute.xlu1 %558 }
 0x13b   : > { %744 = vmatpush1.bf16.msra.mxu0 %v533_v48  ;;  %1002 = vmatprep.subr.bf16.mxu1 %v1298_v4 }
 0x13c   : > { %759 = vmatprep.subr.bf16.mxu0 %v1298_v4 }
 0x13e   : > { %1011 = vmatpush1.bf16.msra.mxu1 %v533_v48  ;;  %v564_v17 = vpop.permute.xlu1 %563 }
 0x13f   : > { %760 = vmatpush2.bf16.msra.mxu0 %v541_v51  ;;  %1003 = vmatprep.subr.bf16.mxu1 %v1298_v4 }
 0x142   : > { %762 = vmatmul.mubr.bf16.vlgmr.msra.gmra.mxu0 %v1258_v52  ;;  %1012 = vmatpush2.bf16.msra.mxu1 %v541_v51 }
 0x145   : > { %770 = vmatmul.mubr.bf16.vlgmr.msra.gmra.mxu1 %v1261_v53 }
 0x16e   : > { %v955_v54 = vpop.f32.mrf.mxu0 }
 0x170   : > { %v956_v55 = vpop.f32.mrf.mxu0 }
 0x171   : > { %v957_v4 = vadd.f32 %v956_v55, %v955_v54 }
 0x172   : > { %v958_v57 = vpop.f32.mrf.mxu0 }
 0x173   : > { %v666_v9 = vadd.f32 %v957_v4, %v549_v3 }
 0x174   : > { %v959_v59 = vpop.f32.mrf.mxu0 }
 0x175   : > { %v960_v11 = vadd.f32 %v959_v59, %v958_v57 }
 0x176   : > { %v961_v61 = vpop.f32.mrf.mxu0 }
 0x177   : > { %v669_v21 = vadd.f32 %v960_v11, %v554_v12 }
 0x178   : > { %v962_v63 = vpop.f32.mrf.mxu0 }
 0x179   : > { %v963_v8 = vadd.f32 %v962_v63, %v961_v61 }
 0x17a   : > { %v964_v5 = vpop.f32.mrf.mxu0 }
 0x17b   : > { %v674_v13 = vadd.f32 %v963_v8, %v559_v1 }
 0x17c   : > { %v965_v7 = vpop.f32.mrf.mxu0 }
 0x17d   : > { %v966_v15 = vadd.f32 %v965_v7, %v964_v5 }
 0x17f   : > { %v677_v23 = vadd.f32 %v966_v15, %v564_v17 }
 0x1e1   : > { %v983_v56 = vpop.f32.mrf.mxu1 }
 0x1e3   : > { %v984_v58 = vpop.f32.mrf.mxu1 }
 0x1e4   : > { %v985_v6 = vadd.f32 %v984_v58, %v983_v56 }
 0x1e5   : > { %v986_v60 = vpop.f32.mrf.mxu1 }
 0x1e6   : > { %v715_v19 = vadd.f32 %v985_v6, %v666_v9 }
 0x1e7   : > { %v987_v62 = vpop.f32.mrf.mxu1 }
 0x1e8   : > { %v988_v16 = vadd.f32 %v987_v62, %v986_v60 }
 0x1e9   : > { %v989_v2 = vpop.f32.mrf.mxu1 }
 0x1ea   : > { %v718_v28 = vadd.f32 %v988_v16, %v669_v21 }
 0x1eb   : > { %v990_v0 = vpop.f32.mrf.mxu1 }
 0x1ec   : > { %v991_v14 = vadd.f32 %v990_v0, %v989_v2 }
 0x1ed   : > { %v992_v10 = vpop.f32.mrf.mxu1 }
 0x1ee   : > { %v723_v26 = vadd.f32 %v991_v14, %v674_v13 }
 0x1ef   : > { %v993_v18 = vpop.f32.mrf.mxu1 }
 0x1f0   : > { %v994_v24 = vadd.f32 %v993_v18, %v992_v10 }
 0x1f2   : > { %v726_v37 = vadd.f32 %v994_v24, %v677_v23 }
 0x202   : > { %v763_v20 = vpop.f32.mrf.mxu0 }
 0x203   : > { %v764_v22 = vadd.f32 %v763_v20, %v715_v19 }
 0x204   : > { %v765_v25 = vpop.f32.mrf.mxu0 }
 0x205   : > { %vm778_vm1 = vcmp.ge.f32.partialorder %v764_v22, 0.0  ;;  %v782_v27 = vmul.f32 0.1, %v764_v22  ;;  %v771_v29 = vpop.f32.mrf.mxu1 }
 0x206   : > { %v766_v30 = vpop.f32.mrf.mxu0  ;;  %v772_v31 = vadd.f32 %v771_v29, %v723_v26 }
 0x207   : > { %v786_v32 = vsel %vm778_vm1, %v764_v22, %v782_v27  ;;  %v767_v33 = vadd.f32 %v766_v30, %v718_v28  ;;  %v773_v34 = vpop.f32.mrf.mxu1 }
 0x208   : > { %791 = vst.msk [vmem:[%s239_s18] sm:$0xff] %vm790_vm2, %v786_v32  ;;  %vm780_vm3 = vcmp.ge.f32.partialorder %v772_v31, 0.0  ;;  %v784_v35 = vmul.f32 0.1, %v772_v31  ;;  %v768_v36 = vpop.f32.mrf.mxu0 }
 0x209   : > { %vm779_vm4 = vcmp.ge.f32.partialorder %v767_v33, 0.0  ;;  %v783_v38 = vmul.f32 0.1, %v767_v33  ;;  %v774_v39 = vpop.f32.mrf.mxu1 }
 0x20a   : > { %v788_v40 = vsel %vm780_vm3, %v772_v31, %v784_v35  ;;  %v775_v41 = vadd.f32 %v774_v39, %v726_v37 }
 0x20b   : > { %v787_v42 = vsel %vm779_vm4, %v767_v33, %v783_v38  ;;  %793 = vst.msk [vmem:[%s239_s18 + $0x10] sm:$0xff] %vm790_vm2, %v788_v40  ;;  %v776_v43 = vpop.f32.mrf.mxu1 }
 0x20c   : > { %792 = vst.msk [vmem:[%s239_s18 + $0x8] sm:$0xff] %vm790_vm2, %v787_v42  ;;  %vm781_vm5 = vcmp.ge.f32.partialorder %v775_v41, 0.0  ;;  %v785_v44 = vmul.f32 0.1, %v775_v41 }
 0x20e   : > { %v789_v45 = vsel %vm781_vm5, %v775_v41, %v785_v44 }
 0x20f   : > { %794 = vst.msk [vmem:[%s239_s18 + $0x18] sm:$0xff] %vm790_vm2, %v789_v45 }
 0x210 PF: > { %s13_s14 = sadd.s32 1, %s1288_s14   ;;  %s1507_s12 = smov %s1284_s13 }
 0x211   : > { %p10_p5 = scmp.ge.s32.totalorder %s13_s14, 4   ;;  %s1508_s13 = smov %s1510_s15 }
 0x213   :  { %12 = sbr.rel (!%p10_p5) target bundleno = 2 (0x2), region = 69 }

// kernel: _lambda_.24
= control target key start
LH: loop header
LB: loop body
LE: loop exit
PB: predicated region body
PF: predicated region fallthrough
CT: control target
= control target key end

     0   :  { %s499_s14 = smov 0   ;;  %s501_s15 = smov 0   ;;  %s539_s0 = inlined_call_operand.vmem [shape: bf16[2,2,1,34], index: 0, kind: input, shape index: {}]   ;;  %s540_s1 = inlined_call_operand.vmem [shape: bf16[1,4], index: 1, kind: input, shape index: {}]   ;;  %s541_s2 = inlined_call_operand.<no memory space> [shape: f32[1,1], index: 2, kind: input, shape index: {}]   ;;  %s542_s3 = inlined_call_operand.vmem [shape: f32[2,1,33], index: 3, kind: output, shape index: {}]  }
   0x1   :  { %v8_v0 = vstv %s541_s2  ;;  %s503_s16 = smov 0  }
   0x2   :  { %9 = vst [vmem:[#allocation2] sm:$0x1] %v8_v0 }
   0x3 LB: > { %s24_s2 = sadd.s32 1, %s466_s15  ;;  %p400_p0 = scmp.ge.s32.totalorder %s470_s16, 1  ;;  %s470_s16 = sphi %s503_s16, %s15_s16   ;;  %s466_s15 = sphi %s501_s15, %s544_s15   ;;  %s462_s14 = sphi %s499_s14, %s543_s14  }
   0x4   : > { %p25_p1 = scmp.ge.s32.totalorder %s24_s2, 2  ;;  %p168_p2 = scmp.lt.s32.totalorder %s470_s16, 3 }
   0x6   : > { %s546_s2 = smov (%p25_p1, %s24_s2), 0  ;;  %p169_p3 = pnand %p400_p0, %p168_p2 }
   0x7   : > { %p198_p4 = scmp.lt.s32.totalorder (!%p169_p3), %s462_s14, 1  ;;  %s475_s21 = smov (!%p169_p3), 127  }
   0x8   : > { %172 = sbr.rel (%p169_p3) target bundleno = 347 (0x15b), region = 32 }
   0xd   : > { %v221_v1 = vlaneseq  ;;  %v472_v2 = vmov 0.0   ;;  %s548_s14 = smov (!%p198_p4, %s462_s14), 1  ;;  %vm237_vm0 = vcmask 1040384   ;;  %vm473_vm1 = vmmov 0   ;;  %v245_v14 = vld [vmem:[#allocation2] sm:$0x1] }
   0xe   : > { %408 = vmatprep.subr.bf16.mxu0 %v472_v2  ;;  %s401_s17 = sshll.u32 %s548_s14, 1  ;;  %410 = vmatprep.mubr.msk.bf16.mxu0 %vm473_vm1, %v472_v2  ;;  %v474_v13 = vmov 0   ;;  %vm239_vm2 = vcmask 1041408   ;;  %vm241_vm3 = vcmask 1042432   ;;  %v243_v22 = vld [vmem:[%s540_s1] sm:$0x1]  ;;  %s213_s26 = scalar_lea.vmem %s542_s3, %s548_s14 }
   0xf   : > { %v222_v3 = vshrl.u32 %v221_v1, 7  ;;  %s201_s20 = scalar_lea.vmem %s539_s0, %s401_s17  ;;  %447 = vset.pattern.permute.xlu0 %v474_v13  ;;  %vm255_vm4 = vcmask 31744   ;;  %vm302_vm5 = vcmask 262144  }
  0x10   : > { %v215_v5 = vld [vmem:[%s201_s20] sm:$0x1]  ;;  %v402_v6 = vld [vmem:[%s201_s20 + $0x1] sm:$0x1] }
  0x11   : > { %v223_v4 = vsub.s32 0, %v222_v3  ;;  %v216_v7 = vunpack.c.l.bf16 %v215_v5  ;;  %v219_v8 = vunpack.c.l.bf16 %v402_v6 }
  0x13   : > { %v224_v9 = vrot.slane %v219_v8, %v223_v4  ;;  %v230_v10 = vrot.slane %v216_v7, %v223_v4 }
  0x15   : > { %v442_v11 = vpack.i.bf16 %v224_v9, %v230_v10  ;;  %v238_v12 = vsel %vm237_vm0, %v216_v7, %v224_v9 }
  0x17   : > { %443 = vrot.lane.b32.xlu0 %v442_v11, %s475_s21 }
  0x1b   : > { %248 = vperm.xlu0 %447, %v245_v14  }
  0x89   : > { %v444_v15 = vpop.permute.xlu0 %443 }
  0x8a   : > { %v446_v16 = vunpack.i.h.bf16 %v444_v15  ;;  %v445_v17 = vunpack.i.l.bf16 %v444_v15 }
  0x8c   : > { %v240_v18 = vsel %vm239_vm2, %v238_v12, %v445_v17 }
  0x8d   : > { %v242_v19 = vsel %vm241_vm3, %v240_v18, %v446_v16 }
  0x8e   : > { %v244_v20 = vpack.c.bf16 %v242_v19, %v242_v19 }
  0x90   : > { %v260_v21 = vsel %vm239_vm2, %v244_v20, 0 }
  0x91   : > { %409 = vmatpush3.bf16.msra.mxu0 %v260_v21 }
  0x94   : > { %411 = vmatmul.mubr.msk.bf16.vlgmr.msra.gmra.mxu0 %vm255_vm4, %v243_v22 }
  0x96   : > { %v249_v23 = vpop.permute.xlu0 %248 }
  0x97   : > { %v254_v24 = vrot.slane %v249_v23, %v223_v4 }
 0x154   : > { %v296_v25 = vpop.f32.mrf.mxu0 }
 0x155   : > { %v297_v26 = vadd.f32 %v296_v25, %v254_v24 }
 0x156   : > { %v412_v27 = vpop.f32.mrf.mxu0 }
 0x157   : > { %303 = vst.msk [vmem:[%s213_s26] sm:$0x1] %vm302_vm5, %v297_v26 }
 0x158   : > { %v299_v28 = vpop.f32.mrf.mxu0 }
 0x15a   : > { %v413_v29 = vpop.f32.mrf.mxu0 }
 0x15b PF: > { %s15_s16 = sadd.s32 1, %s470_s16   ;;  %s543_s14 = smov %s466_s15 }
 0x15c   : > { %p12_p5 = scmp.ge.s32.totalorder %s15_s16, 4   ;;  %s544_s15 = smov %s546_s2 }
 0x15e   :  { %14 = sbr.rel (!%p12_p5) target bundleno = 3 (0x3), region = 69 }

// kernel: _lambda_.25
= control target key start
LH: loop header
LB: loop body
LE: loop exit
PB: predicated region body
PF: predicated region fallthrough
CT: control target
= control target key end

     0   :  { %s619_s12 = smov 0   ;;  %s621_s13 = smov 0   ;;  %s667_s0 = inlined_call_operand.vmem [shape: bf16[2,1,1,47], index: 0, kind: input, shape index: {}]   ;;  %s668_s1 = inlined_call_operand.vmem [shape: bf16[16,15], index: 1, kind: input, shape index: {}]   ;;  %s669_s2 = inlined_call_operand.vmem [shape: f32[16,1], index: 2, kind: input, shape index: {}]   ;;  %s670_s3 = inlined_call_operand.vmem [shape: f32[2,16,33], index: 3, kind: output, shape index: {}]  }
   0x1   :  { %s623_s14 = smov 0  }
   0x2 LB: > { %s22_s15 = sadd.s32 1, %s575_s13  ;;  %p496_p0 = scmp.ge.s32.totalorder %s579_s14, 1  ;;  %s579_s14 = sphi %s623_s14, %s13_s14   ;;  %s575_s13 = sphi %s621_s13, %s672_s13   ;;  %s571_s12 = sphi %s619_s12, %s671_s12  }
   0x3   : > { %p23_p1 = scmp.ge.s32.totalorder %s22_s15, 2  ;;  %p171_p2 = scmp.lt.s32.totalorder %s579_s14, 3 }
   0x5   : > { %s674_s15 = smov (%p23_p1, %s22_s15), 0  ;;  %p172_p3 = pnand %p496_p0, %p171_p2 }
   0x6   : > { %p207_p4 = scmp.lt.s32.totalorder (!%p172_p3), %s571_s12, 1  ;;  %s581_s19 = smov (!%p172_p3), 120  }
   0x7   : > { %175 = sbr.rel (%p172_p3) target bundleno = 370 (0x172), region = 32  ;;  %s582_s20 = smov (!%p172_p3), 127  }
   0x8   : > { %s583_s21 = smov (!%p172_p3), 119   ;;  %s584_s22 = smov (!%p172_p3), 126  }
   0x9   : > { %s585_s23 = smov (!%p172_p3), 118   ;;  %s586_s24 = smov (!%p172_p3), 125  }
   0xa   : > { %s587_s25 = smov (!%p172_p3), 117   ;;  %s588_s26 = smov (!%p172_p3), 124  }
   0xb   : > { %s590_s27 = smov (!%p172_p3), 116   ;;  %s591_s28 = smov (!%p172_p3), 123  }
   0xc   : > { %v236_v0 = vlaneseq  ;;  %s676_s12 = smov (!%p207_p4, %s571_s12), 1  ;;  %v589_v6 = vmov 0.0   ;;  %vm592_vm0 = vmmov 0   ;;  %s593_s29 = smov 115   ;;  %v595_v7 = vmov 0   ;;  %v305_v8 = vld [vmem:[%s669_s2] sm:$0xff] }
   0xd   : > { %s209_s18 = scalar_lea.vmem %s667_s0, %s676_s12  ;;  %506 = vmatprep.subr.bf16.mxu0 %v589_v6  ;;  %508 = vmatprep.mubr.msk.bf16.mxu0 %vm592_vm0, %v589_v6  ;;  %s594_s30 = smov 122   ;;  %v306_v9 = vld [vmem:[%s669_s2 + $0x8] sm:$0xff]  ;;  %vm282_vm1 = vcmask 1040384   ;;  %vm284_vm2 = vcmask 1041408   ;;  %vm286_vm3 = vcmask 1042432   ;;  %vm288_vm4 = vcmask 1043456  }
   0xe   : > { %v237_v1 = vshrl.u32 %v236_v0, 7  ;;  %v233_v3 = vld [vmem:[%s209_s18] sm:$0x1]  ;;  %554 = vset.pattern.permute.xlu0 %v595_v7  ;;  %555 = vset.pattern.permute.xlu1 %v595_v7  ;;  %s596_s4 = smov 114   ;;  %s597_s5 = smov 121   ;;  %vm294_vm5 = vcmask 1046528  }
   0xf   : > { %v234_v4 = vunpack.c.l.bf16 %v233_v3  ;;  %vm290_vm6 = vcmask 1044480   ;;  %vm292_vm7 = vcmask 1045504   ;;  %vm326_vm8 = vcmask 1047552   ;;  %v556_v42 = vld [vmem:[%s668_s1] sm:$0xff]   ;;  %s503_s16 = sshll.u32 %s676_s12, 4 }
  0x10   : > { %v238_v2 = vsub.s32 0, %v237_v1  ;;  %v598_v29 = vmov 65535   ;;  %vm322_vm9 = vcmask 121856   ;;  %vm379_vm10 = vcmask 269312  }
  0x11   : > { %v327_v30 = vsel %vm294_vm5, 4294967295, %v598_v29 }
  0x12   : > { %v239_v5 = vrot.slane %v234_v4, %v238_v2  ;;  %v328_v39 = vsel %vm326_vm8, %v327_v30, 0 }
  0x14   : > { %261 = vrot.lane.b32.xlu1 %v239_v5, %s581_s19  ;;  %240 = vrot.lane.b32.xlu0 %v239_v5, %s582_s20  ;;  %s230_s19 = scalar_lea.vmem %s670_s3, %s503_s16 }
  0x18   : > { %264 = vrot.lane.b32.xlu1 %v239_v5, %s583_s21  ;;  %243 = vrot.lane.b32.xlu0 %v239_v5, %s584_s22 }
  0x1c   : > { %267 = vrot.lane.b32.xlu1 %v239_v5, %s585_s23  ;;  %246 = vrot.lane.b32.xlu0 %v239_v5, %s586_s24 }
  0x20   : > { %270 = vrot.lane.b32.xlu1 %v239_v5, %s587_s25  ;;  %249 = vrot.lane.b32.xlu0 %v239_v5, %s588_s26 }
  0x24   : > { %273 = vrot.lane.b32.xlu1 %v239_v5, %s590_s27  ;;  %252 = vrot.lane.b32.xlu0 %v239_v5, %s591_s28 }
  0x28   : > { %276 = vrot.lane.b32.xlu1 %v239_v5, %s593_s29  ;;  %255 = vrot.lane.b32.xlu0 %v239_v5, %s594_s30 }
  0x2c   : > { %279 = vrot.lane.b32.xlu1 %v239_v5, %s596_s4  ;;  %258 = vrot.lane.b32.xlu0 %v239_v5, %s597_s5 }
  0x30   : > { %309 = vperm.xlu0 %554, %v305_v8   ;;  %314 = vperm.xlu1 %555, %v306_v9  }
  0x86   : > { %v262_v10 = vpop.permute.xlu1 %261  ;;  %v241_v11 = vpop.permute.xlu0 %240 }
  0x87   : > { %v283_v20 = vsel %vm282_vm1, %v234_v4, %v241_v11 }
  0x8a   : > { %v265_v12 = vpop.permute.xlu1 %264  ;;  %v244_v13 = vpop.permute.xlu0 %243 }
  0x8b   : > { %v296_v21 = vsel %vm282_vm1, %v262_v10, %v265_v12  ;;  %v285_v22 = vsel %vm284_vm2, %v283_v20, %v244_v13 }
  0x8e   : > { %v268_v14 = vpop.permute.xlu1 %267  ;;  %v247_v15 = vpop.permute.xlu0 %246 }
  0x8f   : > { %v297_v25 = vsel %vm284_vm2, %v296_v21, %v268_v14  ;;  %v287_v26 = vsel %vm286_vm3, %v285_v22, %v247_v15 }
  0x92   : > { %v271_v16 = vpop.permute.xlu1 %270  ;;  %v250_v17 = vpop.permute.xlu0 %249 }
  0x93   : > { %v298_v27 = vsel %vm286_vm3, %v297_v25, %v271_v16  ;;  %v289_v28 = vsel %vm288_vm4, %v287_v26, %v250_v17 }
  0x96   : > { %v274_v18 = vpop.permute.xlu1 %273  ;;  %v253_v19 = vpop.permute.xlu0 %252 }
  0x97   : > { %v299_v31 = vsel %vm288_vm4, %v298_v27, %v274_v18  ;;  %v291_v32 = vsel %vm290_vm6, %v289_v28, %v253_v19 }
  0x9a   : > { %v277_v23 = vpop.permute.xlu1 %276  ;;  %v256_v24 = vpop.permute.xlu0 %255 }
  0x9b   : > { %v300_v33 = vsel %vm290_vm6, %v299_v31, %v277_v23  ;;  %v293_v34 = vsel %vm292_vm7, %v291_v32, %v256_v24 }
  0x9e   : > { %v280_v35 = vpop.permute.xlu1 %279  ;;  %v259_v36 = vpop.permute.xlu0 %258 }
  0x9f   : > { %v301_v37 = vsel %vm292_vm7, %v300_v33, %v280_v35  ;;  %v295_v38 = vsel %vm294_vm5, %v293_v34, %v259_v36 }
  0xa0   : > { %v304_v40 = vpack.c.bf16 %v301_v37, %v295_v38 }
  0xa2   : > { %v330_v41 = vand.u32 %v328_v39, %v304_v40 }
  0xa4   : > { %507 = vmatpush3.bf16.msra.mxu0 %v330_v41 }
  0xa7   : > { %509 = vmatmul.mubr.msk.bf16.vlgmr.msra.gmra.mxu0 %vm322_vm9, %v556_v42 }
  0xab   : > { %v310_v43 = vpop.permute.xlu0 %309  ;;  %v315_v47 = vpop.permute.xlu1 %314 }
 0x167   : > { %v366_v44 = vpop.f32.mrf.mxu0 }
 0x168   : > { %v367_v45 = vadd.f32 %v366_v44, %v310_v43 }
 0x169   : > { %v510_v46 = vpop.f32.mrf.mxu0 }
 0x16a   : > { %vm373_vm11 = vcmp.ge.f32.partialorder %v367_v45, 0.0  ;;  %v375_v48 = vmul.f32 0.1, %v367_v45 }
 0x16b   : > { %v369_v49 = vpop.f32.mrf.mxu0 }
 0x16c   : > { %v377_v50 = vsel %vm373_vm11, %v367_v45, %v375_v48  ;;  %v370_v51 = vadd.f32 %v369_v49, %v315_v47 }
 0x16d   : > { %380 = vst.msk [vmem:[%s230_s19] sm:$0xff] %vm379_vm10, %v377_v50  ;;  %v511_v52 = vpop.f32.mrf.mxu0 }
 0x16e   : > { %vm374_vm12 = vcmp.ge.f32.partialorder %v370_v51, 0.0  ;;  %v376_v53 = vmul.f32 0.1, %v370_v51 }
 0x170   : > { %v378_v54 = vsel %vm374_vm12, %v370_v51, %v376_v53 }
 0x171   : > { %381 = vst.msk [vmem:[%s230_s19 + $0x8] sm:$0xff] %vm379_vm10, %v378_v54 }
 0x172 PF: > { %s13_s14 = sadd.s32 1, %s579_s14   ;;  %s671_s12 = smov %s575_s13 }
 0x173   : > { %p10_p5 = scmp.ge.s32.totalorder %s13_s14, 4   ;;  %s672_s13 = smov %s674_s15 }
 0x175   :  { %12 = sbr.rel (!%p10_p5) target bundleno = 2 (0x2), region = 68 }

// kernel: _lambda_.26
= control target key start
LH: loop header
LB: loop body
LE: loop exit
PB: predicated region body
PF: predicated region fallthrough
CT: control target
= control target key end

     0   :  { %s1192_s12 = smov 0   ;;  %s1194_s13 = smov 0   ;;  %s1328_s0 = inlined_call_operand.vmem [shape: bf16[2,2,16,37], index: 0, kind: input, shape index: {}]   ;;  %s1329_s1 = inlined_call_operand.vmem [shape: bf16[16,656], index: 1, kind: input, shape index: {}]   ;;  %s1330_s2 = inlined_call_operand.vmem [shape: f32[16,1], index: 2, kind: input, shape index: {}]   ;;  %s1331_s3 = inlined_call_operand.vmem [shape: f32[2,16,17], index: 3, kind: output, shape index: {}]  }
   0x1   :  { %s1196_s14 = smov 0  }
   0x2 LB: > { %s22_s15 = sadd.s32 1, %s1156_s13  ;;  %p830_p0 = scmp.ge.s32.totalorder %s1160_s14, 1  ;;  %s1160_s14 = sphi %s1196_s14, %s13_s14   ;;  %s1156_s13 = sphi %s1194_s13, %s1333_s13   ;;  %s1152_s12 = sphi %s1192_s12, %s1332_s12  }
   0x3   : > { %p23_p1 = scmp.ge.s32.totalorder %s22_s15, 2  ;;  %p174_p2 = scmp.lt.s32.totalorder %s1160_s14, 3 }
   0x5   : > { %s1335_s15 = smov (%p23_p1, %s22_s15), 0  ;;  %p175_p3 = pnand %p830_p0, %p174_p2 }
   0x6   : > { %p213_p4 = scmp.lt.s32.totalorder (!%p175_p3), %s1152_s12, 1  ;;  %s1162_s20 = smov (!%p175_p3), 121  }
   0x7   : > { %178 = sbr.rel (%p175_p3) target bundleno = 510 (0x1fe), region = 32  ;;  %s1163_s21 = smov (!%p175_p3), 125  }
   0x8   : > { %s1164_s22 = smov (!%p175_p3), 122   ;;  %s1165_s23 = smov (!%p175_p3), 126  }
   0x9   : > { %s1166_s24 = smov (!%p175_p3), 123   ;;  %s1167_s25 = smov (!%p175_p3), 127  }
   0xa   : > { %s1168_s26 = smov (!%p175_p3), 124   ;;  %s1169_s27 = smov (!%p175_p3), 120  }
   0xb   : > { %s1171_s30 = smov (!%p175_p3), 112  }
   0xc   : > { %s1337_s12 = smov (!%p213_p4, %s1152_s12), 1  ;;  %v1129_v8 = vld [vmem:[%s1329_s1 + $0x4] ss:$24 sps:$4 sm:$0xff]   ;;  %v1170_v11 = vmov 0   ;;  %vm577_vm0 = vcmask 130048   ;;  %vm710_vm2 = vcmask 138240  }
   0xd   : > { %s848_s16 = sshll.u32 %s1337_s12, 4  ;;  %613 = vmatprep.mubr.bf16.mxu1 %v1129_v8  ;;  %663 = vmatprep.subr.bf16.mxu0 %v1170_v11 }
   0xe   : > { %s217_s19 = scalar_lea.vmem %s1328_s0, %s848_s16  ;;  %1124 = vset.pattern.permute.xlu0 %v1170_v11  ;;  %1123 = vset.pattern.permute.xlu1 %v1170_v11 }
   0xf   : > { %v1218_v0 = vld [vmem:[%s217_s19 + $0x8] sm:$0xff]   ;;  %v1220_v1 = vld [vmem:[%s217_s19] sm:$0xff]  }
  0x10   : > { %v249_v2 = vunpack.c.l.bf16 %v1218_v0  ;;  %v250_v3 = vunpack.c.h.bf16 %v1218_v0  ;;  %v244_v4 = vunpack.c.l.bf16 %v1220_v1  ;;  %v245_v5 = vunpack.c.h.bf16 %v1220_v1 }
  0x12   : > { %v1226_v6 = vpack.i.bf16 %v250_v3, %v249_v2  ;;  %v1228_v7 = vpack.i.bf16 %v245_v5, %v244_v4  ;;  %v1127_v4 = vld [vmem:[%s1329_s1] ss:$24 sps:$4 sm:$0xff]   ;;  %v1135_v5 = vld [vmem:[%s1329_s1 + $0x14] ss:$24 sps:$4 sm:$0xff]  }
  0x13   : > { %845 = vmatprep.mubr.msk.bf16.mxu0 %vm577_vm0, %v1135_v5 }
  0x14   : > { %929 = vrot.lane.b32.xlu0 %v1226_v6, %s1162_s20  ;;  %939 = vrot.lane.b32.xlu1 %v1228_v7, %s1162_s20 }
  0x18   : > { %934 = vrot.lane.b32.xlu0 %v1226_v6, %s1163_s21  ;;  %944 = vrot.lane.b32.xlu1 %v1228_v7, %s1163_s21 }
  0x1c   : > { %949 = vrot.lane.b32.xlu0 %v1226_v6, %s1164_s22  ;;  %954 = vrot.lane.b32.xlu1 %v1226_v6, %s1165_s23 }
  0x20   : > { %959 = vrot.lane.b32.xlu0 %v1228_v7, %s1164_s22  ;;  %964 = vrot.lane.b32.xlu1 %v1228_v7, %s1165_s23 }
  0x24   : > { %969 = vrot.lane.b32.xlu0 %v1226_v6, %s1166_s24  ;;  %974 = vrot.lane.b32.xlu1 %v1226_v6, %s1167_s25 }
  0x28   : > { %979 = vrot.lane.b32.xlu0 %v1228_v7, %s1166_s24  ;;  %984 = vrot.lane.b32.xlu1 %v1228_v7, %s1167_s25  ;;  %s239_s25 = scalar_lea.vmem %s1331_s3, %s848_s16 }
  0x2c   : > { %989 = vrot.lane.b32.xlu0 %v1226_v6, %s1168_s26  ;;  %994 = vrot.lane.b32.xlu1 %v1228_v7, %s1168_s26 }
  0x30   : > { %999 = vrot.lane.b32.xlu1 %v1226_v6, %s1169_s27 }
  0x86   : > { %v930_v9 = vpop.permute.xlu0 %929  ;;  %v940_v10 = vpop.permute.xlu1 %939 }
  0x87   : > { %v932_v12 = vunpack.i.h.bf16 %v930_v9  ;;  %v931_v13 = vunpack.i.l.bf16 %v930_v9  ;;  %v942_v14 = vunpack.i.h.bf16 %v940_v10  ;;  %v941_v15 = vunpack.i.l.bf16 %v940_v10  ;;  %1004 = vrot.lane.b32.xlu0 %v930_v9, %s1169_s27 }
  0x89   : > { %v510_v16 = vpack.c.bf16 %v932_v12, %v931_v13  ;;  %v509_v23 = vpack.c.bf16 %v942_v14, %v941_v15 }
  0x8a   : > { %v935_v17 = vpop.permute.xlu0 %934  ;;  %v945_v18 = vpop.permute.xlu1 %944 }
  0x8b   : > { %v937_v19 = vunpack.i.h.bf16 %v935_v17  ;;  %v936_v20 = vunpack.i.l.bf16 %v935_v17  ;;  %850 = vmatprep.subr.bf16.mxu1 %v510_v16  ;;  %v947_v21 = vunpack.i.h.bf16 %v945_v18  ;;  %v946_v22 = vunpack.i.l.bf16 %v945_v18  ;;  %1014 = vrot.lane.b32.xlu0 %v935_v17, %s1171_s30 }
  0x8c   : > { %1009 = vrot.lane.b32.xlu1 %v935_v17, %s1169_s27 }
  0x8d   : > { %v502_v24 = vpack.c.bf16 %v937_v19, %v936_v20  ;;  %v501_v26 = vpack.c.bf16 %v947_v21, %v946_v22 }
  0x8e   : > { %v950_v25 = vpop.permute.xlu0 %949  ;;  %v955_v27 = vpop.permute.xlu1 %954 }
  0x8f   : > { %851 = vmatpush3.bf16.msra.mxu1 %v502_v24  ;;  %v952_v28 = vunpack.i.h.bf16 %v950_v25  ;;  %v951_v29 = vunpack.i.l.bf16 %v950_v25  ;;  %v957_v30 = vunpack.i.h.bf16 %v955_v27  ;;  %v956_v31 = vunpack.i.l.bf16 %v955_v27  ;;  %1024 = vrot.lane.b32.xlu0 %v945_v18, %s1169_s27 }
  0x90   : > { %852 = vmatprep.subr.bf16.mxu1 %v509_v23  ;;  %1019 = vrot.lane.b32.xlu1 %v940_v10, %s1169_s27 }
  0x91   : > { %v508_v32 = vpack.c.bf16 %v952_v28, %v951_v29  ;;  %v500_v35 = vpack.c.bf16 %v957_v30, %v956_v31 }
  0x92   : > { %v960_v33 = vpop.permute.xlu0 %959  ;;  %v965_v34 = vpop.permute.xlu1 %964 }
  0x93   : > { %853 = vmatpush3.bf16.msra.mxu1 %v501_v26  ;;  %v962_v36 = vunpack.i.h.bf16 %v960_v33  ;;  %v961_v37 = vunpack.i.l.bf16 %v960_v33  ;;  %v967_v38 = vunpack.i.h.bf16 %v965_v34  ;;  %v966_v39 = vunpack.i.l.bf16 %v965_v34  ;;  %1034 = vrot.lane.b32.xlu0 %v950_v25, %s1169_s27 }
  0x94   : > { %854 = vmatprep.subr.bf16.mxu1 %v508_v32  ;;  %1029 = vrot.lane.b32.xlu1 %v945_v18, %s1171_s30 }
  0x95   : > { %v507_v40 = vpack.c.bf16 %v962_v36, %v961_v37  ;;  %v499_v42 = vpack.c.bf16 %v967_v38, %v966_v39 }
  0x96   : > { %v970_v41 = vpop.permute.xlu0 %969  ;;  %v975_v43 = vpop.permute.xlu1 %974 }
  0x97   : > { %855 = vmatpush3.bf16.msra.mxu1 %v500_v35  ;;  %v972_v44 = vunpack.i.h.bf16 %v970_v41  ;;  %v971_v45 = vunpack.i.l.bf16 %v970_v41  ;;  %v977_v46 = vunpack.i.h.bf16 %v975_v43  ;;  %v976_v47 = vunpack.i.l.bf16 %v975_v43  ;;  %1044 = vrot.lane.b32.xlu0 %v955_v27, %s1171_s30 }
  0x98   : > { %856 = vmatprep.subr.bf16.mxu1 %v507_v40  ;;  %1039 = vrot.lane.b32.xlu1 %v955_v27, %s1169_s27 }
  0x99   : > { %v506_v48 = vpack.c.bf16 %v972_v44, %v971_v45  ;;  %v498_v51 = vpack.c.bf16 %v977_v46, %v976_v47 }
  0x9a   : > { %v980_v49 = vpop.permute.xlu0 %979  ;;  %v985_v50 = vpop.permute.xlu1 %984 }
  0x9b   : > { %857 = vmatpush3.bf16.msra.mxu1 %v499_v42  ;;  %v982_v52 = vunpack.i.h.bf16 %v980_v49  ;;  %v981_v53 = vunpack.i.l.bf16 %v980_v49  ;;  %v987_v54 = vunpack.i.h.bf16 %v985_v50  ;;  %v986_v55 = vunpack.i.l.bf16 %v985_v50  ;;  %1054 = vrot.lane.b32.xlu0 %v965_v34, %s1169_s27 }
  0x9c   : > { %858 = vmatprep.subr.bf16.mxu1 %v506_v48  ;;  %1049 = vrot.lane.b32.xlu1 %v960_v33, %s1169_s27 }
  0x9d   : > { %v505_v56 = vpack.c.bf16 %v982_v52, %v981_v53  ;;  %v497_v60 = vpack.c.bf16 %v987_v54, %v986_v55 }
  0x9e   : > { %v990_v57 = vpop.permute.xlu0 %989  ;;  %v995_v61 = vpop.permute.xlu1 %994 }
  0x9f   : > { %859 = vmatpush3.bf16.msra.mxu1 %v498_v51  ;;  %v992_v58 = vunpack.i.h.bf16 %v990_v57  ;;  %v991_v59 = vunpack.i.l.bf16 %v990_v57  ;;  %v997_v63 = vunpack.i.h.bf16 %v995_v61  ;;  %v996_v2 = vunpack.i.l.bf16 %v995_v61  ;;  %1064 = vrot.lane.b32.xlu0 %v970_v41, %s1169_s27 }
  0xa0   : > { %860 = vmatprep.subr.bf16.mxu1 %v505_v56  ;;  %1059 = vrot.lane.b32.xlu1 %v965_v34, %s1171_s30 }
  0xa1   : > { %v504_v62 = vpack.c.bf16 %v992_v58, %v991_v59  ;;  %v503_v3 = vpack.c.bf16 %v997_v63, %v996_v2 }
  0xa2   : > { %v1296_v8 = vpop.permute.xlu1 %999 }
  0xa3   : > { %861 = vmatpush3.bf16.msra.mxu1 %v497_v60  ;;  %1074 = vrot.lane.b32.xlu0 %v975_v43, %s1171_s30 }
  0xa4   : > { %862 = vmatprep.subr.bf16.mxu1 %v504_v62  ;;  %1069 = vrot.lane.b32.xlu1 %v975_v43, %s1169_s27 }
  0xa7   : > { %863 = vmatpush3.bf16.msra.mxu1 %v1218_v0  ;;  %1084 = vrot.lane.b32.xlu0 %v985_v50, %s1169_s27  ;;  %v1132_v0 = vld [vmem:[%s1329_s1 + $0xc] ss:$24 sps:$4 sm:$0xff]  }
  0xa8   : > { %864 = vmatprep.subr.bf16.mxu1 %v503_v3  ;;  %1079 = vrot.lane.b32.xlu1 %v980_v49, %s1169_s27 }
  0xab   : > { %865 = vmatpush3.bf16.msra.mxu1 %v1220_v1  ;;  %1094 = vrot.lane.b32.xlu0 %v990_v57, %s1169_s27  ;;  %v536_v1 = vld [vmem:[%s1330_s2] sm:$0xff] }
  0xac   : > { %1089 = vrot.lane.b32.xlu1 %v985_v50, %s1171_s30 }
  0xae   : > { %614 = vmatmul.mubr.bf16.vlgmr.msra.gmra.mxu1 %v1127_v4 }
  0xaf   : > { %654 = vmatprep.mubr.bf16.mxu1 %v1132_v0  ;;  %1099 = vrot.lane.b32.xlu0 %v1226_v6, %s1171_s30  ;;  %v537_v6 = vld [vmem:[%s1330_s2 + $0x8] sm:$0xff] }
  0xb0   : > { %1109 = vrot.lane.b32.xlu1 %v995_v61, %s1169_s27 }
  0xb3   : > { %1104 = vrot.lane.b32.xlu0 %v1228_v7, %s1169_s27 }
  0xb4   : > { %1114 = vrot.lane.b32.xlu1 %v1228_v7, %s1171_s30 }
  0xb7   : > { %1119 = vrot.lane.b32.xlu0 %v995_v61, %s1171_s30 }
  0xb8   : > { %540 = vperm.xlu1 %1123, %v536_v1  }
  0xbb   : > { %545 = vperm.xlu0 %1124, %v537_v6  }
  0xf9   : > { %v1005_v9 = vpop.permute.xlu0 %1004 }
  0xfa   : > { %v1007_v10 = vunpack.i.h.bf16 %v1005_v9  ;;  %v1006_v12 = vunpack.i.l.bf16 %v1005_v9 }
  0xfc   : > { %v526_v13 = vpack.c.bf16 %v1007_v10, %v1006_v12 }
  0xfd   : > { %v1015_v14 = vpop.permute.xlu0 %1014 }
  0xfe   : > { %v1017_v7 = vunpack.i.h.bf16 %v1015_v14  ;;  %v1016_v15 = vunpack.i.l.bf16 %v1015_v14  ;;  %v1010_v16 = vpop.permute.xlu1 %1009  ;;  %872 = vmatprep.subr.bf16.mxu1 %v526_v13 }
  0xff   : > { %v1012_v17 = vunpack.i.h.bf16 %v1010_v16  ;;  %v1011_v18 = vunpack.i.l.bf16 %v1010_v16  ;;  %v1002_v16 = vunpack.i.h.bf16 %v1296_v8 }
 0x100   : > { %v534_v19 = vpack.c.bf16 %v1017_v7, %v1016_v15 }
 0x101   : > { %v518_v20 = vpack.c.bf16 %v1012_v17, %v1011_v18  ;;  %v1025_v21 = vpop.permute.xlu0 %1024  ;;  %v1001_v17 = vunpack.i.l.bf16 %v1296_v8 }
 0x102   : > { %v1027_v22 = vunpack.i.h.bf16 %v1025_v21  ;;  %v1026_v23 = vunpack.i.l.bf16 %v1025_v21  ;;  %v1020_v24 = vpop.permute.xlu1 %1019  ;;  %664 = vmatpush1.bf16.msra.mxu0 %v534_v19 }
 0x103   : > { %v1022_v25 = vunpack.i.h.bf16 %v1020_v24  ;;  %v1021_v26 = vunpack.i.l.bf16 %v1020_v24  ;;  %873 = vmatpush3.bf16.msra.mxu1 %v518_v20  ;;  %665 = vmatprep.subr.bf16.mxu0 %v1170_v11 }
 0x104   : > { %v517_v27 = vpack.c.bf16 %v1027_v22, %v1026_v23 }
 0x105   : > { %v525_v28 = vpack.c.bf16 %v1022_v25, %v1021_v26  ;;  %v1035_v29 = vpop.permute.xlu0 %1034  ;;  %v512_v26 = vpack.c.bf16 %v1002_v16, %v1001_v17 }
 0x106   : > { %v1037_v30 = vunpack.i.h.bf16 %v1035_v29  ;;  %v1036_v31 = vunpack.i.l.bf16 %v1035_v29  ;;  %v1030_v32 = vpop.permute.xlu1 %1029 }
 0x107   : > { %v1032_v33 = vunpack.i.h.bf16 %v1030_v32  ;;  %v1031_v34 = vunpack.i.l.bf16 %v1030_v32  ;;  %874 = vmatprep.subr.bf16.mxu1 %v525_v28 }
 0x108   : > { %v524_v35 = vpack.c.bf16 %v1037_v30, %v1036_v31  ;;  %875 = vmatpush3.bf16.msra.mxu1 %v517_v27 }
 0x109   : > { %v533_v36 = vpack.c.bf16 %v1032_v33, %v1031_v34  ;;  %v1045_v37 = vpop.permute.xlu0 %1044 }
 0x10a   : > { %v1047_v38 = vunpack.i.h.bf16 %v1045_v37  ;;  %v1046_v39 = vunpack.i.l.bf16 %v1045_v37  ;;  %v1040_v40 = vpop.permute.xlu1 %1039  ;;  %876 = vmatprep.subr.bf16.mxu1 %v524_v35 }
 0x10b   : > { %v1042_v41 = vunpack.i.h.bf16 %v1040_v40  ;;  %v1041_v42 = vunpack.i.l.bf16 %v1040_v40  ;;  %666 = vmatpush1.bf16.msra.mxu0 %v533_v36 }
 0x10c   : > { %v532_v43 = vpack.c.bf16 %v1047_v38, %v1046_v39  ;;  %667 = vmatprep.subr.bf16.mxu0 %v1170_v11 }
 0x10d   : > { %v516_v44 = vpack.c.bf16 %v1042_v41, %v1041_v42  ;;  %v1055_v45 = vpop.permute.xlu0 %1054  ;;  %v1130_v42 = vld [vmem:[%s1329_s1 + $0x8] ss:$24 sps:$4 sm:$0xff]  }
 0x10e   : > { %v1057_v46 = vunpack.i.h.bf16 %v1055_v45  ;;  %v1056_v47 = vunpack.i.l.bf16 %v1055_v45  ;;  %v1050_v48 = vpop.permute.xlu1 %1049 }
 0x10f   : > { %v1052_v49 = vunpack.i.h.bf16 %v1050_v48  ;;  %v1051_v50 = vunpack.i.l.bf16 %v1050_v48  ;;  %877 = vmatpush3.bf16.msra.mxu1 %v516_v44  ;;  %668 = vmatpush1.bf16.msra.mxu0 %v532_v43 }
 0x110   : > { %v515_v51 = vpack.c.bf16 %v1057_v46, %v1056_v47  ;;  %669 = vmatprep.subr.bf16.mxu0 %v1170_v11  ;;  %v1133_v46 = vld [vmem:[%s1329_s1 + $0x10] ss:$24 sps:$4 sm:$0xff]  }
 0x111   : > { %v523_v52 = vpack.c.bf16 %v1052_v49, %v1051_v50  ;;  %v1065_v53 = vpop.permute.xlu0 %1064 }
 0x112   : > { %v1067_v54 = vunpack.i.h.bf16 %v1065_v53  ;;  %v1066_v55 = vunpack.i.l.bf16 %v1065_v53  ;;  %v1060_v56 = vpop.permute.xlu1 %1059 }
 0x113   : > { %v1062_v57 = vunpack.i.h.bf16 %v1060_v56  ;;  %v1061_v58 = vunpack.i.l.bf16 %v1060_v56  ;;  %878 = vmatprep.subr.bf16.mxu1 %v523_v52 }
 0x114   : > { %v522_v59 = vpack.c.bf16 %v1067_v54, %v1066_v55  ;;  %879 = vmatpush3.bf16.msra.mxu1 %v515_v51 }
 0x115   : > { %v531_v60 = vpack.c.bf16 %v1062_v57, %v1061_v58  ;;  %v1075_v61 = vpop.permute.xlu0 %1074 }
 0x116   : > { %v1077_v62 = vunpack.i.h.bf16 %v1075_v61  ;;  %v1076_v63 = vunpack.i.l.bf16 %v1075_v61  ;;  %v1070_v2 = vpop.permute.xlu1 %1069  ;;  %880 = vmatprep.subr.bf16.mxu1 %v522_v59 }
 0x117   : > { %v1072_v3 = vunpack.i.h.bf16 %v1070_v2  ;;  %v1071_v4 = vunpack.i.l.bf16 %v1070_v2  ;;  %670 = vmatpush1.bf16.msra.mxu0 %v531_v60 }
 0x118   : > { %v530_v0 = vpack.c.bf16 %v1077_v62, %v1076_v63  ;;  %671 = vmatprep.subr.bf16.mxu0 %v1170_v11 }
 0x119   : > { %v514_v5 = vpack.c.bf16 %v1072_v3, %v1071_v4  ;;  %v1085_v1 = vpop.permute.xlu0 %1084 }
 0x11a   : > { %v1087_v6 = vunpack.i.h.bf16 %v1085_v1  ;;  %v1086_v9 = vunpack.i.l.bf16 %v1085_v1  ;;  %v1080_v10 = vpop.permute.xlu1 %1079 }
 0x11b   : > { %v1082_v12 = vunpack.i.h.bf16 %v1080_v10  ;;  %v1081_v13 = vunpack.i.l.bf16 %v1080_v10  ;;  %881 = vmatpush3.bf16.msra.mxu1 %v514_v5  ;;  %672 = vmatpush1.bf16.msra.mxu0 %v530_v0 }
 0x11c   : > { %v513_v14 = vpack.c.bf16 %v1087_v6, %v1086_v9  ;;  %673 = vmatprep.subr.bf16.mxu0 %v1170_v11 }
 0x11d   : > { %v521_v7 = vpack.c.bf16 %v1082_v12, %v1081_v13  ;;  %v1095_v15 = vpop.permute.xlu0 %1094 }
 0x11e   : > { %v1097_v18 = vunpack.i.h.bf16 %v1095_v15  ;;  %v1096_v19 = vunpack.i.l.bf16 %v1095_v15  ;;  %v1090_v20 = vpop.permute.xlu1 %1089 }
 0x11f   : > { %v1092_v21 = vunpack.i.h.bf16 %v1090_v20  ;;  %v1091_v22 = vunpack.i.l.bf16 %v1090_v20  ;;  %882 = vmatprep.subr.bf16.mxu1 %v521_v7 }
 0x120   : > { %v520_v23 = vpack.c.bf16 %v1097_v18, %v1096_v19  ;;  %883 = vmatpush3.bf16.msra.mxu1 %v513_v14 }
 0x121   : > { %v529_v24 = vpack.c.bf16 %v1092_v21, %v1091_v22  ;;  %v1100_v25 = vpop.permute.xlu0 %1099 }
 0x122   : > { %v1102_v27 = vunpack.i.h.bf16 %v1100_v25  ;;  %v1101_v28 = vunpack.i.l.bf16 %v1100_v25  ;;  %v1110_v29 = vpop.permute.xlu1 %1109  ;;  %884 = vmatprep.subr.bf16.mxu1 %v520_v23 }
 0x123   : > { %v1112_v30 = vunpack.i.h.bf16 %v1110_v29  ;;  %v1111_v31 = vunpack.i.l.bf16 %v1110_v29  ;;  %674 = vmatpush1.bf16.msra.mxu0 %v529_v24 }
 0x124   : > { %v528_v32 = vpack.c.bf16 %v1102_v27, %v1101_v28  ;;  %885 = vmatpush3.bf16.msra.mxu1 %v512_v26  ;;  %675 = vmatprep.subr.bf16.mxu0 %v1170_v11 }
 0x125   : > { %v519_v8 = vpack.c.bf16 %v1112_v30, %v1111_v31  ;;  %v1105_v33 = vpop.permute.xlu0 %1104 }
 0x126   : > { %v1107_v34 = vunpack.i.h.bf16 %v1105_v33  ;;  %v1106_v35 = vunpack.i.l.bf16 %v1105_v33  ;;  %v1115_v36 = vpop.permute.xlu1 %1114 }
 0x127   : > { %v1117_v37 = vunpack.i.h.bf16 %v1115_v36  ;;  %v1116_v38 = vunpack.i.l.bf16 %v1115_v36  ;;  %676 = vmatpush1.bf16.msra.mxu0 %v528_v32  ;;  %886 = vmatprep.subr.bf16.mxu1 %v519_v8 }
 0x128   : > { %v511_v39 = vpack.c.bf16 %v1107_v34, %v1106_v35  ;;  %677 = vmatprep.subr.bf16.mxu0 %v1170_v11 }
 0x129   : > { %v527_v40 = vpack.c.bf16 %v1117_v37, %v1116_v38  ;;  %v1120_v41 = vpop.permute.xlu0 %1119 }
 0x12a   : > { %v1122_v43 = vunpack.i.h.bf16 %v1120_v41  ;;  %v1121_v44 = vunpack.i.l.bf16 %v1120_v41  ;;  %887 = vmatpush3.bf16.msra.mxu1 %v511_v39 }
 0x12b   : > { %678 = vmatpush1.bf16.msra.mxu0 %v527_v40 }
 0x12c   : > { %v535_v45 = vpack.c.bf16 %v1122_v43, %v1121_v44  ;;  %693 = vmatprep.subr.bf16.mxu0 %v1170_v11 }
 0x12d   : > { %655 = vmatmul.mubr.bf16.vlgmr.msra.gmra.mxu1 %v1130_v42 }
 0x12f   : > { %694 = vmatpush2.bf16.msra.mxu0 %v535_v45 }
 0x132   : > { %696 = vmatmul.mubr.bf16.vlgmr.msra.gmra.mxu0 %v1133_v46 }
 0x133   : > { %v541_v52 = vpop.permute.xlu1 %540 }
 0x136   : > { %v546_v11 = vpop.permute.xlu0 %545 }
 0x16e   : > { %v866_v47 = vpop.f32.mrf.mxu1 }
 0x170   : > { %v867_v48 = vpop.f32.mrf.mxu1 }
 0x171   : > { %v868_v51 = vadd.f32 %v867_v48, %v866_v47 }
 0x172   : > { %v869_v49 = vpop.f32.mrf.mxu1 }
 0x173   : > { %v616_v56 = vadd.f32 %v868_v51, %v541_v52 }
 0x174   : > { %v870_v50 = vpop.f32.mrf.mxu1 }
 0x175   : > { %v871_v55 = vadd.f32 %v870_v50, %v869_v49 }
 0x177   : > { %v619_v62 = vadd.f32 %v871_v55, %v546_v11 }
 0x1ed   : > { %v888_v53 = vpop.f32.mrf.mxu1 }
 0x1ef   : > { %v889_v54 = vpop.f32.mrf.mxu1 }
 0x1f0   : > { %v890_v57 = vadd.f32 %v889_v54, %v888_v53 }
 0x1f1   : > { %v891_v58 = vpop.f32.mrf.mxu1 }
 0x1f2   : > { %v657_v59 = vadd.f32 %v890_v57, %v616_v56  ;;  %v697_v60 = vpop.f32.mrf.mxu0 }
 0x1f3   : > { %v892_v61 = vpop.f32.mrf.mxu1 }
 0x1f4   : > { %v698_v63 = vadd.f32 %v697_v60, %v657_v59  ;;  %v893_v2 = vadd.f32 %v892_v61, %v891_v58  ;;  %v699_v3 = vpop.f32.mrf.mxu0 }
 0x1f6   : > { %vm704_vm1 = vcmp.ge.f32.partialorder %v698_v63, 0.0  ;;  %v706_v4 = vmul.f32 0.1, %v698_v63  ;;  %v660_v0 = vadd.f32 %v893_v2, %v619_v62  ;;  %v700_v5 = vpop.f32.mrf.mxu0 }
 0x1f8   : > { %v708_v1 = vsel %vm704_vm1, %v698_v63, %v706_v4  ;;  %v701_v6 = vadd.f32 %v700_v5, %v660_v0  ;;  %v702_v9 = vpop.f32.mrf.mxu0 }
 0x1f9   : > { %711 = vst.msk [vmem:[%s239_s25] sm:$0xff] %vm710_vm2, %v708_v1 }
 0x1fa   : > { %vm705_vm3 = vcmp.ge.f32.partialorder %v701_v6, 0.0  ;;  %v707_v10 = vmul.f32 0.1, %v701_v6 }
 0x1fc   : > { %v709_v12 = vsel %vm705_vm3, %v701_v6, %v707_v10 }
 0x1fd   : > { %712 = vst.msk [vmem:[%s239_s25 + $0x8] sm:$0xff] %vm710_vm2, %v709_v12 }
 0x1fe PF: > { %s13_s14 = sadd.s32 1, %s1160_s14   ;;  %s1332_s12 = smov %s1156_s13 }
 0x1ff   : > { %p10_p5 = scmp.ge.s32.totalorder %s13_s14, 4   ;;  %s1333_s13 = smov %s1335_s15 }
 0x201   :  { %12 = sbr.rel (!%p10_p5) target bundleno = 2 (0x2), region = 69 }

// kernel: _lambda_.27
= control target key start
LH: loop header
LB: loop body
LE: loop exit
PB: predicated region body
PF: predicated region fallthrough
CT: control target
= control target key end

     0   :  { %s1320_s12 = smov 0   ;;  %s1322_s13 = smov 0   ;;  %s1503_s0 = inlined_call_operand.vmem [shape: bf16[2,2,16,29], index: 0, kind: input, shape index: {}]   ;;  %s1504_s1 = inlined_call_operand.vmem [shape: bf16[32,656], index: 1, kind: input, shape index: {}]   ;;  %s1505_s2 = inlined_call_operand.vmem [shape: f32[32,1], index: 2, kind: input, shape index: {}]   ;;  %s1506_s3 = inlined_call_operand.vmem [shape: f32[2,32,9], index: 3, kind: output, shape index: {}]  }
   0x1   :  { %s1324_s14 = smov 0  }
   0x2 LB: > { %s22_s15 = sadd.s32 1, %s1284_s13  ;;  %p912_p0 = scmp.ge.s32.totalorder %s1288_s14, 1  ;;  %s1288_s14 = sphi %s1324_s14, %s13_s14   ;;  %s1284_s13 = sphi %s1322_s13, %s1508_s13   ;;  %s1280_s12 = sphi %s1320_s12, %s1507_s12  }
   0x3   : > { %p23_p1 = scmp.ge.s32.totalorder %s22_s15, 2  ;;  %p174_p2 = scmp.lt.s32.totalorder %s1288_s14, 3 }
   0x5   : > { %s1510_s15 = smov (%p23_p1, %s22_s15), 0  ;;  %p175_p3 = pnand %p912_p0, %p174_p2 }
   0x6   : > { %p213_p4 = scmp.lt.s32.totalorder (!%p175_p3), %s1280_s12, 1  ;;  %s1290_s20 = smov (!%p175_p3), 121  }
   0x7   : > { %178 = sbr.rel (%p175_p3) target bundleno = 528 (0x210), region = 32  ;;  %s1291_s21 = smov (!%p175_p3), 125  }
   0x8   : > { %s1292_s22 = smov (!%p175_p3), 122   ;;  %s1293_s23 = smov (!%p175_p3), 126  }
   0x9   : > { %s1294_s24 = smov (!%p175_p3), 123   ;;  %s1295_s25 = smov (!%p175_p3), 127  }
   0xa   : > { %s1296_s26 = smov (!%p175_p3), 124   ;;  %s1297_s27 = smov (!%p175_p3), 120  }
   0xb   : > { %s1299_s7 = smov (!%p175_p3), 112  }
   0xc   : > { %s1512_s12 = smov (!%p213_p4, %s1280_s12), 1  ;;  %v1248_v57 = vld [vmem:[%s1504_s1 + $0x4] ss:$24 sps:$4 sm:$0xff]   ;;  %vm624_vm0 = vcmask 130048   ;;  %vm790_vm2 = vcmask 72704  }
   0xd   : > { %s937_s16 = sshll.u32 %s1512_s12, 4  ;;  %663 = vmatprep.mubr.bf16.mxu0 %v1248_v57  ;;  %s938_s11 = sshll.u32 %s1512_s12, 5 }
   0xe   : > { %s217_s19 = scalar_lea.vmem %s1503_s0, %s937_s16  ;;  %s239_s18 = scalar_lea.vmem %s1506_s3, %s938_s11 }
   0xf   : > { %v1344_v0 = vld [vmem:[%s217_s19 + $0x8] sm:$0xff]   ;;  %v1346_v1 = vld [vmem:[%s217_s19] sm:$0xff]  }
  0x10   : > { %v249_v2 = vunpack.c.l.bf16 %v1344_v0  ;;  %v250_v3 = vunpack.c.h.bf16 %v1344_v0  ;;  %v244_v4 = vunpack.c.l.bf16 %v1346_v1  ;;  %v245_v5 = vunpack.c.h.bf16 %v1346_v1 }
  0x12   : > { %v1352_v6 = vpack.i.bf16 %v250_v3, %v249_v2  ;;  %v1354_v7 = vpack.i.bf16 %v245_v5, %v244_v4  ;;  %v1251_v2 = vld [vmem:[%s1504_s1 + $0xc] ss:$24 sps:$4 sm:$0xff]   ;;  %v1298_v4 = vmov 0   ;;  %v1246_v5 = vld [vmem:[%s1504_s1] ss:$24 sps:$4 sm:$0xff]  }
  0x13   : > { %712 = vmatprep.mubr.bf16.mxu1 %v1251_v2  ;;  %1242 = vset.pattern.permute.xlu1 %v1298_v4 }
  0x14   : > { %1048 = vrot.lane.b32.xlu0 %v1352_v6, %s1290_s20  ;;  %1058 = vrot.lane.b32.xlu1 %v1354_v7, %s1290_s20 }
  0x15   : > { %1243 = vset.pattern.permute.xlu0 %v1298_v4 }
  0x18   : > { %1053 = vrot.lane.b32.xlu0 %v1352_v6, %s1291_s21  ;;  %1063 = vrot.lane.b32.xlu1 %v1354_v7, %s1291_s21 }
  0x1c   : > { %1068 = vrot.lane.b32.xlu0 %v1352_v6, %s1292_s22  ;;  %1073 = vrot.lane.b32.xlu1 %v1352_v6, %s1293_s23 }
  0x20   : > { %1078 = vrot.lane.b32.xlu0 %v1354_v7, %s1292_s22  ;;  %1083 = vrot.lane.b32.xlu1 %v1354_v7, %s1293_s23 }
  0x24   : > { %1088 = vrot.lane.b32.xlu0 %v1352_v6, %s1294_s24  ;;  %1093 = vrot.lane.b32.xlu1 %v1352_v6, %s1295_s25 }
  0x28   : > { %1098 = vrot.lane.b32.xlu0 %v1354_v7, %s1294_s24  ;;  %1103 = vrot.lane.b32.xlu1 %v1354_v7, %s1295_s25 }
  0x2c   : > { %1108 = vrot.lane.b32.xlu0 %v1352_v6, %s1296_s26  ;;  %1113 = vrot.lane.b32.xlu1 %v1354_v7, %s1296_s26 }
  0x86   : > { %v1049_v8 = vpop.permute.xlu0 %1048  ;;  %v1059_v9 = vpop.permute.xlu1 %1058 }
  0x87   : > { %v1051_v10 = vunpack.i.h.bf16 %v1049_v8  ;;  %v1050_v11 = vunpack.i.l.bf16 %v1049_v8  ;;  %v1061_v12 = vunpack.i.h.bf16 %v1059_v9  ;;  %v1060_v13 = vunpack.i.l.bf16 %v1059_v9  ;;  %1118 = vrot.lane.b32.xlu0 %v1049_v8, %s1297_s27  ;;  %v1260_v8 = vld [vmem:[%s1504_s1 + $0x14] ss:$24 sps:$4 sm:$0xff]  }
  0x89   : > { %v516_v14 = vpack.c.bf16 %v1051_v10, %v1050_v11  ;;  %v515_v21 = vpack.c.bf16 %v1061_v12, %v1060_v13  ;;  %v545_v10 = vld [vmem:[%s1505_s2 + $0x18] sm:$0xff] }
  0x8a   : > { %v1370_v15 = vpop.permute.xlu0 %1053  ;;  %v1372_v16 = vpop.permute.xlu1 %1063 }
  0x8b   : > { %v1056_v17 = vunpack.i.h.bf16 %v1370_v15  ;;  %v1055_v18 = vunpack.i.l.bf16 %v1370_v15  ;;  %939 = vmatprep.subr.bf16.mxu0 %v516_v14  ;;  %v1066_v19 = vunpack.i.h.bf16 %v1372_v16  ;;  %v1065_v20 = vunpack.i.l.bf16 %v1372_v16  ;;  %1123 = vrot.lane.b32.xlu1 %v1370_v15, %s1297_s27 }
  0x8c   : > { %1128 = vrot.lane.b32.xlu0 %v1059_v9, %s1297_s27  ;;  %v542_v9 = vld [vmem:[%s1505_s2] sm:$0xff] }
  0x8d   : > { %v508_v22 = vpack.c.bf16 %v1056_v17, %v1055_v18  ;;  %v507_v25 = vpack.c.bf16 %v1066_v19, %v1065_v20 }
  0x8e   : > { %v1069_v23 = vpop.permute.xlu0 %1068  ;;  %v1379_v24 = vpop.permute.xlu1 %1073 }
  0x8f   : > { %v1071_v26 = vunpack.i.h.bf16 %v1069_v23  ;;  %v1070_v27 = vunpack.i.l.bf16 %v1069_v23  ;;  %940 = vmatpush3.bf16.msra.mxu0 %v508_v22  ;;  %v1076_v28 = vunpack.i.h.bf16 %v1379_v24  ;;  %v1075_v29 = vunpack.i.l.bf16 %v1379_v24  ;;  %1133 = vrot.lane.b32.xlu1 %v1372_v16, %s1297_s27 }
  0x90   : > { %941 = vmatprep.subr.bf16.mxu0 %v515_v21  ;;  %1138 = vrot.lane.b32.xlu0 %v1069_v23, %s1297_s27 }
  0x91   : > { %v514_v30 = vpack.c.bf16 %v1071_v26, %v1070_v27  ;;  %v506_v33 = vpack.c.bf16 %v1076_v28, %v1075_v29 }
  0x92   : > { %v1079_v31 = vpop.permute.xlu0 %1078  ;;  %v1386_v32 = vpop.permute.xlu1 %1083 }
  0x93   : > { %v1081_v34 = vunpack.i.h.bf16 %v1079_v31  ;;  %v1080_v35 = vunpack.i.l.bf16 %v1079_v31  ;;  %942 = vmatpush3.bf16.msra.mxu0 %v507_v25  ;;  %v1086_v36 = vunpack.i.h.bf16 %v1386_v32  ;;  %v1085_v37 = vunpack.i.l.bf16 %v1386_v32  ;;  %1143 = vrot.lane.b32.xlu1 %v1379_v24, %s1297_s27 }
  0x94   : > { %943 = vmatprep.subr.bf16.mxu0 %v514_v30  ;;  %1148 = vrot.lane.b32.xlu0 %v1079_v31, %s1297_s27 }
  0x95   : > { %v513_v38 = vpack.c.bf16 %v1081_v34, %v1080_v35  ;;  %v505_v41 = vpack.c.bf16 %v1086_v36, %v1085_v37 }
  0x96   : > { %v1089_v39 = vpop.permute.xlu0 %1088  ;;  %v1094_v40 = vpop.permute.xlu1 %1093 }
  0x97   : > { %v1091_v42 = vunpack.i.h.bf16 %v1089_v39  ;;  %v1090_v43 = vunpack.i.l.bf16 %v1089_v39  ;;  %944 = vmatpush3.bf16.msra.mxu0 %v506_v33  ;;  %v1096_v44 = vunpack.i.h.bf16 %v1094_v40  ;;  %v1095_v45 = vunpack.i.l.bf16 %v1094_v40  ;;  %1153 = vrot.lane.b32.xlu1 %v1386_v32, %s1297_s27 }
  0x98   : > { %945 = vmatprep.subr.bf16.mxu0 %v513_v38  ;;  %1158 = vrot.lane.b32.xlu0 %v1089_v39, %s1297_s27 }
  0x99   : > { %v512_v46 = vpack.c.bf16 %v1091_v42, %v1090_v43  ;;  %v504_v49 = vpack.c.bf16 %v1096_v44, %v1095_v45 }
  0x9a   : > { %v1099_v47 = vpop.permute.xlu0 %1098  ;;  %v1104_v48 = vpop.permute.xlu1 %1103 }
  0x9b   : > { %v1101_v50 = vunpack.i.h.bf16 %v1099_v47  ;;  %v1100_v51 = vunpack.i.l.bf16 %v1099_v47  ;;  %946 = vmatpush3.bf16.msra.mxu0 %v505_v41  ;;  %v1106_v52 = vunpack.i.h.bf16 %v1104_v48  ;;  %v1105_v53 = vunpack.i.l.bf16 %v1104_v48  ;;  %1163 = vrot.lane.b32.xlu1 %v1094_v40, %s1297_s27 }
  0x9c   : > { %947 = vmatprep.subr.bf16.mxu0 %v512_v46  ;;  %1168 = vrot.lane.b32.xlu0 %v1099_v47, %s1297_s27 }
  0x9d   : > { %v511_v54 = vpack.c.bf16 %v1101_v50, %v1100_v51  ;;  %v503_v60 = vpack.c.bf16 %v1106_v52, %v1105_v53 }
  0x9e   : > { %v1109_v55 = vpop.permute.xlu0 %1108  ;;  %v1114_v56 = vpop.permute.xlu1 %1113 }
  0x9f   : > { %v1111_v58 = vunpack.i.h.bf16 %v1109_v55  ;;  %v1110_v59 = vunpack.i.l.bf16 %v1109_v55  ;;  %948 = vmatpush3.bf16.msra.mxu0 %v504_v49  ;;  %v1116_v61 = vunpack.i.h.bf16 %v1114_v56  ;;  %v1115_v62 = vunpack.i.l.bf16 %v1114_v56  ;;  %1173 = vrot.lane.b32.xlu1 %v1104_v48, %s1297_s27 }
  0xa0   : > { %949 = vmatprep.subr.bf16.mxu0 %v511_v54  ;;  %1183 = vrot.lane.b32.xlu0 %v1109_v55, %s1297_s27 }
  0xa1   : > { %v510_v63 = vpack.c.bf16 %v1111_v58, %v1110_v59  ;;  %v509_v3 = vpack.c.bf16 %v1116_v61, %v1115_v62 }
  0xa3   : > { %950 = vmatpush3.bf16.msra.mxu0 %v503_v60  ;;  %1178 = vrot.lane.b32.xlu1 %v1352_v6, %s1297_s27 }
  0xa4   : > { %951 = vmatprep.subr.bf16.mxu0 %v510_v63  ;;  %1188 = vrot.lane.b32.xlu0 %v1114_v56, %s1297_s27 }
  0xa7   : > { %952 = vmatpush3.bf16.msra.mxu0 %v1344_v0  ;;  %1193 = vrot.lane.b32.xlu1 %v1354_v7, %s1297_s27  ;;  %v1252_v0 = vld [vmem:[%s1504_s1 + $0x34] ss:$24 sps:$4 sm:$0xff]  }
  0xa8   : > { %953 = vmatprep.subr.bf16.mxu0 %v509_v3  ;;  %1198 = vrot.lane.b32.xlu0 %v1370_v15, %s1299_s7 }
  0xab   : > { %954 = vmatpush3.bf16.msra.mxu0 %v1346_v1  ;;  %1203 = vrot.lane.b32.xlu1 %v1372_v16, %s1299_s7  ;;  %v1254_v1 = vld [vmem:[%s1504_s1 + $0x30] ss:$24 sps:$4 sm:$0xff]  }
  0xac   : > { %729 = vmatprep.subr.bf16.mxu0 %v1298_v4  ;;  %1208 = vrot.lane.b32.xlu0 %v1379_v24, %s1299_s7 }
  0xae   : > { %664 = vmatmul.mubr.bf16.vlgmr.msra.gmra.mxu0 %v1246_v5 }
  0xaf   : > { %1213 = vrot.lane.b32.xlu1 %v1386_v32, %s1299_s7  ;;  %671 = vmatprep.mubr.bf16.mxu0 %v1252_v0 }
  0xb0   : > { %1218 = vrot.lane.b32.xlu0 %v1094_v40, %s1299_s7 }
  0xb3   : > { %1223 = vrot.lane.b32.xlu1 %v1104_v48, %s1299_s7 }
  0xb4   : > { %1228 = vrot.lane.b32.xlu0 %v1352_v6, %s1299_s7  ;;  %v543_v6 = vld [vmem:[%s1505_s2 + $0x8] sm:$0xff] }
  0xb6   : > { %672 = vmatmul.mubr.bf16.gmra.mxu0 %v1254_v1 }
  0xb7   : > { %1233 = vrot.lane.b32.xlu1 %v1354_v7, %s1299_s7  ;;  %933 = vmatprep.mubr.msk.bf16.mxu0 %vm624_vm0, %v1260_v8  ;;  %v544_v7 = vld [vmem:[%s1505_s2 + $0x10] sm:$0xff] }
  0xb8   : > { %1238 = vrot.lane.b32.xlu0 %v1114_v56, %s1299_s7 }
  0xbb   : > { %548 = vperm.xlu1 %1242, %v542_v9  }
  0xbc   : > { %553 = vperm.xlu0 %1243, %v543_v6  }
  0xbf   : > { %558 = vperm.xlu1 %1242, %v544_v7  }
  0xc3   : > { %563 = vperm.xlu1 %1242, %v545_v10  }
  0xf9   : > { %v1119_v11 = vpop.permute.xlu0 %1118 }
  0xfa   : > { %v1121_v12 = vunpack.i.h.bf16 %v1119_v11  ;;  %v1120_v13 = vunpack.i.l.bf16 %v1119_v11 }
  0xfc   : > { %v532_v14 = vpack.c.bf16 %v1121_v12, %v1120_v13 }
  0xfd   : > { %v1124_v15 = vpop.permute.xlu1 %1123 }
  0xfe   : > { %v1126_v16 = vunpack.i.h.bf16 %v1124_v15  ;;  %v1125_v17 = vunpack.i.l.bf16 %v1124_v15  ;;  %v1129_v18 = vpop.permute.xlu0 %1128  ;;  %967 = vmatprep.subr.bf16.mxu1 %v532_v14 }
  0xff   : > { %v1131_v19 = vunpack.i.h.bf16 %v1129_v18  ;;  %v1130_v20 = vunpack.i.l.bf16 %v1129_v18 }
 0x100   : > { %v524_v21 = vpack.c.bf16 %v1126_v16, %v1125_v17  ;;  %v1249_v17 = vld [vmem:[%s1504_s1 + $0x8] ss:$24 sps:$4 sm:$0xff]  }
 0x101   : > { %v531_v22 = vpack.c.bf16 %v1131_v19, %v1130_v20  ;;  %v1134_v23 = vpop.permute.xlu1 %1133 }
 0x102   : > { %v1136_v24 = vunpack.i.h.bf16 %v1134_v23  ;;  %v1135_v25 = vunpack.i.l.bf16 %v1134_v23  ;;  %v1139_v26 = vpop.permute.xlu0 %1138  ;;  %968 = vmatpush3.bf16.msra.mxu1 %v524_v21  ;;  %v1255_v21 = vld [vmem:[%s1504_s1 + $0x3c] ss:$24 sps:$4 sm:$0xff]  }
 0x103   : > { %v1141_v27 = vunpack.i.h.bf16 %v1139_v26  ;;  %v1140_v28 = vunpack.i.l.bf16 %v1139_v26  ;;  %969 = vmatprep.subr.bf16.mxu1 %v531_v22 }
 0x104   : > { %v523_v29 = vpack.c.bf16 %v1136_v24, %v1135_v25 }
 0x105   : > { %v530_v30 = vpack.c.bf16 %v1141_v27, %v1140_v28  ;;  %v1144_v31 = vpop.permute.xlu1 %1143 }
 0x106   : > { %v1146_v32 = vunpack.i.h.bf16 %v1144_v31  ;;  %v1145_v33 = vunpack.i.l.bf16 %v1144_v31  ;;  %v1149_v34 = vpop.permute.xlu0 %1148  ;;  %970 = vmatpush3.bf16.msra.mxu1 %v523_v29  ;;  %v1257_v29 = vld [vmem:[%s1504_s1 + $0x38] ss:$24 sps:$4 sm:$0xff]   ;;  %v1263_v31 = vld [vmem:[%s1504_s1 + $0x44] ss:$24 sps:$4 sm:$0xff]  }
 0x107   : > { %v1151_v35 = vunpack.i.h.bf16 %v1149_v34  ;;  %v1150_v36 = vunpack.i.l.bf16 %v1149_v34  ;;  %971 = vmatprep.subr.bf16.mxu1 %v530_v30 }
 0x108   : > { %v522_v37 = vpack.c.bf16 %v1146_v32, %v1145_v33 }
 0x109   : > { %v529_v38 = vpack.c.bf16 %v1151_v35, %v1150_v36  ;;  %v1154_v39 = vpop.permute.xlu1 %1153 }
 0x10a   : > { %v1156_v40 = vunpack.i.h.bf16 %v1154_v39  ;;  %v1155_v41 = vunpack.i.l.bf16 %v1154_v39  ;;  %v1159_v42 = vpop.permute.xlu0 %1158  ;;  %972 = vmatpush3.bf16.msra.mxu1 %v522_v37 }
 0x10b   : > { %v1161_v43 = vunpack.i.h.bf16 %v1159_v42  ;;  %v1160_v44 = vunpack.i.l.bf16 %v1159_v42  ;;  %973 = vmatprep.subr.bf16.mxu1 %v529_v38 }
 0x10c   : > { %v521_v45 = vpack.c.bf16 %v1156_v40, %v1155_v41 }
 0x10d   : > { %v528_v46 = vpack.c.bf16 %v1161_v43, %v1160_v44  ;;  %v1164_v47 = vpop.permute.xlu1 %1163 }
 0x10e   : > { %v1166_v48 = vunpack.i.h.bf16 %v1164_v47  ;;  %v1165_v49 = vunpack.i.l.bf16 %v1164_v47  ;;  %v1169_v50 = vpop.permute.xlu0 %1168  ;;  %974 = vmatpush3.bf16.msra.mxu1 %v521_v45 }
 0x10f   : > { %v1171_v51 = vunpack.i.h.bf16 %v1169_v50  ;;  %v1170_v52 = vunpack.i.l.bf16 %v1169_v50  ;;  %975 = vmatprep.subr.bf16.mxu1 %v528_v46 }
 0x110   : > { %v520_v53 = vpack.c.bf16 %v1166_v48, %v1165_v49 }
 0x111   : > { %v527_v54 = vpack.c.bf16 %v1171_v51, %v1170_v52  ;;  %v1174_v55 = vpop.permute.xlu1 %1173  ;;  %v1258_v52 = vld [vmem:[%s1504_s1 + $0x10] ss:$24 sps:$4 sm:$0xff]  }
 0x112   : > { %v1176_v56 = vunpack.i.h.bf16 %v1174_v55  ;;  %v1175_v57 = vunpack.i.l.bf16 %v1174_v55  ;;  %v1184_v58 = vpop.permute.xlu0 %1183  ;;  %976 = vmatpush3.bf16.msra.mxu1 %v520_v53  ;;  %v1261_v53 = vld [vmem:[%s1504_s1 + $0x40] ss:$24 sps:$4 sm:$0xff]  }
 0x113   : > { %v1186_v59 = vunpack.i.h.bf16 %v1184_v58  ;;  %v1185_v60 = vunpack.i.l.bf16 %v1184_v58  ;;  %977 = vmatprep.subr.bf16.mxu1 %v527_v54 }
 0x114   : > { %v519_v61 = vpack.c.bf16 %v1176_v56, %v1175_v57 }
 0x115   : > { %v526_v62 = vpack.c.bf16 %v1186_v59, %v1185_v60  ;;  %v1179_v63 = vpop.permute.xlu1 %1178 }
 0x116   : > { %v1181_v2 = vunpack.i.h.bf16 %v1179_v63  ;;  %v1180_v3 = vunpack.i.l.bf16 %v1179_v63  ;;  %v1189_v5 = vpop.permute.xlu0 %1188  ;;  %978 = vmatpush3.bf16.msra.mxu1 %v519_v61 }
 0x117   : > { %v1191_v0 = vunpack.i.h.bf16 %v1189_v5  ;;  %v1190_v1 = vunpack.i.l.bf16 %v1189_v5  ;;  %979 = vmatprep.subr.bf16.mxu1 %v526_v62 }
 0x118   : > { %v518_v8 = vpack.c.bf16 %v1181_v2, %v1180_v3 }
 0x119   : > { %v525_v9 = vpack.c.bf16 %v1191_v0, %v1190_v1  ;;  %v1194_v6 = vpop.permute.xlu1 %1193 }
 0x11a   : > { %v1196_v7 = vunpack.i.h.bf16 %v1194_v6  ;;  %v1195_v10 = vunpack.i.l.bf16 %v1194_v6  ;;  %v1199_v11 = vpop.permute.xlu0 %1198  ;;  %980 = vmatpush3.bf16.msra.mxu1 %v518_v8 }
 0x11b   : > { %v1201_v12 = vunpack.i.h.bf16 %v1199_v11  ;;  %v1200_v13 = vunpack.i.l.bf16 %v1199_v11  ;;  %981 = vmatprep.subr.bf16.mxu1 %v525_v9 }
 0x11c   : > { %v517_v14 = vpack.c.bf16 %v1196_v7, %v1195_v10 }
 0x11d   : > { %v540_v15 = vpack.c.bf16 %v1201_v12, %v1200_v13  ;;  %v1204_v16 = vpop.permute.xlu1 %1203 }
 0x11e   : > { %v1206_v18 = vunpack.i.h.bf16 %v1204_v16  ;;  %v1205_v19 = vunpack.i.l.bf16 %v1204_v16  ;;  %v1209_v20 = vpop.permute.xlu0 %1208  ;;  %982 = vmatpush3.bf16.msra.mxu1 %v517_v14 }
 0x11f   : > { %730 = vmatpush1.bf16.msra.mxu0 %v540_v15  ;;  %995 = vmatprep.subr.bf16.mxu1 %v1298_v4  ;;  %v1211_v23 = vunpack.i.h.bf16 %v1209_v20  ;;  %v1210_v24 = vunpack.i.l.bf16 %v1209_v20 }
 0x120   : > { %v539_v22 = vpack.c.bf16 %v1206_v18, %v1205_v19  ;;  %731 = vmatprep.subr.bf16.mxu0 %v1298_v4 }
 0x121   : > { %713 = vmatmul.mubr.bf16.vlgmr.msra.gmra.mxu1 %v1249_v17  ;;  %v1214_v25 = vpop.permute.xlu1 %1213  ;;  %v538_v26 = vpack.c.bf16 %v1211_v23, %v1210_v24 }
 0x122   : > { %1004 = vmatpush1.bf16.msra.mxu1 %v540_v15  ;;  %720 = vmatprep.mubr.bf16.mxu1 %v1255_v21  ;;  %v1216_v27 = vunpack.i.h.bf16 %v1214_v25  ;;  %v1215_v28 = vunpack.i.l.bf16 %v1214_v25  ;;  %v1219_v30 = vpop.permute.xlu0 %1218 }
 0x123   : > { %732 = vmatpush1.bf16.msra.mxu0 %v539_v22  ;;  %996 = vmatprep.subr.bf16.mxu1 %v1298_v4  ;;  %v1221_v33 = vunpack.i.h.bf16 %v1219_v30  ;;  %v1220_v34 = vunpack.i.l.bf16 %v1219_v30 }
 0x124   : > { %733 = vmatprep.subr.bf16.mxu0 %v1298_v4  ;;  %v537_v32 = vpack.c.bf16 %v1216_v27, %v1215_v28 }
 0x125   : > { %v1224_v35 = vpop.permute.xlu1 %1223  ;;  %v536_v36 = vpack.c.bf16 %v1221_v33, %v1220_v34 }
 0x126   : > { %1005 = vmatpush1.bf16.msra.mxu1 %v539_v22  ;;  %v1226_v37 = vunpack.i.h.bf16 %v1224_v35  ;;  %v1225_v38 = vunpack.i.l.bf16 %v1224_v35  ;;  %v1229_v39 = vpop.permute.xlu0 %1228 }
 0x127   : > { %734 = vmatpush1.bf16.msra.mxu0 %v538_v26  ;;  %997 = vmatprep.subr.bf16.mxu1 %v1298_v4  ;;  %v1231_v40 = vunpack.i.h.bf16 %v1229_v39  ;;  %v1230_v41 = vunpack.i.l.bf16 %v1229_v39 }
 0x128   : > { %735 = vmatprep.subr.bf16.mxu0 %v1298_v4  ;;  %v535_v43 = vpack.c.bf16 %v1226_v37, %v1225_v38 }
 0x129   : > { %721 = vmatmul.mubr.bf16.gmra.mxu1 %v1257_v29  ;;  %v1234_v42 = vpop.permute.xlu1 %1233  ;;  %v534_v44 = vpack.c.bf16 %v1231_v40, %v1230_v41 }
 0x12a   : > { %1006 = vmatpush1.bf16.msra.mxu1 %v538_v26  ;;  %934 = vmatprep.mubr.msk.bf16.mxu1 %vm624_vm0, %v1263_v31  ;;  %v1236_v45 = vunpack.i.h.bf16 %v1234_v42  ;;  %v1235_v46 = vunpack.i.l.bf16 %v1234_v42  ;;  %v1239_v47 = vpop.permute.xlu0 %1238 }
 0x12b   : > { %736 = vmatpush1.bf16.msra.mxu0 %v537_v32  ;;  %998 = vmatprep.subr.bf16.mxu1 %v1298_v4  ;;  %v1241_v49 = vunpack.i.h.bf16 %v1239_v47  ;;  %v1240_v50 = vunpack.i.l.bf16 %v1239_v47 }
 0x12c   : > { %737 = vmatprep.subr.bf16.mxu0 %v1298_v4  ;;  %v533_v48 = vpack.c.bf16 %v1236_v45, %v1235_v46 }
 0x12d   : > { %v541_v51 = vpack.c.bf16 %v1241_v49, %v1240_v50 }
 0x12e   : > { %1007 = vmatpush1.bf16.msra.mxu1 %v537_v32 }
 0x12f   : > { %738 = vmatpush1.bf16.msra.mxu0 %v536_v36  ;;  %999 = vmatprep.subr.bf16.mxu1 %v1298_v4 }
 0x130   : > { %739 = vmatprep.subr.bf16.mxu0 %v1298_v4 }
 0x132   : > { %1008 = vmatpush1.bf16.msra.mxu1 %v536_v36 }
 0x133   : > { %740 = vmatpush1.bf16.msra.mxu0 %v535_v43  ;;  %1000 = vmatprep.subr.bf16.mxu1 %v1298_v4 }
 0x134   : > { %741 = vmatprep.subr.bf16.mxu0 %v1298_v4 }
 0x136   : > { %1009 = vmatpush1.bf16.msra.mxu1 %v535_v43  ;;  %v549_v3 = vpop.permute.xlu1 %548 }
 0x137   : > { %742 = vmatpush1.bf16.msra.mxu0 %v534_v44  ;;  %1001 = vmatprep.subr.bf16.mxu1 %v1298_v4  ;;  %v554_v12 = vpop.permute.xlu0 %553 }
 0x138   : > { %743 = vmatprep.subr.bf16.mxu0 %v1298_v4 }
 0x13a   : > { %1010 = vmatpush1.bf16.msra.mxu1 %v534_v44  ;;  %v559_v1 = vpop.permute.xlu1 %558 }
 0x13b   : > { %744 = vmatpush1.bf16.msra.mxu0 %v533_v48  ;;  %1002 = vmatprep.subr.bf16.mxu1 %v1298_v4 }
 0x13c   : > { %759 = vmatprep.subr.bf16.mxu0 %v1298_v4 }
 0x13e   : > { %1011 = vmatpush1.bf16.msra.mxu1 %v533_v48  ;;  %v564_v17 = vpop.permute.xlu1 %563 }
 0x13f   : > { %760 = vmatpush2.bf16.msra.mxu0 %v541_v51  ;;  %1003 = vmatprep.subr.bf16.mxu1 %v1298_v4 }
 0x142   : > { %762 = vmatmul.mubr.bf16.vlgmr.msra.gmra.mxu0 %v1258_v52  ;;  %1012 = vmatpush2.bf16.msra.mxu1 %v541_v51 }
 0x145   : > { %770 = vmatmul.mubr.bf16.vlgmr.msra.gmra.mxu1 %v1261_v53 }
 0x16e   : > { %v955_v54 = vpop.f32.mrf.mxu0 }
 0x170   : > { %v956_v55 = vpop.f32.mrf.mxu0 }
 0x171   : > { %v957_v4 = vadd.f32 %v956_v55, %v955_v54 }
 0x172   : > { %v958_v57 = vpop.f32.mrf.mxu0 }
 0x173   : > { %v666_v9 = vadd.f32 %v957_v4, %v549_v3 }
 0x174   : > { %v959_v59 = vpop.f32.mrf.mxu0 }
 0x175   : > { %v960_v11 = vadd.f32 %v959_v59, %v958_v57 }
 0x176   : > { %v961_v61 = vpop.f32.mrf.mxu0 }
 0x177   : > { %v669_v21 = vadd.f32 %v960_v11, %v554_v12 }
 0x178   : > { %v962_v63 = vpop.f32.mrf.mxu0 }
 0x179   : > { %v963_v8 = vadd.f32 %v962_v63, %v961_v61 }
 0x17a   : > { %v964_v5 = vpop.f32.mrf.mxu0 }
 0x17b   : > { %v674_v13 = vadd.f32 %v963_v8, %v559_v1 }
 0x17c   : > { %v965_v7 = vpop.f32.mrf.mxu0 }
 0x17d   : > { %v966_v15 = vadd.f32 %v965_v7, %v964_v5 }
 0x17f   : > { %v677_v23 = vadd.f32 %v966_v15, %v564_v17 }
 0x1e1   : > { %v983_v56 = vpop.f32.mrf.mxu1 }
 0x1e3   : > { %v984_v58 = vpop.f32.mrf.mxu1 }
 0x1e4   : > { %v985_v6 = vadd.f32 %v984_v58, %v983_v56 }
 0x1e5   : > { %v986_v60 = vpop.f32.mrf.mxu1 }
 0x1e6   : > { %v715_v19 = vadd.f32 %v985_v6, %v666_v9 }
 0x1e7   : > { %v987_v62 = vpop.f32.mrf.mxu1 }
 0x1e8   : > { %v988_v16 = vadd.f32 %v987_v62, %v986_v60 }
 0x1e9   : > { %v989_v2 = vpop.f32.mrf.mxu1 }
 0x1ea   : > { %v718_v28 = vadd.f32 %v988_v16, %v669_v21 }
 0x1eb   : > { %v990_v0 = vpop.f32.mrf.mxu1 }
 0x1ec   : > { %v991_v14 = vadd.f32 %v990_v0, %v989_v2 }
 0x1ed   : > { %v992_v10 = vpop.f32.mrf.mxu1 }
 0x1ee   : > { %v723_v26 = vadd.f32 %v991_v14, %v674_v13 }
 0x1ef   : > { %v993_v18 = vpop.f32.mrf.mxu1 }
 0x1f0   : > { %v994_v24 = vadd.f32 %v993_v18, %v992_v10 }
 0x1f2   : > { %v726_v37 = vadd.f32 %v994_v24, %v677_v23 }
 0x202   : > { %v763_v20 = vpop.f32.mrf.mxu0 }
 0x203   : > { %v764_v22 = vadd.f32 %v763_v20, %v715_v19 }
 0x204   : > { %v765_v25 = vpop.f32.mrf.mxu0 }
 0x205   : > { %vm778_vm1 = vcmp.ge.f32.partialorder %v764_v22, 0.0  ;;  %v782_v27 = vmul.f32 0.1, %v764_v22  ;;  %v771_v29 = vpop.f32.mrf.mxu1 }
 0x206   : > { %v766_v30 = vpop.f32.mrf.mxu0  ;;  %v772_v31 = vadd.f32 %v771_v29, %v723_v26 }
 0x207   : > { %v786_v32 = vsel %vm778_vm1, %v764_v22, %v782_v27  ;;  %v767_v33 = vadd.f32 %v766_v30, %v718_v28  ;;  %v773_v34 = vpop.f32.mrf.mxu1 }
 0x208   : > { %791 = vst.msk [vmem:[%s239_s18] sm:$0xff] %vm790_vm2, %v786_v32  ;;  %vm780_vm3 = vcmp.ge.f32.partialorder %v772_v31, 0.0  ;;  %v784_v35 = vmul.f32 0.1, %v772_v31  ;;  %v768_v36 = vpop.f32.mrf.mxu0 }
 0x209   : > { %vm779_vm4 = vcmp.ge.f32.partialorder %v767_v33, 0.0  ;;  %v783_v38 = vmul.f32 0.1, %v767_v33  ;;  %v774_v39 = vpop.f32.mrf.mxu1 }
 0x20a   : > { %v788_v40 = vsel %vm780_vm3, %v772_v31, %v784_v35  ;;  %v775_v41 = vadd.f32 %v774_v39, %v726_v37 }
 0x20b   : > { %v787_v42 = vsel %vm779_vm4, %v767_v33, %v783_v38  ;;  %793 = vst.msk [vmem:[%s239_s18 + $0x10] sm:$0xff] %vm790_vm2, %v788_v40  ;;  %v776_v43 = vpop.f32.mrf.mxu1 }
 0x20c   : > { %792 = vst.msk [vmem:[%s239_s18 + $0x8] sm:$0xff] %vm790_vm2, %v787_v42  ;;  %vm781_vm5 = vcmp.ge.f32.partialorder %v775_v41, 0.0  ;;  %v785_v44 = vmul.f32 0.1, %v775_v41 }
 0x20e   : > { %v789_v45 = vsel %vm781_vm5, %v775_v41, %v785_v44 }
 0x20f   : > { %794 = vst.msk [vmem:[%s239_s18 + $0x18] sm:$0xff] %vm790_vm2, %v789_v45 }
 0x210 PF: > { %s13_s14 = sadd.s32 1, %s1288_s14   ;;  %s1507_s12 = smov %s1284_s13 }
 0x211   : > { %p10_p5 = scmp.ge.s32.totalorder %s13_s14, 4   ;;  %s1508_s13 = smov %s1510_s15 }
 0x213   :  { %12 = sbr.rel (!%p10_p5) target bundleno = 2 (0x2), region = 69 }

// kernel: _lambda_.28
= control target key start
LH: loop header
LB: loop body
LE: loop exit
PB: predicated region body
PF: predicated region fallthrough
CT: control target
= control target key end

     0   :  { %s530_s12 = smov 0   ;;  %s532_s13 = smov 0   ;;  %s575_s0 = inlined_call_operand.vmem [shape: bf16[4,3,1,23], index: 0, kind: input, shape index: {}]   ;;  %s576_s1 = inlined_call_operand.vmem [shape: bf16[8,5], index: 1, kind: input, shape index: {}]   ;;  %s577_s2 = inlined_call_operand.vmem [shape: f32[8,1], index: 2, kind: input, shape index: {}]   ;;  %s578_s3 = inlined_call_operand.vmem [shape: f32[4,8,22], index: 3, kind: output, shape index: {}]  }
   0x1   :  { %s534_s14 = smov 0  }
   0x2 LB: > { %s22_s15 = sadd.s32 1, %s499_s13  ;;  %p430_p0 = scmp.ge.s32.totalorder %s503_s14, 1  ;;  %s503_s14 = sphi %s534_s14, %s13_s14   ;;  %s499_s13 = sphi %s532_s13, %s580_s13   ;;  %s495_s12 = sphi %s530_s12, %s579_s12  }
   0x3   : > { %p23_p1 = scmp.ge.s32.totalorder %s22_s15, 4  ;;  %p168_p2 = scmp.lt.s32.totalorder %s503_s14, 5 }
   0x5   : > { %s582_s15 = smov (%p23_p1, %s22_s15), 0  ;;  %p169_p3 = pnand %p430_p0, %p168_p2 }
   0x6   : > { %p201_p4 = scmp.lt.s32.totalorder (!%p169_p3), %s495_s12, 3  ;;  %s508_s20 = smov (!%p169_p3), 127  }
   0x7   : > { %172 = sbr.rel (%p169_p3) target bundleno = 348 (0x15c), region = 32 }
   0xc   : > { %v230_v0 = vlaneseq  ;;  %s584_s12 = smov (!%p201_p4, %s495_s12), 3  ;;  %v505_v2 = vmov 0.0   ;;  %vm252_vm0 = vcmask 1040384   ;;  %vm254_vm1 = vcmask 1041408   ;;  %v262_v17 = vld [vmem:[%s577_s2] sm:$0xff] }
   0xd   : > { %439 = vmatprep.subr.bf16.mxu0 %v505_v2  ;;  %s445_s16 = smul.u32 3, %s584_s12  ;;  %vm506_vm2 = vmmov 0   ;;  %v507_v16 = vmov 0   ;;  %vm256_vm3 = vcmask 1042432   ;;  %vm258_vm4 = vcmask 1043456   ;;  %s431_s25 = sshll.u32 %s584_s12, 3 }
   0xe   : > { %v231_v1 = vshrl.u32 %v230_v0, 7  ;;  %441 = vmatprep.mubr.msk.bf16.mxu0 %vm506_vm2, %v505_v2  ;;  %480 = vset.pattern.permute.xlu0 %v507_v16  ;;  %v509_v21 = vmov 65535   ;;  %v260_v28 = vld [vmem:[%s576_s1] sm:$0xf]  ;;  %vm268_vm5 = vcmask 39936   ;;  %s219_s28 = scalar_lea.vmem %s578_s3, %s431_s25  ;;  %vm320_vm7 = vcmask 179200  }
   0xf   : > { %s204_s19 = scalar_lea.vmem %s575_s0, %s445_s16  ;;  %v272_v22 = vsel %vm254_vm1, 4294967295, %v509_v21 }
  0x10   : > { %v232_v3 = vsub.s32 0, %v231_v1  ;;  %v221_v4 = vld [vmem:[%s204_s19] sm:$0x1]  ;;  %v432_v5 = vld [vmem:[%s204_s19 + $0x1] sm:$0x1]  ;;  %v273_v25 = vsel %vm256_vm3, %v272_v22, 0 }
  0x11   : > { %v433_v6 = vld [vmem:[%s204_s19 + $0x2] sm:$0x1]  ;;  %v222_v7 = vunpack.c.l.bf16 %v221_v4  ;;  %v225_v8 = vunpack.c.l.bf16 %v432_v5 }
  0x12   : > { %v228_v9 = vunpack.c.l.bf16 %v433_v6 }
  0x13   : > { %v233_v10 = vrot.slane %v225_v8, %v232_v3  ;;  %v245_v11 = vrot.slane %v222_v7, %v232_v3 }
  0x14   : > { %v239_v12 = vrot.slane %v228_v9, %v232_v3 }
  0x15   : > { %v253_v13 = vsel %vm252_vm0, %v222_v7, %v233_v10  ;;  %v475_v14 = vpack.i.bf16 %v233_v10, %v245_v11 }
  0x16   : > { %v255_v15 = vsel %vm254_vm1, %v253_v13, %v239_v12 }
  0x17   : > { %476 = vrot.lane.b32.xlu0 %v475_v14, %s508_s20 }
  0x1b   : > { %265 = vperm.xlu0 %480, %v262_v17  }
  0x89   : > { %v477_v18 = vpop.permute.xlu0 %476 }
  0x8a   : > { %v479_v19 = vunpack.i.h.bf16 %v477_v18  ;;  %v478_v20 = vunpack.i.l.bf16 %v477_v18 }
  0x8c   : > { %v257_v23 = vsel %vm256_vm3, %v255_v15, %v478_v20 }
  0x8d   : > { %v259_v24 = vsel %vm258_vm4, %v257_v23, %v479_v19 }
  0x8e   : > { %v261_v26 = vpack.c.bf16 %v259_v24, %v259_v24 }
  0x90   : > { %v275_v27 = vand.u32 %v273_v25, %v261_v26 }
  0x92   : > { %440 = vmatpush3.bf16.msra.mxu0 %v275_v27 }
  0x95   : > { %442 = vmatmul.mubr.msk.bf16.vlgmr.msra.gmra.mxu0 %vm268_vm5, %v260_v28 }
  0x96   : > { %v266_v29 = vpop.permute.xlu0 %265 }
 0x155   : > { %v311_v30 = vpop.f32.mrf.mxu0 }
 0x156   : > { %v312_v31 = vadd.f32 %v311_v30, %v266_v29 }
 0x157   : > { %v443_v32 = vpop.f32.mrf.mxu0 }
 0x158   : > { %vm317_vm6 = vcmp.ge.f32.partialorder %v312_v31, 0.0  ;;  %v318_v33 = vmul.f32 0.1, %v312_v31 }
 0x159   : > { %v314_v34 = vpop.f32.mrf.mxu0 }
 0x15a   : > { %v319_v35 = vsel %vm317_vm6, %v312_v31, %v318_v33 }
 0x15b   : > { %321 = vst.msk [vmem:[%s219_s28] sm:$0xff] %vm320_vm7, %v319_v35  ;;  %v444_v36 = vpop.f32.mrf.mxu0 }
 0x15c PF: > { %s13_s14 = sadd.s32 1, %s503_s14   ;;  %s579_s12 = smov %s499_s13 }
 0x15d   : > { %p10_p5 = scmp.ge.s32.totalorder %s13_s14, 6   ;;  %s580_s13 = smov %s582_s15 }
 0x15f   :  { %12 = sbr.rel (!%p10_p5) target bundleno = 2 (0x2), region = 70 }

// kernel: _lambda_.29
= control target key start
LH: loop header
LB: loop body
LE: loop exit
PB: predicated region body
PF: predicated region fallthrough
CT: control target
= control target key end

     0   :  { %s599_s12 = smov 0   ;;  %s601_s13 = smov 0   ;;  %s660_s0 = inlined_call_operand.vmem [shape: bf16[4,3,8,9], index: 0, kind: input, shape index: {}]   ;;  %s661_s1 = inlined_call_operand.vmem [shape: bf16[32,40], index: 1, kind: input, shape index: {}]   ;;  %s662_s2 = inlined_call_operand.vmem [shape: f32[32,1], index: 2, kind: input, shape index: {}]   ;;  %s663_s3 = inlined_call_operand.vmem [shape: f32[4,32,8], index: 3, kind: output, shape index: {}]  }
   0x1   :  { %s603_s14 = smov 0  }
   0x2 LB: > { %s22_s15 = sadd.s32 1, %s571_s13  ;;  %p490_p0 = scmp.ge.s32.totalorder %s575_s14, 1  ;;  %s575_s14 = sphi %s603_s14, %s13_s14   ;;  %s571_s13 = sphi %s601_s13, %s665_s13   ;;  %s567_s12 = sphi %s599_s12, %s664_s12  }
   0x3   : > { %p23_p1 = scmp.ge.s32.totalorder %s22_s15, 4  ;;  %p173_p2 = scmp.lt.s32.totalorder %s575_s14, 5 }
   0x5   : > { %s667_s15 = smov (%p23_p1, %s22_s15), 0  ;;  %p174_p3 = pnand %p490_p0, %p173_p2 }
   0x6   : > { %p211_p4 = scmp.lt.s32.totalorder (!%p174_p3), %s567_s12, 3  ;;  %s577_s22 = smov (!%p174_p3), 127  }
   0x7   : > { %177 = sbr.rel (%p174_p3) target bundleno = 353 (0x161), region = 32 }
   0xc   : > { %s669_s12 = smov (!%p211_p4, %s567_s12), 3  ;;  %v550_v2 = vld [vmem:[%s661_s1] sm:$0xff]   ;;  %vm296_vm0 = vcmask 326656   ;;  %v578_v5 = vmov 0   ;;  %v263_v6 = vld [vmem:[%s662_s2 + $0x8] sm:$0xff]  ;;  %v264_v7 = vld [vmem:[%s662_s2 + $0x10] sm:$0xff] }
   0xd   : > { %s520_s16 = smul.u32 12, %s669_s12  ;;  %515 = vmatprep.mubr.msk.bf16.mxu0 %vm296_vm0, %v550_v2  ;;  %v262_v4 = vld [vmem:[%s662_s2] sm:$0xff]  ;;  %547 = vset.pattern.permute.xlu1 %v578_v5  ;;  %v265_v8 = vld [vmem:[%s662_s2 + $0x18] sm:$0xff]  ;;  %vm303_vm1 = vcmask 1043456   ;;  %v551_v16 = vld [vmem:[%s661_s1 + $0x8] sm:$0xff]   ;;  %s503_s6 = sshll.u32 %s669_s12, 5 }
   0xe   : > { %548 = vset.pattern.permute.xlu0 %v578_v5  ;;  %268 = vperm.xlu1 %547, %v262_v4   ;;  %s236_s9 = scalar_lea.vmem %s663_s3, %s503_s6  ;;  %vm368_vm2 = vcmask 64512  }
   0xf   : > { %s215_s19 = scalar_lea.vmem %s660_s0, %s520_s16 }
  0x10   : > { %v494_v0 = vld [vmem:[%s215_s19] sm:$0xff]   ;;  %v495_v9 = vld [vmem:[%s215_s19 + $0x8] sm:$0xf] }
  0x11   : > { %v243_v1 = vunpack.c.h.bf16 %v494_v0  ;;  %v240_v3 = vunpack.c.l.bf16 %v494_v0  ;;  %v246_v12 = vunpack.c.l.bf16 %v495_v9 }
  0x12   : > { %273 = vperm.xlu1 %547, %v263_v6  }
  0x13   : > { %252 = vrot.lane.b32.xlu0 %v243_v1, %s577_s22 }
  0x16   : > { %283 = vperm.xlu1 %547, %v265_v8  }
  0x17   : > { %248 = vrot.lane.b32.xlu0 %v240_v3, %s577_s22 }
  0x1b   : > { %278 = vperm.xlu0 %548, %v264_v7  }
  0x85   : > { %v253_v10 = vpop.permute.xlu0 %252 }
  0x86   : > { %v261_v11 = vpack.c.bf16 %v253_v10, %v253_v10 }
  0x88   : > { %519 = vmatprep.subr.msk.bf16.mxu0 %vm303_vm1, %v261_v11  ;;  %v305_v13 = vsel %vm303_vm1, %v261_v11, 0 }
  0x89   : > { %510 = vmatpush3.bf16.msra.mxu0 %v305_v13  ;;  %v249_v14 = vpop.permute.xlu0 %248  ;;  %v269_v17 = vpop.permute.xlu1 %268 }
  0x8a   : > { %v260_v15 = vpack.c.bf16 %v249_v14, %v246_v12 }
  0x8c   : > { %511 = vmatprep.subr.bf16.mxu0 %v260_v15 }
  0x8d   : > { %512 = vmatpush3.bf16.msra.mxu0 %v260_v15  ;;  %v274_v18 = vpop.permute.xlu1 %273 }
  0x8e   : > { %513 = vmatprep.subr.bf16.mxu0 %v494_v0 }
  0x91   : > { %514 = vmatpush3.bf16.msra.mxu0 %v494_v0  ;;  %v284_v25 = vpop.permute.xlu1 %283 }
  0x94   : > { %516 = vmatmul.mubr.msk.bf16.vlgmr.msra.gmra.mxu0 %vm296_vm0, %v551_v16 }
  0x96   : > { %v279_v19 = vpop.permute.xlu0 %278 }
 0x154   : > { %v517_v20 = vpop.f32.mrf.mxu0 }
 0x155   : > { %v350_v21 = vadd.f32 %v517_v20, %v279_v19 }
 0x156   : > { %v341_v22 = vpop.f32.mrf.mxu0 }
 0x157   : > { %vm358_vm3 = vcmp.ge.f32.partialorder %v350_v21, 0.0  ;;  %v362_v23 = vmul.f32 0.1, %v350_v21  ;;  %v342_v24 = vadd.f32 %v341_v22, %v269_v17 }
 0x158   : > { %v518_v26 = vpop.f32.mrf.mxu0 }
 0x159   : > { %v366_v27 = vsel %vm358_vm3, %v350_v21, %v362_v23  ;;  %vm356_vm4 = vcmp.ge.f32.partialorder %v342_v24, 0.0  ;;  %v360_v28 = vmul.f32 0.1, %v342_v24  ;;  %v353_v29 = vadd.f32 %v518_v26, %v284_v25 }
 0x15a   : > { %371 = vst.msk [vmem:[%s236_s9 + $0x10] sm:$0xff] %vm368_vm2, %v366_v27  ;;  %v344_v30 = vpop.f32.mrf.mxu0 }
 0x15b   : > { %v364_v31 = vsel %vm356_vm4, %v342_v24, %v360_v28  ;;  %vm359_vm5 = vcmp.ge.f32.partialorder %v353_v29, 0.0  ;;  %v363_v32 = vmul.f32 0.1, %v353_v29  ;;  %v345_v33 = vadd.f32 %v344_v30, %v274_v18 }
 0x15c   : > { %369 = vst.msk [vmem:[%s236_s9] sm:$0xff] %vm368_vm2, %v364_v31 }
 0x15d   : > { %v367_v34 = vsel %vm359_vm5, %v353_v29, %v363_v32  ;;  %vm357_vm6 = vcmp.ge.f32.partialorder %v345_v33, 0.0  ;;  %v361_v35 = vmul.f32 0.1, %v345_v33 }
 0x15e   : > { %372 = vst.msk [vmem:[%s236_s9 + $0x18] sm:$0xff] %vm368_vm2, %v367_v34 }
 0x15f   : > { %v365_v36 = vsel %vm357_vm6, %v345_v33, %v361_v35 }
 0x160   : > { %370 = vst.msk [vmem:[%s236_s9 + $0x8] sm:$0xff] %vm368_vm2, %v365_v36 }
 0x161 PF: > { %s13_s14 = sadd.s32 1, %s575_s14   ;;  %s664_s12 = smov %s571_s13 }
 0x162   : > { %p10_p5 = scmp.ge.s32.totalorder %s13_s14, 6   ;;  %s665_s13 = smov %s667_s15 }
 0x164   :  { %12 = sbr.rel (!%p10_p5) target bundleno = 2 (0x2), region = 70 }

// kernel: _lambda_.30
= control target key start
LH: loop header
LB: loop body
LE: loop exit
PB: predicated region body
PF: predicated region fallthrough
CT: control target
= control target key end

     0   :  { %s530_s12 = smov 0   ;;  %s532_s13 = smov 0   ;;  %s575_s0 = inlined_call_operand.vmem [shape: bf16[6,3,1,16], index: 0, kind: input, shape index: {}]   ;;  %s576_s1 = inlined_call_operand.vmem [shape: bf16[8,5], index: 1, kind: input, shape index: {}]   ;;  %s577_s2 = inlined_call_operand.vmem [shape: f32[8,1], index: 2, kind: input, shape index: {}]   ;;  %s578_s3 = inlined_call_operand.vmem [shape: f32[6,8,15], index: 3, kind: output, shape index: {}]  }
   0x1   :  { %s534_s14 = smov 0  }
   0x2 LB: > { %s22_s15 = sadd.s32 1, %s499_s13  ;;  %p430_p0 = scmp.ge.s32.totalorder %s503_s14, 1  ;;  %s503_s14 = sphi %s534_s14, %s13_s14   ;;  %s499_s13 = sphi %s532_s13, %s580_s13   ;;  %s495_s12 = sphi %s530_s12, %s579_s12  }
   0x3   : > { %p23_p1 = scmp.ge.s32.totalorder %s22_s15, 6  ;;  %p168_p2 = scmp.lt.s32.totalorder %s503_s14, 7 }
   0x5   : > { %s582_s15 = smov (%p23_p1, %s22_s15), 0  ;;  %p169_p3 = pnand %p430_p0, %p168_p2 }
   0x6   : > { %p201_p4 = scmp.lt.s32.totalorder (!%p169_p3), %s495_s12, 5  ;;  %s508_s20 = smov (!%p169_p3), 127  }
   0x7   : > { %172 = sbr.rel (%p169_p3) target bundleno = 348 (0x15c), region = 32 }
   0xc   : > { %v230_v0 = vlaneseq  ;;  %s584_s12 = smov (!%p201_p4, %s495_s12), 5  ;;  %v505_v2 = vmov 0.0   ;;  %vm252_vm0 = vcmask 1040384   ;;  %vm254_vm1 = vcmask 1041408   ;;  %v262_v17 = vld [vmem:[%s577_s2] sm:$0xff] }
   0xd   : > { %439 = vmatprep.subr.bf16.mxu0 %v505_v2  ;;  %s445_s16 = smul.u32 3, %s584_s12  ;;  %vm506_vm2 = vmmov 0   ;;  %v507_v16 = vmov 0   ;;  %vm256_vm3 = vcmask 1042432   ;;  %vm258_vm4 = vcmask 1043456   ;;  %s431_s25 = sshll.u32 %s584_s12, 3 }
   0xe   : > { %v231_v1 = vshrl.u32 %v230_v0, 7  ;;  %441 = vmatprep.mubr.msk.bf16.mxu0 %vm506_vm2, %v505_v2  ;;  %480 = vset.pattern.permute.xlu0 %v507_v16  ;;  %v509_v21 = vmov 65535   ;;  %v260_v28 = vld [vmem:[%s576_s1] sm:$0xf]  ;;  %vm268_vm5 = vcmask 39936   ;;  %s219_s28 = scalar_lea.vmem %s578_s3, %s431_s25  ;;  %vm320_vm7 = vcmask 121856  }
   0xf   : > { %s204_s19 = scalar_lea.vmem %s575_s0, %s445_s16  ;;  %v272_v22 = vsel %vm254_vm1, 4294967295, %v509_v21 }
  0x10   : > { %v232_v3 = vsub.s32 0, %v231_v1  ;;  %v221_v4 = vld [vmem:[%s204_s19] sm:$0x1]  ;;  %v432_v5 = vld [vmem:[%s204_s19 + $0x1] sm:$0x1]  ;;  %v273_v25 = vsel %vm256_vm3, %v272_v22, 0 }
  0x11   : > { %v433_v6 = vld [vmem:[%s204_s19 + $0x2] sm:$0x1]  ;;  %v222_v7 = vunpack.c.l.bf16 %v221_v4  ;;  %v225_v8 = vunpack.c.l.bf16 %v432_v5 }
  0x12   : > { %v228_v9 = vunpack.c.l.bf16 %v433_v6 }
  0x13   : > { %v233_v10 = vrot.slane %v225_v8, %v232_v3  ;;  %v245_v11 = vrot.slane %v222_v7, %v232_v3 }
  0x14   : > { %v239_v12 = vrot.slane %v228_v9, %v232_v3 }
  0x15   : > { %v253_v13 = vsel %vm252_vm0, %v222_v7, %v233_v10  ;;  %v475_v14 = vpack.i.bf16 %v233_v10, %v245_v11 }
  0x16   : > { %v255_v15 = vsel %vm254_vm1, %v253_v13, %v239_v12 }
  0x17   : > { %476 = vrot.lane.b32.xlu0 %v475_v14, %s508_s20 }
  0x1b   : > { %265 = vperm.xlu0 %480, %v262_v17  }
  0x89   : > { %v477_v18 = vpop.permute.xlu0 %476 }
  0x8a   : > { %v479_v19 = vunpack.i.h.bf16 %v477_v18  ;;  %v478_v20 = vunpack.i.l.bf16 %v477_v18 }
  0x8c   : > { %v257_v23 = vsel %vm256_vm3, %v255_v15, %v478_v20 }
  0x8d   : > { %v259_v24 = vsel %vm258_vm4, %v257_v23, %v479_v19 }
  0x8e   : > { %v261_v26 = vpack.c.bf16 %v259_v24, %v259_v24 }
  0x90   : > { %v275_v27 = vand.u32 %v273_v25, %v261_v26 }
  0x92   : > { %440 = vmatpush3.bf16.msra.mxu0 %v275_v27 }
  0x95   : > { %442 = vmatmul.mubr.msk.bf16.vlgmr.msra.gmra.mxu0 %vm268_vm5, %v260_v28 }
  0x96   : > { %v266_v29 = vpop.permute.xlu0 %265 }
 0x155   : > { %v311_v30 = vpop.f32.mrf.mxu0 }
 0x156   : > { %v312_v31 = vadd.f32 %v311_v30, %v266_v29 }
 0x157   : > { %v443_v32 = vpop.f32.mrf.mxu0 }
 0x158   : > { %vm317_vm6 = vcmp.ge.f32.partialorder %v312_v31, 0.0  ;;  %v318_v33 = vmul.f32 0.1, %v312_v31 }
 0x159   : > { %v314_v34 = vpop.f32.mrf.mxu0 }
 0x15a   : > { %v319_v35 = vsel %vm317_vm6, %v312_v31, %v318_v33 }
 0x15b   : > { %321 = vst.msk [vmem:[%s219_s28] sm:$0xff] %vm320_vm7, %v319_v35  ;;  %v444_v36 = vpop.f32.mrf.mxu0 }
 0x15c PF: > { %s13_s14 = sadd.s32 1, %s503_s14   ;;  %s579_s12 = smov %s499_s13 }
 0x15d   : > { %p10_p5 = scmp.ge.s32.totalorder %s13_s14, 8   ;;  %s580_s13 = smov %s582_s15 }
 0x15f   :  { %12 = sbr.rel (!%p10_p5) target bundleno = 2 (0x2), region = 70 }

// kernel: _lambda_.31
= control target key start
LH: loop header
LB: loop body
LE: loop exit
PB: predicated region body
PF: predicated region fallthrough
CT: control target
= control target key end

     0   :  { %s530_s12 = smov 0   ;;  %s532_s13 = smov 0   ;;  %s575_s0 = inlined_call_operand.vmem [shape: bf16[10,3,1,10], index: 0, kind: input, shape index: {}]   ;;  %s576_s1 = inlined_call_operand.vmem [shape: bf16[8,5], index: 1, kind: input, shape index: {}]   ;;  %s577_s2 = inlined_call_operand.vmem [shape: f32[8,1], index: 2, kind: input, shape index: {}]   ;;  %s578_s3 = inlined_call_operand.vmem [shape: f32[10,8,9], index: 3, kind: output, shape index: {}]  }
   0x1   :  { %s534_s14 = smov 0  }
   0x2 LB: > { %s22_s15 = sadd.s32 1, %s499_s13  ;;  %p430_p0 = scmp.ge.s32.totalorder %s503_s14, 1  ;;  %s503_s14 = sphi %s534_s14, %s13_s14   ;;  %s499_s13 = sphi %s532_s13, %s580_s13   ;;  %s495_s12 = sphi %s530_s12, %s579_s12  }
   0x3   : > { %p23_p1 = scmp.ge.s32.totalorder %s22_s15, 10  ;;  %p168_p2 = scmp.lt.s32.totalorder %s503_s14, 11 }
   0x5   : > { %s582_s15 = smov (%p23_p1, %s22_s15), 0  ;;  %p169_p3 = pnand %p430_p0, %p168_p2 }
   0x6   : > { %p201_p4 = scmp.lt.s32.totalorder (!%p169_p3), %s495_s12, 9  ;;  %s508_s20 = smov (!%p169_p3), 127  }
   0x7   : > { %172 = sbr.rel (%p169_p3) target bundleno = 348 (0x15c), region = 32 }
   0xc   : > { %v230_v0 = vlaneseq  ;;  %s584_s12 = smov (!%p201_p4, %s495_s12), 9  ;;  %v505_v2 = vmov 0.0   ;;  %vm252_vm0 = vcmask 1040384   ;;  %vm254_vm1 = vcmask 1041408   ;;  %v262_v17 = vld [vmem:[%s577_s2] sm:$0xff] }
   0xd   : > { %439 = vmatprep.subr.bf16.mxu0 %v505_v2  ;;  %s445_s16 = smul.u32 3, %s584_s12  ;;  %vm506_vm2 = vmmov 0   ;;  %v507_v16 = vmov 0   ;;  %vm256_vm3 = vcmask 1042432   ;;  %vm258_vm4 = vcmask 1043456   ;;  %s431_s25 = sshll.u32 %s584_s12, 3 }
   0xe   : > { %v231_v1 = vshrl.u32 %v230_v0, 7  ;;  %441 = vmatprep.mubr.msk.bf16.mxu0 %vm506_vm2, %v505_v2  ;;  %480 = vset.pattern.permute.xlu0 %v507_v16  ;;  %v509_v21 = vmov 65535   ;;  %v260_v28 = vld [vmem:[%s576_s1] sm:$0xf]  ;;  %vm268_vm5 = vcmask 39936   ;;  %s219_s28 = scalar_lea.vmem %s578_s3, %s431_s25  ;;  %vm320_vm7 = vcmask 72704  }
   0xf   : > { %s204_s19 = scalar_lea.vmem %s575_s0, %s445_s16  ;;  %v272_v22 = vsel %vm254_vm1, 4294967295, %v509_v21 }
  0x10   : > { %v232_v3 = vsub.s32 0, %v231_v1  ;;  %v221_v4 = vld [vmem:[%s204_s19] sm:$0x1]  ;;  %v432_v5 = vld [vmem:[%s204_s19 + $0x1] sm:$0x1]  ;;  %v273_v25 = vsel %vm256_vm3, %v272_v22, 0 }
  0x11   : > { %v433_v6 = vld [vmem:[%s204_s19 + $0x2] sm:$0x1]  ;;  %v222_v7 = vunpack.c.l.bf16 %v221_v4  ;;  %v225_v8 = vunpack.c.l.bf16 %v432_v5 }
  0x12   : > { %v228_v9 = vunpack.c.l.bf16 %v433_v6 }
  0x13   : > { %v233_v10 = vrot.slane %v225_v8, %v232_v3  ;;  %v245_v11 = vrot.slane %v222_v7, %v232_v3 }
  0x14   : > { %v239_v12 = vrot.slane %v228_v9, %v232_v3 }
  0x15   : > { %v253_v13 = vsel %vm252_vm0, %v222_v7, %v233_v10  ;;  %v475_v14 = vpack.i.bf16 %v233_v10, %v245_v11 }
  0x16   : > { %v255_v15 = vsel %vm254_vm1, %v253_v13, %v239_v12 }
  0x17   : > { %476 = vrot.lane.b32.xlu0 %v475_v14, %s508_s20 }
  0x1b   : > { %265 = vperm.xlu0 %480, %v262_v17  }
  0x89   : > { %v477_v18 = vpop.permute.xlu0 %476 }
  0x8a   : > { %v479_v19 = vunpack.i.h.bf16 %v477_v18  ;;  %v478_v20 = vunpack.i.l.bf16 %v477_v18 }
  0x8c   : > { %v257_v23 = vsel %vm256_vm3, %v255_v15, %v478_v20 }
  0x8d   : > { %v259_v24 = vsel %vm258_vm4, %v257_v23, %v479_v19 }
  0x8e   : > { %v261_v26 = vpack.c.bf16 %v259_v24, %v259_v24 }
  0x90   : > { %v275_v27 = vand.u32 %v273_v25, %v261_v26 }
  0x92   : > { %440 = vmatpush3.bf16.msra.mxu0 %v275_v27 }
  0x95   : > { %442 = vmatmul.mubr.msk.bf16.vlgmr.msra.gmra.mxu0 %vm268_vm5, %v260_v28 }
  0x96   : > { %v266_v29 = vpop.permute.xlu0 %265 }
 0x155   : > { %v311_v30 = vpop.f32.mrf.mxu0 }
 0x156   : > { %v312_v31 = vadd.f32 %v311_v30, %v266_v29 }
 0x157   : > { %v443_v32 = vpop.f32.mrf.mxu0 }
 0x158   : > { %vm317_vm6 = vcmp.ge.f32.partialorder %v312_v31, 0.0  ;;  %v318_v33 = vmul.f32 0.1, %v312_v31 }
 0x159   : > { %v314_v34 = vpop.f32.mrf.mxu0 }
 0x15a   : > { %v319_v35 = vsel %vm317_vm6, %v312_v31, %v318_v33 }
 0x15b   : > { %321 = vst.msk [vmem:[%s219_s28] sm:$0xff] %vm320_vm7, %v319_v35  ;;  %v444_v36 = vpop.f32.mrf.mxu0 }
 0x15c PF: > { %s13_s14 = sadd.s32 1, %s503_s14   ;;  %s579_s12 = smov %s499_s13 }
 0x15d   : > { %p10_p5 = scmp.ge.s32.totalorder %s13_s14, 12   ;;  %s580_s13 = smov %s582_s15 }
 0x15f   :  { %12 = sbr.rel (!%p10_p5) target bundleno = 2 (0x2), region = 70 }

</bundles_post_ra>
